<compile_context>
chip_gen: v7x
topology: tpu7x:2x2x1
jax: 0.10.0
libtpu: 0.0.40
codegen_flags: <defaults>
</compile_context>

<pallas_src>
import jax
import jax.numpy as jnp
from jax.experimental import pallas as pl
from jax.experimental.pallas import tpu as pltpu

N_BITS = 8
HALF_LVLS = (2.0 ** N_BITS - 2.0) / 2.0   # 127.0, matches quan_Linear / quan_Conv2d
N_CLASSES = 10
CLS_PAD = 128                             # lane-dense padded class dimension
FEATURES = 512


def _round_up(v, m):
    return (v + m - 1) // m * m


# ---------------------------------------------------------------------------
# Pallas kernels
# ---------------------------------------------------------------------------
def quantize_weights_kernel(w1_ref, w2_ref, w3_ref, wq1_ref, wq2_ref, wq3_ref):
    """Fake-quantize all classifier weights in one pallas_call.

    For each torch-layout (out, in) f32 weight:
      step = max|w| / 127                      (quan_Linear.__reset_stepsize__)
      wq   = round(hardtanh(w, +-127*step) / step) * step   (_quantize_func * step)
    then transpose to (in, out) once and store as bf16 for the MXU hot loop.
    """
    def quantize_t(w_ref, wq_ref):
        w = w_ref[...]
        step = jnp.maximum(jnp.max(jnp.abs(w), keepdims=True) / HALF_LVLS, 1e-12)
        lim = HALF_LVLS * step
        wq = jnp.round(jnp.clip(w, -lim, lim) * (1.0 / step)) * step
        wq_ref[...] = wq.T.astype(wq_ref.dtype)   # (out,in) -> (in,out), one-time

    quantize_t(w1_ref, wq1_ref)
    quantize_t(w2_ref, wq2_ref)
    quantize_t(w3_ref, wq3_ref)


def quantize_all_weights(w1, w2, w3p):
    vmem = lambda: pl.BlockSpec(memory_space=pltpu.MemorySpace.VMEM)
    out_shapes = tuple(
        jax.ShapeDtypeStruct((w.shape[1], w.shape[0]), jnp.bfloat16)
        for w in (w1, w2, w3p)
    )
    return pl.pallas_call(
        quantize_weights_kernel,
        out_shape=out_shapes,
        in_specs=[vmem(), vmem(), vmem()],
        out_specs=(vmem(), vmem(), vmem()),
    )(w1, w2, w3p)


def classifier_kernel(x_ref, w1_ref, b1_ref, w2_ref, b2_ref, w3_ref, b3_ref, o_ref):
    # x_ref : (TB, 512)  f32    batch tile of flattened features (cast to bf16 here)
    # w*_ref: (in, out)  bf16   quantized weights, VMEM-resident across the grid
    # b*_ref: (1, out)   f32    biases
    # o_ref : (TB, 128)  f32    padded logits (lane-dense store)
    x = x_ref[...].astype(jnp.bfloat16)
    h = jnp.dot(x, w1_ref[...], preferred_element_type=jnp.float32)
    h = jnp.maximum(h + b1_ref[...], 0.0)                       # quan_Linear + ReLU
    h = jnp.dot(h.astype(jnp.bfloat16), w2_ref[...], preferred_element_type=jnp.float32)
    h = jnp.maximum(h + b2_ref[...], 0.0)                       # quan_Linear + ReLU
    o = jnp.dot(h.astype(jnp.bfloat16), w3_ref[...], preferred_element_type=jnp.float32)
    o_ref[...] = o + b3_ref[...]                                # final quan_Linear


def fused_classifier(x, w1q, b1, w2q, b2, w3q, b3, tb):
    n, d_in = x.shape
    d_out = w3q.shape[1]
    const = lambda i: (0, 0)
    return pl.pallas_call(
        classifier_kernel,
        out_shape=jax.ShapeDtypeStruct((n, d_out), jnp.float32),
        grid=(pl.cdiv(n, tb),),
        in_specs=[
            pl.BlockSpec((tb, d_in), lambda i: (i, 0)),   # batch-tiled activations
            pl.BlockSpec(w1q.shape, const),               # weights: fetched once, resident
            pl.BlockSpec(b1.shape, const),
            pl.BlockSpec(w2q.shape, const),
            pl.BlockSpec(b2.shape, const),
            pl.BlockSpec(w3q.shape, const),
            pl.BlockSpec(b3.shape, const),
        ],
        out_specs=pl.BlockSpec((tb, d_out), lambda i: (i, 0)),
        compiler_params=pltpu.CompilerParams(dimension_semantics=("parallel",)),
    )(x, w1q, b1, w2q, b2, w3q, b3)


def _pick_batch_tile(n):
    if n <= 16:
        return n                                        # one full-height block
    if n <= 1024:
        # >= 2 tiles so both v7x TensorCores get work; 16-row multiple for packing.
        return min(512, _round_up(pl.cdiv(n, 2), 16))
    return 512                                          # large batch: amortize grid steps


# ---------------------------------------------------------------------------
# JAX glue: parameter prep, forward, reference
# ---------------------------------------------------------------------------
def vgg_forward(x_features, params):
    n = x_features.shape[0]
    x = x_features.reshape(n, -1).astype(jnp.float32)   # x.view(x.size(0), -1)

    # Pad the 10-class layer to 128 output lanes (tiny: 10x512 -> 128x512 f32).
    w3p = jnp.pad(params["w3"].astype(jnp.float32), ((0, CLS_PAD - N_CLASSES), (0, 0)))
    b3p = jnp.pad(params["b3"].astype(jnp.float32), (0, CLS_PAD - N_CLASSES))

    # One kernel: step-size reduction + fake-quant + transpose + bf16 cast, all 3 weights.
    w1q, w2q, w3q = quantize_all_weights(params["w1"].astype(jnp.float32),
                                         params["w2"].astype(jnp.float32), w3p)

    b1 = params["b1"].reshape(1, -1).astype(jnp.float32)
    b2 = params["b2"].reshape(1, -1).astype(jnp.float32)
    b3 = b3p.reshape(1, -1)

    tb = _pick_batch_tile(n)
    logits = fused_classifier(x, w1q, b1, w2q, b2, w3q, b3, tb)
    return logits[:, :N_CLASSES]


def init_params(key):
    # quan_Linear keeps nn.Linear's default init (VGG.__init__ only re-inits conv weights).
    ks = jax.random.split(key, 6)

    def linear(kw, kb, fan_in, fan_out):
        bound = 1.0 / (fan_in ** 0.5)
        w = jax.random.uniform(kw, (fan_out, fan_in), jnp.float32, -bound, bound)
        b = jax.random.uniform(kb, (fan_out,), jnp.float32, -bound, bound)
        return w, b

    w1, b1 = linear(ks[0], ks[1], FEATURES, 512)
    w2, b2 = linear(ks[2], ks[3], 512, 512)
    w3, b3 = linear(ks[4], ks[5], 512, N_CLASSES)
    return dict(w1=w1, b1=b1, w2=w2, b2=b2, w3=w3, b3=b3)


def reference_forward(x_features, params):
    """Pure-JAX reference for the classifier head (same bf16 matmul inputs, f32 acc)."""
    x = x_features.reshape(x_features.shape[0], -1).astype(jnp.float32)

    def qlinear(inp, w, b):
        step = jnp.maximum(jnp.max(jnp.abs(w)) / HALF_LVLS, 1e-12)
        lim = HALF_LVLS * step
        wq = jnp.round(jnp.clip(w, -lim, lim) * (1.0 / step)) * step
        return jnp.dot(inp.astype(jnp.bfloat16), wq.T.astype(jnp.bfloat16),
                       preferred_element_type=jnp.float32) + b

    h = jax.nn.relu(qlinear(x, params["w1"], params["b1"]))
    h = jax.nn.relu(qlinear(h, params["w2"], params["b2"]))
    return qlinear(h, params["w3"], params["b3"])


if __name__ == "__main__":
    key = jax.random.PRNGKey(0)
    kx, kp = jax.random.split(key)

    # features output for CIFAR-style VGG: (N, 512, 1, 1); flattens to (N, 512)
    N = 2
    x = jax.random.normal(kx, (N, 512, 1, 1), jnp.float32)
    params = init_params(kp)

    fwd = jax.jit(vgg_forward)
    out = jax.block_until_ready(fwd(x, params))
    assert out.shape == (N, N_CLASSES), out.shape

    ref = jax.block_until_ready(reference_forward(x, params))
    max_err = float(jnp.max(jnp.abs(out - ref)))
    assert max_err < 5e-3, f"mismatch vs reference: {max_err}"

    print("KERNEL_OK")
</pallas_src>

<mosaic_0001>
module attributes {stable_mosaic.version = 11 : i64} {
  func.func @quantize_weights_kernel(%arg0: memref<512x512xf32, #tpu.memory_space<vmem>>, %arg1: memref<512x512xf32, #tpu.memory_space<vmem>>, %arg2: memref<128x512xf32, #tpu.memory_space<vmem>>, %arg3: memref<512x512xbf16, #tpu.memory_space<vmem>>, %arg4: memref<512x512xbf16, #tpu.memory_space<vmem>>, %arg5: memref<512x128xbf16, #tpu.memory_space<vmem>>) attributes {dimension_semantics = [], scalar_prefetch = 0 : i64, scratch_operands = 0 : i64, tpu.core_type = #tpu.core_type<tc>} {
    %c0 = arith.constant 0 : index
    %c0_0 = arith.constant 0 : index
    %0 = vector.load %arg0[%c0, %c0_0] : memref<512x512xf32, #tpu.memory_space<vmem>>, vector<512x512xf32>
    %1 = math.absf %0 : vector<512x512xf32>
    %2 = vector.shape_cast %1 : vector<512x512xf32> to vector<1x512x512xf32>
    %cst = arith.constant dense<0xFF800000> : vector<1xf32>
    %3 = vector.multi_reduction <maximumf>, %2, %cst [1, 2] : vector<1x512x512xf32> to vector<1xf32>
    %4 = vector.shape_cast %3 : vector<1xf32> to vector<1x1x1xf32>
    %5 = vector.extract %4[0, 0, 0] : f32 from vector<1x1x1xf32>
    %6 = vector.broadcast %5 : f32 to vector<1x1xf32>
    %cst_1 = arith.constant 1.270000e+02 : f32
    %7 = vector.broadcast %cst_1 : f32 to vector<1x1xf32>
    %8 = arith.divf %6, %7 : vector<1x1xf32>
    %cst_2 = arith.constant 9.99999996E-13 : f32
    %9 = vector.broadcast %cst_2 : f32 to vector<1x1xf32>
    %10 = arith.maximumf %8, %9 : vector<1x1xf32>
    %cst_3 = arith.constant 1.270000e+02 : f32
    %11 = vector.broadcast %cst_3 : f32 to vector<1x1xf32>
    %12 = arith.mulf %11, %10 : vector<1x1xf32>
    %cst_4 = arith.constant 0.000000e+00 : f32
    %13 = vector.broadcast %cst_4 : f32 to vector<1x1xf32>
    %14 = arith.subf %13, %12 : vector<1x1xf32>
    %15 = vector.broadcast %14 : vector<1x1xf32> to vector<512x512xf32>
    %16 = arith.maximumf %15, %0 : vector<512x512xf32>
    %17 = vector.broadcast %12 : vector<1x1xf32> to vector<512x512xf32>
    %18 = arith.minimumf %17, %16 : vector<512x512xf32>
    %cst_5 = arith.constant 1.000000e+00 : f32
    %19 = vector.broadcast %cst_5 : f32 to vector<1x1xf32>
    %20 = arith.divf %19, %10 : vector<1x1xf32>
    %21 = vector.broadcast %20 : vector<1x1xf32> to vector<512x512xf32>
    %22 = arith.mulf %18, %21 : vector<512x512xf32>
    %23 = math.roundeven %22 : vector<512x512xf32>
    %24 = vector.broadcast %10 : vector<1x1xf32> to vector<512x512xf32>
    %25 = arith.mulf %23, %24 : vector<512x512xf32>
    %26 = tpu.transpose %25, [1, 0] : vector<512x512xf32> -> vector<512x512xf32>
    %27 = arith.truncf %26 : vector<512x512xf32> to vector<512x512xbf16>
    %c0_6 = arith.constant 0 : index
    %c0_7 = arith.constant 0 : index
    %28 = vector.load %arg3[%c0_6, %c0_7] : memref<512x512xbf16, #tpu.memory_space<vmem>>, vector<512x512xbf16>
    tpu.vector_store %arg3[%c0_6, %c0_7], %27 {strides = array<i32>} : memref<512x512xbf16, #tpu.memory_space<vmem>>, vector<512x512xbf16>,
    %c0_8 = arith.constant 0 : index
    %c0_9 = arith.constant 0 : index
    %29 = vector.load %arg1[%c0_8, %c0_9] : memref<512x512xf32, #tpu.memory_space<vmem>>, vector<512x512xf32>
    %30 = math.absf %29 : vector<512x512xf32>
    %31 = vector.shape_cast %30 : vector<512x512xf32> to vector<1x512x512xf32>
    %cst_10 = arith.constant dense<0xFF800000> : vector<1xf32>
    %32 = vector.multi_reduction <maximumf>, %31, %cst_10 [1, 2] : vector<1x512x512xf32> to vector<1xf32>
    %33 = vector.shape_cast %32 : vector<1xf32> to vector<1x1x1xf32>
    %34 = vector.extract %33[0, 0, 0] : f32 from vector<1x1x1xf32>
    %35 = vector.broadcast %34 : f32 to vector<1x1xf32>
    %cst_11 = arith.constant 1.270000e+02 : f32
    %36 = vector.broadcast %cst_11 : f32 to vector<1x1xf32>
    %37 = arith.divf %35, %36 : vector<1x1xf32>
    %cst_12 = arith.constant 9.99999996E-13 : f32
    %38 = vector.broadcast %cst_12 : f32 to vector<1x1xf32>
    %39 = arith.maximumf %37, %38 : vector<1x1xf32>
    %cst_13 = arith.constant 1.270000e+02 : f32
    %40 = vector.broadcast %cst_13 : f32 to vector<1x1xf32>
    %41 = arith.mulf %40, %39 : vector<1x1xf32>
    %cst_14 = arith.constant 0.000000e+00 : f32
    %42 = vector.broadcast %cst_14 : f32 to vector<1x1xf32>
    %43 = arith.subf %42, %41 : vector<1x1xf32>
    %44 = vector.broadcast %43 : vector<1x1xf32> to vector<512x512xf32>
    %45 = arith.maximumf %44, %29 : vector<512x512xf32>
    %46 = vector.broadcast %41 : vector<1x1xf32> to vector<512x512xf32>
    %47 = arith.minimumf %46, %45 : vector<512x512xf32>
    %cst_15 = arith.constant 1.000000e+00 : f32
    %48 = vector.broadcast %cst_15 : f32 to vector<1x1xf32>
    %49 = arith.divf %48, %39 : vector<1x1xf32>
    %50 = vector.broadcast %49 : vector<1x1xf32> to vector<512x512xf32>
    %51 = arith.mulf %47, %50 : vector<512x512xf32>
    %52 = math.roundeven %51 : vector<512x512xf32>
    %53 = vector.broadcast %39 : vector<1x1xf32> to vector<512x512xf32>
    %54 = arith.mulf %52, %53 : vector<512x512xf32>
    %55 = tpu.transpose %54, [1, 0] : vector<512x512xf32> -> vector<512x512xf32>
    %56 = arith.truncf %55 : vector<512x512xf32> to vector<512x512xbf16>
    %c0_16 = arith.constant 0 : index
    %c0_17 = arith.constant 0 : index
    %57 = vector.load %arg4[%c0_16, %c0_17] : memref<512x512xbf16, #tpu.memory_space<vmem>>, vector<512x512xbf16>
    tpu.vector_store %arg4[%c0_16, %c0_17], %56 {strides = array<i32>} : memref<512x512xbf16, #tpu.memory_space<vmem>>, vector<512x512xbf16>,
    %c0_18 = arith.constant 0 : index
    %c0_19 = arith.constant 0 : index
    %58 = vector.load %arg2[%c0_18, %c0_19] : memref<128x512xf32, #tpu.memory_space<vmem>>, vector<128x512xf32>
    %59 = math.absf %58 : vector<128x512xf32>
    %60 = vector.shape_cast %59 : vector<128x512xf32> to vector<1x128x512xf32>
    %cst_20 = arith.constant dense<0xFF800000> : vector<1xf32>
    %61 = vector.multi_reduction <maximumf>, %60, %cst_20 [1, 2] : vector<1x128x512xf32> to vector<1xf32>
    %62 = vector.shape_cast %61 : vector<1xf32> to vector<1x1x1xf32>
    %63 = vector.extract %62[0, 0, 0] : f32 from vector<1x1x1xf32>
    %64 = vector.broadcast %63 : f32 to vector<1x1xf32>
    %cst_21 = arith.constant 1.270000e+02 : f32
    %65 = vector.broadcast %cst_21 : f32 to vector<1x1xf32>
    %66 = arith.divf %64, %65 : vector<1x1xf32>
    %cst_22 = arith.constant 9.99999996E-13 : f32
    %67 = vector.broadcast %cst_22 : f32 to vector<1x1xf32>
    %68 = arith.maximumf %66, %67 : vector<1x1xf32>
    %cst_23 = arith.constant 1.270000e+02 : f32
    %69 = vector.broadcast %cst_23 : f32 to vector<1x1xf32>
    %70 = arith.mulf %69, %68 : vector<1x1xf32>
    %cst_24 = arith.constant 0.000000e+00 : f32
    %71 = vector.broadcast %cst_24 : f32 to vector<1x1xf32>
    %72 = arith.subf %71, %70 : vector<1x1xf32>
    %73 = vector.broadcast %72 : vector<1x1xf32> to vector<128x512xf32>
    %74 = arith.maximumf %73, %58 : vector<128x512xf32>
    %75 = vector.broadcast %70 : vector<1x1xf32> to vector<128x512xf32>
    %76 = arith.minimumf %75, %74 : vector<128x512xf32>
    %cst_25 = arith.constant 1.000000e+00 : f32
    %77 = vector.broadcast %cst_25 : f32 to vector<1x1xf32>
    %78 = arith.divf %77, %68 : vector<1x1xf32>
    %79 = vector.broadcast %78 : vector<1x1xf32> to vector<128x512xf32>
    %80 = arith.mulf %76, %79 : vector<128x512xf32>
    %81 = math.roundeven %80 : vector<128x512xf32>
    %82 = vector.broadcast %68 : vector<1x1xf32> to vector<128x512xf32>
    %83 = arith.mulf %81, %82 : vector<128x512xf32>
    %84 = tpu.transpose %83, [1, 0] : vector<128x512xf32> -> vector<512x128xf32>
    %85 = arith.truncf %84 : vector<512x128xf32> to vector<512x128xbf16>
    %c0_26 = arith.constant 0 : index
    %c0_27 = arith.constant 0 : index
    %86 = vector.load %arg5[%c0_26, %c0_27] : memref<512x128xbf16, #tpu.memory_space<vmem>>, vector<512x128xbf16>
    tpu.vector_store %arg5[%c0_26, %c0_27], %85 {strides = array<i32>} : memref<512x128xbf16, #tpu.memory_space<vmem>>, vector<512x128xbf16>,
    return
  }
}

module attributes {stable_mosaic.version = 11 : i64} {
  func.func @classifier_kernel(%arg0: i32, %arg1: memref<2x512xf32, #tpu.memory_space<vmem>>, %arg2: memref<512x512xbf16, #tpu.memory_space<vmem>>, %arg3: memref<1x512xf32, #tpu.memory_space<vmem>>, %arg4: memref<512x512xbf16, #tpu.memory_space<vmem>>, %arg5: memref<1x512xf32, #tpu.memory_space<vmem>>, %arg6: memref<512x128xbf16, #tpu.memory_space<vmem>>, %arg7: memref<1x128xf32, #tpu.memory_space<vmem>>, %arg8: memref<2x128xf32, #tpu.memory_space<vmem>>) attributes {dimension_semantics = [#tpu.dimension_semantics<parallel>], iteration_bounds = array<i64: 1>, scalar_prefetch = 0 : i64, scratch_operands = 0 : i64, tpu.core_type = #tpu.core_type<tc>, window_params = [{transform_indices = @transform_0, window_bounds = array<i64: 2, 512>}, {pipeline_mode = #tpu.pipeline_mode<synchronous>, transform_indices = @transform_1, window_bounds = array<i64: 512, 512>}, {pipeline_mode = #tpu.pipeline_mode<synchronous>, transform_indices = @transform_2, window_bounds = array<i64: 1, 512>}, {pipeline_mode = #tpu.pipeline_mode<synchronous>, transform_indices = @transform_3, window_bounds = array<i64: 512, 512>}, {pipeline_mode = #tpu.pipeline_mode<synchronous>, transform_indices = @transform_4, window_bounds = array<i64: 1, 512>}, {pipeline_mode = #tpu.pipeline_mode<synchronous>, transform_indices = @transform_5, window_bounds = array<i64: 512, 128>}, {pipeline_mode = #tpu.pipeline_mode<synchronous>, transform_indices = @transform_6, window_bounds = array<i64: 1, 128>}, {transform_indices = @transform_7, window_bounds = array<i64: 2, 128>}]} {
    %c0 = arith.constant 0 : index
    %c0_0 = arith.constant 0 : index
    %0 = vector.load %arg1[%c0, %c0_0] : memref<2x512xf32, #tpu.memory_space<vmem>>, vector<2x512xf32>
    %1 = arith.truncf %0 : vector<2x512xf32> to vector<2x512xbf16>
    %c0_1 = arith.constant 0 : index
    %c0_2 = arith.constant 0 : index
    %2 = vector.load %arg2[%c0_1, %c0_2] : memref<512x512xbf16, #tpu.memory_space<vmem>>, vector<512x512xbf16>
    %cst = arith.constant dense<0.000000e+00> : vector<2x512xf32>
    %3 = tpu.matmul %1, %2, %cst {dimension_numbers = #tpu.dot_dimension_numbers<[1], [0], [0], [1], [0, 0, 1, 1], [], []>} : vector<2x512xbf16>, vector<512x512xbf16>, vector<2x512xf32> -> vector<2x512xf32>
    %c0_3 = arith.constant 0 : index
    %c0_4 = arith.constant 0 : index
    %4 = vector.load %arg3[%c0_3, %c0_4] : memref<1x512xf32, #tpu.memory_space<vmem>>, vector<1x512xf32>
    %5 = vector.broadcast %4 : vector<1x512xf32> to vector<2x512xf32>
    %6 = arith.addf %3, %5 : vector<2x512xf32>
    %cst_5 = arith.constant 0.000000e+00 : f32
    %7 = vector.broadcast %cst_5 : f32 to vector<2x512xf32>
    %8 = arith.maximumf %6, %7 : vector<2x512xf32>
    %9 = arith.truncf %8 : vector<2x512xf32> to vector<2x512xbf16>
    %c0_6 = arith.constant 0 : index
    %c0_7 = arith.constant 0 : index
    %10 = vector.load %arg4[%c0_6, %c0_7] : memref<512x512xbf16, #tpu.memory_space<vmem>>, vector<512x512xbf16>
    %cst_8 = arith.constant dense<0.000000e+00> : vector<2x512xf32>
    %11 = tpu.matmul %9, %10, %cst_8 {dimension_numbers = #tpu.dot_dimension_numbers<[1], [0], [0], [1], [0, 0, 1, 1], [], []>} : vector<2x512xbf16>, vector<512x512xbf16>, vector<2x512xf32> -> vector<2x512xf32>
    %c0_9 = arith.constant 0 : index
    %c0_10 = arith.constant 0 : index
    %12 = vector.load %arg5[%c0_9, %c0_10] : memref<1x512xf32, #tpu.memory_space<vmem>>, vector<1x512xf32>
    %13 = vector.broadcast %12 : vector<1x512xf32> to vector<2x512xf32>
    %14 = arith.addf %11, %13 : vector<2x512xf32>
    %cst_11 = arith.constant 0.000000e+00 : f32
    %15 = vector.broadcast %cst_11 : f32 to vector<2x512xf32>
    %16 = arith.maximumf %14, %15 : vector<2x512xf32>
    %17 = arith.truncf %16 : vector<2x512xf32> to vector<2x512xbf16>
    %c0_12 = arith.constant 0 : index
    %c0_13 = arith.constant 0 : index
    %18 = vector.load %arg6[%c0_12, %c0_13] : memref<512x128xbf16, #tpu.memory_space<vmem>>, vector<512x128xbf16>
    %cst_14 = arith.constant dense<0.000000e+00> : vector<2x128xf32>
    %19 = tpu.matmul %17, %18, %cst_14 {dimension_numbers = #tpu.dot_dimension_numbers<[1], [0], [0], [1], [0, 0, 1, 1], [], []>} : vector<2x512xbf16>, vector<512x128xbf16>, vector<2x128xf32> -> vector<2x128xf32>
    %c0_15 = arith.constant 0 : index
    %c0_16 = arith.constant 0 : index
    %20 = vector.load %arg7[%c0_15, %c0_16] : memref<1x128xf32, #tpu.memory_space<vmem>>, vector<1x128xf32>
    %21 = vector.broadcast %20 : vector<1x128xf32> to vector<2x128xf32>
    %22 = arith.addf %19, %21 : vector<2x128xf32>
    %c0_17 = arith.constant 0 : index
    %c0_18 = arith.constant 0 : index
    %23 = vector.load %arg8[%c0_17, %c0_18] : memref<2x128xf32, #tpu.memory_space<vmem>>, vector<2x128xf32>
    tpu.vector_store %arg8[%c0_17, %c0_18], %22 {strides = array<i32>} : memref<2x128xf32, #tpu.memory_space<vmem>>, vector<2x128xf32>,
    return
  }
  func.func @transform_0(%arg0: i32) -> (i32, i32) {
    %c0_i32 = arith.constant 0 : i32
    %c0_i32_0 = arith.constant 0 : i32
    return %arg0, %c0_i32 : i32, i32
  }
  func.func @transform_1(%arg0: i32) -> (i32, i32) {
    %c0_i32 = arith.constant 0 : i32
    %c0_i32_0 = arith.constant 0 : i32
    %c0_i32_1 = arith.constant 0 : i32
    return %c0_i32, %c0_i32_0 : i32, i32
  }
  func.func @transform_2(%arg0: i32) -> (i32, i32) {
    %c0_i32 = arith.constant 0 : i32
    %c0_i32_0 = arith.constant 0 : i32
    %c0_i32_1 = arith.constant 0 : i32
    return %c0_i32, %c0_i32_0 : i32, i32
  }
  func.func @transform_3(%arg0: i32) -> (i32, i32) {
    %c0_i32 = arith.constant 0 : i32
    %c0_i32_0 = arith.constant 0 : i32
    %c0_i32_1 = arith.constant 0 : i32
    return %c0_i32, %c0_i32_0 : i32, i32
  }
  func.func @transform_4(%arg0: i32) -> (i32, i32) {
    %c0_i32 = arith.constant 0 : i32
    %c0_i32_0 = arith.constant 0 : i32
    %c0_i32_1 = arith.constant 0 : i32
    return %c0_i32, %c0_i32_0 : i32, i32
  }
  func.func @transform_5(%arg0: i32) -> (i32, i32) {
    %c0_i32 = arith.constant 0 : i32
    %c0_i32_0 = arith.constant 0 : i32
    %c0_i32_1 = arith.constant 0 : i32
    return %c0_i32, %c0_i32_0 : i32, i32
  }
  func.func @transform_6(%arg0: i32) -> (i32, i32) {
    %c0_i32 = arith.constant 0 : i32
    %c0_i32_0 = arith.constant 0 : i32
    %c0_i32_1 = arith.constant 0 : i32
    return %c0_i32, %c0_i32_0 : i32, i32
  }
  func.func @transform_7(%arg0: i32) -> (i32, i32) {
    %c0_i32 = arith.constant 0 : i32
    %c0_i32_0 = arith.constant 0 : i32
    return %arg0, %c0_i32 : i32, i32
  }
}

</mosaic_0001>

<bundles_post_ra>
// kernel: vgg_forward.3
= control target key start
LH: loop header
LB: loop body
LE: loop exit
PB: predicated region body
PF: predicated region fallthrough
CT: control target
= control target key end

     0   :  { %v3137_v36 = vmov 1983009808   ;;  %v34_v38 = vlaneseq  ;;  %s4105_s0 = inlined_call_operand.vmem [shape: f32[2,512], index: 0, kind: input, shape index: {}]   ;;  %s4106_s1 = inlined_call_operand.vmem [shape: bf16[512,512], index: 1, kind: input, shape index: {}]   ;;  %s4107_s2 = inlined_call_operand.vmem [shape: f32[1,512], index: 2, kind: input, shape index: {}]   ;;  %s4108_s3 = inlined_call_operand.vmem [shape: bf16[512,512], index: 3, kind: input, shape index: {}]   ;;  %s4109_s4 = inlined_call_operand.vmem [shape: f32[1,512], index: 4, kind: input, shape index: {}]   ;;  %s4110_s5 = inlined_call_operand.vmem [shape: bf16[512,128], index: 5, kind: input, shape index: {}]   ;;  %s4111_s6 = inlined_call_operand.vmem [shape: f32[1,128], index: 6, kind: input, shape index: {}]   ;;  %s4112_s7 = inlined_call_operand.hbm [shape: f32[2,128], index: 7, kind: output, shape index: {}]  }
   0x1   :  { %v2696_v0 = vld [vmem:[%s4106_s1 + $0x4] ss:$16 sps:$4 sm:$0xff]   ;;  %v2698_v1 = vld [vmem:[%s4106_s1 + $0xc] ss:$16 sps:$4 sm:$0xff]   ;;  %v2700_v2 = vld [vmem:[%s4106_s1] ss:$16 sps:$4 sm:$0xff]   ;;  %v32_v37 = vunpack.c.l.s4 %v3137_v36 }
   0x2   :  { %845 = vmatprep.subr.bf16.mxu0 %v2696_v0  ;;  %v2701_v3 = vld [vmem:[%s4106_s1 + $0x8] ss:$16 sps:$4 sm:$0xff]   ;;  %927 = vmatprep.subr.bf16.mxu1 %v2698_v1  ;;  %v2702_v4 = vld [vmem:[%s4106_s1 + $0x24] ss:$16 sps:$4 sm:$0xff]   ;;  %v2704_v5 = vld [vmem:[%s4106_s1 + $0x2c] ss:$16 sps:$4 sm:$0xff]  }
   0x3   :  { %846 = vmatpush1.bf16.msra.mxu0 %v2700_v2  ;;  %928 = vmatpush1.bf16.msra.mxu1 %v2701_v3  ;;  %v2706_v6 = vld [vmem:[%s4106_s1 + $0x20] ss:$16 sps:$4 sm:$0xff]   ;;  %v2707_v7 = vld [vmem:[%s4106_s1 + $0x28] ss:$16 sps:$4 sm:$0xff]   ;;  %v2708_v8 = vld [vmem:[%s4106_s1 + $0x44] ss:$16 sps:$4 sm:$0xff]   ;;  %v33_v42 = vunpack.c.0.s8 %v32_v37 }
   0x4   :  { %847 = vmatprep.subr.bf16.mxu0 %v2702_v4  ;;  %929 = vmatprep.subr.bf16.mxu1 %v2704_v5  ;;  %v2710_v9 = vld [vmem:[%s4106_s1 + $0x4c] ss:$16 sps:$4 sm:$0xff]   ;;  %v2712_v10 = vld [vmem:[%s4106_s1 + $0x40] ss:$16 sps:$4 sm:$0xff]   ;;  %v2713_v11 = vld [vmem:[%s4106_s1 + $0x48] ss:$16 sps:$4 sm:$0xff]  }
   0x5   :  { %v2714_v12 = vld [vmem:[%s4106_s1 + $0x64] ss:$16 sps:$4 sm:$0xff]   ;;  %v2716_v13 = vld [vmem:[%s4106_s1 + $0x6c] ss:$16 sps:$4 sm:$0xff]   ;;  %v2718_v14 = vld [vmem:[%s4106_s1 + $0x60] ss:$16 sps:$4 sm:$0xff]  }
   0x6   :  { %v2719_v15 = vld [vmem:[%s4106_s1 + $0x68] ss:$16 sps:$4 sm:$0xff]   ;;  %v2720_v16 = vld [vmem:[%s4106_s1 + $0x84] ss:$16 sps:$4 sm:$0xff]   ;;  %v2722_v17 = vld [vmem:[%s4106_s1 + $0x8c] ss:$16 sps:$4 sm:$0xff]  }
   0x7   :  { %848 = vmatpush1.bf16.msra.mxu0 %v2706_v6  ;;  %930 = vmatpush1.bf16.msra.mxu1 %v2707_v7  ;;  %v2724_v18 = vld [vmem:[%s4106_s1 + $0x80] ss:$16 sps:$4 sm:$0xff]   ;;  %v2725_v19 = vld [vmem:[%s4106_s1 + $0x88] ss:$16 sps:$4 sm:$0xff]   ;;  %v2726_v20 = vld [vmem:[%s4106_s1 + $0xa4] ss:$16 sps:$4 sm:$0xff]  }
   0x8   :  { %849 = vmatprep.subr.bf16.mxu0 %v2708_v8  ;;  %931 = vmatprep.subr.bf16.mxu1 %v2710_v9  ;;  %v2728_v21 = vld [vmem:[%s4106_s1 + $0xac] ss:$16 sps:$4 sm:$0xff]   ;;  %v2730_v22 = vld [vmem:[%s4106_s1 + $0xa0] ss:$16 sps:$4 sm:$0xff]   ;;  %v2731_v23 = vld [vmem:[%s4106_s1 + $0xa8] ss:$16 sps:$4 sm:$0xff]  }
   0x9   :  { %v2732_v24 = vld [vmem:[%s4106_s1 + $0xc4] ss:$16 sps:$4 sm:$0xff]   ;;  %v2734_v25 = vld [vmem:[%s4106_s1 + $0xcc] ss:$16 sps:$4 sm:$0xff]   ;;  %v2736_v26 = vld [vmem:[%s4106_s1 + $0xc0] ss:$16 sps:$4 sm:$0xff]  }
   0xa   :  { %v2737_v27 = vld [vmem:[%s4106_s1 + $0xc8] ss:$16 sps:$4 sm:$0xff]   ;;  %v2738_v28 = vld [vmem:[%s4106_s1 + $0xe4] ss:$16 sps:$4 sm:$0xff]   ;;  %v2740_v29 = vld [vmem:[%s4106_s1 + $0xec] ss:$16 sps:$4 sm:$0xff]  }
   0xb   :  { %850 = vmatpush1.bf16.msra.mxu0 %v2712_v10  ;;  %932 = vmatpush1.bf16.msra.mxu1 %v2713_v11  ;;  %v2742_v30 = vld [vmem:[%s4106_s1 + $0xe0] ss:$16 sps:$4 sm:$0xff]   ;;  %v2743_v31 = vld [vmem:[%s4106_s1 + $0xe8] ss:$16 sps:$4 sm:$0xff]   ;;  %v2744_v32 = vld [vmem:[%s4106_s1 + $0x104] ss:$16 sps:$4 sm:$0xff]  }
   0xc   :  { %851 = vmatprep.subr.bf16.mxu0 %v2714_v12  ;;  %933 = vmatprep.subr.bf16.mxu1 %v2716_v13  ;;  %v2746_v33 = vld [vmem:[%s4106_s1 + $0x10c] ss:$16 sps:$4 sm:$0xff]   ;;  %v2748_v34 = vld [vmem:[%s4106_s1 + $0x100] ss:$16 sps:$4 sm:$0xff]   ;;  %v2749_v35 = vld [vmem:[%s4106_s1 + $0x108] ss:$16 sps:$4 sm:$0xff]  }
   0xd   :  { %v2750_v39 = vld [vmem:[%s4106_s1 + $0x124] ss:$16 sps:$4 sm:$0xff]   ;;  %v2752_v40 = vld [vmem:[%s4106_s1 + $0x12c] ss:$16 sps:$4 sm:$0xff]   ;;  %v2754_v41 = vld [vmem:[%s4106_s1 + $0x120] ss:$16 sps:$4 sm:$0xff]  }
   0xe   :  { %v3296_v43 = vshrl.u32 %v34_v38, 7  ;;  %v2755_v44 = vld [vmem:[%s4106_s1 + $0x128] ss:$16 sps:$4 sm:$0xff]   ;;  %v2756_v45 = vld [vmem:[%s4106_s1 + $0x144] ss:$16 sps:$4 sm:$0xff]  }
   0xf   :  { %852 = vmatpush1.bf16.msra.mxu0 %v2718_v14  ;;  %934 = vmatpush1.bf16.msra.mxu1 %v2719_v15  ;;  %v2758_v46 = vld [vmem:[%s4106_s1 + $0x14c] ss:$16 sps:$4 sm:$0xff]   ;;  %v2760_v47 = vld [vmem:[%s4106_s1 + $0x140] ss:$16 sps:$4 sm:$0xff]   ;;  %v2761_v48 = vld [vmem:[%s4106_s1 + $0x148] ss:$16 sps:$4 sm:$0xff]  }
  0x10   :  { %853 = vmatprep.subr.bf16.mxu0 %v2720_v16  ;;  %935 = vmatprep.subr.bf16.mxu1 %v2722_v17  ;;  %v36_v49 = vsub.s32 %v33_v42, %v3296_v43  ;;  %v2762_v50 = vld [vmem:[%s4106_s1 + $0x164] ss:$16 sps:$4 sm:$0xff]   ;;  %v2764_v51 = vld [vmem:[%s4106_s1 + $0x16c] ss:$16 sps:$4 sm:$0xff]   ;;  %v2766_v53 = vld [vmem:[%s4106_s1 + $0x160] ss:$16 sps:$4 sm:$0xff]  }
  0x11   :  { %v28_v52 = vld [vmem:[%s4105_s0] sm:$0xff]  ;;  %v2767_v55 = vld [vmem:[%s4106_s1 + $0x168] ss:$16 sps:$4 sm:$0xff]   ;;  %v2770_v57 = vld [vmem:[%s4106_s1 + $0x18c] ss:$16 sps:$4 sm:$0xff]  }
  0x12   :  { %v37_v54 = vrot.slane %v28_v52, %v36_v49  ;;  %v2768_v56 = vld [vmem:[%s4106_s1 + $0x184] ss:$16 sps:$4 sm:$0xff]   ;;  %v2772_v59 = vld [vmem:[%s4106_s1 + $0x180] ss:$16 sps:$4 sm:$0xff]   ;;  %v2773_v61 = vld [vmem:[%s4106_s1 + $0x188] ss:$16 sps:$4 sm:$0xff]   ;;  %v30_v4 = vcombine.high %v28_v52, %v28_v52 }
  0x13   :  { %854 = vmatpush1.bf16.msra.mxu0 %v2724_v18  ;;  %936 = vmatpush1.bf16.msra.mxu1 %v2725_v19  ;;  %v2774_v62 = vld [vmem:[%s4106_s1 + $0x1a4] ss:$16 sps:$4 sm:$0xff]   ;;  %v2776_v63 = vld [vmem:[%s4106_s1 + $0x1ac] ss:$16 sps:$4 sm:$0xff]   ;;  %v2778_v0 = vld [vmem:[%s4106_s1 + $0x1a0] ss:$16 sps:$4 sm:$0xff]  }
  0x14   :  { %855 = vmatprep.subr.bf16.mxu0 %v2726_v20  ;;  %937 = vmatprep.subr.bf16.mxu1 %v2728_v21  ;;  %v45_v58 = vcombine.high %v37_v54, %v37_v54  ;;  %v2779_v1 = vld [vmem:[%s4106_s1 + $0x1a8] ss:$16 sps:$4 sm:$0xff]   ;;  %v2780_v2 = vld [vmem:[%s4106_s1 + $0x1c4] ss:$16 sps:$4 sm:$0xff]   ;;  %v2782_v3 = vld [vmem:[%s4106_s1 + $0x1cc] ss:$16 sps:$4 sm:$0xff]   ;;  %v3371_v9 = vrot.slane %v30_v4, %v36_v49  ;;  %v51_v16 = vpack.c.bf16 %v37_v54, %v37_v54 }
  0x15   :  { %v2784_v5 = vld [vmem:[%s4106_s1 + $0x1c0] ss:$16 sps:$4 sm:$0xff]   ;;  %v2785_v6 = vld [vmem:[%s4106_s1 + $0x1c8] ss:$16 sps:$4 sm:$0xff]   ;;  %v2786_v7 = vld [vmem:[%s4106_s1 + $0x1e4] ss:$16 sps:$4 sm:$0xff]  }
  0x16   :  { %v52_v60 = vpack.c.bf16 %v45_v58, %v45_v58  ;;  %v2788_v8 = vld [vmem:[%s4106_s1 + $0x1ec] ss:$16 sps:$4 sm:$0xff]   ;;  %v2790_v10 = vld [vmem:[%s4106_s1 + $0x1e0] ss:$16 sps:$4 sm:$0xff]   ;;  %v2791_v11 = vld [vmem:[%s4106_s1 + $0x1e8] ss:$16 sps:$4 sm:$0xff]   ;;  %v46_v14 = vcombine.high %v3371_v9, %v3371_v9 }
  0x17   :  { %856 = vmatpush1.bf16.msra.mxu0 %v2730_v22  ;;  %938 = vmatpush1.bf16.msra.mxu1 %v2731_v23  ;;  %v2795_v12 = vld [vmem:[%s4106_s1 + $0x204] ss:$16 sps:$4 sm:$0xff]   ;;  %v2798_v13 = vld [vmem:[%s4106_s1 + $0x20c] ss:$16 sps:$4 sm:$0xff]   ;;  %v2793_v15 = vld [vmem:[%s4106_s1 + $0x200] ss:$16 sps:$4 sm:$0xff]  }
  0x18   :  { %857 = vmatprep.subr.bf16.mxu0 %v2732_v24  ;;  %939 = vmatprep.subr.bf16.mxu1 %v2734_v25  ;;  %v2796_v17 = vld [vmem:[%s4106_s1 + $0x208] ss:$16 sps:$4 sm:$0xff]   ;;  %v2801_v18 = vld [vmem:[%s4106_s1 + $0x224] ss:$16 sps:$4 sm:$0xff]   ;;  %v2804_v19 = vld [vmem:[%s4106_s1 + $0x22c] ss:$16 sps:$4 sm:$0xff]   ;;  %v54_v20 = vpack.c.bf16 %v46_v14, %v46_v14 }
  0x19   :  { %877 = vmatprep.mubr.bf16.mxu0 %v52_v60  ;;  %959 = vmatprep.mubr.bf16.mxu1 %v52_v60  ;;  %v2799_v21 = vld [vmem:[%s4106_s1 + $0x220] ss:$16 sps:$4 sm:$0xff]   ;;  %v2802_v22 = vld [vmem:[%s4106_s1 + $0x228] ss:$16 sps:$4 sm:$0xff]   ;;  %v2807_v23 = vld [vmem:[%s4106_s1 + $0x244] ss:$16 sps:$4 sm:$0xff]  }
  0x1a   :  { %v2810_v24 = vld [vmem:[%s4106_s1 + $0x24c] ss:$16 sps:$4 sm:$0xff]   ;;  %v2805_v25 = vld [vmem:[%s4106_s1 + $0x240] ss:$16 sps:$4 sm:$0xff]   ;;  %v2826_v38 = vld [vmem:[%s4106_s1 + $0x2a8] ss:$16 sps:$4 sm:$0xff]  }
  0x1b   :  { %858 = vmatpush1.bf16.msra.mxu0 %v2736_v26  ;;  %940 = vmatpush1.bf16.msra.mxu1 %v2737_v27  ;;  %v2808_v26 = vld [vmem:[%s4106_s1 + $0x248] ss:$16 sps:$4 sm:$0xff]   ;;  %v2813_v27 = vld [vmem:[%s4106_s1 + $0x264] ss:$16 sps:$4 sm:$0xff]   ;;  %v2828_v36 = vld [vmem:[%s4106_s1 + $0x2ac] ss:$16 sps:$4 sm:$0xff]  }
  0x1c   :  { %859 = vmatprep.subr.bf16.mxu0 %v2738_v28  ;;  %941 = vmatprep.subr.bf16.mxu1 %v2740_v29  ;;  %v2816_v28 = vld [vmem:[%s4106_s1 + $0x26c] ss:$16 sps:$4 sm:$0xff]   ;;  %v2811_v29 = vld [vmem:[%s4106_s1 + $0x260] ss:$16 sps:$4 sm:$0xff]   ;;  %v2832_v42 = vld [vmem:[%s4106_s1 + $0x2c8] ss:$16 sps:$4 sm:$0xff]  }
  0x1d   :  { %v2823_v37 = vld [vmem:[%s4106_s1 + $0x2a0] ss:$16 sps:$4 sm:$0xff]   ;;  %v2846_v49 = vld [vmem:[%s4106_s1 + $0x30c] ss:$16 sps:$4 sm:$0xff]   ;;  %v2849_v52 = vld [vmem:[%s4106_s1 + $0x324] ss:$16 sps:$4 sm:$0xff]  }
  0x1e   :  { %v2847_v54 = vld [vmem:[%s4106_s1 + $0x320] ss:$16 sps:$4 sm:$0xff]   ;;  %v2861_v60 = vld [vmem:[%s4106_s1 + $0x364] ss:$16 sps:$4 sm:$0xff]   ;;  %v2888_v14 = vld [vmem:[%s4106_s1 + $0x3ec] ss:$16 sps:$4 sm:$0xff]  }
  0x1f   :  { %860 = vmatpush1.bf16.msra.mxu0 %v2742_v30  ;;  %942 = vmatpush1.bf16.msra.mxu1 %v2743_v31  ;;  %v2814_v30 = vld [vmem:[%s4106_s1 + $0x268] ss:$16 sps:$4 sm:$0xff]   ;;  %v2819_v31 = vld [vmem:[%s4106_s1 + $0x284] ss:$16 sps:$4 sm:$0xff]   ;;  %v2853_v58 = vld [vmem:[%s4106_s1 + $0x340] ss:$16 sps:$4 sm:$0xff]  }
  0x20   :  { %861 = vmatprep.subr.bf16.mxu0 %v2744_v32  ;;  %943 = vmatprep.subr.bf16.mxu1 %v2746_v33  ;;  %v2822_v32 = vld [vmem:[%s4106_s1 + $0x28c] ss:$16 sps:$4 sm:$0xff]   ;;  %v2817_v33 = vld [vmem:[%s4106_s1 + $0x280] ss:$16 sps:$4 sm:$0xff]   ;;  %v2873_v4 = vld [vmem:[%s4106_s1 + $0x3a4] ss:$16 sps:$4 sm:$0xff]  }
  0x23   :  { %862 = vmatpush1.bf16.msra.mxu0 %v2748_v34  ;;  %944 = vmatpush1.bf16.msra.mxu1 %v2749_v35  ;;  %v2820_v34 = vld [vmem:[%s4106_s1 + $0x288] ss:$16 sps:$4 sm:$0xff]   ;;  %v2825_v35 = vld [vmem:[%s4106_s1 + $0x2a4] ss:$16 sps:$4 sm:$0xff]  }
  0x24   :  { %863 = vmatprep.subr.bf16.mxu0 %v2750_v39  ;;  %945 = vmatprep.subr.bf16.mxu1 %v2752_v40  ;;  %v2831_v39 = vld [vmem:[%s4106_s1 + $0x2c4] ss:$16 sps:$4 sm:$0xff]   ;;  %v2834_v40 = vld [vmem:[%s4106_s1 + $0x2cc] ss:$16 sps:$4 sm:$0xff]  }
  0x27   :  { %864 = vmatpush1.bf16.msra.mxu0 %v2754_v41  ;;  %946 = vmatpush1.bf16.msra.mxu1 %v2755_v44  ;;  %v2829_v41 = vld [vmem:[%s4106_s1 + $0x2c0] ss:$16 sps:$4 sm:$0xff]   ;;  %v2837_v44 = vld [vmem:[%s4106_s1 + $0x2e4] ss:$16 sps:$4 sm:$0xff]  }
  0x28   :  { %865 = vmatprep.subr.bf16.mxu0 %v2756_v45  ;;  %947 = vmatprep.subr.bf16.mxu1 %v2758_v46  ;;  %v2840_v45 = vld [vmem:[%s4106_s1 + $0x2ec] ss:$16 sps:$4 sm:$0xff]   ;;  %v2835_v46 = vld [vmem:[%s4106_s1 + $0x2e0] ss:$16 sps:$4 sm:$0xff]  }
  0x2b   :  { %866 = vmatpush1.bf16.msra.mxu0 %v2760_v47  ;;  %948 = vmatpush1.bf16.msra.mxu1 %v2761_v48  ;;  %v2838_v47 = vld [vmem:[%s4106_s1 + $0x2e8] ss:$16 sps:$4 sm:$0xff]   ;;  %v2843_v48 = vld [vmem:[%s4106_s1 + $0x304] ss:$16 sps:$4 sm:$0xff]  }
  0x2c   :  { %867 = vmatprep.subr.bf16.mxu0 %v2762_v50  ;;  %949 = vmatprep.subr.bf16.mxu1 %v2764_v51  ;;  %v2841_v50 = vld [vmem:[%s4106_s1 + $0x300] ss:$16 sps:$4 sm:$0xff]   ;;  %v2844_v51 = vld [vmem:[%s4106_s1 + $0x308] ss:$16 sps:$4 sm:$0xff]  }
  0x2f   :  { %868 = vmatpush1.bf16.msra.mxu0 %v2766_v53  ;;  %950 = vmatpush1.bf16.msra.mxu1 %v2767_v55  ;;  %v2852_v53 = vld [vmem:[%s4106_s1 + $0x32c] ss:$16 sps:$4 sm:$0xff]   ;;  %v2850_v55 = vld [vmem:[%s4106_s1 + $0x328] ss:$16 sps:$4 sm:$0xff]  }
  0x30   :  { %869 = vmatprep.subr.bf16.mxu0 %v2768_v56  ;;  %951 = vmatprep.subr.bf16.mxu1 %v2770_v57  ;;  %v2855_v56 = vld [vmem:[%s4106_s1 + $0x344] ss:$16 sps:$4 sm:$0xff]   ;;  %v2858_v57 = vld [vmem:[%s4106_s1 + $0x34c] ss:$16 sps:$4 sm:$0xff]  }
  0x33   :  { %870 = vmatpush1.bf16.msra.mxu0 %v2772_v59  ;;  %952 = vmatpush1.bf16.msra.mxu1 %v2773_v61  ;;  %v2856_v59 = vld [vmem:[%s4106_s1 + $0x348] ss:$16 sps:$4 sm:$0xff]   ;;  %v2864_v61 = vld [vmem:[%s4106_s1 + $0x36c] ss:$16 sps:$4 sm:$0xff]  }
  0x34   :  { %871 = vmatprep.subr.bf16.mxu0 %v2774_v62  ;;  %953 = vmatprep.subr.bf16.mxu1 %v2776_v63  ;;  %v2859_v62 = vld [vmem:[%s4106_s1 + $0x360] ss:$16 sps:$4 sm:$0xff]   ;;  %v2862_v63 = vld [vmem:[%s4106_s1 + $0x368] ss:$16 sps:$4 sm:$0xff]  }
  0x37   :  { %872 = vmatpush1.bf16.msra.mxu0 %v2778_v0  ;;  %954 = vmatpush1.bf16.msra.mxu1 %v2779_v1  ;;  %v2867_v0 = vld [vmem:[%s4106_s1 + $0x384] ss:$16 sps:$4 sm:$0xff]   ;;  %v2870_v1 = vld [vmem:[%s4106_s1 + $0x38c] ss:$16 sps:$4 sm:$0xff]  }
  0x38   :  { %873 = vmatprep.subr.bf16.mxu0 %v2780_v2  ;;  %955 = vmatprep.subr.bf16.mxu1 %v2782_v3  ;;  %v2865_v2 = vld [vmem:[%s4106_s1 + $0x380] ss:$16 sps:$4 sm:$0xff]   ;;  %v2868_v3 = vld [vmem:[%s4106_s1 + $0x388] ss:$16 sps:$4 sm:$0xff]  }
  0x3b   :  { %874 = vmatpush1.bf16.msra.mxu0 %v2784_v5  ;;  %956 = vmatpush1.bf16.msra.mxu1 %v2785_v6  ;;  %v2876_v5 = vld [vmem:[%s4106_s1 + $0x3ac] ss:$16 sps:$4 sm:$0xff]   ;;  %v2871_v6 = vld [vmem:[%s4106_s1 + $0x3a0] ss:$16 sps:$4 sm:$0xff]  }
  0x3c   :  { %875 = vmatprep.subr.bf16.mxu0 %v2786_v7  ;;  %957 = vmatprep.subr.bf16.mxu1 %v2788_v8  ;;  %v2874_v7 = vld [vmem:[%s4106_s1 + $0x3a8] ss:$16 sps:$4 sm:$0xff]   ;;  %v2879_v8 = vld [vmem:[%s4106_s1 + $0x3c4] ss:$16 sps:$4 sm:$0xff]  }
  0x3f   :  { %876 = vmatpush1.bf16.msra.mxu0 %v2790_v10  ;;  %958 = vmatpush1.bf16.msra.mxu1 %v2791_v11  ;;  %v2882_v10 = vld [vmem:[%s4106_s1 + $0x3cc] ss:$16 sps:$4 sm:$0xff]   ;;  %v2877_v11 = vld [vmem:[%s4106_s1 + $0x3c0] ss:$16 sps:$4 sm:$0xff]  }
  0x40   :  { %886 = vmatprep.subr.bf16.mxu0 %v2795_v12  ;;  %968 = vmatprep.subr.bf16.mxu1 %v2798_v13  ;;  %v2880_v12 = vld [vmem:[%s4106_s1 + $0x3c8] ss:$16 sps:$4 sm:$0xff]   ;;  %v2885_v13 = vld [vmem:[%s4106_s1 + $0x3e4] ss:$16 sps:$4 sm:$0xff]  }
  0x42   :  { %878 = vmatmul.mubr.bf16.vlgmr.msra.gmra.mrb[0].mxu0 %v51_v16  ;;  %960 = vmatmul.mubr.bf16.vlgmr.msra.gmra.mrb[0].mxu1 %v51_v16  ;;  %v2886_v16 = vld [vmem:[%s4106_s1 + $0x3e8] ss:$16 sps:$4 sm:$0xff]  }
  0x43   :  { %887 = vmatpush1.bf16.msra.mxu0 %v2793_v15  ;;  %969 = vmatpush1.bf16.msra.mxu1 %v2796_v17  ;;  %v2883_v15 = vld [vmem:[%s4106_s1 + $0x3e0] ss:$16 sps:$4 sm:$0xff]   ;;  %v2891_v17 = vld [vmem:[%s4108_s3 + $0x4] ss:$16 sps:$4 sm:$0xff]  }
  0x44   :  { %888 = vmatprep.subr.bf16.mxu0 %v2801_v18  ;;  %970 = vmatprep.subr.bf16.mxu1 %v2804_v19  ;;  %v2894_v18 = vld [vmem:[%s4108_s3 + $0xc] ss:$16 sps:$4 sm:$0xff]   ;;  %v2889_v19 = vld [vmem:[%s4108_s3] ss:$16 sps:$4 sm:$0xff]  }
  0x45   :  { %918 = vmatprep.mubr.bf16.mxu0 %v54_v20  ;;  %1000 = vmatprep.mubr.bf16.mxu1 %v54_v20  ;;  %v2892_v20 = vld [vmem:[%s4108_s3 + $0x8] ss:$16 sps:$4 sm:$0xff]  }
  0x47   :  { %889 = vmatpush1.bf16.msra.mxu0 %v2799_v21  ;;  %971 = vmatpush1.bf16.msra.mxu1 %v2802_v22  ;;  %v53_v21 = vpack.c.bf16 %v3371_v9, %v3371_v9  ;;  %v2897_v22 = vld [vmem:[%s4108_s3 + $0x24] ss:$16 sps:$4 sm:$0xff]   ;;  %v2898_v9 = vld [vmem:[%s4108_s3 + $0x28] ss:$16 sps:$4 sm:$0xff]  }
  0x48   :  { %890 = vmatprep.subr.bf16.mxu0 %v2807_v23  ;;  %972 = vmatprep.subr.bf16.mxu1 %v2810_v24  ;;  %v2900_v23 = vld [vmem:[%s4108_s3 + $0x2c] ss:$16 sps:$4 sm:$0xff]   ;;  %v2895_v24 = vld [vmem:[%s4108_s3 + $0x20] ss:$16 sps:$4 sm:$0xff]  }
  0x4b   :  { %891 = vmatpush1.bf16.msra.mxu0 %v2805_v25  ;;  %973 = vmatpush1.bf16.msra.mxu1 %v2808_v26  ;;  %v2903_v25 = vld [vmem:[%s4108_s3 + $0x44] ss:$16 sps:$4 sm:$0xff]   ;;  %v2906_v26 = vld [vmem:[%s4108_s3 + $0x4c] ss:$16 sps:$4 sm:$0xff]  }
  0x4c   :  { %892 = vmatprep.subr.bf16.mxu0 %v2813_v27  ;;  %974 = vmatprep.subr.bf16.mxu1 %v2816_v28  ;;  %v2901_v27 = vld [vmem:[%s4108_s3 + $0x40] ss:$16 sps:$4 sm:$0xff]   ;;  %v2904_v28 = vld [vmem:[%s4108_s3 + $0x48] ss:$16 sps:$4 sm:$0xff]  }
  0x4f   :  { %893 = vmatpush1.bf16.msra.mxu0 %v2811_v29  ;;  %975 = vmatpush1.bf16.msra.mxu1 %v2814_v30  ;;  %v2909_v29 = vld [vmem:[%s4108_s3 + $0x64] ss:$16 sps:$4 sm:$0xff]   ;;  %v2912_v30 = vld [vmem:[%s4108_s3 + $0x6c] ss:$16 sps:$4 sm:$0xff]  }
  0x50   :  { %894 = vmatprep.subr.bf16.mxu0 %v2819_v31  ;;  %976 = vmatprep.subr.bf16.mxu1 %v2822_v32  ;;  %v2907_v31 = vld [vmem:[%s4108_s3 + $0x60] ss:$16 sps:$4 sm:$0xff]   ;;  %v2910_v32 = vld [vmem:[%s4108_s3 + $0x68] ss:$16 sps:$4 sm:$0xff]  }
  0x53   :  { %895 = vmatpush1.bf16.msra.mxu0 %v2817_v33  ;;  %977 = vmatpush1.bf16.msra.mxu1 %v2820_v34  ;;  %v2915_v33 = vld [vmem:[%s4108_s3 + $0x84] ss:$16 sps:$4 sm:$0xff]   ;;  %v2918_v34 = vld [vmem:[%s4108_s3 + $0x8c] ss:$16 sps:$4 sm:$0xff]  }
  0x54   :  { %896 = vmatprep.subr.bf16.mxu0 %v2825_v35  ;;  %978 = vmatprep.subr.bf16.mxu1 %v2828_v36  ;;  %v2913_v35 = vld [vmem:[%s4108_s3 + $0x80] ss:$16 sps:$4 sm:$0xff]   ;;  %v2916_v36 = vld [vmem:[%s4108_s3 + $0x88] ss:$16 sps:$4 sm:$0xff]  }
  0x57   :  { %897 = vmatpush1.bf16.msra.mxu0 %v2823_v37  ;;  %979 = vmatpush1.bf16.msra.mxu1 %v2826_v38  ;;  %v2921_v37 = vld [vmem:[%s4108_s3 + $0xa4] ss:$16 sps:$4 sm:$0xff]   ;;  %v2924_v38 = vld [vmem:[%s4108_s3 + $0xac] ss:$16 sps:$4 sm:$0xff]  }
  0x58   :  { %898 = vmatprep.subr.bf16.mxu0 %v2831_v39  ;;  %980 = vmatprep.subr.bf16.mxu1 %v2834_v40  ;;  %v2919_v39 = vld [vmem:[%s4108_s3 + $0xa0] ss:$16 sps:$4 sm:$0xff]   ;;  %v2922_v40 = vld [vmem:[%s4108_s3 + $0xa8] ss:$16 sps:$4 sm:$0xff]  }
  0x5b   :  { %899 = vmatpush1.bf16.msra.mxu0 %v2829_v41  ;;  %981 = vmatpush1.bf16.msra.mxu1 %v2832_v42  ;;  %v2927_v41 = vld [vmem:[%s4108_s3 + $0xc4] ss:$16 sps:$4 sm:$0xff]   ;;  %v2930_v42 = vld [vmem:[%s4108_s3 + $0xcc] ss:$16 sps:$4 sm:$0xff]  }
  0x5c   :  { %900 = vmatprep.subr.bf16.mxu0 %v2837_v44  ;;  %982 = vmatprep.subr.bf16.mxu1 %v2840_v45  ;;  %v2925_v44 = vld [vmem:[%s4108_s3 + $0xc0] ss:$16 sps:$4 sm:$0xff]   ;;  %v2928_v45 = vld [vmem:[%s4108_s3 + $0xc8] ss:$16 sps:$4 sm:$0xff]  }
  0x5f   :  { %901 = vmatpush1.bf16.msra.mxu0 %v2835_v46  ;;  %983 = vmatpush1.bf16.msra.mxu1 %v2838_v47  ;;  %v2933_v46 = vld [vmem:[%s4108_s3 + $0xe4] ss:$16 sps:$4 sm:$0xff]   ;;  %v2936_v47 = vld [vmem:[%s4108_s3 + $0xec] ss:$16 sps:$4 sm:$0xff]  }
  0x60   :  { %902 = vmatprep.subr.bf16.mxu0 %v2843_v48  ;;  %984 = vmatprep.subr.bf16.mxu1 %v2846_v49  ;;  %v2931_v48 = vld [vmem:[%s4108_s3 + $0xe0] ss:$16 sps:$4 sm:$0xff]   ;;  %v2934_v49 = vld [vmem:[%s4108_s3 + $0xe8] ss:$16 sps:$4 sm:$0xff]  }
  0x63   :  { %903 = vmatpush1.bf16.msra.mxu0 %v2841_v50  ;;  %985 = vmatpush1.bf16.msra.mxu1 %v2844_v51  ;;  %v2939_v50 = vld [vmem:[%s4108_s3 + $0x104] ss:$16 sps:$4 sm:$0xff]   ;;  %v2942_v51 = vld [vmem:[%s4108_s3 + $0x10c] ss:$16 sps:$4 sm:$0xff]  }
  0x64   :  { %904 = vmatprep.subr.bf16.mxu0 %v2849_v52  ;;  %986 = vmatprep.subr.bf16.mxu1 %v2852_v53  ;;  %v2937_v52 = vld [vmem:[%s4108_s3 + $0x100] ss:$16 sps:$4 sm:$0xff]   ;;  %v2940_v53 = vld [vmem:[%s4108_s3 + $0x108] ss:$16 sps:$4 sm:$0xff]  }
  0x67   :  { %905 = vmatpush1.bf16.msra.mxu0 %v2847_v54  ;;  %987 = vmatpush1.bf16.msra.mxu1 %v2850_v55  ;;  %v2945_v54 = vld [vmem:[%s4108_s3 + $0x124] ss:$16 sps:$4 sm:$0xff]   ;;  %v2948_v55 = vld [vmem:[%s4108_s3 + $0x12c] ss:$16 sps:$4 sm:$0xff]  }
  0x68   :  { %906 = vmatprep.subr.bf16.mxu0 %v2855_v56  ;;  %988 = vmatprep.subr.bf16.mxu1 %v2858_v57  ;;  %v2943_v56 = vld [vmem:[%s4108_s3 + $0x120] ss:$16 sps:$4 sm:$0xff]   ;;  %v2946_v57 = vld [vmem:[%s4108_s3 + $0x128] ss:$16 sps:$4 sm:$0xff]  }
  0x6b   :  { %907 = vmatpush1.bf16.msra.mxu0 %v2853_v58  ;;  %989 = vmatpush1.bf16.msra.mxu1 %v2856_v59  ;;  %v2951_v58 = vld [vmem:[%s4108_s3 + $0x144] ss:$16 sps:$4 sm:$0xff]   ;;  %v2954_v59 = vld [vmem:[%s4108_s3 + $0x14c] ss:$16 sps:$4 sm:$0xff]  }
  0x6c   :  { %908 = vmatprep.subr.bf16.mxu0 %v2861_v60  ;;  %990 = vmatprep.subr.bf16.mxu1 %v2864_v61  ;;  %v2949_v60 = vld [vmem:[%s4108_s3 + $0x140] ss:$16 sps:$4 sm:$0xff]   ;;  %v2952_v61 = vld [vmem:[%s4108_s3 + $0x148] ss:$16 sps:$4 sm:$0xff]  }
  0x6f   :  { %909 = vmatpush1.bf16.msra.mxu0 %v2859_v62  ;;  %991 = vmatpush1.bf16.msra.mxu1 %v2862_v63 }
  0x70   :  { %910 = vmatprep.subr.bf16.mxu0 %v2867_v0  ;;  %992 = vmatprep.subr.bf16.mxu1 %v2870_v1 }
  0x73   :  { %911 = vmatpush1.bf16.msra.mxu0 %v2865_v2  ;;  %993 = vmatpush1.bf16.msra.mxu1 %v2868_v3 }
  0x74   :  { %912 = vmatprep.subr.bf16.mxu0 %v2873_v4  ;;  %994 = vmatprep.subr.bf16.mxu1 %v2876_v5 }
  0x77   :  { %913 = vmatpush1.bf16.msra.mxu0 %v2871_v6  ;;  %995 = vmatpush1.bf16.msra.mxu1 %v2874_v7 }
  0x78   :  { %914 = vmatprep.subr.bf16.mxu0 %v2879_v8  ;;  %996 = vmatprep.subr.bf16.mxu1 %v2882_v10 }
  0x7b   :  { %915 = vmatpush1.bf16.msra.mxu0 %v2877_v11  ;;  %997 = vmatpush1.bf16.msra.mxu1 %v2880_v12 }
  0x7c   :  { %916 = vmatprep.subr.bf16.mxu0 %v2885_v13  ;;  %998 = vmatprep.subr.bf16.mxu1 %v2888_v14 }
  0x7f   :  { %917 = vmatpush1.bf16.msra.mxu0 %v2883_v15  ;;  %999 = vmatpush1.bf16.msra.mxu1 %v2886_v16 }
  0x80   :  { %1807 = vmatprep.subr.bf16.mxu0 %v2891_v17  ;;  %1889 = vmatprep.subr.bf16.mxu1 %v2894_v18 }
  0x82   :  { %919 = vmatmul.mubr.bf16.vlgmr.msra.gmra.mrb[0].mxu0 %v53_v21  ;;  %1001 = vmatmul.mubr.bf16.vlgmr.msra.gmra.mrb[0].mxu1 %v53_v21 }
  0x83   :  { %1808 = vmatpush1.bf16.msra.mxu0 %v2889_v19  ;;  %1890 = vmatpush1.bf16.msra.mxu1 %v2892_v20 }
  0x84   :  { %1809 = vmatprep.subr.bf16.mxu0 %v2897_v22  ;;  %1891 = vmatprep.subr.bf16.mxu1 %v2900_v23 }
  0x87   :  { %1810 = vmatpush1.bf16.msra.mxu0 %v2895_v24  ;;  %1892 = vmatpush1.bf16.msra.mxu1 %v2898_v9 }
  0x88   :  { %1811 = vmatprep.subr.bf16.mxu0 %v2903_v25  ;;  %1893 = vmatprep.subr.bf16.mxu1 %v2906_v26 }
  0x8b   :  { %1812 = vmatpush1.bf16.msra.mxu0 %v2901_v27  ;;  %1894 = vmatpush1.bf16.msra.mxu1 %v2904_v28 }
  0x8c   :  { %1813 = vmatprep.subr.bf16.mxu0 %v2909_v29  ;;  %1895 = vmatprep.subr.bf16.mxu1 %v2912_v30 }
  0x8f   :  { %1814 = vmatpush1.bf16.msra.mxu0 %v2907_v31  ;;  %1896 = vmatpush1.bf16.msra.mxu1 %v2910_v32 }
  0x90   :  { %1815 = vmatprep.subr.bf16.mxu0 %v2915_v33  ;;  %1897 = vmatprep.subr.bf16.mxu1 %v2918_v34 }
  0x93   :  { %1816 = vmatpush1.bf16.msra.mxu0 %v2913_v35  ;;  %1898 = vmatpush1.bf16.msra.mxu1 %v2916_v36 }
  0x94   :  { %1817 = vmatprep.subr.bf16.mxu0 %v2921_v37  ;;  %1899 = vmatprep.subr.bf16.mxu1 %v2924_v38 }
  0x97   :  { %1818 = vmatpush1.bf16.msra.mxu0 %v2919_v39  ;;  %1900 = vmatpush1.bf16.msra.mxu1 %v2922_v40 }
  0x98   :  { %1819 = vmatprep.subr.bf16.mxu0 %v2927_v41  ;;  %1901 = vmatprep.subr.bf16.mxu1 %v2930_v42 }
  0x9b   :  { %1820 = vmatpush1.bf16.msra.mxu0 %v2925_v44  ;;  %1902 = vmatpush1.bf16.msra.mxu1 %v2928_v45 }
  0x9c   :  { %1821 = vmatprep.subr.bf16.mxu0 %v2933_v46  ;;  %1903 = vmatprep.subr.bf16.mxu1 %v2936_v47 }
  0x9f   :  { %1822 = vmatpush1.bf16.msra.mxu0 %v2931_v48  ;;  %1904 = vmatpush1.bf16.msra.mxu1 %v2934_v49 }
  0xa0   :  { %1823 = vmatprep.subr.bf16.mxu0 %v2939_v50  ;;  %1905 = vmatprep.subr.bf16.mxu1 %v2942_v51 }
  0xa3   :  { %1824 = vmatpush1.bf16.msra.mxu0 %v2937_v52  ;;  %1906 = vmatpush1.bf16.msra.mxu1 %v2940_v53 }
  0xa4   :  { %1825 = vmatprep.subr.bf16.mxu0 %v2945_v54  ;;  %1907 = vmatprep.subr.bf16.mxu1 %v2948_v55 }
  0xa7   :  { %1826 = vmatpush1.bf16.msra.mxu0 %v2943_v56  ;;  %1908 = vmatpush1.bf16.msra.mxu1 %v2946_v57 }
  0xa8   :  { %12 = vsyncpa [#allocation3], 0  ;;  %1827 = vmatprep.subr.bf16.mxu0 %v2951_v58  ;;  %1909 = vmatprep.subr.bf16.mxu1 %v2954_v59  ;;  %v2957_v62 = vld [vmem:[%s4108_s3 + $0x164] ss:$16 sps:$4 sm:$0xff]   ;;  %v2960_v63 = vld [vmem:[%s4108_s3 + $0x16c] ss:$16 sps:$4 sm:$0xff]  }
  0xa9   :  { %v2955_v0 = vld [vmem:[%s4108_s3 + $0x160] ss:$16 sps:$4 sm:$0xff]   ;;  %v2958_v1 = vld [vmem:[%s4108_s3 + $0x168] ss:$16 sps:$4 sm:$0xff]   ;;  %v2963_v2 = vld [vmem:[%s4108_s3 + $0x184] ss:$16 sps:$4 sm:$0xff]  }
  0xaa   :  { %v2966_v3 = vld [vmem:[%s4108_s3 + $0x18c] ss:$16 sps:$4 sm:$0xff]   ;;  %v2961_v4 = vld [vmem:[%s4108_s3 + $0x180] ss:$16 sps:$4 sm:$0xff]   ;;  %v2964_v5 = vld [vmem:[%s4108_s3 + $0x188] ss:$16 sps:$4 sm:$0xff]  }
  0xab   :  { %1828 = vmatpush1.bf16.msra.mxu0 %v2949_v60  ;;  %1910 = vmatpush1.bf16.msra.mxu1 %v2952_v61  ;;  %v2969_v6 = vld [vmem:[%s4108_s3 + $0x1a4] ss:$16 sps:$4 sm:$0xff]   ;;  %v2972_v7 = vld [vmem:[%s4108_s3 + $0x1ac] ss:$16 sps:$4 sm:$0xff]   ;;  %v2967_v8 = vld [vmem:[%s4108_s3 + $0x1a0] ss:$16 sps:$4 sm:$0xff]  }
  0xac   :  { %1829 = vmatprep.subr.bf16.mxu0 %v2957_v62  ;;  %1911 = vmatprep.subr.bf16.mxu1 %v2960_v63  ;;  %v2970_v10 = vld [vmem:[%s4108_s3 + $0x1a8] ss:$16 sps:$4 sm:$0xff]   ;;  %v2975_v11 = vld [vmem:[%s4108_s3 + $0x1c4] ss:$16 sps:$4 sm:$0xff]   ;;  %v2978_v12 = vld [vmem:[%s4108_s3 + $0x1cc] ss:$16 sps:$4 sm:$0xff]  }
  0xad   :  { %v2973_v13 = vld [vmem:[%s4108_s3 + $0x1c0] ss:$16 sps:$4 sm:$0xff]   ;;  %v2976_v14 = vld [vmem:[%s4108_s3 + $0x1c8] ss:$16 sps:$4 sm:$0xff]   ;;  %v2981_v15 = vld [vmem:[%s4108_s3 + $0x1e4] ss:$16 sps:$4 sm:$0xff]  }
  0xae   :  { %v2984_v16 = vld [vmem:[%s4108_s3 + $0x1ec] ss:$16 sps:$4 sm:$0xff]   ;;  %v2979_v17 = vld [vmem:[%s4108_s3 + $0x1e0] ss:$16 sps:$4 sm:$0xff]   ;;  %v2982_v18 = vld [vmem:[%s4108_s3 + $0x1e8] ss:$16 sps:$4 sm:$0xff]  }
  0xaf   :  { %1830 = vmatpush1.bf16.msra.mxu0 %v2955_v0  ;;  %1912 = vmatpush1.bf16.msra.mxu1 %v2958_v1  ;;  %v2987_v19 = vld [vmem:[%s4108_s3 + $0x204] ss:$16 sps:$4 sm:$0xff]   ;;  %v2990_v20 = vld [vmem:[%s4108_s3 + $0x20c] ss:$16 sps:$4 sm:$0xff]   ;;  %v187_v21 = vsub.s32 0, %v3296_v43  ;;  %v191_v23 = vsub.s32 1, %v3296_v43 }
  0xb0   :  { %1831 = vmatprep.subr.bf16.mxu0 %v2963_v2  ;;  %1913 = vmatprep.subr.bf16.mxu1 %v2966_v3  ;;  %v3777_v22 = vld [vmem:[%s4107_s2] sm:$0xf]  ;;  %v199_v24 = vsub.s32 3, %v3296_v43  ;;  %v2988_v44 = vld [vmem:[%s4108_s3 + $0x208] ss:$16 sps:$4 sm:$0xff]   ;;  %s3138_s0 = smov [#allocation2]  }
  0xb1   :  { %v188_v9 = vrot.slane %v3777_v22, %v187_v21  ;;  %v192_v25 = vrot.slane %v3777_v22, %v191_v23  ;;  %v2985_v42 = vld [vmem:[%s4108_s3 + $0x200] ss:$16 sps:$4 sm:$0xff]   ;;  %v2993_v46 = vld [vmem:[%s4108_s3 + $0x224] ss:$16 sps:$4 sm:$0xff]   ;;  %v2996_v47 = vld [vmem:[%s4108_s3 + $0x22c] ss:$16 sps:$4 sm:$0xff]  }
  0xb2   :  { %v200_v26 = vrot.slane %v3777_v22, %v199_v24  ;;  %v2991_v49 = vld [vmem:[%s4108_s3 + $0x220] ss:$16 sps:$4 sm:$0xff]   ;;  %v2994_v50 = vld [vmem:[%s4108_s3 + $0x228] ss:$16 sps:$4 sm:$0xff]   ;;  %v2999_v51 = vld [vmem:[%s4108_s3 + $0x244] ss:$16 sps:$4 sm:$0xff]  }
  0xb3   :  { %1832 = vmatpush1.bf16.msra.mxu0 %v2961_v4  ;;  %1914 = vmatpush1.bf16.msra.mxu1 %v2964_v5  ;;  %v3002_v52 = vld [vmem:[%s4108_s3 + $0x24c] ss:$16 sps:$4 sm:$0xff]   ;;  %v2997_v53 = vld [vmem:[%s4108_s3 + $0x240] ss:$16 sps:$4 sm:$0xff]   ;;  %v3000_v54 = vld [vmem:[%s4108_s3 + $0x248] ss:$16 sps:$4 sm:$0xff]  }
  0xb4   :  { %1833 = vmatprep.subr.bf16.mxu0 %v2969_v6  ;;  %1915 = vmatprep.subr.bf16.mxu1 %v2972_v7  ;;  %v3005_v55 = vld [vmem:[%s4108_s3 + $0x264] ss:$16 sps:$4 sm:$0xff]   ;;  %v3008_v56 = vld [vmem:[%s4108_s3 + $0x26c] ss:$16 sps:$4 sm:$0xff]   ;;  %v3003_v57 = vld [vmem:[%s4108_s3 + $0x260] ss:$16 sps:$4 sm:$0xff]  }
  0xb5   :  { %v3006_v58 = vld [vmem:[%s4108_s3 + $0x268] ss:$16 sps:$4 sm:$0xff]   ;;  %v3011_v59 = vld [vmem:[%s4108_s3 + $0x284] ss:$16 sps:$4 sm:$0xff]   ;;  %v3014_v60 = vld [vmem:[%s4108_s3 + $0x28c] ss:$16 sps:$4 sm:$0xff]  }
  0xb6   :  { %v3009_v61 = vld [vmem:[%s4108_s3 + $0x280] ss:$16 sps:$4 sm:$0xff]   ;;  %v3012_v62 = vld [vmem:[%s4108_s3 + $0x288] ss:$16 sps:$4 sm:$0xff]   ;;  %v3017_v63 = vld [vmem:[%s4108_s3 + $0x2a4] ss:$16 sps:$4 sm:$0xff]  }
  0xb7   :  { %1834 = vmatpush1.bf16.msra.mxu0 %v2967_v8  ;;  %1916 = vmatpush1.bf16.msra.mxu1 %v2970_v10  ;;  %v3020_v0 = vld [vmem:[%s4108_s3 + $0x2ac] ss:$16 sps:$4 sm:$0xff]   ;;  %v3015_v1 = vld [vmem:[%s4108_s3 + $0x2a0] ss:$16 sps:$4 sm:$0xff]   ;;  %v3018_v2 = vld [vmem:[%s4108_s3 + $0x2a8] ss:$16 sps:$4 sm:$0xff]  }
  0xb8   :  { %1835 = vmatprep.subr.bf16.mxu0 %v2975_v11  ;;  %1917 = vmatprep.subr.bf16.mxu1 %v2978_v12  ;;  %v3023_v3 = vld [vmem:[%s4108_s3 + $0x2c4] ss:$16 sps:$4 sm:$0xff]   ;;  %v3026_v4 = vld [vmem:[%s4108_s3 + $0x2cc] ss:$16 sps:$4 sm:$0xff]   ;;  %v3021_v5 = vld [vmem:[%s4108_s3 + $0x2c0] ss:$16 sps:$4 sm:$0xff]  }
  0xb9   :  { %v3024_v6 = vld [vmem:[%s4108_s3 + $0x2c8] ss:$16 sps:$4 sm:$0xff]   ;;  %v3029_v7 = vld [vmem:[%s4108_s3 + $0x2e4] ss:$16 sps:$4 sm:$0xff]   ;;  %v3032_v8 = vld [vmem:[%s4108_s3 + $0x2ec] ss:$16 sps:$4 sm:$0xff]  }
  0xba   :  { %v3027_v10 = vld [vmem:[%s4108_s3 + $0x2e0] ss:$16 sps:$4 sm:$0xff]   ;;  %v3030_v11 = vld [vmem:[%s4108_s3 + $0x2e8] ss:$16 sps:$4 sm:$0xff]   ;;  %v3035_v12 = vld [vmem:[%s4108_s3 + $0x304] ss:$16 sps:$4 sm:$0xff]  }
  0xbb   :  { %1836 = vmatpush1.bf16.msra.mxu0 %v2973_v13  ;;  %1918 = vmatpush1.bf16.msra.mxu1 %v2976_v14  ;;  %v3038_v13 = vld [vmem:[%s4108_s3 + $0x30c] ss:$16 sps:$4 sm:$0xff]   ;;  %v3033_v14 = vld [vmem:[%s4108_s3 + $0x300] ss:$16 sps:$4 sm:$0xff]   ;;  %s2329_s11 = sshll.u32 %s3138_s0, 4  ;;  %s2330_s11 = int_to_ptr.vmem [resolvable:$true] %s2329_s11 }
  0xbc   :  { %1837 = vmatprep.subr.bf16.mxu0 %v2981_v15  ;;  %1919 = vmatprep.subr.bf16.mxu1 %v2984_v16  ;;  %v3036_v15 = vld [vmem:[%s4108_s3 + $0x308] ss:$16 sps:$4 sm:$0xff]   ;;  %v3041_v16 = vld [vmem:[%s4108_s3 + $0x324] ss:$16 sps:$4 sm:$0xff]   ;;  %s3113_s12 = scalar_lea.vmem %s2330_s11, 32  ;;  %p3118_p1 = scmp.lt.s32.totalorder %s2330_s11, %s2330_s11 }
  0xbd   :  { %p3114_p0 = scmp.ne.s32.totalorder %s2330_s11, %s3113_s12  ;;  %p3119_p2 = scmp.lt.s32.totalorder %s3113_s12, %s3113_s12 }
  0xbf   :  { %1838 = vmatpush1.bf16.msra.mxu0 %v2979_v17  ;;  %1920 = vmatpush1.bf16.msra.mxu1 %v2982_v18  ;;  %v3044_v17 = vld [vmem:[%s4108_s3 + $0x32c] ss:$16 sps:$4 sm:$0xff]   ;;  %v3039_v18 = vld [vmem:[%s4108_s3 + $0x320] ss:$16 sps:$4 sm:$0xff]   ;;  %p3120_p3 = por %p3119_p2, %p3118_p1 }
  0xc0   :  { %1848 = vmatprep.subr.bf16.mxu0 %v2987_v19  ;;  %1930 = vmatprep.subr.bf16.mxu1 %v2990_v20  ;;  %v3042_v19 = vld [vmem:[%s4108_s3 + $0x328] ss:$16 sps:$4 sm:$0xff]   ;;  %v3047_v20 = vld [vmem:[%s4108_s3 + $0x344] ss:$16 sps:$4 sm:$0xff]  }
  0xc1   :  { %p3121_p4 = pnand %p3120_p3, %p3114_p0 }
 0x155   :  { %v920_v27 = vpop.f32.mrb[0].mxu0  ;;  %v3790_v28 = vpop.f32.mrb[0].mxu1 }
 0x156   :  { %v2670_v29 = vadd.f32 %v920_v27, %v188_v9  ;;  %v922_v30 = vpop.f32.mrb[1].mxu0  ;;  %v1004_v31 = vpop.f32.mrb[1].mxu1  ;;  %v3050_v9 = vld [vmem:[%s4108_s3 + $0x34c] ss:$16 sps:$4 sm:$0xff]   ;;  %v3053_v27 = vld [vmem:[%s4108_s3 + $0x364] ss:$16 sps:$4 sm:$0xff]  }
 0x157   :  { %v2671_v32 = vadd.f32 %v922_v30, %v192_v25  ;;  %v2673_v33 = vadd.f32 %v1004_v31, %v200_v26  ;;  %v924_v34 = vpop.f32.mrb[2].mxu0  ;;  %v1006_v35 = vpop.f32.mrb[2].mxu1  ;;  %v3045_v25 = vld [vmem:[%s4108_s3 + $0x340] ss:$16 sps:$4 sm:$0xff]   ;;  %v3048_v26 = vld [vmem:[%s4108_s3 + $0x348] ss:$16 sps:$4 sm:$0xff]  }
 0x158   :  { %v1009_v36 = vmax.f32 %v2670_v29, 0.0  ;;  %v925_v37 = vpop.f32.mrb[3].mxu0  ;;  %v1007_v38 = vpop.f32.mrb[3].mxu1  ;;  %v3056_v29 = vld [vmem:[%s4108_s3 + $0x36c] ss:$16 sps:$4 sm:$0xff]  }
 0x159   :  { %v1010_v39 = vmax.f32 %v2671_v32, 0.0  ;;  %v1012_v40 = vmax.f32 %v2673_v33, 0.0  ;;  %v3051_v30 = vld [vmem:[%s4108_s3 + $0x360] ss:$16 sps:$4 sm:$0xff]   ;;  %v3054_v31 = vld [vmem:[%s4108_s3 + $0x368] ss:$16 sps:$4 sm:$0xff]  }
 0x15a   :  { %v1013_v45 = vpack.c.bf16 %v1009_v36, %v1009_v36  ;;  %v3059_v32 = vld [vmem:[%s4108_s3 + $0x384] ss:$16 sps:$4 sm:$0xff]   ;;  %v3062_v33 = vld [vmem:[%s4108_s3 + $0x38c] ss:$16 sps:$4 sm:$0xff]   ;;  %v3057_v34 = vld [vmem:[%s4108_s3 + $0x380] ss:$16 sps:$4 sm:$0xff]  }
 0x15b   :  { %v1014_v41 = vpack.c.bf16 %v1010_v39, %v1010_v39  ;;  %v1016_v48 = vpack.c.bf16 %v1012_v40, %v1012_v40  ;;  %v3060_v35 = vld [vmem:[%s4108_s3 + $0x388] ss:$16 sps:$4 sm:$0xff]   ;;  %v195_v36 = vsub.s32 2, %v3296_v43  ;;  %v3065_v37 = vld [vmem:[%s4108_s3 + $0x3a4] ss:$16 sps:$4 sm:$0xff]  }
 0x15c   :  { %v3068_v38 = vld [vmem:[%s4108_s3 + $0x3ac] ss:$16 sps:$4 sm:$0xff]   ;;  %v3063_v39 = vld [vmem:[%s4108_s3 + $0x3a0] ss:$16 sps:$4 sm:$0xff]   ;;  %v3066_v40 = vld [vmem:[%s4108_s3 + $0x3a8] ss:$16 sps:$4 sm:$0xff]  }
 0x15d   :  { %1839 = vmatprep.mubr.bf16.mxu0 %v1014_v41  ;;  %1921 = vmatprep.mubr.bf16.mxu1 %v1014_v41  ;;  %v196_v41 = vrot.slane %v3777_v22, %v195_v36  ;;  %v3072_v22 = vld [vmem:[%s4108_s3 + $0x3c8] ss:$16 sps:$4 sm:$0xff]  }
 0x15e   :  { %1840 = vmatmul.mubr.bf16.vlgmr.msra.gmra.mrb[4].mxu0 %v1013_v45  ;;  %1922 = vmatmul.mubr.bf16.vlgmr.msra.gmra.mrb[4].mxu1 %v1013_v45  ;;  %v3069_v45 = vld [vmem:[%s4108_s3 + $0x3c0] ss:$16 sps:$4 sm:$0xff]  }
 0x15f   :  { %1849 = vmatpush1.bf16.msra.mxu0 %v2985_v42  ;;  %1931 = vmatpush1.bf16.msra.mxu1 %v2988_v44  ;;  %v3071_v42 = vld [vmem:[%s4108_s3 + $0x3c4] ss:$16 sps:$4 sm:$0xff]   ;;  %v3074_v44 = vld [vmem:[%s4108_s3 + $0x3cc] ss:$16 sps:$4 sm:$0xff]  }
 0x160   :  { %1880 = vmatprep.mubr.bf16.mxu0 %v1016_v48  ;;  %1962 = vmatprep.mubr.bf16.mxu1 %v1016_v48  ;;  %v3080_v48 = vld [vmem:[%s4108_s3 + $0x3ec] ss:$16 sps:$4 sm:$0xff]  }
 0x161   :  { %1850 = vmatprep.subr.bf16.mxu0 %v2993_v46  ;;  %1932 = vmatprep.subr.bf16.mxu1 %v2996_v47  ;;  %v2672_v46 = vadd.f32 %v3790_v28, %v196_v41  ;;  %v3077_v47 = vld [vmem:[%s4108_s3 + $0x3e4] ss:$16 sps:$4 sm:$0xff]   ;;  %v3078_v28 = vld [vmem:[%s4108_s3 + $0x3e8] ss:$16 sps:$4 sm:$0xff]  }
 0x163   :  { %1851 = vmatpush1.bf16.msra.mxu0 %v2991_v49  ;;  %1933 = vmatpush1.bf16.msra.mxu1 %v2994_v50  ;;  %v3075_v49 = vld [vmem:[%s4108_s3 + $0x3e0] ss:$16 sps:$4 sm:$0xff]   ;;  %v1011_v50 = vmax.f32 %v2672_v46, 0.0 }
 0x164   :  { %1852 = vmatprep.subr.bf16.mxu0 %v2999_v51  ;;  %1934 = vmatprep.subr.bf16.mxu1 %v3002_v52  ;;  %v3081_v51 = vld [vmem:[%s4110_s5 + $0x40] sm:$0xff]  }
 0x165   :  { %v3082_v52 = vld [vmem:[%s4110_s5 + $0xc0] sm:$0xff]  }
 0x167   :  { %1853 = vmatpush1.bf16.msra.mxu0 %v2997_v53  ;;  %1935 = vmatpush1.bf16.msra.mxu1 %v3000_v54  ;;  %v3083_v53 = vld [vmem:[%s4110_s5] sm:$0xff]  }
 0x168   :  { %1854 = vmatprep.subr.bf16.mxu0 %v3005_v55  ;;  %1936 = vmatprep.subr.bf16.mxu1 %v3008_v56  ;;  %v3084_v54 = vld [vmem:[%s4110_s5 + $0x80] sm:$0xff]   ;;  %v1015_v55 = vpack.c.bf16 %v1011_v50, %v1011_v50  ;;  %v3085_v56 = vld [vmem:[%s4110_s5 + $0x48] sm:$0xff]  }
 0x16b   :  { %1855 = vmatpush1.bf16.msra.mxu0 %v3003_v57  ;;  %1937 = vmatpush1.bf16.msra.mxu1 %v3006_v58  ;;  %v3086_v57 = vld [vmem:[%s4110_s5 + $0xc8] sm:$0xff]  }
 0x16c   :  { %1856 = vmatprep.subr.bf16.mxu0 %v3011_v59  ;;  %1938 = vmatprep.subr.bf16.mxu1 %v3014_v60  ;;  %v3087_v58 = vld [vmem:[%s4110_s5 + $0x8] sm:$0xff]   ;;  %v3089_v60 = vld [vmem:[%s4110_s5 + $0x50] sm:$0xff]  }
 0x16d   :  { %v3088_v59 = vld [vmem:[%s4110_s5 + $0x88] sm:$0xff]  }
 0x16f   :  { %1857 = vmatpush1.bf16.msra.mxu0 %v3009_v61  ;;  %1939 = vmatpush1.bf16.msra.mxu1 %v3012_v62  ;;  %v3090_v61 = vld [vmem:[%s4110_s5 + $0xd0] sm:$0xff]  }
 0x170   :  { %1858 = vmatprep.subr.bf16.mxu0 %v3017_v63  ;;  %1940 = vmatprep.subr.bf16.mxu1 %v3020_v0  ;;  %v3091_v62 = vld [vmem:[%s4110_s5 + $0x10] sm:$0xff]   ;;  %v3093_v0 = vld [vmem:[%s4110_s5 + $0x58] sm:$0xff]  }
 0x171   :  { %v3092_v63 = vld [vmem:[%s4110_s5 + $0x90] sm:$0xff]  }
 0x173   :  { %1859 = vmatpush1.bf16.msra.mxu0 %v3015_v1  ;;  %1941 = vmatpush1.bf16.msra.mxu1 %v3018_v2  ;;  %v3094_v1 = vld [vmem:[%s4110_s5 + $0xd8] sm:$0xff]  }
 0x174   :  { %1860 = vmatprep.subr.bf16.mxu0 %v3023_v3  ;;  %1942 = vmatprep.subr.bf16.mxu1 %v3026_v4  ;;  %v3095_v2 = vld [vmem:[%s4110_s5 + $0x18] sm:$0xff]   ;;  %v3097_v4 = vld [vmem:[%s4110_s5 + $0x60] sm:$0xff]  }
 0x175   :  { %v3096_v3 = vld [vmem:[%s4110_s5 + $0x98] sm:$0xff]  }
 0x177   :  { %1861 = vmatpush1.bf16.msra.mxu0 %v3021_v5  ;;  %1943 = vmatpush1.bf16.msra.mxu1 %v3024_v6  ;;  %v3098_v5 = vld [vmem:[%s4110_s5 + $0xe0] sm:$0xff]  }
 0x178   :  { %1862 = vmatprep.subr.bf16.mxu0 %v3029_v7  ;;  %1944 = vmatprep.subr.bf16.mxu1 %v3032_v8  ;;  %v3099_v6 = vld [vmem:[%s4110_s5 + $0x20] sm:$0xff]   ;;  %v3101_v8 = vld [vmem:[%s4110_s5 + $0x68] sm:$0xff]  }
 0x179   :  { %v3100_v7 = vld [vmem:[%s4110_s5 + $0xa0] sm:$0xff]  }
 0x17b   :  { %1863 = vmatpush1.bf16.msra.mxu0 %v3027_v10  ;;  %1945 = vmatpush1.bf16.msra.mxu1 %v3030_v11  ;;  %v3102_v10 = vld [vmem:[%s4110_s5 + $0xe8] sm:$0xff]  }
 0x17c   :  { %1864 = vmatprep.subr.bf16.mxu0 %v3035_v12  ;;  %1946 = vmatprep.subr.bf16.mxu1 %v3038_v13  ;;  %v3103_v11 = vld [vmem:[%s4110_s5 + $0x28] sm:$0xff]   ;;  %v3105_v13 = vld [vmem:[%s4110_s5 + $0x70] sm:$0xff]  }
 0x17d   :  { %v3104_v12 = vld [vmem:[%s4110_s5 + $0xa8] sm:$0xff]  }
 0x17f   :  { %1865 = vmatpush1.bf16.msra.mxu0 %v3033_v14  ;;  %1947 = vmatpush1.bf16.msra.mxu1 %v3036_v15  ;;  %v3106_v14 = vld [vmem:[%s4110_s5 + $0xf0] sm:$0xff]  }
 0x180   :  { %1866 = vmatprep.subr.bf16.mxu0 %v3041_v16  ;;  %1948 = vmatprep.subr.bf16.mxu1 %v3044_v17  ;;  %v3107_v15 = vld [vmem:[%s4110_s5 + $0x30] sm:$0xff]   ;;  %v3109_v17 = vld [vmem:[%s4110_s5 + $0x78] sm:$0xff]  }
 0x181   :  { %v3108_v16 = vld [vmem:[%s4110_s5 + $0xb0] sm:$0xff]  }
 0x183   :  { %1867 = vmatpush1.bf16.msra.mxu0 %v3039_v18  ;;  %1949 = vmatpush1.bf16.msra.mxu1 %v3042_v19  ;;  %v3110_v18 = vld [vmem:[%s4110_s5 + $0xf8] sm:$0xff]  }
 0x184   :  { %1868 = vmatprep.subr.bf16.mxu0 %v3047_v20  ;;  %1950 = vmatprep.subr.bf16.mxu1 %v3050_v9  ;;  %v3111_v19 = vld [vmem:[%s4110_s5 + $0x38] sm:$0xff]   ;;  %v1145_v9 = vld [vmem:[%s4109_s4] sm:$0xf] }
 0x185   :  { %v3112_v20 = vld [vmem:[%s4110_s5 + $0xb8] sm:$0xff]  }
 0x187   :  { %1869 = vmatpush1.bf16.msra.mxu0 %v3045_v25  ;;  %1951 = vmatpush1.bf16.msra.mxu1 %v3048_v26  ;;  %v1150_v25 = vrot.slane %v1145_v9, %v187_v21  ;;  %v1158_v26 = vrot.slane %v1145_v9, %v195_v36 }
 0x188   :  { %1870 = vmatprep.subr.bf16.mxu0 %v3053_v27  ;;  %1952 = vmatprep.subr.bf16.mxu1 %v3056_v29  ;;  %v1154_v27 = vrot.slane %v1145_v9, %v191_v23  ;;  %v1162_v29 = vrot.slane %v1145_v9, %v199_v24 }
 0x18b   :  { %1871 = vmatpush1.bf16.msra.mxu0 %v3051_v30  ;;  %1953 = vmatpush1.bf16.msra.mxu1 %v3054_v31 }
 0x18c   :  { %1872 = vmatprep.subr.bf16.mxu0 %v3059_v32  ;;  %1954 = vmatprep.subr.bf16.mxu1 %v3062_v33 }
 0x18f   :  { %1873 = vmatpush1.bf16.msra.mxu0 %v3057_v34  ;;  %1955 = vmatpush1.bf16.msra.mxu1 %v3060_v35 }
 0x190   :  { %1874 = vmatprep.subr.bf16.mxu0 %v3065_v37  ;;  %1956 = vmatprep.subr.bf16.mxu1 %v3068_v38 }
 0x193   :  { %1875 = vmatpush1.bf16.msra.mxu0 %v3063_v39  ;;  %1957 = vmatpush1.bf16.msra.mxu1 %v3066_v40 }
 0x194   :  { %1876 = vmatprep.subr.bf16.mxu0 %v3071_v42  ;;  %1958 = vmatprep.subr.bf16.mxu1 %v3074_v44 }
 0x197   :  { %1877 = vmatpush1.bf16.msra.mxu0 %v3069_v45  ;;  %1959 = vmatpush1.bf16.msra.mxu1 %v3072_v22 }
 0x198   :  { %1878 = vmatprep.subr.bf16.mxu0 %v3077_v47  ;;  %1960 = vmatprep.subr.bf16.mxu1 %v3080_v48  ;;  %v2593_v48 = vld [vmem:[%s4111_s6] ss:$0 sm:$0xff] }
 0x19b   :  { %1879 = vmatpush1.bf16.msra.mxu0 %v3075_v49  ;;  %1961 = vmatpush1.bf16.msra.mxu1 %v3078_v28 }
 0x19c   :  { %2626 = vmatprep.subr.bf16.mxu0 %v3081_v51  ;;  %2648 = vmatprep.subr.bf16.mxu1 %v3082_v52 }
 0x19e   :  { %1881 = vmatmul.mubr.bf16.vlgmr.msra.gmra.mrb[4].mxu0 %v1015_v55  ;;  %1963 = vmatmul.mubr.bf16.vlgmr.msra.gmra.mrb[4].mxu1 %v1015_v55 }
 0x19f   :  { %2627 = vmatpush3.bf16.msra.mxu0 %v3083_v53  ;;  %2649 = vmatpush3.bf16.msra.mxu1 %v3084_v54 }
 0x1a0   :  { %2628 = vmatprep.subr.bf16.mxu0 %v3085_v56  ;;  %2650 = vmatprep.subr.bf16.mxu1 %v3086_v57 }
 0x1a3   :  { %2629 = vmatpush3.bf16.msra.mxu0 %v3087_v58  ;;  %2651 = vmatpush3.bf16.msra.mxu1 %v3088_v59 }
 0x1a4   :  { %2630 = vmatprep.subr.bf16.mxu0 %v3089_v60  ;;  %2652 = vmatprep.subr.bf16.mxu1 %v3090_v61 }
 0x1a7   :  { %2631 = vmatpush3.bf16.msra.mxu0 %v3091_v62  ;;  %2653 = vmatpush3.bf16.msra.mxu1 %v3092_v63 }
 0x1a8   :  { %2632 = vmatprep.subr.bf16.mxu0 %v3093_v0  ;;  %2654 = vmatprep.subr.bf16.mxu1 %v3094_v1 }
 0x1ab   :  { %2633 = vmatpush3.bf16.msra.mxu0 %v3095_v2  ;;  %2655 = vmatpush3.bf16.msra.mxu1 %v3096_v3 }
 0x1ac   :  { %2634 = vmatprep.subr.bf16.mxu0 %v3097_v4  ;;  %2656 = vmatprep.subr.bf16.mxu1 %v3098_v5 }
 0x1af   :  { %2635 = vmatpush3.bf16.msra.mxu0 %v3099_v6  ;;  %2657 = vmatpush3.bf16.msra.mxu1 %v3100_v7 }
 0x1b0   :  { %2636 = vmatprep.subr.bf16.mxu0 %v3101_v8  ;;  %2658 = vmatprep.subr.bf16.mxu1 %v3102_v10 }
 0x1b3   :  { %2637 = vmatpush3.bf16.msra.mxu0 %v3103_v11  ;;  %2659 = vmatpush3.bf16.msra.mxu1 %v3104_v12 }
 0x1b4   :  { %2638 = vmatprep.subr.bf16.mxu0 %v3105_v13  ;;  %2660 = vmatprep.subr.bf16.mxu1 %v3106_v14 }
 0x1b7   :  { %2639 = vmatpush3.bf16.msra.mxu0 %v3107_v15  ;;  %2661 = vmatpush3.bf16.msra.mxu1 %v3108_v16 }
 0x1b8   :  { %2640 = vmatprep.subr.bf16.mxu0 %v3109_v17  ;;  %2662 = vmatprep.subr.bf16.mxu1 %v3110_v18 }
 0x1bb   :  { %2641 = vmatpush3.bf16.msra.mxu0 %v3111_v19  ;;  %2663 = vmatpush3.bf16.msra.mxu1 %v3112_v20 }
 0x271   :  { %v1882_v30 = vpop.f32.mrb[4].mxu0  ;;  %v1964_v31 = vpop.f32.mrb[4].mxu1 }
 0x272   :  { %v2674_v32 = vadd.f32 %v1882_v30, %v1150_v25  ;;  %v2676_v33 = vadd.f32 %v1964_v31, %v1158_v26  ;;  %v1884_v34 = vpop.f32.mrb[5].mxu0  ;;  %v1966_v35 = vpop.f32.mrb[5].mxu1 }
 0x273   :  { %v2675_v37 = vadd.f32 %v1884_v34, %v1154_v27  ;;  %v2677_v38 = vadd.f32 %v1966_v35, %v1162_v29  ;;  %v1886_v39 = vpop.f32.mrb[6].mxu0  ;;  %v1968_v40 = vpop.f32.mrb[6].mxu1 }
 0x274   :  { %v1971_v21 = vmax.f32 %v2674_v32, 0.0  ;;  %v1973_v41 = vmax.f32 %v2676_v33, 0.0  ;;  %v1887_v42 = vpop.f32.mrb[7].mxu0  ;;  %v1969_v36 = vpop.f32.mrb[7].mxu1 }
 0x275   :  { %v1972_v44 = vmax.f32 %v2675_v37, 0.0  ;;  %v1974_v45 = vmax.f32 %v2677_v38, 0.0 }
 0x276   :  { %v1975_v43 = vpack.c.bf16 %v1971_v21, %v1971_v21  ;;  %v1977_v24 = vpack.c.bf16 %v1973_v41, %v1973_v41 }
 0x277   :  { %v1976_v23 = vpack.c.bf16 %v1972_v44, %v1972_v44  ;;  %v1978_v22 = vpack.c.bf16 %v1974_v45, %v1974_v45 }
 0x279   :  { %2274 = vmatprep.mubr.bf16.mxu0 %v1976_v23  ;;  %2314 = vmatprep.mubr.bf16.mxu1 %v1978_v22 }
 0x27a   :  { %2275 = vmatmul.mubr.bf16.vlgmr.msra.gmra.mrb[8].mxu0 %v1975_v43  ;;  %2315 = vmatmul.mubr.bf16.vlgmr.msra.gmra.mrb[8].mxu1 %v1977_v24 }
 0x34d   :  { %v2642_v46 = vpop.f32.mrb[8].mxu0  ;;  %v2664_v47 = vpop.f32.mrb[8].mxu1 }
 0x34e   :  { %v2643_v49 = vpop.f32.mrb[9].mxu0  ;;  %v2665_v28 = vpop.f32.mrb[9].mxu1 }
 0x34f   :  { %v2644_v50 = vadd.f32 %v2643_v49, %v2642_v46  ;;  %v2666_v51 = vadd.f32 %v2665_v28, %v2664_v47  ;;  %v2645_v52 = vpop.f32.mrb[10].mxu0  ;;  %v2667_v53 = vpop.f32.mrb[10].mxu1 }
 0x350   :  { %v2646_v54 = vpop.f32.mrb[11].mxu0  ;;  %v2668_v55 = vpop.f32.mrb[11].mxu1 }
 0x351   :  { %v2277_v56 = vadd.f32 %v2644_v50, %v2593_v48 }
 0x353   :  { %v2317_v57 = vadd.f32 %v2666_v51, %v2277_v56 }
 0x355   :  { %2322 = vst [vmem:[#allocation2] sm:$0x3] %v2317_v57 }
 0x356   :  { %3124 = shalt.err (!%p3121_p4)
}
 0x357   :  { %s3125_s14 = scalar_lea.hbm %s4112_s7, 32 }
 0x358   :  { %p3126_p5 = scmp.ne.s32.totalorder %s4112_s7, %s3125_s14  ;;  %p3129_p6 = scmp.lt.u32.totalorder %s3125_s14, %s4112_s7 }
 0x35a   :  { %p3131_p7 = pnand %p3129_p6, %p3126_p5 }
 0x35c   :  { %3134 = shalt.err (!%p3131_p7)
}
 0x35d   :  { %2332 = dma.vmem_to_hbm [thread:$0]  %s2330_s11, 32, %s4112_s7, [#allocation3]  }
 0x35e   :  { %3135 = dma.done.wait [#allocation3], 32  }
 0x35f   :  { %3136 = vsyncadd [#allocation3], 4294967264 }
 0x360   :  { %2336 = vsyncpa [#allocation3], 1 }

// kernel: vgg_forward.2
= control target key start
LH: loop header
LB: loop body
LE: loop exit
PB: predicated region body
PF: predicated region fallthrough
CT: control target
= control target key end

     0   :  { %11 = vsyncpa [#allocation3], 0  ;;  %s17332_s0 = inlined_call_operand.hbm [shape: f32[512,512], index: 0, kind: input, shape index: {}]   ;;  %s17333_s1 = inlined_call_operand.hbm [shape: f32[512,512], index: 1, kind: input, shape index: {}]   ;;  %s17334_s2 = inlined_call_operand.vmem [shape: f32[128,512], index: 2, kind: input, shape index: {}]   ;;  %s17335_s3 = inlined_call_operand.vmem [shape: bf16[512,512], index: 3, kind: output, shape index: {0}]   ;;  %s17336_s4 = inlined_call_operand.vmem [shape: bf16[512,512], index: 4, kind: output, shape index: {1}]   ;;  %s17337_s5 = inlined_call_operand.vmem [shape: bf16[512,128], index: 5, kind: output, shape index: {2}]  }
   0x1   :  { %12 = vsyncpa [#allocation5], 0  ;;  %s12319_s18 = smov [#allocation2]   ;;  %s11980_s22 = scalar_lea.hbm %s17332_s0, 32768 }
   0x2   :  { %s18_s19 = sshll.u32 %s12319_s18, 4  ;;  %p11981_p0 = scmp.ne.s32.totalorder %s17332_s0, %s11980_s22  ;;  %s19_s19 = int_to_ptr.vmem [resolvable:$true] %s18_s19 }
   0x3   :  { %p11984_p1 = scmp.lt.u32.totalorder %s11980_s22, %s17332_s0 }
   0x5   :  { %p11986_p2 = pnand %p11984_p1, %p11981_p0 }
   0x7   :  { %11989 = shalt.err (!%p11986_p2)
}
   0x8   :  { %s11990_s27 = scalar_lea.vmem %s19_s19, 32768  ;;  %p11995_p4 = scmp.lt.s32.totalorder %s19_s19, %s19_s19 }
   0x9   :  { %p11991_p3 = scmp.ne.s32.totalorder %s19_s19, %s11990_s27  ;;  %p11996_p5 = scmp.lt.s32.totalorder %s11990_s27, %s11990_s27 }
   0xb   :  { %p11997_p6 = por %p11996_p5, %p11995_p4 }
   0xd   :  { %p11998_p7 = pnand %p11997_p6, %p11991_p3 }
   0xf   :  { %12001 = shalt.err (!%p11998_p7)
}
  0x10   :  { %s12320_s28 = smov 512   ;;  %s12321_s29 = smov 32  }
  0x11   :  { %24 = dma.hbm_to_vmem [thread:$0]  %s17332_s0, 32768, %s19_s19, [#allocation3], %s12320_s28, %s12320_s28, %s12321_s29  }
  0x12   :  { %s12322_s7 = smov [#allocation4]   ;;  %s12002_s11 = scalar_lea.hbm %s17333_s1, 32768 }
  0x13   :  { %s30_s8 = sshll.u32 %s12322_s7, 4  ;;  %p12003_p8 = scmp.ne.s32.totalorder %s17333_s1, %s12002_s11  ;;  %s31_s8 = int_to_ptr.vmem [resolvable:$true] %s30_s8 }
  0x14   :  { %p12006_p9 = scmp.lt.u32.totalorder %s12002_s11, %s17333_s1 }
  0x16   :  { %p12008_p10 = pnand %p12006_p9, %p12003_p8 }
  0x18   :  { %12011 = shalt.err (!%p12008_p10)
}
  0x19   :  { %s12012_s16 = scalar_lea.vmem %s31_s8, 32768  ;;  %p12017_p12 = scmp.lt.s32.totalorder %s31_s8, %s31_s8 }
  0x1a   :  { %p12013_p11 = scmp.ne.s32.totalorder %s31_s8, %s12012_s16  ;;  %p12018_p13 = scmp.lt.s32.totalorder %s12012_s16, %s12012_s16 }
  0x1c   :  { %p12019_p0 = por %p12018_p13, %p12017_p12 }
  0x1e   :  { %p12020_p1 = pnand %p12019_p0, %p12013_p11 }
  0x20   :  { %12023 = shalt.err (!%p12020_p1)
}
  0x21   :  { %36 = dma.hbm_to_vmem [thread:$0]  %s17333_s1, 32768, %s31_s8, [#allocation5], %s12320_s28, %s12320_s28, %s12321_s29  }
  0x22   :  { %12024 = dma.done.wait [#allocation3], 32768  }
  0x23   :  { %12025 = vsyncadd [#allocation3], 4294934528 }
  0x24   :  { %12026 = dma.done.wait [#allocation5], 32768  }
  0x25   :  { %12027 = vsyncadd [#allocation5], 4294934528  ;;  %v53_v0 = vld [vmem:[#allocation2 + $0x40] sm:$0xff]  ;;  %v54_v1 = vld [vmem:[#allocation2 + $0x48] sm:$0xff] }
  0x26   :  { %v55_v2 = vld [vmem:[#allocation2 + $0x50] sm:$0xff]  ;;  %v56_v3 = vld [vmem:[#allocation2 + $0x58] sm:$0xff]  ;;  %v57_v4 = vld [vmem:[#allocation2 + $0x60] sm:$0xff]  ;;  %12190 = vmaxabs.init.f32.vacc2 %v53_v0, %v54_v1 }
  0x27   :  { %v58_v5 = vld [vmem:[#allocation2 + $0x68] sm:$0xff]  ;;  %v59_v6 = vld [vmem:[#allocation2 + $0x70] sm:$0xff]  ;;  %v60_v7 = vld [vmem:[#allocation2 + $0x78] sm:$0xff] }
  0x28   :  { %12191 = vmaxabs.f32.vacc2 %v55_v2, %v56_v3  ;;  %v61_v8 = vld [vmem:[#allocation2 + $0x80] sm:$0xff]  ;;  %v62_v9 = vld [vmem:[#allocation2 + $0x88] sm:$0xff]  ;;  %v63_v10 = vld [vmem:[#allocation2 + $0x90] sm:$0xff] }
  0x29   :  { %v64_v11 = vld [vmem:[#allocation2 + $0x98] sm:$0xff]  ;;  %v65_v12 = vld [vmem:[#allocation2 + $0xa0] sm:$0xff]  ;;  %v66_v13 = vld [vmem:[#allocation2 + $0xa8] sm:$0xff] }
  0x2a   :  { %12192 = vmaxabs.f32.vacc2 %v57_v4, %v58_v5  ;;  %v67_v14 = vld [vmem:[#allocation2 + $0xb0] sm:$0xff]  ;;  %v68_v15 = vld [vmem:[#allocation2 + $0xb8] sm:$0xff]  ;;  %v69_v16 = vld [vmem:[#allocation2 + $0xc0] sm:$0xff] }
  0x2b   :  { %v70_v17 = vld [vmem:[#allocation2 + $0xc8] sm:$0xff]  ;;  %v71_v18 = vld [vmem:[#allocation2 + $0xd0] sm:$0xff]  ;;  %v72_v19 = vld [vmem:[#allocation2 + $0xd8] sm:$0xff] }
  0x2c   :  { %12193 = vmaxabs.f32.vacc2 %v59_v6, %v60_v7  ;;  %v73_v20 = vld [vmem:[#allocation2 + $0xe0] sm:$0xff]  ;;  %v74_v21 = vld [vmem:[#allocation2 + $0xe8] sm:$0xff]  ;;  %v75_v22 = vld [vmem:[#allocation2 + $0xf0] sm:$0xff] }
  0x2d   :  { %v76_v23 = vld [vmem:[#allocation2 + $0xf8] sm:$0xff]  ;;  %v77_v24 = vld [vmem:[#allocation2 + $0x100] sm:$0xff]  ;;  %v78_v25 = vld [vmem:[#allocation2 + $0x108] sm:$0xff] }
  0x2e   :  { %12194 = vmaxabs.f32.vacc2 %v61_v8, %v62_v9  ;;  %v79_v26 = vld [vmem:[#allocation2 + $0x110] sm:$0xff]  ;;  %v80_v27 = vld [vmem:[#allocation2 + $0x118] sm:$0xff]  ;;  %v81_v28 = vld [vmem:[#allocation2 + $0x120] sm:$0xff] }
  0x2f   :  { %v82_v29 = vld [vmem:[#allocation2 + $0x128] sm:$0xff]  ;;  %v83_v30 = vld [vmem:[#allocation2 + $0x130] sm:$0xff]  ;;  %v84_v31 = vld [vmem:[#allocation2 + $0x138] sm:$0xff] }
  0x30   :  { %12195 = vmaxabs.f32.vacc2 %v63_v10, %v64_v11  ;;  %v85_v32 = vld [vmem:[#allocation2 + $0x140] sm:$0xff]  ;;  %v86_v33 = vld [vmem:[#allocation2 + $0x148] sm:$0xff]  ;;  %v87_v34 = vld [vmem:[#allocation2 + $0x150] sm:$0xff] }
  0x31   :  { %v88_v35 = vld [vmem:[#allocation2 + $0x158] sm:$0xff]  ;;  %v89_v36 = vld [vmem:[#allocation2 + $0x160] sm:$0xff]  ;;  %v90_v37 = vld [vmem:[#allocation2 + $0x168] sm:$0xff] }
  0x32   :  { %12196 = vmaxabs.f32.vacc2 %v65_v12, %v66_v13  ;;  %v91_v38 = vld [vmem:[#allocation2 + $0x170] sm:$0xff]  ;;  %v92_v39 = vld [vmem:[#allocation2 + $0x178] sm:$0xff]  ;;  %v93_v40 = vld [vmem:[#allocation2 + $0x180] sm:$0xff] }
  0x33   :  { %v94_v41 = vld [vmem:[#allocation2 + $0x188] sm:$0xff]  ;;  %v95_v42 = vld [vmem:[#allocation2 + $0x190] sm:$0xff]  ;;  %v96_v43 = vld [vmem:[#allocation2 + $0x198] sm:$0xff] }
  0x34   :  { %12197 = vmaxabs.f32.vacc2 %v67_v14, %v68_v15  ;;  %v97_v44 = vld [vmem:[#allocation2 + $0x1a0] sm:$0xff]  ;;  %v98_v45 = vld [vmem:[#allocation2 + $0x1a8] sm:$0xff]  ;;  %v99_v47 = vld [vmem:[#allocation2 + $0x1b0] sm:$0xff] }
  0x35   :  { %v3525_v46 = vld [vmem:[#allocation4 + $0x40] sm:$0xff]  ;;  %v3526_v48 = vld [vmem:[#allocation4 + $0x48] sm:$0xff]  ;;  %v100_v49 = vld [vmem:[#allocation2 + $0x1b8] sm:$0xff] }
  0x36   :  { %12198 = vmaxabs.f32.vacc2 %v69_v16, %v70_v17  ;;  %v3527_v50 = vld [vmem:[#allocation4 + $0x50] sm:$0xff]  ;;  %v101_v51 = vld [vmem:[#allocation2 + $0x1c0] sm:$0xff]  ;;  %v3528_v52 = vld [vmem:[#allocation4 + $0x58] sm:$0xff]  ;;  %12061 = vmaxabs.init.f32.vacc1 %v3525_v46, %v3526_v48 }
  0x37   :  { %v102_v53 = vld [vmem:[#allocation2 + $0x1c8] sm:$0xff]  ;;  %v3529_v54 = vld [vmem:[#allocation4 + $0x60] sm:$0xff]  ;;  %v103_v56 = vld [vmem:[#allocation2 + $0x1d0] sm:$0xff] }
  0x38   :  { %12199 = vmaxabs.f32.vacc2 %v71_v18, %v72_v19  ;;  %v3530_v55 = vld [vmem:[#allocation4 + $0x68] sm:$0xff]  ;;  %v3531_v57 = vld [vmem:[#allocation4 + $0x70] sm:$0xff]  ;;  %v104_v58 = vld [vmem:[#allocation2 + $0x1d8] sm:$0xff]  ;;  %12062 = vmaxabs.f32.vacc1 %v3527_v50, %v3528_v52 }
  0x39   :  { %v3532_v59 = vld [vmem:[#allocation4 + $0x78] sm:$0xff]  ;;  %v105_v60 = vld [vmem:[#allocation2 + $0x1e0] sm:$0xff]  ;;  %v106_v62 = vld [vmem:[#allocation2 + $0x1e8] sm:$0xff] }
  0x3a   :  { %12200 = vmaxabs.f32.vacc2 %v73_v20, %v74_v21  ;;  %v3533_v61 = vld [vmem:[#allocation4 + $0x80] sm:$0xff]  ;;  %12063 = vmaxabs.f32.vacc1 %v3529_v54, %v3530_v55  ;;  %v3534_v63 = vld [vmem:[#allocation4 + $0x88] sm:$0xff]  ;;  %v107_v0 = vld [vmem:[#allocation2 + $0x1f0] sm:$0xff] }
  0x3b   :  { %v3535_v1 = vld [vmem:[#allocation4 + $0x90] sm:$0xff]  ;;  %v108_v2 = vld [vmem:[#allocation2 + $0x1f8] sm:$0xff]  ;;  %v109_v4 = vld [vmem:[#allocation2 + $0x200] sm:$0xff] }
  0x3c   :  { %12201 = vmaxabs.f32.vacc2 %v75_v22, %v76_v23  ;;  %12064 = vmaxabs.f32.vacc1 %v3531_v57, %v3532_v59  ;;  %v3536_v3 = vld [vmem:[#allocation4 + $0x98] sm:$0xff]  ;;  %v3537_v5 = vld [vmem:[#allocation4 + $0xa0] sm:$0xff]  ;;  %v110_v6 = vld [vmem:[#allocation2 + $0x208] sm:$0xff] }
  0x3d   :  { %v3538_v7 = vld [vmem:[#allocation4 + $0xa8] sm:$0xff]  ;;  %v111_v8 = vld [vmem:[#allocation2 + $0x210] sm:$0xff]  ;;  %v112_v10 = vld [vmem:[#allocation2 + $0x218] sm:$0xff] }
  0x3e   :  { %12202 = vmaxabs.f32.vacc2 %v77_v24, %v78_v25  ;;  %12065 = vmaxabs.f32.vacc1 %v3533_v61, %v3534_v63  ;;  %v3539_v9 = vld [vmem:[#allocation4 + $0xb0] sm:$0xff]  ;;  %v3540_v11 = vld [vmem:[#allocation4 + $0xb8] sm:$0xff]  ;;  %v113_v12 = vld [vmem:[#allocation2 + $0x220] sm:$0xff] }
  0x3f   :  { %v3541_v13 = vld [vmem:[#allocation4 + $0xc0] sm:$0xff]  ;;  %v114_v14 = vld [vmem:[#allocation2 + $0x228] sm:$0xff]  ;;  %v115_v16 = vld [vmem:[#allocation2 + $0x230] sm:$0xff] }
  0x40   :  { %12203 = vmaxabs.f32.vacc2 %v79_v26, %v80_v27  ;;  %12066 = vmaxabs.f32.vacc1 %v3535_v1, %v3536_v3  ;;  %v3542_v15 = vld [vmem:[#allocation4 + $0xc8] sm:$0xff]  ;;  %v3543_v17 = vld [vmem:[#allocation4 + $0xd0] sm:$0xff]  ;;  %v116_v18 = vld [vmem:[#allocation2 + $0x238] sm:$0xff] }
  0x41   :  { %v3544_v19 = vld [vmem:[#allocation4 + $0xd8] sm:$0xff]  ;;  %v117_v20 = vld [vmem:[#allocation2 + $0x240] sm:$0xff]  ;;  %v118_v22 = vld [vmem:[#allocation2 + $0x248] sm:$0xff] }
  0x42   :  { %12204 = vmaxabs.f32.vacc2 %v81_v28, %v82_v29  ;;  %12067 = vmaxabs.f32.vacc1 %v3537_v5, %v3538_v7  ;;  %v3545_v21 = vld [vmem:[#allocation4 + $0xe0] sm:$0xff]  ;;  %v3546_v23 = vld [vmem:[#allocation4 + $0xe8] sm:$0xff]  ;;  %v119_v24 = vld [vmem:[#allocation2 + $0x250] sm:$0xff] }
  0x43   :  { %v3547_v25 = vld [vmem:[#allocation4 + $0xf0] sm:$0xff]  ;;  %v120_v26 = vld [vmem:[#allocation2 + $0x258] sm:$0xff]  ;;  %v121_v28 = vld [vmem:[#allocation2 + $0x260] sm:$0xff] }
  0x44   :  { %12205 = vmaxabs.f32.vacc2 %v83_v30, %v84_v31  ;;  %12068 = vmaxabs.f32.vacc1 %v3539_v9, %v3540_v11  ;;  %v3548_v27 = vld [vmem:[#allocation4 + $0xf8] sm:$0xff]  ;;  %v3549_v29 = vld [vmem:[#allocation4 + $0x100] sm:$0xff]  ;;  %v122_v30 = vld [vmem:[#allocation2 + $0x268] sm:$0xff] }
  0x45   :  { %v3550_v31 = vld [vmem:[#allocation4 + $0x108] sm:$0xff]  ;;  %v131_v48 = vld [vmem:[#allocation2 + $0x2b0] sm:$0xff]  ;;  %v132_v50 = vld [vmem:[#allocation2 + $0x2b8] sm:$0xff] }
  0x46   :  { %12206 = vmaxabs.f32.vacc2 %v85_v32, %v86_v33  ;;  %12069 = vmaxabs.f32.vacc1 %v3541_v13, %v3542_v15  ;;  %v123_v32 = vld [vmem:[#allocation2 + $0x270] sm:$0xff]  ;;  %v130_v46 = vld [vmem:[#allocation2 + $0x2a8] sm:$0xff]  ;;  %v133_v52 = vld [vmem:[#allocation2 + $0x2c0] sm:$0xff] }
  0x47   :  { %v3551_v33 = vld [vmem:[#allocation4 + $0x110] sm:$0xff]  ;;  %v134_v54 = vld [vmem:[#allocation2 + $0x2c8] sm:$0xff]  ;;  %v3564_v59 = vld [vmem:[#allocation4 + $0x178] sm:$0xff] }
  0x48   :  { %12207 = vmaxabs.f32.vacc2 %v87_v34, %v88_v35  ;;  %12070 = vmaxabs.f32.vacc1 %v3543_v17, %v3544_v19  ;;  %v124_v34 = vld [vmem:[#allocation2 + $0x278] sm:$0xff]  ;;  %v3562_v55 = vld [vmem:[#allocation4 + $0x168] sm:$0xff]  ;;  %v3563_v57 = vld [vmem:[#allocation4 + $0x170] sm:$0xff] }
  0x49   :  { %v3552_v35 = vld [vmem:[#allocation4 + $0x118] sm:$0xff]  ;;  %v3565_v61 = vld [vmem:[#allocation4 + $0x180] sm:$0xff]  ;;  %v3566_v63 = vld [vmem:[#allocation4 + $0x188] sm:$0xff] }
  0x4a   :  { %12208 = vmaxabs.f32.vacc2 %v89_v36, %v90_v37  ;;  %12071 = vmaxabs.f32.vacc1 %v3545_v21, %v3546_v23  ;;  %v125_v36 = vld [vmem:[#allocation2 + $0x280] sm:$0xff]  ;;  %v3567_v1 = vld [vmem:[#allocation4 + $0x190] sm:$0xff]  ;;  %v3568_v3 = vld [vmem:[#allocation4 + $0x198] sm:$0xff] }
  0x4b   :  { %v3553_v37 = vld [vmem:[#allocation4 + $0x120] sm:$0xff]  ;;  %v3570_v7 = vld [vmem:[#allocation4 + $0x1a8] sm:$0xff]  ;;  %v3571_v9 = vld [vmem:[#allocation4 + $0x1b0] sm:$0xff] }
  0x4c   :  { %12209 = vmaxabs.f32.vacc2 %v91_v38, %v92_v39  ;;  %12072 = vmaxabs.f32.vacc1 %v3547_v25, %v3548_v27  ;;  %v126_v38 = vld [vmem:[#allocation2 + $0x288] sm:$0xff]  ;;  %v3569_v5 = vld [vmem:[#allocation4 + $0x1a0] sm:$0xff]  ;;  %v3572_v11 = vld [vmem:[#allocation4 + $0x1b8] sm:$0xff] }
  0x4d   :  { %v3554_v39 = vld [vmem:[#allocation4 + $0x128] sm:$0xff]  ;;  %v3573_v13 = vld [vmem:[#allocation4 + $0x1c0] sm:$0xff]  ;;  %v3575_v17 = vld [vmem:[#allocation4 + $0x1d0] sm:$0xff] }
  0x4e   :  { %12210 = vmaxabs.f32.vacc2 %v93_v40, %v94_v41  ;;  %12073 = vmaxabs.f32.vacc1 %v3549_v29, %v3550_v31  ;;  %v127_v40 = vld [vmem:[#allocation2 + $0x290] sm:$0xff]  ;;  %v3574_v15 = vld [vmem:[#allocation4 + $0x1c8] sm:$0xff]  ;;  %v3576_v19 = vld [vmem:[#allocation4 + $0x1d8] sm:$0xff] }
  0x4f   :  { %v3555_v41 = vld [vmem:[#allocation4 + $0x130] sm:$0xff]  ;;  %v3577_v21 = vld [vmem:[#allocation4 + $0x1e0] sm:$0xff]  ;;  %v3578_v23 = vld [vmem:[#allocation4 + $0x1e8] sm:$0xff] }
  0x50   :  { %12211 = vmaxabs.f32.vacc2 %v95_v42, %v96_v43  ;;  %v128_v42 = vld [vmem:[#allocation2 + $0x298] sm:$0xff]  ;;  %12074 = vmaxabs.f32.vacc1 %v3551_v33, %v3552_v35  ;;  %v3579_v25 = vld [vmem:[#allocation4 + $0x1f0] sm:$0xff]  ;;  %v3581_v29 = vld [vmem:[#allocation4 + $0x200] sm:$0xff] }
  0x51   :  { %v3556_v43 = vld [vmem:[#allocation4 + $0x138] sm:$0xff]  ;;  %v3582_v31 = vld [vmem:[#allocation4 + $0x208] sm:$0xff]  ;;  %v3583_v33 = vld [vmem:[#allocation4 + $0x210] sm:$0xff] }
  0x52   :  { %12212 = vmaxabs.f32.vacc2 %v97_v44, %v98_v45  ;;  %v129_v44 = vld [vmem:[#allocation2 + $0x2a0] sm:$0xff]  ;;  %12075 = vmaxabs.f32.vacc1 %v3553_v37, %v3554_v39  ;;  %v3580_v27 = vld [vmem:[#allocation4 + $0x1f8] sm:$0xff]  ;;  %v3586_v39 = vld [vmem:[#allocation4 + $0x228] sm:$0xff] }
  0x53   :  { %v3557_v45 = vld [vmem:[#allocation4 + $0x140] sm:$0xff]  ;;  %v3584_v35 = vld [vmem:[#allocation4 + $0x218] sm:$0xff] }
  0x54   :  { %12213 = vmaxabs.f32.vacc2 %v99_v47, %v100_v49  ;;  %v3558_v47 = vld [vmem:[#allocation4 + $0x148] sm:$0xff]  ;;  %v3559_v49 = vld [vmem:[#allocation4 + $0x150] sm:$0xff]  ;;  %12076 = vmaxabs.f32.vacc1 %v3555_v41, %v3556_v43  ;;  %v3585_v37 = vld [vmem:[#allocation4 + $0x220] sm:$0xff] }
  0x55   :  { %v3587_v41 = vld [vmem:[#allocation4 + $0x230] sm:$0xff]  ;;  %v3588_v43 = vld [vmem:[#allocation4 + $0x238] sm:$0xff] }
  0x56   :  { %12214 = vmaxabs.f32.vacc2 %v101_v51, %v102_v53  ;;  %v3560_v51 = vld [vmem:[#allocation4 + $0x158] sm:$0xff]  ;;  %v3561_v53 = vld [vmem:[#allocation4 + $0x160] sm:$0xff]  ;;  %12077 = vmaxabs.f32.vacc1 %v3557_v45, %v3558_v47  ;;  %v3590_v47 = vld [vmem:[#allocation4 + $0x248] sm:$0xff] }
  0x57   :  { %v3589_v45 = vld [vmem:[#allocation4 + $0x240] sm:$0xff] }
  0x58   :  { %12215 = vmaxabs.f32.vacc2 %v103_v56, %v104_v58  ;;  %v135_v56 = vld [vmem:[#allocation2 + $0x2d0] sm:$0xff]  ;;  %v136_v58 = vld [vmem:[#allocation2 + $0x2d8] sm:$0xff]  ;;  %12078 = vmaxabs.f32.vacc1 %v3559_v49, %v3560_v51 }
  0x59   :  { %v3591_v49 = vld [vmem:[#allocation4 + $0x250] sm:$0xff]  ;;  %v3592_v51 = vld [vmem:[#allocation4 + $0x258] sm:$0xff] }
  0x5a   :  { %12216 = vmaxabs.f32.vacc2 %v105_v60, %v106_v62  ;;  %v137_v60 = vld [vmem:[#allocation2 + $0x2e0] sm:$0xff]  ;;  %v138_v62 = vld [vmem:[#allocation2 + $0x2e8] sm:$0xff]  ;;  %12079 = vmaxabs.f32.vacc1 %v3561_v53, %v3562_v55 }
  0x5b   :  { %v3593_v53 = vld [vmem:[#allocation4 + $0x260] sm:$0xff]  ;;  %v3594_v55 = vld [vmem:[#allocation4 + $0x268] sm:$0xff] }
  0x5c   :  { %12217 = vmaxabs.f32.vacc2 %v107_v0, %v108_v2  ;;  %v139_v0 = vld [vmem:[#allocation2 + $0x2f0] sm:$0xff]  ;;  %v140_v2 = vld [vmem:[#allocation2 + $0x2f8] sm:$0xff]  ;;  %12080 = vmaxabs.f32.vacc1 %v3563_v57, %v3564_v59 }
  0x5d   :  { %v3595_v57 = vld [vmem:[#allocation4 + $0x270] sm:$0xff]  ;;  %v3596_v59 = vld [vmem:[#allocation4 + $0x278] sm:$0xff] }
  0x5e   :  { %12218 = vmaxabs.f32.vacc2 %v109_v4, %v110_v6  ;;  %v141_v4 = vld [vmem:[#allocation2 + $0x300] sm:$0xff]  ;;  %v142_v6 = vld [vmem:[#allocation2 + $0x308] sm:$0xff]  ;;  %12081 = vmaxabs.f32.vacc1 %v3565_v61, %v3566_v63 }
  0x5f   :  { %v3597_v61 = vld [vmem:[#allocation4 + $0x280] sm:$0xff]  ;;  %v3598_v63 = vld [vmem:[#allocation4 + $0x288] sm:$0xff] }
  0x60   :  { %12219 = vmaxabs.f32.vacc2 %v111_v8, %v112_v10  ;;  %v143_v8 = vld [vmem:[#allocation2 + $0x310] sm:$0xff]  ;;  %v144_v10 = vld [vmem:[#allocation2 + $0x318] sm:$0xff]  ;;  %12082 = vmaxabs.f32.vacc1 %v3567_v1, %v3568_v3 }
  0x61   :  { %v3599_v1 = vld [vmem:[#allocation4 + $0x290] sm:$0xff]  ;;  %v3600_v3 = vld [vmem:[#allocation4 + $0x298] sm:$0xff] }
  0x62   :  { %12220 = vmaxabs.f32.vacc2 %v113_v12, %v114_v14  ;;  %v145_v12 = vld [vmem:[#allocation2 + $0x320] sm:$0xff]  ;;  %v146_v14 = vld [vmem:[#allocation2 + $0x328] sm:$0xff]  ;;  %12083 = vmaxabs.f32.vacc1 %v3569_v5, %v3570_v7 }
  0x63   :  { %v3601_v5 = vld [vmem:[#allocation4 + $0x2a0] sm:$0xff]  ;;  %v3602_v7 = vld [vmem:[#allocation4 + $0x2a8] sm:$0xff] }
  0x64   :  { %12221 = vmaxabs.f32.vacc2 %v115_v16, %v116_v18  ;;  %v147_v16 = vld [vmem:[#allocation2 + $0x330] sm:$0xff]  ;;  %v148_v18 = vld [vmem:[#allocation2 + $0x338] sm:$0xff]  ;;  %12084 = vmaxabs.f32.vacc1 %v3571_v9, %v3572_v11 }
  0x65   :  { %v3603_v9 = vld [vmem:[#allocation4 + $0x2b0] sm:$0xff]  ;;  %v3604_v11 = vld [vmem:[#allocation4 + $0x2b8] sm:$0xff] }
  0x66   :  { %12222 = vmaxabs.f32.vacc2 %v117_v20, %v118_v22  ;;  %v149_v20 = vld [vmem:[#allocation2 + $0x340] sm:$0xff]  ;;  %v150_v22 = vld [vmem:[#allocation2 + $0x348] sm:$0xff]  ;;  %12085 = vmaxabs.f32.vacc1 %v3573_v13, %v3574_v15 }
  0x67   :  { %v3605_v13 = vld [vmem:[#allocation4 + $0x2c0] sm:$0xff]  ;;  %v3606_v15 = vld [vmem:[#allocation4 + $0x2c8] sm:$0xff] }
  0x68   :  { %12223 = vmaxabs.f32.vacc2 %v119_v24, %v120_v26  ;;  %v151_v24 = vld [vmem:[#allocation2 + $0x350] sm:$0xff]  ;;  %v152_v26 = vld [vmem:[#allocation2 + $0x358] sm:$0xff]  ;;  %12086 = vmaxabs.f32.vacc1 %v3575_v17, %v3576_v19 }
  0x69   :  { %v3607_v17 = vld [vmem:[#allocation4 + $0x2d0] sm:$0xff]  ;;  %v3608_v19 = vld [vmem:[#allocation4 + $0x2d8] sm:$0xff] }
  0x6a   :  { %12224 = vmaxabs.f32.vacc2 %v121_v28, %v122_v30  ;;  %v153_v28 = vld [vmem:[#allocation2 + $0x360] sm:$0xff]  ;;  %v154_v30 = vld [vmem:[#allocation2 + $0x368] sm:$0xff]  ;;  %12087 = vmaxabs.f32.vacc1 %v3577_v21, %v3578_v23 }
  0x6b   :  { %v3609_v21 = vld [vmem:[#allocation4 + $0x2e0] sm:$0xff]  ;;  %v3610_v23 = vld [vmem:[#allocation4 + $0x2e8] sm:$0xff] }
  0x6c   :  { %12225 = vmaxabs.f32.vacc2 %v123_v32, %v124_v34  ;;  %v155_v32 = vld [vmem:[#allocation2 + $0x370] sm:$0xff]  ;;  %v156_v34 = vld [vmem:[#allocation2 + $0x378] sm:$0xff]  ;;  %12088 = vmaxabs.f32.vacc1 %v3579_v25, %v3580_v27 }
  0x6d   :  { %v3611_v25 = vld [vmem:[#allocation4 + $0x2f0] sm:$0xff]  ;;  %v3612_v27 = vld [vmem:[#allocation4 + $0x2f8] sm:$0xff] }
  0x6e   :  { %12226 = vmaxabs.f32.vacc2 %v125_v36, %v126_v38  ;;  %v157_v36 = vld [vmem:[#allocation2 + $0x380] sm:$0xff]  ;;  %v158_v38 = vld [vmem:[#allocation2 + $0x388] sm:$0xff]  ;;  %12089 = vmaxabs.f32.vacc1 %v3581_v29, %v3582_v31 }
  0x6f   :  { %v3613_v29 = vld [vmem:[#allocation4 + $0x300] sm:$0xff]  ;;  %v3614_v31 = vld [vmem:[#allocation4 + $0x308] sm:$0xff] }
  0x70   :  { %12227 = vmaxabs.f32.vacc2 %v127_v40, %v128_v42  ;;  %v159_v40 = vld [vmem:[#allocation2 + $0x390] sm:$0xff]  ;;  %v160_v42 = vld [vmem:[#allocation2 + $0x398] sm:$0xff]  ;;  %12090 = vmaxabs.f32.vacc1 %v3583_v33, %v3584_v35 }
  0x71   :  { %v3615_v33 = vld [vmem:[#allocation4 + $0x310] sm:$0xff]  ;;  %v3616_v35 = vld [vmem:[#allocation4 + $0x318] sm:$0xff] }
  0x72   :  { %12228 = vmaxabs.f32.vacc2 %v129_v44, %v130_v46  ;;  %v161_v44 = vld [vmem:[#allocation2 + $0x3a0] sm:$0xff]  ;;  %v162_v46 = vld [vmem:[#allocation2 + $0x3a8] sm:$0xff]  ;;  %12091 = vmaxabs.f32.vacc1 %v3585_v37, %v3586_v39 }
  0x73   :  { %v3617_v37 = vld [vmem:[#allocation4 + $0x320] sm:$0xff]  ;;  %v3618_v39 = vld [vmem:[#allocation4 + $0x328] sm:$0xff] }
  0x74   :  { %12229 = vmaxabs.f32.vacc2 %v131_v48, %v132_v50  ;;  %v163_v48 = vld [vmem:[#allocation2 + $0x3b0] sm:$0xff]  ;;  %v164_v50 = vld [vmem:[#allocation2 + $0x3b8] sm:$0xff]  ;;  %12092 = vmaxabs.f32.vacc1 %v3587_v41, %v3588_v43 }
  0x75   :  { %v3619_v41 = vld [vmem:[#allocation4 + $0x330] sm:$0xff]  ;;  %v3620_v43 = vld [vmem:[#allocation4 + $0x338] sm:$0xff] }
  0x76   :  { %12230 = vmaxabs.f32.vacc2 %v133_v52, %v134_v54  ;;  %v165_v52 = vld [vmem:[#allocation2 + $0x3c0] sm:$0xff]  ;;  %v166_v54 = vld [vmem:[#allocation2 + $0x3c8] sm:$0xff]  ;;  %12093 = vmaxabs.f32.vacc1 %v3589_v45, %v3590_v47 }
  0x77   :  { %v3621_v45 = vld [vmem:[#allocation4 + $0x340] sm:$0xff]  ;;  %v3622_v47 = vld [vmem:[#allocation4 + $0x348] sm:$0xff] }
  0x78   :  { %12231 = vmaxabs.f32.vacc2 %v135_v56, %v136_v58  ;;  %v167_v56 = vld [vmem:[#allocation2 + $0x3d0] sm:$0xff]  ;;  %v168_v58 = vld [vmem:[#allocation2 + $0x3d8] sm:$0xff]  ;;  %12094 = vmaxabs.f32.vacc1 %v3591_v49, %v3592_v51 }
  0x79   :  { %v3623_v49 = vld [vmem:[#allocation4 + $0x350] sm:$0xff]  ;;  %v3624_v51 = vld [vmem:[#allocation4 + $0x358] sm:$0xff] }
  0x7a   :  { %12232 = vmaxabs.f32.vacc2 %v137_v60, %v138_v62  ;;  %v169_v60 = vld [vmem:[#allocation2 + $0x3e0] sm:$0xff]  ;;  %v170_v62 = vld [vmem:[#allocation2 + $0x3e8] sm:$0xff]  ;;  %12095 = vmaxabs.f32.vacc1 %v3593_v53, %v3594_v55 }
  0x7b   :  { %v3625_v53 = vld [vmem:[#allocation4 + $0x360] sm:$0xff]  ;;  %v3626_v55 = vld [vmem:[#allocation4 + $0x368] sm:$0xff] }
  0x7c   :  { %12233 = vmaxabs.f32.vacc2 %v139_v0, %v140_v2  ;;  %v171_v0 = vld [vmem:[#allocation2 + $0x3f0] sm:$0xff]  ;;  %v172_v2 = vld [vmem:[#allocation2 + $0x3f8] sm:$0xff]  ;;  %12096 = vmaxabs.f32.vacc1 %v3595_v57, %v3596_v59 }
  0x7d   :  { %v3627_v57 = vld [vmem:[#allocation4 + $0x370] sm:$0xff]  ;;  %v3628_v59 = vld [vmem:[#allocation4 + $0x378] sm:$0xff] }
  0x7e   :  { %12234 = vmaxabs.f32.vacc2 %v141_v4, %v142_v6  ;;  %v173_v4 = vld [vmem:[#allocation2 + $0x400] sm:$0xff]  ;;  %v174_v6 = vld [vmem:[#allocation2 + $0x408] sm:$0xff]  ;;  %12097 = vmaxabs.f32.vacc1 %v3597_v61, %v3598_v63 }
  0x7f   :  { %v3629_v61 = vld [vmem:[#allocation4 + $0x380] sm:$0xff]  ;;  %v3630_v63 = vld [vmem:[#allocation4 + $0x388] sm:$0xff] }
  0x80   :  { %12235 = vmaxabs.f32.vacc2 %v143_v8, %v144_v10  ;;  %v175_v8 = vld [vmem:[#allocation2 + $0x410] sm:$0xff]  ;;  %v176_v10 = vld [vmem:[#allocation2 + $0x418] sm:$0xff]  ;;  %12098 = vmaxabs.f32.vacc1 %v3599_v1, %v3600_v3 }
  0x81   :  { %v3631_v1 = vld [vmem:[#allocation4 + $0x390] sm:$0xff]  ;;  %v3632_v3 = vld [vmem:[#allocation4 + $0x398] sm:$0xff] }
  0x82   :  { %12236 = vmaxabs.f32.vacc2 %v145_v12, %v146_v14  ;;  %v177_v12 = vld [vmem:[#allocation2 + $0x420] sm:$0xff]  ;;  %v178_v14 = vld [vmem:[#allocation2 + $0x428] sm:$0xff]  ;;  %12099 = vmaxabs.f32.vacc1 %v3601_v5, %v3602_v7 }
  0x83   :  { %v3633_v5 = vld [vmem:[#allocation4 + $0x3a0] sm:$0xff]  ;;  %v3634_v7 = vld [vmem:[#allocation4 + $0x3a8] sm:$0xff] }
  0x84   :  { %12237 = vmaxabs.f32.vacc2 %v147_v16, %v148_v18  ;;  %v179_v16 = vld [vmem:[#allocation2 + $0x430] sm:$0xff]  ;;  %v180_v18 = vld [vmem:[#allocation2 + $0x438] sm:$0xff]  ;;  %12100 = vmaxabs.f32.vacc1 %v3603_v9, %v3604_v11 }
  0x85   :  { %v3635_v9 = vld [vmem:[#allocation4 + $0x3b0] sm:$0xff]  ;;  %v3636_v11 = vld [vmem:[#allocation4 + $0x3b8] sm:$0xff] }
  0x86   :  { %12238 = vmaxabs.f32.vacc2 %v149_v20, %v150_v22  ;;  %v181_v20 = vld [vmem:[#allocation2 + $0x440] sm:$0xff]  ;;  %v182_v22 = vld [vmem:[#allocation2 + $0x448] sm:$0xff]  ;;  %12101 = vmaxabs.f32.vacc1 %v3605_v13, %v3606_v15 }
  0x87   :  { %v3637_v13 = vld [vmem:[#allocation4 + $0x3c0] sm:$0xff]  ;;  %v3638_v15 = vld [vmem:[#allocation4 + $0x3c8] sm:$0xff] }
  0x88   :  { %12239 = vmaxabs.f32.vacc2 %v151_v24, %v152_v26  ;;  %v183_v24 = vld [vmem:[#allocation2 + $0x450] sm:$0xff]  ;;  %v184_v26 = vld [vmem:[#allocation2 + $0x458] sm:$0xff]  ;;  %12102 = vmaxabs.f32.vacc1 %v3607_v17, %v3608_v19 }
  0x89   :  { %v3639_v17 = vld [vmem:[#allocation4 + $0x3d0] sm:$0xff]  ;;  %v3640_v19 = vld [vmem:[#allocation4 + $0x3d8] sm:$0xff] }
  0x8a   :  { %12240 = vmaxabs.f32.vacc2 %v153_v28, %v154_v30  ;;  %v185_v28 = vld [vmem:[#allocation2 + $0x460] sm:$0xff]  ;;  %v186_v30 = vld [vmem:[#allocation2 + $0x468] sm:$0xff]  ;;  %12103 = vmaxabs.f32.vacc1 %v3609_v21, %v3610_v23 }
  0x8b   :  { %v3641_v21 = vld [vmem:[#allocation4 + $0x3e0] sm:$0xff]  ;;  %v3642_v23 = vld [vmem:[#allocation4 + $0x3e8] sm:$0xff] }
  0x8c   :  { %12241 = vmaxabs.f32.vacc2 %v155_v32, %v156_v34  ;;  %v187_v32 = vld [vmem:[#allocation2 + $0x470] sm:$0xff]  ;;  %v188_v34 = vld [vmem:[#allocation2 + $0x478] sm:$0xff]  ;;  %12104 = vmaxabs.f32.vacc1 %v3611_v25, %v3612_v27 }
  0x8d   :  { %v3643_v25 = vld [vmem:[#allocation4 + $0x3f0] sm:$0xff]  ;;  %v3644_v27 = vld [vmem:[#allocation4 + $0x3f8] sm:$0xff] }
  0x8e   :  { %12242 = vmaxabs.f32.vacc2 %v157_v36, %v158_v38  ;;  %v189_v36 = vld [vmem:[#allocation2 + $0x480] sm:$0xff]  ;;  %v190_v38 = vld [vmem:[#allocation2 + $0x488] sm:$0xff]  ;;  %12105 = vmaxabs.f32.vacc1 %v3613_v29, %v3614_v31 }
  0x8f   :  { %v3645_v29 = vld [vmem:[#allocation4 + $0x400] sm:$0xff]  ;;  %v3646_v31 = vld [vmem:[#allocation4 + $0x408] sm:$0xff] }
  0x90   :  { %12243 = vmaxabs.f32.vacc2 %v159_v40, %v160_v42  ;;  %v191_v40 = vld [vmem:[#allocation2 + $0x490] sm:$0xff]  ;;  %v192_v42 = vld [vmem:[#allocation2 + $0x498] sm:$0xff]  ;;  %12106 = vmaxabs.f32.vacc1 %v3615_v33, %v3616_v35 }
  0x91   :  { %v3647_v33 = vld [vmem:[#allocation4 + $0x410] sm:$0xff]  ;;  %v3648_v35 = vld [vmem:[#allocation4 + $0x418] sm:$0xff] }
  0x92   :  { %12244 = vmaxabs.f32.vacc2 %v161_v44, %v162_v46  ;;  %v193_v44 = vld [vmem:[#allocation2 + $0x4a0] sm:$0xff]  ;;  %v194_v46 = vld [vmem:[#allocation2 + $0x4a8] sm:$0xff]  ;;  %12107 = vmaxabs.f32.vacc1 %v3617_v37, %v3618_v39 }
  0x93   :  { %v3649_v37 = vld [vmem:[#allocation4 + $0x420] sm:$0xff]  ;;  %v3650_v39 = vld [vmem:[#allocation4 + $0x428] sm:$0xff] }
  0x94   :  { %12245 = vmaxabs.f32.vacc2 %v163_v48, %v164_v50  ;;  %v195_v48 = vld [vmem:[#allocation2 + $0x4b0] sm:$0xff]  ;;  %v196_v50 = vld [vmem:[#allocation2 + $0x4b8] sm:$0xff]  ;;  %12108 = vmaxabs.f32.vacc1 %v3619_v41, %v3620_v43 }
  0x95   :  { %v3651_v41 = vld [vmem:[#allocation4 + $0x430] sm:$0xff]  ;;  %v3652_v43 = vld [vmem:[#allocation4 + $0x438] sm:$0xff] }
  0x96   :  { %12246 = vmaxabs.f32.vacc2 %v165_v52, %v166_v54  ;;  %v197_v52 = vld [vmem:[#allocation2 + $0x4c0] sm:$0xff]  ;;  %v198_v54 = vld [vmem:[#allocation2 + $0x4c8] sm:$0xff]  ;;  %12109 = vmaxabs.f32.vacc1 %v3621_v45, %v3622_v47 }
  0x97   :  { %v3653_v45 = vld [vmem:[#allocation4 + $0x440] sm:$0xff]  ;;  %v3654_v47 = vld [vmem:[#allocation4 + $0x448] sm:$0xff] }
  0x98   :  { %12247 = vmaxabs.f32.vacc2 %v167_v56, %v168_v58  ;;  %v199_v56 = vld [vmem:[#allocation2 + $0x4d0] sm:$0xff]  ;;  %v200_v58 = vld [vmem:[#allocation2 + $0x4d8] sm:$0xff]  ;;  %12110 = vmaxabs.f32.vacc1 %v3623_v49, %v3624_v51 }
  0x99   :  { %v3655_v49 = vld [vmem:[#allocation4 + $0x450] sm:$0xff]  ;;  %v3656_v51 = vld [vmem:[#allocation4 + $0x458] sm:$0xff] }
  0x9a   :  { %12248 = vmaxabs.f32.vacc2 %v169_v60, %v170_v62  ;;  %v201_v60 = vld [vmem:[#allocation2 + $0x4e0] sm:$0xff]  ;;  %v202_v62 = vld [vmem:[#allocation2 + $0x4e8] sm:$0xff]  ;;  %12111 = vmaxabs.f32.vacc1 %v3625_v53, %v3626_v55 }
  0x9b   :  { %v3657_v53 = vld [vmem:[#allocation4 + $0x460] sm:$0xff]  ;;  %v3658_v55 = vld [vmem:[#allocation4 + $0x468] sm:$0xff] }
  0x9c   :  { %12249 = vmaxabs.f32.vacc2 %v171_v0, %v172_v2  ;;  %v203_v0 = vld [vmem:[#allocation2 + $0x4f0] sm:$0xff]  ;;  %v204_v2 = vld [vmem:[#allocation2 + $0x4f8] sm:$0xff]  ;;  %12112 = vmaxabs.f32.vacc1 %v3627_v57, %v3628_v59 }
  0x9d   :  { %v3659_v57 = vld [vmem:[#allocation4 + $0x470] sm:$0xff]  ;;  %v3660_v59 = vld [vmem:[#allocation4 + $0x478] sm:$0xff] }
  0x9e   :  { %12250 = vmaxabs.f32.vacc2 %v173_v4, %v174_v6  ;;  %v205_v4 = vld [vmem:[#allocation2 + $0x500] sm:$0xff]  ;;  %v206_v6 = vld [vmem:[#allocation2 + $0x508] sm:$0xff]  ;;  %12113 = vmaxabs.f32.vacc1 %v3629_v61, %v3630_v63 }
  0x9f   :  { %v3661_v61 = vld [vmem:[#allocation4 + $0x480] sm:$0xff]  ;;  %v3662_v63 = vld [vmem:[#allocation4 + $0x488] sm:$0xff] }
  0xa0   :  { %12251 = vmaxabs.f32.vacc2 %v175_v8, %v176_v10  ;;  %v207_v8 = vld [vmem:[#allocation2 + $0x510] sm:$0xff]  ;;  %v208_v10 = vld [vmem:[#allocation2 + $0x518] sm:$0xff]  ;;  %12114 = vmaxabs.f32.vacc1 %v3631_v1, %v3632_v3 }
  0xa1   :  { %v3663_v1 = vld [vmem:[#allocation4 + $0x490] sm:$0xff]  ;;  %v3664_v3 = vld [vmem:[#allocation4 + $0x498] sm:$0xff] }
  0xa2   :  { %12252 = vmaxabs.f32.vacc2 %v177_v12, %v178_v14  ;;  %v209_v12 = vld [vmem:[#allocation2 + $0x520] sm:$0xff]  ;;  %v210_v14 = vld [vmem:[#allocation2 + $0x528] sm:$0xff]  ;;  %12115 = vmaxabs.f32.vacc1 %v3633_v5, %v3634_v7 }
  0xa3   :  { %v3665_v5 = vld [vmem:[#allocation4 + $0x4a0] sm:$0xff]  ;;  %v3666_v7 = vld [vmem:[#allocation4 + $0x4a8] sm:$0xff] }
  0xa4   :  { %12253 = vmaxabs.f32.vacc2 %v179_v16, %v180_v18  ;;  %v211_v16 = vld [vmem:[#allocation2 + $0x530] sm:$0xff]  ;;  %v212_v18 = vld [vmem:[#allocation2 + $0x538] sm:$0xff]  ;;  %12116 = vmaxabs.f32.vacc1 %v3635_v9, %v3636_v11 }
  0xa5   :  { %v3667_v9 = vld [vmem:[#allocation4 + $0x4b0] sm:$0xff]  ;;  %v3668_v11 = vld [vmem:[#allocation4 + $0x4b8] sm:$0xff] }
  0xa6   :  { %12254 = vmaxabs.f32.vacc2 %v181_v20, %v182_v22  ;;  %v213_v20 = vld [vmem:[#allocation2 + $0x540] sm:$0xff]  ;;  %v214_v22 = vld [vmem:[#allocation2 + $0x548] sm:$0xff]  ;;  %12117 = vmaxabs.f32.vacc1 %v3637_v13, %v3638_v15 }
  0xa7   :  { %v3669_v13 = vld [vmem:[#allocation4 + $0x4c0] sm:$0xff]  ;;  %v3670_v15 = vld [vmem:[#allocation4 + $0x4c8] sm:$0xff] }
  0xa8   :  { %12255 = vmaxabs.f32.vacc2 %v183_v24, %v184_v26  ;;  %v215_v24 = vld [vmem:[#allocation2 + $0x550] sm:$0xff]  ;;  %v216_v26 = vld [vmem:[#allocation2 + $0x558] sm:$0xff]  ;;  %12118 = vmaxabs.f32.vacc1 %v3639_v17, %v3640_v19 }
  0xa9   :  { %v3671_v17 = vld [vmem:[#allocation4 + $0x4d0] sm:$0xff]  ;;  %v3672_v19 = vld [vmem:[#allocation4 + $0x4d8] sm:$0xff] }
  0xaa   :  { %12256 = vmaxabs.f32.vacc2 %v185_v28, %v186_v30  ;;  %v217_v28 = vld [vmem:[#allocation2 + $0x560] sm:$0xff]  ;;  %v218_v30 = vld [vmem:[#allocation2 + $0x568] sm:$0xff]  ;;  %12119 = vmaxabs.f32.vacc1 %v3641_v21, %v3642_v23 }
  0xab   :  { %v3673_v21 = vld [vmem:[#allocation4 + $0x4e0] sm:$0xff]  ;;  %v3674_v23 = vld [vmem:[#allocation4 + $0x4e8] sm:$0xff] }
  0xac   :  { %12257 = vmaxabs.f32.vacc2 %v187_v32, %v188_v34  ;;  %v219_v32 = vld [vmem:[#allocation2 + $0x570] sm:$0xff]  ;;  %v220_v34 = vld [vmem:[#allocation2 + $0x578] sm:$0xff]  ;;  %12120 = vmaxabs.f32.vacc1 %v3643_v25, %v3644_v27 }
  0xad   :  { %v3675_v25 = vld [vmem:[#allocation4 + $0x4f0] sm:$0xff]  ;;  %v3676_v27 = vld [vmem:[#allocation4 + $0x4f8] sm:$0xff] }
  0xae   :  { %12258 = vmaxabs.f32.vacc2 %v189_v36, %v190_v38  ;;  %v221_v36 = vld [vmem:[#allocation2 + $0x580] sm:$0xff]  ;;  %v222_v38 = vld [vmem:[#allocation2 + $0x588] sm:$0xff]  ;;  %12121 = vmaxabs.f32.vacc1 %v3645_v29, %v3646_v31 }
  0xaf   :  { %v3677_v29 = vld [vmem:[#allocation4 + $0x500] sm:$0xff]  ;;  %v3678_v31 = vld [vmem:[#allocation4 + $0x508] sm:$0xff] }
  0xb0   :  { %12259 = vmaxabs.f32.vacc2 %v191_v40, %v192_v42  ;;  %v223_v40 = vld [vmem:[#allocation2 + $0x590] sm:$0xff]  ;;  %v224_v42 = vld [vmem:[#allocation2 + $0x598] sm:$0xff]  ;;  %12122 = vmaxabs.f32.vacc1 %v3647_v33, %v3648_v35 }
  0xb1   :  { %v3679_v33 = vld [vmem:[#allocation4 + $0x510] sm:$0xff]  ;;  %v3680_v35 = vld [vmem:[#allocation4 + $0x518] sm:$0xff] }
  0xb2   :  { %12260 = vmaxabs.f32.vacc2 %v193_v44, %v194_v46  ;;  %v225_v44 = vld [vmem:[#allocation2 + $0x5a0] sm:$0xff]  ;;  %v226_v46 = vld [vmem:[#allocation2 + $0x5a8] sm:$0xff]  ;;  %12123 = vmaxabs.f32.vacc1 %v3649_v37, %v3650_v39 }
  0xb3   :  { %v3681_v37 = vld [vmem:[#allocation4 + $0x520] sm:$0xff]  ;;  %v3682_v39 = vld [vmem:[#allocation4 + $0x528] sm:$0xff] }
  0xb4   :  { %12261 = vmaxabs.f32.vacc2 %v195_v48, %v196_v50  ;;  %v227_v48 = vld [vmem:[#allocation2 + $0x5b0] sm:$0xff]  ;;  %v228_v50 = vld [vmem:[#allocation2 + $0x5b8] sm:$0xff]  ;;  %12124 = vmaxabs.f32.vacc1 %v3651_v41, %v3652_v43 }
  0xb5   :  { %v3683_v41 = vld [vmem:[#allocation4 + $0x530] sm:$0xff]  ;;  %v3684_v43 = vld [vmem:[#allocation4 + $0x538] sm:$0xff] }
  0xb6   :  { %12262 = vmaxabs.f32.vacc2 %v197_v52, %v198_v54  ;;  %v229_v52 = vld [vmem:[#allocation2 + $0x5c0] sm:$0xff]  ;;  %v230_v54 = vld [vmem:[#allocation2 + $0x5c8] sm:$0xff]  ;;  %12125 = vmaxabs.f32.vacc1 %v3653_v45, %v3654_v47 }
  0xb7   :  { %v3685_v45 = vld [vmem:[#allocation4 + $0x540] sm:$0xff]  ;;  %v3686_v47 = vld [vmem:[#allocation4 + $0x548] sm:$0xff] }
  0xb8   :  { %12263 = vmaxabs.f32.vacc2 %v199_v56, %v200_v58  ;;  %v231_v56 = vld [vmem:[#allocation2 + $0x5d0] sm:$0xff]  ;;  %v232_v58 = vld [vmem:[#allocation2 + $0x5d8] sm:$0xff]  ;;  %12126 = vmaxabs.f32.vacc1 %v3655_v49, %v3656_v51 }
  0xb9   :  { %v3687_v49 = vld [vmem:[#allocation4 + $0x550] sm:$0xff]  ;;  %v3688_v51 = vld [vmem:[#allocation4 + $0x558] sm:$0xff] }
  0xba   :  { %12264 = vmaxabs.f32.vacc2 %v201_v60, %v202_v62  ;;  %v233_v60 = vld [vmem:[#allocation2 + $0x5e0] sm:$0xff]  ;;  %v234_v62 = vld [vmem:[#allocation2 + $0x5e8] sm:$0xff]  ;;  %12127 = vmaxabs.f32.vacc1 %v3657_v53, %v3658_v55 }
  0xbb   :  { %v3689_v53 = vld [vmem:[#allocation4 + $0x560] sm:$0xff]  ;;  %v3690_v55 = vld [vmem:[#allocation4 + $0x568] sm:$0xff] }
  0xbc   :  { %12265 = vmaxabs.f32.vacc2 %v203_v0, %v204_v2  ;;  %v235_v0 = vld [vmem:[#allocation2 + $0x5f0] sm:$0xff]  ;;  %v236_v2 = vld [vmem:[#allocation2 + $0x5f8] sm:$0xff]  ;;  %12128 = vmaxabs.f32.vacc1 %v3659_v57, %v3660_v59 }
  0xbd   :  { %v3691_v57 = vld [vmem:[#allocation4 + $0x570] sm:$0xff]  ;;  %v3692_v59 = vld [vmem:[#allocation4 + $0x578] sm:$0xff] }
  0xbe   :  { %12266 = vmaxabs.f32.vacc2 %v205_v4, %v206_v6  ;;  %v237_v4 = vld [vmem:[#allocation2 + $0x600] sm:$0xff]  ;;  %v238_v6 = vld [vmem:[#allocation2 + $0x608] sm:$0xff]  ;;  %12129 = vmaxabs.f32.vacc1 %v3661_v61, %v3662_v63 }
  0xbf   :  { %v3693_v61 = vld [vmem:[#allocation4 + $0x580] sm:$0xff]  ;;  %v3694_v63 = vld [vmem:[#allocation4 + $0x588] sm:$0xff] }
  0xc0   :  { %12267 = vmaxabs.f32.vacc2 %v207_v8, %v208_v10  ;;  %v239_v8 = vld [vmem:[#allocation2 + $0x610] sm:$0xff]  ;;  %v240_v10 = vld [vmem:[#allocation2 + $0x618] sm:$0xff]  ;;  %12130 = vmaxabs.f32.vacc1 %v3663_v1, %v3664_v3 }
  0xc1   :  { %v3695_v1 = vld [vmem:[#allocation4 + $0x590] sm:$0xff]  ;;  %v3696_v3 = vld [vmem:[#allocation4 + $0x598] sm:$0xff] }
  0xc2   :  { %12268 = vmaxabs.f32.vacc2 %v209_v12, %v210_v14  ;;  %v241_v12 = vld [vmem:[#allocation2 + $0x620] sm:$0xff]  ;;  %v242_v14 = vld [vmem:[#allocation2 + $0x628] sm:$0xff]  ;;  %12131 = vmaxabs.f32.vacc1 %v3665_v5, %v3666_v7 }
  0xc3   :  { %v3697_v5 = vld [vmem:[#allocation4 + $0x5a0] sm:$0xff]  ;;  %v3698_v7 = vld [vmem:[#allocation4 + $0x5a8] sm:$0xff] }
  0xc4   :  { %12269 = vmaxabs.f32.vacc2 %v211_v16, %v212_v18  ;;  %v243_v16 = vld [vmem:[#allocation2 + $0x630] sm:$0xff]  ;;  %v244_v18 = vld [vmem:[#allocation2 + $0x638] sm:$0xff]  ;;  %12132 = vmaxabs.f32.vacc1 %v3667_v9, %v3668_v11 }
  0xc5   :  { %v3699_v9 = vld [vmem:[#allocation4 + $0x5b0] sm:$0xff]  ;;  %v3700_v11 = vld [vmem:[#allocation4 + $0x5b8] sm:$0xff] }
  0xc6   :  { %12270 = vmaxabs.f32.vacc2 %v213_v20, %v214_v22  ;;  %v245_v20 = vld [vmem:[#allocation2 + $0x640] sm:$0xff]  ;;  %v246_v22 = vld [vmem:[#allocation2 + $0x648] sm:$0xff]  ;;  %12133 = vmaxabs.f32.vacc1 %v3669_v13, %v3670_v15 }
  0xc7   :  { %v3701_v13 = vld [vmem:[#allocation4 + $0x5c0] sm:$0xff]  ;;  %v3702_v15 = vld [vmem:[#allocation4 + $0x5c8] sm:$0xff] }
  0xc8   :  { %12271 = vmaxabs.f32.vacc2 %v215_v24, %v216_v26  ;;  %v247_v24 = vld [vmem:[#allocation2 + $0x650] sm:$0xff]  ;;  %v248_v26 = vld [vmem:[#allocation2 + $0x658] sm:$0xff]  ;;  %12134 = vmaxabs.f32.vacc1 %v3671_v17, %v3672_v19 }
  0xc9   :  { %v3703_v17 = vld [vmem:[#allocation4 + $0x5d0] sm:$0xff]  ;;  %v3704_v19 = vld [vmem:[#allocation4 + $0x5d8] sm:$0xff] }
  0xca   :  { %12272 = vmaxabs.f32.vacc2 %v217_v28, %v218_v30  ;;  %v249_v28 = vld [vmem:[#allocation2 + $0x660] sm:$0xff]  ;;  %v250_v30 = vld [vmem:[#allocation2 + $0x668] sm:$0xff]  ;;  %12135 = vmaxabs.f32.vacc1 %v3673_v21, %v3674_v23 }
  0xcb   :  { %v3705_v21 = vld [vmem:[#allocation4 + $0x5e0] sm:$0xff]  ;;  %v3706_v23 = vld [vmem:[#allocation4 + $0x5e8] sm:$0xff] }
  0xcc   :  { %12273 = vmaxabs.f32.vacc2 %v219_v32, %v220_v34  ;;  %v251_v32 = vld [vmem:[#allocation2 + $0x670] sm:$0xff]  ;;  %v252_v34 = vld [vmem:[#allocation2 + $0x678] sm:$0xff]  ;;  %12136 = vmaxabs.f32.vacc1 %v3675_v25, %v3676_v27 }
  0xcd   :  { %v3707_v25 = vld [vmem:[#allocation4 + $0x5f0] sm:$0xff]  ;;  %v3708_v27 = vld [vmem:[#allocation4 + $0x5f8] sm:$0xff] }
  0xce   :  { %12274 = vmaxabs.f32.vacc2 %v221_v36, %v222_v38  ;;  %v253_v36 = vld [vmem:[#allocation2 + $0x680] sm:$0xff]  ;;  %v254_v38 = vld [vmem:[#allocation2 + $0x688] sm:$0xff]  ;;  %12137 = vmaxabs.f32.vacc1 %v3677_v29, %v3678_v31 }
  0xcf   :  { %v3709_v29 = vld [vmem:[#allocation4 + $0x600] sm:$0xff]  ;;  %v3710_v31 = vld [vmem:[#allocation4 + $0x608] sm:$0xff] }
  0xd0   :  { %12275 = vmaxabs.f32.vacc2 %v223_v40, %v224_v42  ;;  %v255_v40 = vld [vmem:[#allocation2 + $0x690] sm:$0xff]  ;;  %v256_v42 = vld [vmem:[#allocation2 + $0x698] sm:$0xff]  ;;  %12138 = vmaxabs.f32.vacc1 %v3679_v33, %v3680_v35 }
  0xd1   :  { %v3711_v33 = vld [vmem:[#allocation4 + $0x610] sm:$0xff]  ;;  %v3712_v35 = vld [vmem:[#allocation4 + $0x618] sm:$0xff] }
  0xd2   :  { %12276 = vmaxabs.f32.vacc2 %v225_v44, %v226_v46  ;;  %v257_v44 = vld [vmem:[#allocation2 + $0x6a0] sm:$0xff]  ;;  %v258_v46 = vld [vmem:[#allocation2 + $0x6a8] sm:$0xff]  ;;  %12139 = vmaxabs.f32.vacc1 %v3681_v37, %v3682_v39 }
  0xd3   :  { %v3713_v37 = vld [vmem:[#allocation4 + $0x620] sm:$0xff]  ;;  %v3714_v39 = vld [vmem:[#allocation4 + $0x628] sm:$0xff] }
  0xd4   :  { %12277 = vmaxabs.f32.vacc2 %v227_v48, %v228_v50  ;;  %v259_v48 = vld [vmem:[#allocation2 + $0x6b0] sm:$0xff]  ;;  %v260_v50 = vld [vmem:[#allocation2 + $0x6b8] sm:$0xff]  ;;  %12140 = vmaxabs.f32.vacc1 %v3683_v41, %v3684_v43 }
  0xd5   :  { %v3715_v41 = vld [vmem:[#allocation4 + $0x630] sm:$0xff]  ;;  %v3716_v43 = vld [vmem:[#allocation4 + $0x638] sm:$0xff] }
  0xd6   :  { %12278 = vmaxabs.f32.vacc2 %v229_v52, %v230_v54  ;;  %v261_v52 = vld [vmem:[#allocation2 + $0x6c0] sm:$0xff]  ;;  %v262_v54 = vld [vmem:[#allocation2 + $0x6c8] sm:$0xff]  ;;  %12141 = vmaxabs.f32.vacc1 %v3685_v45, %v3686_v47 }
  0xd7   :  { %v3717_v45 = vld [vmem:[#allocation4 + $0x640] sm:$0xff]  ;;  %v3718_v47 = vld [vmem:[#allocation4 + $0x648] sm:$0xff] }
  0xd8   :  { %12279 = vmaxabs.f32.vacc2 %v231_v56, %v232_v58  ;;  %v263_v56 = vld [vmem:[#allocation2 + $0x6d0] sm:$0xff]  ;;  %v264_v58 = vld [vmem:[#allocation2 + $0x6d8] sm:$0xff]  ;;  %12142 = vmaxabs.f32.vacc1 %v3687_v49, %v3688_v51 }
  0xd9   :  { %v3719_v49 = vld [vmem:[#allocation4 + $0x650] sm:$0xff]  ;;  %v3720_v51 = vld [vmem:[#allocation4 + $0x658] sm:$0xff] }
  0xda   :  { %12280 = vmaxabs.f32.vacc2 %v233_v60, %v234_v62  ;;  %v265_v60 = vld [vmem:[#allocation2 + $0x6e0] sm:$0xff]  ;;  %v266_v62 = vld [vmem:[#allocation2 + $0x6e8] sm:$0xff]  ;;  %12143 = vmaxabs.f32.vacc1 %v3689_v53, %v3690_v55 }
  0xdb   :  { %v3721_v53 = vld [vmem:[#allocation4 + $0x660] sm:$0xff]  ;;  %v3722_v55 = vld [vmem:[#allocation4 + $0x668] sm:$0xff] }
  0xdc   :  { %12281 = vmaxabs.f32.vacc2 %v235_v0, %v236_v2  ;;  %v267_v0 = vld [vmem:[#allocation2 + $0x6f0] sm:$0xff]  ;;  %v268_v2 = vld [vmem:[#allocation2 + $0x6f8] sm:$0xff]  ;;  %12144 = vmaxabs.f32.vacc1 %v3691_v57, %v3692_v59 }
  0xdd   :  { %v3723_v57 = vld [vmem:[#allocation4 + $0x670] sm:$0xff]  ;;  %v3724_v59 = vld [vmem:[#allocation4 + $0x678] sm:$0xff] }
  0xde   :  { %12282 = vmaxabs.f32.vacc2 %v237_v4, %v238_v6  ;;  %v269_v4 = vld [vmem:[#allocation2 + $0x700] sm:$0xff]  ;;  %v270_v6 = vld [vmem:[#allocation2 + $0x708] sm:$0xff]  ;;  %12145 = vmaxabs.f32.vacc1 %v3693_v61, %v3694_v63 }
  0xdf   :  { %v3725_v61 = vld [vmem:[#allocation4 + $0x680] sm:$0xff] }
  0xe0   :  { %12283 = vmaxabs.f32.vacc2 %v239_v8, %v240_v10  ;;  %v271_v8 = vld [vmem:[#allocation2 + $0x710] sm:$0xff]  ;;  %v272_v10 = vld [vmem:[#allocation2 + $0x718] sm:$0xff]  ;;  %12146 = vmaxabs.f32.vacc1 %v3695_v1, %v3696_v3  ;;  %v12389_v63 = vld [vmem:[#allocation2] sm:$0xff] }
  0xe1   :  { %v12391_v1 = vld [vmem:[#allocation2 + $0x20] sm:$0xff]  ;;  %v12393_v3 = vld [vmem:[#allocation2 + $0x8] sm:$0xff] }
  0xe2   :  { %12284 = vmaxabs.f32.vacc2 %v241_v12, %v242_v14  ;;  %v273_v12 = vld [vmem:[#allocation2 + $0x720] sm:$0xff]  ;;  %v274_v14 = vld [vmem:[#allocation2 + $0x728] sm:$0xff]  ;;  %12147 = vmaxabs.f32.vacc1 %v3697_v5, %v3698_v7  ;;  %v3728_v7 = vld [vmem:[#allocation4 + $0x698] sm:$0xff] }
  0xe3   :  { %v12395_v5 = vld [vmem:[#allocation2 + $0x28] sm:$0xff] }
  0xe4   :  { %12285 = vmaxabs.f32.vacc2 %v243_v16, %v244_v18  ;;  %v275_v16 = vld [vmem:[#allocation2 + $0x730] sm:$0xff]  ;;  %v276_v18 = vld [vmem:[#allocation2 + $0x738] sm:$0xff]  ;;  %12148 = vmaxabs.f32.vacc1 %v3699_v9, %v3700_v11 }
  0xe5   :  { %v12399_v9 = vld [vmem:[#allocation2 + $0x30] sm:$0xff]  ;;  %v12401_v11 = vld [vmem:[#allocation2 + $0x18] sm:$0xff] }
  0xe6   :  { %12286 = vmaxabs.f32.vacc2 %v245_v20, %v246_v22  ;;  %v277_v20 = vld [vmem:[#allocation2 + $0x740] sm:$0xff]  ;;  %v278_v22 = vld [vmem:[#allocation2 + $0x748] sm:$0xff]  ;;  %12149 = vmaxabs.f32.vacc1 %v3701_v13, %v3702_v15  ;;  %v3732_v15 = vld [vmem:[#allocation4 + $0x6b8] sm:$0xff] }
  0xe7   :  { %v3730_v13 = vld [vmem:[#allocation4 + $0x6a8] sm:$0xff] }
  0xe8   :  { %12287 = vmaxabs.f32.vacc2 %v247_v24, %v248_v26  ;;  %v279_v24 = vld [vmem:[#allocation2 + $0x750] sm:$0xff]  ;;  %v280_v26 = vld [vmem:[#allocation2 + $0x758] sm:$0xff]  ;;  %12150 = vmaxabs.f32.vacc1 %v3703_v17, %v3704_v19  ;;  %v3734_v17 = vld [vmem:[#allocation4 + $0x6c8] sm:$0xff] }
  0xe9   :  { %v3735_v19 = vld [vmem:[#allocation4 + $0x6d0] sm:$0xff] }
  0xea   :  { %12288 = vmaxabs.f32.vacc2 %v249_v28, %v250_v30  ;;  %v281_v28 = vld [vmem:[#allocation2 + $0x760] sm:$0xff]  ;;  %v282_v30 = vld [vmem:[#allocation2 + $0x768] sm:$0xff]  ;;  %12151 = vmaxabs.f32.vacc1 %v3705_v21, %v3706_v23  ;;  %v3739_v23 = vld [vmem:[#allocation4 + $0x6f0] sm:$0xff] }
  0xeb   :  { %v3737_v21 = vld [vmem:[#allocation4 + $0x6e0] sm:$0xff] }
  0xec   :  { %12289 = vmaxabs.f32.vacc2 %v251_v32, %v252_v34  ;;  %v283_v32 = vld [vmem:[#allocation2 + $0x770] sm:$0xff]  ;;  %v284_v34 = vld [vmem:[#allocation2 + $0x778] sm:$0xff]  ;;  %12152 = vmaxabs.f32.vacc1 %v3707_v25, %v3708_v27  ;;  %v3741_v25 = vld [vmem:[#allocation4 + $0x700] sm:$0xff] }
  0xed   :  { %v3743_v27 = vld [vmem:[#allocation4 + $0x710] sm:$0xff] }
  0xee   :  { %12290 = vmaxabs.f32.vacc2 %v253_v36, %v254_v38  ;;  %v285_v36 = vld [vmem:[#allocation2 + $0x780] sm:$0xff]  ;;  %v286_v38 = vld [vmem:[#allocation2 + $0x788] sm:$0xff]  ;;  %12153 = vmaxabs.f32.vacc1 %v3709_v29, %v3710_v31  ;;  %v3747_v31 = vld [vmem:[#allocation4 + $0x730] sm:$0xff] }
  0xef   :  { %v3745_v29 = vld [vmem:[#allocation4 + $0x720] sm:$0xff] }
  0xf0   :  { %12291 = vmaxabs.f32.vacc2 %v255_v40, %v256_v42  ;;  %v287_v40 = vld [vmem:[#allocation2 + $0x790] sm:$0xff]  ;;  %v288_v42 = vld [vmem:[#allocation2 + $0x798] sm:$0xff]  ;;  %12154 = vmaxabs.f32.vacc1 %v3711_v33, %v3712_v35  ;;  %v3749_v33 = vld [vmem:[#allocation4 + $0x740] sm:$0xff] }
  0xf1   :  { %v3751_v35 = vld [vmem:[#allocation4 + $0x750] sm:$0xff] }
  0xf2   :  { %12292 = vmaxabs.f32.vacc2 %v257_v44, %v258_v46  ;;  %v12377_v44 = vld [vmem:[#allocation2 + $0x7a0] sm:$0xff]  ;;  %v12379_v46 = vld [vmem:[#allocation2 + $0x7a8] sm:$0xff]  ;;  %12155 = vmaxabs.f32.vacc1 %v3713_v37, %v3714_v39  ;;  %v3755_v39 = vld [vmem:[#allocation4 + $0x770] sm:$0xff] }
  0xf3   :  { %v3753_v37 = vld [vmem:[#allocation4 + $0x760] sm:$0xff] }
  0xf4   :  { %12293 = vmaxabs.f32.vacc2 %v259_v48, %v260_v50  ;;  %v12381_v48 = vld [vmem:[#allocation2 + $0x7b0] sm:$0xff]  ;;  %v12383_v50 = vld [vmem:[#allocation2 + $0x7b8] sm:$0xff]  ;;  %12156 = vmaxabs.f32.vacc1 %v3715_v41, %v3716_v43  ;;  %v6988_v41 = vld [vmem:[%s17334_s2] sm:$0xff] }
  0xf5   :  { %v3757_v43 = vld [vmem:[#allocation4 + $0x780] sm:$0xff] }
  0xf6   :  { %12294 = vmaxabs.f32.vacc2 %v261_v52, %v262_v54  ;;  %v293_v52 = vld [vmem:[#allocation2 + $0x7c0] sm:$0xff]  ;;  %v294_v54 = vld [vmem:[#allocation2 + $0x7c8] sm:$0xff]  ;;  %12157 = vmaxabs.f32.vacc1 %v3717_v45, %v3718_v47 }
  0xf7   :  { %v3758_v45 = vld [vmem:[#allocation4 + $0x788] sm:$0xff] }
  0xf8   :  { %12295 = vmaxabs.f32.vacc2 %v263_v56, %v264_v58  ;;  %v295_v56 = vld [vmem:[#allocation2 + $0x7d0] sm:$0xff]  ;;  %v296_v58 = vld [vmem:[#allocation2 + $0x7d8] sm:$0xff]  ;;  %12158 = vmaxabs.f32.vacc1 %v3719_v49, %v3720_v51  ;;  %v6989_v47 = vld [vmem:[%s17334_s2 + $0x8] sm:$0xff] }
  0xf9   :  { %v6990_v49 = vld [vmem:[%s17334_s2 + $0x10] sm:$0xff]  ;;  %v6993_v51 = vld [vmem:[%s17334_s2 + $0x28] sm:$0xff] }
  0xfa   :  { %12296 = vmaxabs.f32.vacc2 %v265_v60, %v266_v62  ;;  %v297_v60 = vld [vmem:[#allocation2 + $0x7e0] sm:$0xff]  ;;  %v298_v62 = vld [vmem:[#allocation2 + $0x7e8] sm:$0xff]  ;;  %12159 = vmaxabs.f32.vacc1 %v3721_v53, %v3722_v55  ;;  %v6991_v53 = vld [vmem:[%s17334_s2 + $0x18] sm:$0xff] }
  0xfb   :  { %v6995_v55 = vld [vmem:[%s17334_s2 + $0x38] sm:$0xff] }
  0xfc   :  { %12297 = vmaxabs.f32.vacc2 %v267_v0, %v268_v2  ;;  %v3726_v0 = vld [vmem:[#allocation4 + $0x688] sm:$0xff]  ;;  %v299_v2 = vld [vmem:[#allocation2 + $0x7f0] sm:$0xff]  ;;  %12160 = vmaxabs.f32.vacc1 %v3723_v57, %v3724_v59  ;;  %v6996_v57 = vld [vmem:[%s17334_s2 + $0x40] sm:$0xff] }
  0xfd   :  { %v6998_v59 = vld [vmem:[%s17334_s2 + $0x50] sm:$0xff] }
  0xfe   :  { %12298 = vmaxabs.f32.vacc2 %v269_v4, %v270_v6  ;;  %v3727_v4 = vld [vmem:[#allocation4 + $0x690] sm:$0xff]  ;;  %v300_v6 = vld [vmem:[#allocation2 + $0x7f8] sm:$0xff]  ;;  %12161 = vmaxabs.f32.vacc1 %v3725_v61, %v3726_v0  ;;  %v12453_v61 = vld [vmem:[#allocation4 + $0x7a0] sm:$0xff] }
  0xff   :  { %v12455_v0 = vld [vmem:[#allocation4 + $0x7b0] sm:$0xff] }
 0x100   :  { %12299 = vmaxabs.f32.vacc2 %v271_v8, %v272_v10  ;;  %v12397_v8 = vld [vmem:[#allocation2 + $0x10] sm:$0xff]  ;;  %v3729_v10 = vld [vmem:[#allocation4 + $0x6a0] sm:$0xff]  ;;  %12162 = vmaxabs.f32.vacc1 %v3727_v4, %v3728_v7  ;;  %v12460_v4 = vld [vmem:[#allocation4 + $0x7b8] sm:$0xff] }
 0x101   :  { %v7002_v7 = vld [vmem:[%s17334_s2 + $0x70] sm:$0xff] }
 0x102   :  { %12300 = vmaxabs.f32.vacc2 %v273_v12, %v274_v14  ;;  %v12403_v12 = vld [vmem:[#allocation2 + $0x38] sm:$0xff]  ;;  %v3731_v14 = vld [vmem:[#allocation4 + $0x6b0] sm:$0xff]  ;;  %12163 = vmaxabs.f32.vacc1 %v3729_v10, %v3730_v13  ;;  %v12471_v13 = vld [vmem:[#allocation4 + $0x7c0] sm:$0xff] }
 0x103   :  { %v7003_v10 = vld [vmem:[%s17334_s2 + $0x78] sm:$0xff] }
 0x104   :  { %12301 = vmaxabs.f32.vacc2 %v275_v16, %v276_v18  ;;  %v3733_v16 = vld [vmem:[#allocation4 + $0x6c0] sm:$0xff]  ;;  %12164 = vmaxabs.f32.vacc1 %v3731_v14, %v3732_v15  ;;  %v12476_v15 = vld [vmem:[#allocation4 + $0x7c8] sm:$0xff] }
 0x105   :  { %v7004_v14 = vld [vmem:[%s17334_s2 + $0x80] sm:$0xff] }
 0x106   :  { %12302 = vmaxabs.f32.vacc2 %v277_v20, %v278_v22  ;;  %v3736_v20 = vld [vmem:[#allocation4 + $0x6d8] sm:$0xff]  ;;  %12165 = vmaxabs.f32.vacc1 %v3733_v16, %v3734_v17  ;;  %v3738_v22 = vld [vmem:[#allocation4 + $0x6e8] sm:$0xff]  ;;  %v7006_v17 = vld [vmem:[%s17334_s2 + $0x90] sm:$0xff] }
 0x107   :  { %v7005_v16 = vld [vmem:[%s17334_s2 + $0x88] sm:$0xff] }
 0x108   :  { %12303 = vmaxabs.f32.vacc2 %v279_v24, %v280_v26  ;;  %12166 = vmaxabs.f32.vacc1 %v3735_v19, %v3736_v20  ;;  %v3740_v24 = vld [vmem:[#allocation4 + $0x6f8] sm:$0xff]  ;;  %v3742_v26 = vld [vmem:[#allocation4 + $0x708] sm:$0xff]  ;;  %v7008_v19 = vld [vmem:[%s17334_s2 + $0xa0] sm:$0xff] }
 0x109   :  { %v12490_v20 = vld [vmem:[#allocation4 + $0x7d0] sm:$0xff] }
 0x10a   :  { %12304 = vmaxabs.f32.vacc2 %v281_v28, %v282_v30  ;;  %12167 = vmaxabs.f32.vacc1 %v3737_v21, %v3738_v22  ;;  %v3744_v28 = vld [vmem:[#allocation4 + $0x718] sm:$0xff]  ;;  %v3746_v30 = vld [vmem:[#allocation4 + $0x728] sm:$0xff] }
 0x10b   :  { %v12492_v21 = vld [vmem:[#allocation4 + $0x7d8] sm:$0xff]  ;;  %v7009_v22 = vld [vmem:[%s17334_s2 + $0xa8] sm:$0xff] }
 0x10c   :  { %12305 = vmaxabs.f32.vacc2 %v283_v32, %v284_v34  ;;  %12168 = vmaxabs.f32.vacc1 %v3739_v23, %v3740_v24  ;;  %v3748_v32 = vld [vmem:[#allocation4 + $0x738] sm:$0xff]  ;;  %v3750_v34 = vld [vmem:[#allocation4 + $0x748] sm:$0xff]  ;;  %v12497_v23 = vld [vmem:[#allocation4] sm:$0xff] }
 0x10d   :  { %v7010_v24 = vld [vmem:[%s17334_s2 + $0xb0] sm:$0xff] }
 0x10e   :  { %12306 = vmaxabs.f32.vacc2 %v285_v36, %v286_v38  ;;  %12169 = vmaxabs.f32.vacc1 %v3741_v25, %v3742_v26  ;;  %v3752_v36 = vld [vmem:[#allocation4 + $0x758] sm:$0xff]  ;;  %v3754_v38 = vld [vmem:[#allocation4 + $0x768] sm:$0xff] }
 0x10f   :  { %v12502_v25 = vld [vmem:[#allocation4 + $0x8] sm:$0xff]  ;;  %v7011_v26 = vld [vmem:[%s17334_s2 + $0xb8] sm:$0xff] }
 0x110   :  { %12307 = vmaxabs.f32.vacc2 %v287_v40, %v288_v42  ;;  %12170 = vmaxabs.f32.vacc1 %v3743_v27, %v3744_v28  ;;  %v3756_v40 = vld [vmem:[#allocation4 + $0x778] sm:$0xff]  ;;  %v6992_v42 = vld [vmem:[%s17334_s2 + $0x20] sm:$0xff]  ;;  %v7013_v28 = vld [vmem:[%s17334_s2 + $0xc8] sm:$0xff] }
 0x111   :  { %12028 = vmaxabs.init.f32.vacc0 %v6988_v41, %v6992_v42  ;;  %v7012_v27 = vld [vmem:[%s17334_s2 + $0xc0] sm:$0xff]  ;;  %v7025_v41 = vld [vmem:[%s17334_s2 + $0x128] sm:$0xff]  ;;  %v7026_v42 = vld [vmem:[%s17334_s2 + $0x130] sm:$0xff] }
 0x112   :  { %12308 = vmaxabs.f32.vacc2 %v12377_v44, %v12379_v46  ;;  %12171 = vmaxabs.f32.vacc1 %v3745_v29, %v3746_v30  ;;  %v12513_v29 = vld [vmem:[#allocation4 + $0x20] sm:$0xff]  ;;  %v7014_v30 = vld [vmem:[%s17334_s2 + $0xd0] sm:$0xff] }
 0x113   :  { %12029 = vmaxabs.f32.vacc0 %v6989_v47, %v6993_v51  ;;  %v7029_v47 = vld [vmem:[%s17334_s2 + $0x148] sm:$0xff]  ;;  %v7031_v51 = vld [vmem:[%s17334_s2 + $0x158] sm:$0xff] }
 0x114   :  { %12309 = vmaxabs.f32.vacc2 %v12381_v48, %v12383_v50  ;;  %12172 = vmaxabs.f32.vacc1 %v3747_v31, %v3748_v32  ;;  %v7015_v31 = vld [vmem:[%s17334_s2 + $0xd8] sm:$0xff]  ;;  %v7016_v32 = vld [vmem:[%s17334_s2 + $0xe0] sm:$0xff] }
 0x116   :  { %12310 = vmaxabs.f32.vacc2 %v293_v52, %v294_v54  ;;  %v12428_v52 = vld [vmem:[#allocation4 + $0x790] sm:$0xff]  ;;  %12173 = vmaxabs.f32.vacc1 %v3749_v33, %v3750_v34  ;;  %v7017_v33 = vld [vmem:[%s17334_s2 + $0xe8] sm:$0xff] }
 0x117   :  { %v6994_v54 = vld [vmem:[%s17334_s2 + $0x30] sm:$0xff] }
 0x118   :  { %12311 = vmaxabs.f32.vacc2 %v295_v56, %v296_v58  ;;  %v12439_v56 = vld [vmem:[#allocation4 + $0x798] sm:$0xff]  ;;  %v6997_v58 = vld [vmem:[%s17334_s2 + $0x48] sm:$0xff]  ;;  %12030 = vmaxabs.f32.vacc0 %v6990_v49, %v6994_v54  ;;  %12174 = vmaxabs.f32.vacc1 %v3751_v35, %v3752_v36  ;;  %v7018_v34 = vld [vmem:[%s17334_s2 + $0xf0] sm:$0xff] }
 0x119   :  { %v7019_v35 = vld [vmem:[%s17334_s2 + $0xf8] sm:$0xff]  ;;  %v7020_v36 = vld [vmem:[%s17334_s2 + $0x100] sm:$0xff]  ;;  %v7030_v49 = vld [vmem:[%s17334_s2 + $0x150] sm:$0xff] }
 0x11a   :  { %12312 = vmaxabs.f32.vacc2 %v297_v60, %v298_v62  ;;  %v6999_v60 = vld [vmem:[%s17334_s2 + $0x58] sm:$0xff]  ;;  %v3762_v62 = vld [vmem:[#allocation4 + $0x7a8] sm:$0xff]  ;;  %12031 = vmaxabs.f32.vacc0 %v6991_v53, %v6995_v55  ;;  %12175 = vmaxabs.f32.vacc1 %v3753_v37, %v3754_v38  ;;  %v7022_v38 = vld [vmem:[%s17334_s2 + $0x110] sm:$0xff] }
 0x11b   :  { %v7021_v37 = vld [vmem:[%s17334_s2 + $0x108] sm:$0xff]  ;;  %v7032_v53 = vld [vmem:[%s17334_s2 + $0x160] sm:$0xff]  ;;  %v7034_v54 = vld [vmem:[%s17334_s2 + $0x170] sm:$0xff] }
 0x11c   :  { %12313 = vmaxabs.f32.vacc2 %v299_v2, %v12389_v63  ;;  %v7000_v2 = vld [vmem:[%s17334_s2 + $0x60] sm:$0xff]  ;;  %12032 = vmaxabs.f32.vacc0 %v6996_v57, %v6997_v58  ;;  %12176 = vmaxabs.f32.vacc1 %v3755_v39, %v3756_v40  ;;  %v7023_v39 = vld [vmem:[%s17334_s2 + $0x118] sm:$0xff]  ;;  %v7037_v57 = vld [vmem:[%s17334_s2 + $0x188] sm:$0xff] }
 0x11d   :  { %v7024_v40 = vld [vmem:[%s17334_s2 + $0x120] sm:$0xff]  ;;  %v7035_v55 = vld [vmem:[%s17334_s2 + $0x178] sm:$0xff]  ;;  %v7038_v58 = vld [vmem:[%s17334_s2 + $0x190] sm:$0xff] }
 0x11e   :  { %12314 = vmaxabs.f32.vacc2 %v12391_v1, %v300_v6  ;;  %v7001_v6 = vld [vmem:[%s17334_s2 + $0x68] sm:$0xff]  ;;  %12033 = vmaxabs.f32.vacc0 %v6998_v59, %v6999_v60  ;;  %12177 = vmaxabs.f32.vacc1 %v3757_v43, %v3758_v45  ;;  %v7027_v43 = vld [vmem:[%s17334_s2 + $0x138] sm:$0xff]  ;;  %v7028_v45 = vld [vmem:[%s17334_s2 + $0x140] sm:$0xff] }
 0x11f   :  { %v7039_v59 = vld [vmem:[%s17334_s2 + $0x198] sm:$0xff]  ;;  %v3769_v60 = vld [vmem:[#allocation4 + $0x7e0] sm:$0xff] }
 0x120   :  { %12315 = vmaxabs.f32.vacc2 %v12393_v3, %v12395_v5  ;;  %12034 = vmaxabs.f32.vacc0 %v7000_v2, %v7001_v6  ;;  %12178 = vmaxabs.f32.vacc1 %v12428_v52, %v12439_v56  ;;  %v7033_v52 = vld [vmem:[%s17334_s2 + $0x168] sm:$0xff]  ;;  %v7036_v56 = vld [vmem:[%s17334_s2 + $0x180] sm:$0xff]  ;;  %v7042_v2 = vld [vmem:[%s17334_s2 + $0x1b0] sm:$0xff] }
 0x121   :  { %v3771_v6 = vld [vmem:[#allocation4 + $0x7f0] sm:$0xff] }
 0x122   :  { %12316 = vmaxabs.f32.vacc2 %v12397_v8, %v12399_v9  ;;  %12035 = vmaxabs.f32.vacc0 %v7002_v7, %v7003_v10  ;;  %12179 = vmaxabs.f32.vacc1 %v12453_v61, %v3762_v62  ;;  %v7040_v61 = vld [vmem:[%s17334_s2 + $0x1a0] sm:$0xff]  ;;  %v7041_v62 = vld [vmem:[%s17334_s2 + $0x1a8] sm:$0xff] }
 0x123   :  { %v7044_v7 = vld [vmem:[%s17334_s2 + $0x1c0] sm:$0xff]  ;;  %v7045_v10 = vld [vmem:[%s17334_s2 + $0x1c8] sm:$0xff] }
 0x124   :  { %12317 = vmaxabs.f32.vacc2 %v12401_v11, %v12403_v12  ;;  %12036 = vmaxabs.f32.vacc0 %v7004_v14, %v7005_v16  ;;  %12180 = vmaxabs.f32.vacc1 %v12455_v0, %v12460_v4  ;;  %v7043_v0 = vld [vmem:[%s17334_s2 + $0x1b8] sm:$0xff]  ;;  %v3770_v4 = vld [vmem:[#allocation4 + $0x7e8] sm:$0xff]  ;;  %v7046_v14 = vld [vmem:[%s17334_s2 + $0x1d0] sm:$0xff] }
 0x125   :  { %v7047_v16 = vld [vmem:[%s17334_s2 + $0x1d8] sm:$0xff] }
 0x126   :  { %v12318_v18 = vmovacc.low.even.vacc2  ;;  %12181 = vmaxabs.f32.vacc1 %v12471_v13, %v12476_v15  ;;  %v3519_v13 = vld [vmem:[#allocation4 + $0x10] sm:$0xff]  ;;  %v3522_v15 = vld [vmem:[#allocation4 + $0x28] sm:$0xff] }
 0x128   :  { %812 = vmax.xlane.f32.xlu0 %v12318_v18  ;;  %v7007_v18 = vld [vmem:[%s17334_s2 + $0x98] sm:$0xff]  ;;  %12182 = vmaxabs.f32.vacc1 %v12490_v20, %v12492_v21 }
 0x129   :  { %12037 = vmaxabs.f32.vacc0 %v7006_v17, %v7007_v18  ;;  %v3523_v17 = vld [vmem:[#allocation4 + $0x30] sm:$0xff]  ;;  %v3772_v18 = vld [vmem:[#allocation4 + $0x7f8] sm:$0xff] }
 0x12a   :  { %v3524_v20 = vld [vmem:[#allocation4 + $0x38] sm:$0xff]  ;;  %12183 = vmaxabs.f32.vacc1 %v3769_v60, %v3770_v4 }
 0x12b   :  { %12038 = vmaxabs.f32.vacc0 %v7008_v19, %v7009_v22  ;;  %v7048_v19 = vld [vmem:[%s17334_s2 + $0x1e0] sm:$0xff]  ;;  %v7049_v22 = vld [vmem:[%s17334_s2 + $0x1e8] sm:$0xff] }
 0x12c   :  { %12184 = vmaxabs.f32.vacc1 %v12497_v23, %v12513_v29 }
 0x12d   :  { %12039 = vmaxabs.f32.vacc0 %v7010_v24, %v7011_v26  ;;  %v7050_v24 = vld [vmem:[%s17334_s2 + $0x1f0] sm:$0xff]  ;;  %v7051_v26 = vld [vmem:[%s17334_s2 + $0x1f8] sm:$0xff] }
 0x12e   :  { %12185 = vmaxabs.f32.vacc1 %v3771_v6, %v3772_v18 }
 0x12f   :  { %12040 = vmaxabs.f32.vacc0 %v7012_v27, %v7013_v28  ;;  %v3520_v27 = vld [vmem:[#allocation4 + $0x18] sm:$0xff] }
 0x130   :  { %12186 = vmaxabs.f32.vacc1 %v12502_v25, %v3522_v15 }
 0x131   :  { %12041 = vmaxabs.f32.vacc0 %v7014_v30, %v7015_v31 }
 0x132   :  { %12187 = vmaxabs.f32.vacc1 %v3519_v13, %v3523_v17 }
 0x133   :  { %12042 = vmaxabs.f32.vacc0 %v7016_v32, %v7017_v33 }
 0x134   :  { %12188 = vmaxabs.f32.vacc1 %v3520_v27, %v3524_v20  ;;  %v11416_v27 = vld [vmem:[#allocation2 + $0x50] sm:$0xff] }
 0x135   :  { %12043 = vmaxabs.f32.vacc0 %v7018_v34, %v7019_v35 }
 0x136   :  { %v12189_v21 = vmovacc.low.even.vacc1 }
 0x137   :  { %12044 = vmaxabs.f32.vacc0 %v7020_v36, %v7021_v37 }
 0x138   :  { %4284 = vmax.xlane.f32.xlu1 %v12189_v21 }
 0x139   :  { %12045 = vmaxabs.f32.vacc0 %v7022_v38, %v7023_v39 }
 0x13b   :  { %12046 = vmaxabs.f32.vacc0 %v7024_v40, %v7025_v41 }
 0x13d   :  { %12047 = vmaxabs.f32.vacc0 %v7026_v42, %v7027_v43 }
 0x13f   :  { %12048 = vmaxabs.f32.vacc0 %v7028_v45, %v7029_v47 }
 0x141   :  { %12049 = vmaxabs.f32.vacc0 %v7030_v49, %v7031_v51  ;;  %v11570_v51 = vld [vmem:[#allocation2 + $0x4d0] sm:$0xff] }
 0x143   :  { %12050 = vmaxabs.f32.vacc0 %v7032_v53, %v7033_v52  ;;  %v11569_v53 = vld [vmem:[#allocation2 + $0x4c8] sm:$0xff] }
 0x145   :  { %12051 = vmaxabs.f32.vacc0 %v7034_v54, %v7035_v55 }
 0x147   :  { %12052 = vmaxabs.f32.vacc0 %v7036_v56, %v7037_v57 }
 0x149   :  { %12053 = vmaxabs.f32.vacc0 %v7038_v58, %v7039_v59 }
 0x14b   :  { %12054 = vmaxabs.f32.vacc0 %v7040_v61, %v7041_v62 }
 0x14d   :  { %12055 = vmaxabs.f32.vacc0 %v7042_v2, %v7043_v0 }
 0x14f   :  { %12056 = vmaxabs.f32.vacc0 %v7044_v7, %v7045_v10 }
 0x151   :  { %12057 = vmaxabs.f32.vacc0 %v7046_v14, %v7047_v16 }
 0x153   :  { %12058 = vmaxabs.f32.vacc0 %v7048_v19, %v7049_v22 }
 0x155   :  { %12059 = vmaxabs.f32.vacc0 %v7050_v24, %v7051_v26 }
 0x157   :  { %v12060_v28 = vmovacc.low.even.vacc0 }
 0x159   :  { %7179 = vmax.xlane.f32.xlu1 %v12060_v28 }
 0x1b5   :  { %v813_v30 = vpop.xlane.xlu0 %812 }
 0x1b6   :  { %v814_v31 = vrot.slane %v813_v30, 4 }
 0x1b8   :  { %v815_v32 = vmax.f32 %v813_v30, %v814_v31  ;;  %v11417_v30 = vld [vmem:[#allocation2 + $0x58] sm:$0xff] }
 0x1ba   :  { %v816_v33 = vrot.slane %v815_v32, 2 }
 0x1bc   :  { %v817_v34 = vmax.f32 %v815_v32, %v816_v33  ;;  %v11418_v32 = vld [vmem:[#allocation2 + $0x40] sm:$0xff] }
 0x1be   :  { %v818_v35 = vrot.slane %v817_v34, 1 }
 0x1c0   :  { %v819_v23 = vmax.f32 %v817_v34, %v818_v35 }
 0x1c2   :  { %8808 = vpush %v819_v23 }
 0x1f3   :  { %s8809_s12 = spop %8808 }
 0x1f4   :  { %v821_v29 = vstv %s8809_s12 }
 0x1f5   :  { %v823_v36 = vmul.f32 0.007874016, %v821_v29  ;;  %v11419_v29 = vld [vmem:[#allocation2 + $0x48] sm:$0xff] }
 0x1f7   :  { %v12641_v25 = vmax.f32 %v823_v36, 1e-12 }
 0x1f9   :  { %v12644_v37 = vmul.f32 127.0, %v12641_v25  ;;  %11410 = vrcp.f32 %v12641_v25 }
 0x1fb   :  { %v12648_v38 = vsub.f32 0.0, %v12644_v37 }
 0x1fd   :  { %v829_v39 = vmax.f32 %v12648_v38, %v12397_v8  ;;  %v830_v40 = vmax.f32 %v12648_v38, %v12401_v11  ;;  %v827_v43 = vmax.f32 %v12648_v38, %v12389_v63  ;;  %v828_v45 = vmax.f32 %v12648_v38, %v12393_v3 }
 0x1fe   :  { %v833_v47 = vmax.f32 %v12648_v38, %v12399_v9  ;;  %v834_v8 = vmax.f32 %v12648_v38, %v12403_v12  ;;  %v831_v56 = vmax.f32 %v12648_v38, %v12391_v1  ;;  %v832_v57 = vmax.f32 %v12648_v38, %v12395_v5 }
 0x1ff   :  { %v1085_v11 = vmin.f32 %v12644_v37, %v829_v39  ;;  %v1086_v49 = vmin.f32 %v12644_v37, %v830_v40  ;;  %v1083_v3 = vmin.f32 %v12644_v37, %v827_v43  ;;  %v1084_v52 = vmin.f32 %v12644_v37, %v828_v45  ;;  %v11420_v43 = vld [vmem:[#allocation2 + $0x70] sm:$0xff] }
 0x200   :  { %v1089_v9 = vmin.f32 %v12644_v37, %v833_v47  ;;  %v1090_v12 = vmin.f32 %v12644_v37, %v834_v8  ;;  %v1087_v0 = vmin.f32 %v12644_v37, %v831_v56  ;;  %v1088_v4 = vmin.f32 %v12644_v37, %v832_v57  ;;  %v11421_v47 = vld [vmem:[#allocation2 + $0x78] sm:$0xff] }
 0x201   :  { %v837_v20 = vmax.f32 %v12648_v38, %v11416_v27  ;;  %v838_v31 = vmax.f32 %v12648_v38, %v11417_v30  ;;  %v835_v33 = vmax.f32 %v12648_v38, %v11418_v32  ;;  %v836_v36 = vmax.f32 %v12648_v38, %v11419_v29  ;;  %v11427_v29 = vld [vmem:[#allocation2 + $0x88] sm:$0xff] }
 0x202   :  { %v841_v45 = vmax.f32 %v12648_v38, %v11420_v43  ;;  %v842_v8 = vmax.f32 %v12648_v38, %v11421_v47  ;;  %v11428_v43 = vld [vmem:[#allocation2 + $0xb0] sm:$0xff]  ;;  %v11429_v47 = vld [vmem:[#allocation2 + $0xb8] sm:$0xff]  ;;  %v981_v42 = vmax.f32 %v12648_v38, %v11570_v51 }
 0x203   :  { %v12672_v63 = vpop.eup %11410  ;;  %v1093_v23 = vmin.f32 %v12644_v37, %v837_v20  ;;  %v1094_v39 = vmin.f32 %v12644_v37, %v838_v31  ;;  %v1091_v40 = vmin.f32 %v12644_v37, %v835_v33  ;;  %v11425_v20 = vld [vmem:[#allocation2 + $0x98] sm:$0xff] }
 0x204   :  { %v1343_v54 = vmul.f32 %v12672_v63, %v1085_v11  ;;  %v1344_v55 = vmul.f32 %v12672_v63, %v1086_v49  ;;  %v1341_v58 = vmul.f32 %v12672_v63, %v1083_v3  ;;  %v1342_v59 = vmul.f32 %v12672_v63, %v1084_v52  ;;  %v11422_v52 = vld [vmem:[#allocation2 + $0x60] sm:$0xff]  ;;  %v11575_v51 = vld [vmem:[#allocation2 + $0x4f8] sm:$0xff] }
 0x205   :  { %v1347_v60 = vmul.f32 %v12672_v63, %v1089_v9  ;;  %v1348_v61 = vmul.f32 %v12672_v63, %v1090_v12  ;;  %v1345_v16 = vmul.f32 %v12672_v63, %v1087_v0  ;;  %v1346_v13 = vmul.f32 %v12672_v63, %v1088_v4 }
 0x206   :  { %v8812_v62 = vround.rtne.f32 %v1343_v54  ;;  %v8813_v2 = vround.rtne.f32 %v1344_v55  ;;  %v8810_v6 = vround.rtne.f32 %v1341_v58  ;;  %v8811_v7 = vround.rtne.f32 %v1342_v59  ;;  %v11423_v59 = vld [vmem:[#allocation2 + $0x68] sm:$0xff] }
 0x207   :  { %v8816_v1 = vround.rtne.f32 %v1347_v60  ;;  %v8817_v10 = vround.rtne.f32 %v1348_v61  ;;  %v8814_v24 = vround.rtne.f32 %v1345_v16  ;;  %v8815_v26 = vround.rtne.f32 %v1346_v13 }
 0x208   :  { %v1855_v5 = vmul.f32 %v8812_v62, %v12641_v25  ;;  %v1856_v14 = vmul.f32 %v8813_v2, %v12641_v25  ;;  %v1853_v15 = vmul.f32 %v8810_v6, %v12641_v25  ;;  %v1854_v17 = vmul.f32 %v8811_v7, %v12641_v25 }
 0x209   :  { %v1859_v18 = vmul.f32 %v8816_v1, %v12641_v25  ;;  %v1860_v19 = vmul.f32 %v8817_v10, %v12641_v25  ;;  %v1857_v34 = vmul.f32 %v8814_v24, %v12641_v25  ;;  %v1858_v35 = vmul.f32 %v8815_v26, %v12641_v25 }
 0x20a   :  { %v10290_v22 = vpack.i.bf16 %v1856_v14, %v1855_v5  ;;  %v9394_v21 = vpack.i.bf16 %v1854_v17, %v1853_v15  ;;  %v1351_v49 = vmul.f32 %v12672_v63, %v1093_v23  ;;  %v1092_v3 = vmin.f32 %v12644_v37, %v836_v36 }
 0x20b   :  { %v10292_v28 = vpack.i.bf16 %v1860_v19, %v1859_v18  ;;  %v9396_v11 = vpack.i.bf16 %v1858_v35, %v1857_v34  ;;  %v839_v9 = vmax.f32 %v12648_v38, %v11422_v52  ;;  %v1352_v12 = vmul.f32 %v12672_v63, %v1094_v39  ;;  %v11424_v19 = vld [vmem:[#allocation2 + $0x90] sm:$0xff]  ;;  %v11426_v35 = vld [vmem:[#allocation2 + $0x80] sm:$0xff] }
 0x20c   :  { %10291 = vxpose.xlu1.b32.start [1/16] %v10290_v22, 128  ;;  %9395 = vxpose.xlu0.b32.start [1/16] %v9394_v21, 128  ;;  %v1349_v54 = vmul.f32 %v12672_v63, %v1091_v40  ;;  %v1097_v55 = vmin.f32 %v12644_v37, %v841_v45  ;;  %v1098_v56 = vmin.f32 %v12644_v37, %v842_v8  ;;  %v8820_v57 = vround.rtne.f32 %v1351_v49  ;;  %v11430_v52 = vld [vmem:[#allocation2 + $0xa0] sm:$0xff] }
 0x20d   :  { %v1350_v58 = vmul.f32 %v12672_v63, %v1092_v3  ;;  %v840_v60 = vmax.f32 %v12648_v38, %v11423_v59  ;;  %v1095_v61 = vmin.f32 %v12644_v37, %v839_v9  ;;  %v8821_v62 = vround.rtne.f32 %v1352_v12 }
 0x20e   :  { %v8818_v2 = vround.rtne.f32 %v1349_v54  ;;  %v1355_v0 = vmul.f32 %v12672_v63, %v1097_v55  ;;  %v1356_v4 = vmul.f32 %v12672_v63, %v1098_v56  ;;  %v1863_v6 = vmul.f32 %v8820_v57, %v12641_v25 }
 0x20f   :  { %v8819_v7 = vround.rtne.f32 %v1350_v58  ;;  %v1096_v1 = vmin.f32 %v12644_v37, %v840_v60  ;;  %v1353_v10 = vmul.f32 %v12672_v63, %v1095_v61  ;;  %v1864_v5 = vmul.f32 %v8821_v62, %v12641_v25  ;;  %v11431_v60 = vld [vmem:[#allocation2 + $0xa8] sm:$0xff] }
 0x210   :  { %10293 = vxpose.xlu1.b32.cont [2/16] %v10292_v28, 128  ;;  %9397 = vxpose.xlu0.b32.cont [2/16] %v9396_v11, 128  ;;  %v1861_v14 = vmul.f32 %v8818_v2, %v12641_v25  ;;  %v8824_v16 = vround.rtne.f32 %v1355_v0  ;;  %v8825_v13 = vround.rtne.f32 %v1356_v4  ;;  %v845_v22 = vmax.f32 %v12648_v38, %v11424_v19 }
 0x211   :  { %v1862_v15 = vmul.f32 %v8819_v7, %v12641_v25  ;;  %v1354_v17 = vmul.f32 %v12672_v63, %v1096_v1  ;;  %v8822_v18 = vround.rtne.f32 %v1353_v10  ;;  %v10294_v24 = vpack.i.bf16 %v1864_v5, %v1863_v6 }
 0x212   :  { %v1867_v26 = vmul.f32 %v8824_v16, %v12641_v25  ;;  %v1868_v27 = vmul.f32 %v8825_v13, %v12641_v25  ;;  %v846_v21 = vmax.f32 %v12648_v38, %v11425_v20  ;;  %v1101_v32 = vmin.f32 %v12644_v37, %v845_v22  ;;  %v11432_v13 = vld [vmem:[#allocation2 + $0xd0] sm:$0xff]  ;;  %v11433_v20 = vld [vmem:[#allocation2 + $0xd8] sm:$0xff] }
 0x213   :  { %v9398_v28 = vpack.i.bf16 %v1862_v15, %v1861_v14  ;;  %v8823_v30 = vround.rtne.f32 %v1354_v17  ;;  %v1865_v31 = vmul.f32 %v8822_v18, %v12641_v25  ;;  %v843_v23 = vmax.f32 %v12648_v38, %v11426_v35 }
 0x214   :  { %10295 = vxpose.xlu1.b32.cont [3/16] %v10294_v24, 128  ;;  %v10296_v33 = vpack.i.bf16 %v1868_v27, %v1867_v26  ;;  %v1102_v34 = vmin.f32 %v12644_v37, %v846_v21  ;;  %v844_v36 = vmax.f32 %v12648_v38, %v11427_v29  ;;  %v1359_v40 = vmul.f32 %v12672_v63, %v1101_v32  ;;  %v11434_v32 = vld [vmem:[#allocation2 + $0xc0] sm:$0xff]  ;;  %v11435_v29 = vld [vmem:[#allocation2 + $0xc8] sm:$0xff] }
 0x215   :  { %9399 = vxpose.xlu0.b32.cont [3/16] %v9398_v28, 128  ;;  %v1866_v39 = vmul.f32 %v8823_v30, %v12641_v25  ;;  %v849_v45 = vmax.f32 %v12648_v38, %v11428_v43  ;;  %v850_v8 = vmax.f32 %v12648_v38, %v11429_v47  ;;  %v1099_v49 = vmin.f32 %v12644_v37, %v843_v23 }
 0x216   :  { %v1360_v11 = vmul.f32 %v12672_v63, %v1102_v34  ;;  %v1100_v3 = vmin.f32 %v12644_v37, %v844_v36  ;;  %v847_v9 = vmax.f32 %v12648_v38, %v11430_v52  ;;  %v8828_v54 = vround.rtne.f32 %v1359_v40  ;;  %v11438_v52 = vld [vmem:[#allocation2 + $0xe0] sm:$0xff] }
 0x217   :  { %v9400_v12 = vpack.i.bf16 %v1866_v39, %v1865_v31  ;;  %v1105_v55 = vmin.f32 %v12644_v37, %v849_v45  ;;  %v1106_v56 = vmin.f32 %v12644_v37, %v850_v8  ;;  %v1357_v58 = vmul.f32 %v12672_v63, %v1099_v49  ;;  %v11436_v45 = vld [vmem:[#allocation2 + $0xf0] sm:$0xff]  ;;  %v11437_v49 = vld [vmem:[#allocation2 + $0xf8] sm:$0xff] }
 0x218   :  { %10297 = vxpose.xlu1.b32.cont [4/16] %v10296_v33, 128  ;;  %v8829_v57 = vround.rtne.f32 %v1360_v11  ;;  %v1358_v59 = vmul.f32 %v12672_v63, %v1100_v3  ;;  %v848_v61 = vmax.f32 %v12648_v38, %v11431_v60  ;;  %v1871_v62 = vmul.f32 %v8828_v54, %v12641_v25  ;;  %v11439_v60 = vld [vmem:[#allocation2 + $0xe8] sm:$0xff] }
 0x219   :  { %9401 = vxpose.xlu0.b32.cont [4/16] %v9400_v12, 128  ;;  %v1363_v2 = vmul.f32 %v12672_v63, %v1105_v55  ;;  %v1364_v0 = vmul.f32 %v12672_v63, %v1106_v56  ;;  %v1103_v4 = vmin.f32 %v12644_v37, %v847_v9  ;;  %v8826_v7 = vround.rtne.f32 %v1357_v58 }
 0x21a   :  { %v1872_v6 = vmul.f32 %v8829_v57, %v12641_v25  ;;  %v8827_v1 = vround.rtne.f32 %v1358_v59  ;;  %v1104_v10 = vmin.f32 %v12644_v37, %v848_v61  ;;  %v853_v15 = vmax.f32 %v12648_v38, %v11432_v13  ;;  %v11440_v13 = vld [vmem:[#allocation2 + $0x110] sm:$0xff] }
 0x21b   :  { %v8832_v5 = vround.rtne.f32 %v1363_v2  ;;  %v8833_v14 = vround.rtne.f32 %v1364_v0  ;;  %v1361_v16 = vmul.f32 %v12672_v63, %v1103_v4  ;;  %v1869_v18 = vmul.f32 %v8826_v7, %v12641_v25 }
 0x21c   :  { %v10298_v17 = vpack.i.bf16 %v1872_v6, %v1871_v62  ;;  %v1870_v19 = vmul.f32 %v8827_v1, %v12641_v25  ;;  %v1362_v22 = vmul.f32 %v12672_v63, %v1104_v10  ;;  %v854_v21 = vmax.f32 %v12648_v38, %v11433_v20 }
 0x21d   :  { %v1875_v24 = vmul.f32 %v8832_v5, %v12641_v25  ;;  %v1876_v26 = vmul.f32 %v8833_v14, %v12641_v25  ;;  %v8830_v27 = vround.rtne.f32 %v1361_v16  ;;  %v1109_v31 = vmin.f32 %v12644_v37, %v853_v15 }
 0x21e   :  { %10299 = vxpose.xlu1.b32.cont [5/16] %v10298_v17, 128  ;;  %v9402_v28 = vpack.i.bf16 %v1870_v19, %v1869_v18  ;;  %v8831_v30 = vround.rtne.f32 %v1362_v22  ;;  %v851_v33 = vmax.f32 %v12648_v38, %v11434_v32  ;;  %v1110_v23 = vmin.f32 %v12644_v37, %v854_v21  ;;  %v11442_v32 = vld [vmem:[#allocation2 + $0x100] sm:$0xff] }
 0x21f   :  { %v10300_v34 = vpack.i.bf16 %v1876_v26, %v1875_v24  ;;  %v1873_v35 = vmul.f32 %v8830_v27, %v12641_v25  ;;  %v852_v36 = vmax.f32 %v12648_v38, %v11435_v29  ;;  %v1367_v40 = vmul.f32 %v12672_v63, %v1109_v31  ;;  %v11441_v27 = vld [vmem:[#allocation2 + $0x118] sm:$0xff]  ;;  %v11443_v29 = vld [vmem:[#allocation2 + $0x108] sm:$0xff] }
 0x220   :  { %9403 = vxpose.xlu0.b32.cont [5/16] %v9402_v28, 128  ;;  %v1874_v39 = vmul.f32 %v8831_v30, %v12641_v25  ;;  %v1107_v43 = vmin.f32 %v12644_v37, %v851_v33  ;;  %v857_v47 = vmax.f32 %v12648_v38, %v11436_v45  ;;  %v1368_v8 = vmul.f32 %v12672_v63, %v1110_v23  ;;  %v11444_v45 = vld [vmem:[#allocation2 + $0x130] sm:$0xff] }
 0x221   :  { %v1108_v11 = vmin.f32 %v12644_v37, %v852_v36  ;;  %v858_v3 = vmax.f32 %v12648_v38, %v11437_v49  ;;  %v855_v9 = vmax.f32 %v12648_v38, %v11438_v52  ;;  %v8836_v54 = vround.rtne.f32 %v1367_v40 }
 0x222   :  { %10301 = vxpose.xlu1.b32.cont [6/16] %v10300_v34, 128  ;;  %v9404_v12 = vpack.i.bf16 %v1874_v39, %v1873_v35  ;;  %v1365_v55 = vmul.f32 %v12672_v63, %v1107_v43  ;;  %v1113_v56 = vmin.f32 %v12644_v37, %v857_v47  ;;  %v8837_v57 = vround.rtne.f32 %v1368_v8 }
 0x223   :  { %v1366_v58 = vmul.f32 %v12672_v63, %v1108_v11  ;;  %v1114_v59 = vmin.f32 %v12644_v37, %v858_v3  ;;  %v856_v61 = vmax.f32 %v12648_v38, %v11439_v60  ;;  %v1879_v62 = vmul.f32 %v8836_v54, %v12641_v25  ;;  %v11445_v3 = vld [vmem:[#allocation2 + $0x138] sm:$0xff] }
 0x224   :  { %9405 = vxpose.xlu0.b32.cont [6/16] %v9404_v12, 128  ;;  %v8834_v2 = vround.rtne.f32 %v1365_v55  ;;  %v1371_v0 = vmul.f32 %v12672_v63, %v1113_v56  ;;  %v1111_v4 = vmin.f32 %v12644_v37, %v855_v9  ;;  %v1880_v6 = vmul.f32 %v8837_v57, %v12641_v25  ;;  %v11446_v55 = vld [vmem:[#allocation2 + $0x120] sm:$0xff] }
 0x225   :  { %v8835_v7 = vround.rtne.f32 %v1366_v58  ;;  %v1372_v1 = vmul.f32 %v12672_v63, %v1114_v59  ;;  %v1112_v10 = vmin.f32 %v12644_v37, %v856_v61  ;;  %v861_v15 = vmax.f32 %v12648_v38, %v11440_v13 }
 0x226   :  { %v1877_v5 = vmul.f32 %v8834_v2, %v12641_v25  ;;  %v8840_v14 = vround.rtne.f32 %v1371_v0  ;;  %v1369_v16 = vmul.f32 %v12672_v63, %v1111_v4  ;;  %v10302_v17 = vpack.i.bf16 %v1880_v6, %v1879_v62  ;;  %v11447_v2 = vld [vmem:[#allocation2 + $0x128] sm:$0xff] }
 0x227   :  { %v1878_v18 = vmul.f32 %v8835_v7, %v12641_v25  ;;  %v8841_v19 = vround.rtne.f32 %v1372_v1  ;;  %v1370_v22 = vmul.f32 %v12672_v63, %v1112_v10  ;;  %v862_v20 = vmax.f32 %v12648_v38, %v11441_v27  ;;  %v11448_v10 = vld [vmem:[#allocation2 + $0x150] sm:$0xff] }
 0x228   :  { %v1883_v24 = vmul.f32 %v8840_v14, %v12641_v25  ;;  %v8838_v26 = vround.rtne.f32 %v1369_v16  ;;  %v1117_v21 = vmin.f32 %v12644_v37, %v861_v15  ;;  %10303 = vxpose.xlu1.b32.cont [7/16] %v10302_v17, 128  ;;  %v859_v33 = vmax.f32 %v12648_v38, %v11442_v32  ;;  %v11450_v32 = vld [vmem:[#allocation2 + $0x140] sm:$0xff] }
 0x229   :  { %v9406_v28 = vpack.i.bf16 %v1878_v18, %v1877_v5  ;;  %v1884_v30 = vmul.f32 %v8841_v19, %v12641_v25  ;;  %v8839_v31 = vround.rtne.f32 %v1370_v22  ;;  %v1118_v35 = vmin.f32 %v12644_v37, %v862_v20  ;;  %v11449_v22 = vld [vmem:[#allocation2 + $0x158] sm:$0xff] }
 0x22a   :  { %v1881_v34 = vmul.f32 %v8838_v26, %v12641_v25  ;;  %v1375_v23 = vmul.f32 %v12672_v63, %v1117_v21  ;;  %v860_v36 = vmax.f32 %v12648_v38, %v11443_v29  ;;  %v1115_v43 = vmin.f32 %v12644_v37, %v859_v33  ;;  %v11451_v29 = vld [vmem:[#allocation2 + $0x148] sm:$0xff] }
 0x22b   :  { %9407 = vxpose.xlu0.b32.cont [7/16] %v9406_v28, 128  ;;  %v10304_v39 = vpack.i.bf16 %v1884_v30, %v1883_v24  ;;  %v1882_v40 = vmul.f32 %v8839_v31, %v12641_v25  ;;  %v865_v47 = vmax.f32 %v12648_v38, %v11444_v45  ;;  %v1376_v8 = vmul.f32 %v12672_v63, %v1118_v35  ;;  %v11452_v45 = vld [vmem:[#allocation2 + $0x170] sm:$0xff] }
 0x22c   :  { %v8844_v11 = vround.rtne.f32 %v1375_v23  ;;  %v1116_v49 = vmin.f32 %v12644_v37, %v860_v36  ;;  %v866_v52 = vmax.f32 %v12648_v38, %v11445_v3  ;;  %v1373_v12 = vmul.f32 %v12672_v63, %v1115_v43  ;;  %v11453_v3 = vld [vmem:[#allocation2 + $0x178] sm:$0xff] }
 0x22d   :  { %10305 = vxpose.xlu1.b32.cont [8/16] %v10304_v39, 128  ;;  %v9408_v9 = vpack.i.bf16 %v1882_v40, %v1881_v34  ;;  %v1121_v54 = vmin.f32 %v12644_v37, %v865_v47  ;;  %v863_v56 = vmax.f32 %v12648_v38, %v11446_v55  ;;  %v8845_v57 = vround.rtne.f32 %v1376_v8  ;;  %v11454_v55 = vld [vmem:[#allocation2 + $0x160] sm:$0xff] }
 0x22e   :  { %v1887_v58 = vmul.f32 %v8844_v11, %v12641_v25  ;;  %v1374_v59 = vmul.f32 %v12672_v63, %v1116_v49  ;;  %v1122_v60 = vmin.f32 %v12644_v37, %v866_v52  ;;  %v8842_v61 = vround.rtne.f32 %v1373_v12 }
 0x22f   :  { %9409 = vxpose.xlu0.b32.cont [8/16] %v9408_v9, 128  ;;  %v1379_v62 = vmul.f32 %v12672_v63, %v1121_v54  ;;  %v864_v0 = vmax.f32 %v12648_v38, %v11447_v2  ;;  %v1119_v4 = vmin.f32 %v12644_v37, %v863_v56  ;;  %v1888_v6 = vmul.f32 %v8845_v57, %v12641_v25 }
 0x230   :  { %v8843_v7 = vround.rtne.f32 %v1374_v59  ;;  %v1380_v1 = vmul.f32 %v12672_v63, %v1122_v60  ;;  %v869_v5 = vmax.f32 %v12648_v38, %v11448_v10  ;;  %v1885_v14 = vmul.f32 %v8842_v61, %v12641_v25  ;;  %v11456_v10 = vld [vmem:[#allocation2 + $0x190] sm:$0xff] }
 0x231   :  { %v8848_v16 = vround.rtne.f32 %v1379_v62  ;;  %v1120_v13 = vmin.f32 %v12644_v37, %v864_v0  ;;  %v1377_v15 = vmul.f32 %v12672_v63, %v1119_v4  ;;  %v10306_v17 = vpack.i.bf16 %v1888_v6, %v1887_v58  ;;  %v11455_v0 = vld [vmem:[#allocation2 + $0x168] sm:$0xff] }
 0x232   :  { %v1886_v18 = vmul.f32 %v8843_v7, %v12641_v25  ;;  %v8849_v19 = vround.rtne.f32 %v1380_v1  ;;  %v870_v24 = vmax.f32 %v12648_v38, %v11449_v22  ;;  %v1125_v21 = vmin.f32 %v12644_v37, %v869_v5  ;;  %v11457_v22 = vld [vmem:[#allocation2 + $0x198] sm:$0xff] }
 0x233   :  { %v1891_v26 = vmul.f32 %v8848_v16, %v12641_v25  ;;  %v1378_v27 = vmul.f32 %v12672_v63, %v1120_v13  ;;  %v8846_v20 = vround.rtne.f32 %v1377_v15  ;;  %10307 = vxpose.xlu1.b32.cont [9/16] %v10306_v17, 128  ;;  %v867_v33 = vmax.f32 %v12648_v38, %v11450_v32 }
 0x234   :  { %v9410_v28 = vpack.i.bf16 %v1886_v18, %v1885_v14  ;;  %v1892_v30 = vmul.f32 %v8849_v19, %v12641_v25  ;;  %v1126_v31 = vmin.f32 %v12644_v37, %v870_v24  ;;  %v1383_v23 = vmul.f32 %v12672_v63, %v1125_v21  ;;  %v11458_v21 = vld [vmem:[#allocation2 + $0x180] sm:$0xff] }
 0x235   :  { %v8847_v34 = vround.rtne.f32 %v1378_v27  ;;  %v1889_v35 = vmul.f32 %v8846_v20, %v12641_v25  ;;  %v868_v36 = vmax.f32 %v12648_v38, %v11451_v29  ;;  %v1123_v43 = vmin.f32 %v12644_v37, %v867_v33 }
 0x236   :  { %9411 = vxpose.xlu0.b32.cont [9/16] %v9410_v28, 128  ;;  %v10308_v39 = vpack.i.bf16 %v1892_v30, %v1891_v26  ;;  %v1384_v40 = vmul.f32 %v12672_v63, %v1126_v31  ;;  %v873_v47 = vmax.f32 %v12648_v38, %v11452_v45  ;;  %v8852_v11 = vround.rtne.f32 %v1383_v23  ;;  %v11459_v23 = vld [vmem:[#allocation2 + $0x188] sm:$0xff]  ;;  %v11460_v45 = vld [vmem:[#allocation2 + $0x1b0] sm:$0xff] }
 0x237   :  { %v1890_v8 = vmul.f32 %v8847_v34, %v12641_v25  ;;  %v1124_v49 = vmin.f32 %v12644_v37, %v868_v36  ;;  %v874_v52 = vmax.f32 %v12648_v38, %v11453_v3  ;;  %v1381_v12 = vmul.f32 %v12672_v63, %v1123_v43 }
 0x238   :  { %10309 = vxpose.xlu1.b32.cont [10/16] %v10308_v39, 128  ;;  %v8853_v9 = vround.rtne.f32 %v1384_v40  ;;  %v1129_v54 = vmin.f32 %v12644_v37, %v873_v47  ;;  %v871_v56 = vmax.f32 %v12648_v38, %v11454_v55  ;;  %v1895_v58 = vmul.f32 %v8852_v11, %v12641_v25  ;;  %v11462_v55 = vld [vmem:[#allocation2 + $0x1a0] sm:$0xff] }
 0x239   :  { %v9412_v57 = vpack.i.bf16 %v1890_v8, %v1889_v35  ;;  %v1382_v59 = vmul.f32 %v12672_v63, %v1124_v49  ;;  %v1130_v60 = vmin.f32 %v12644_v37, %v874_v52  ;;  %v8850_v62 = vround.rtne.f32 %v1381_v12 }
 0x23a   :  { %v1896_v61 = vmul.f32 %v8853_v9, %v12641_v25  ;;  %v1387_v2 = vmul.f32 %v12672_v63, %v1129_v54  ;;  %v872_v4 = vmax.f32 %v12648_v38, %v11455_v0  ;;  %v1127_v1 = vmin.f32 %v12644_v37, %v871_v56  ;;  %v11461_v9 = vld [vmem:[#allocation2 + $0x1b8] sm:$0xff]  ;;  %v11463_v0 = vld [vmem:[#allocation2 + $0x1a8] sm:$0xff] }
 0x23b   :  { %9413 = vxpose.xlu0.b32.cont [10/16] %v9412_v57, 128  ;;  %v8851_v6 = vround.rtne.f32 %v1382_v59  ;;  %v1388_v7 = vmul.f32 %v12672_v63, %v1130_v60  ;;  %v877_v5 = vmax.f32 %v12648_v38, %v11456_v10  ;;  %v1893_v16 = vmul.f32 %v8850_v62, %v12641_v25  ;;  %v11464_v10 = vld [vmem:[#allocation2 + $0x1d0] sm:$0xff] }
 0x23c   :  { %v10310_v14 = vpack.i.bf16 %v1896_v61, %v1895_v58  ;;  %v8856_v13 = vround.rtne.f32 %v1387_v2  ;;  %v1128_v15 = vmin.f32 %v12644_v37, %v872_v4  ;;  %v1385_v19 = vmul.f32 %v12672_v63, %v1127_v1 }
 0x23d   :  { %v1894_v17 = vmul.f32 %v8851_v6, %v12641_v25  ;;  %v8857_v18 = vround.rtne.f32 %v1388_v7  ;;  %v878_v24 = vmax.f32 %v12648_v38, %v11457_v22  ;;  %v1133_v20 = vmin.f32 %v12644_v37, %v877_v5 }
 0x23e   :  { %10311 = vxpose.xlu1.b32.cont [11/16] %v10310_v14, 128  ;;  %v1899_v26 = vmul.f32 %v8856_v13, %v12641_v25  ;;  %v1386_v27 = vmul.f32 %v12672_v63, %v1128_v15  ;;  %v875_v28 = vmax.f32 %v12648_v38, %v11458_v21  ;;  %v8854_v32 = vround.rtne.f32 %v1385_v19  ;;  %v11465_v19 = vld [vmem:[#allocation2 + $0x1d8] sm:$0xff]  ;;  %v11466_v21 = vld [vmem:[#allocation2 + $0x1c0] sm:$0xff] }
 0x23f   :  { %v9414_v30 = vpack.i.bf16 %v1894_v17, %v1893_v16  ;;  %v1900_v31 = vmul.f32 %v8857_v18, %v12641_v25  ;;  %v1134_v33 = vmin.f32 %v12644_v37, %v878_v24  ;;  %v1391_v35 = vmul.f32 %v12672_v63, %v1133_v20 }
 0x240   :  { %v8855_v34 = vround.rtne.f32 %v1386_v27  ;;  %v876_v29 = vmax.f32 %v12648_v38, %v11459_v23  ;;  %v1131_v36 = vmin.f32 %v12644_v37, %v875_v28  ;;  %v1897_v40 = vmul.f32 %v8854_v32, %v12641_v25  ;;  %v11467_v23 = vld [vmem:[#allocation2 + $0x1c8] sm:$0xff] }
 0x241   :  { %9415 = vxpose.xlu0.b32.cont [11/16] %v9414_v30, 128  ;;  %v10312_v39 = vpack.i.bf16 %v1900_v31, %v1899_v26  ;;  %v1392_v43 = vmul.f32 %v12672_v63, %v1134_v33  ;;  %v881_v47 = vmax.f32 %v12648_v38, %v11460_v45  ;;  %v8860_v11 = vround.rtne.f32 %v1391_v35  ;;  %v11468_v45 = vld [vmem:[#allocation2 + $0x1f0] sm:$0xff] }
 0x242   :  { %v1898_v8 = vmul.f32 %v8855_v34, %v12641_v25  ;;  %v1132_v49 = vmin.f32 %v12644_v37, %v876_v29  ;;  %v1389_v3 = vmul.f32 %v12672_v63, %v1131_v36  ;;  %v882_v12 = vmax.f32 %v12648_v38, %v11461_v9 }
 0x243   :  { %10313 = vxpose.xlu1.b32.cont [12/16] %v10312_v39, 128  ;;  %v8861_v52 = vround.rtne.f32 %v1392_v43  ;;  %v1137_v54 = vmin.f32 %v12644_v37, %v881_v47  ;;  %v879_v56 = vmax.f32 %v12648_v38, %v11462_v55  ;;  %v1903_v58 = vmul.f32 %v8860_v11, %v12641_v25 }
 0x244   :  { %v9416_v57 = vpack.i.bf16 %v1898_v8, %v1897_v40  ;;  %v1390_v59 = vmul.f32 %v12672_v63, %v1132_v49  ;;  %v8858_v60 = vround.rtne.f32 %v1389_v3  ;;  %v1138_v62 = vmin.f32 %v12644_v37, %v882_v12  ;;  %v11469_v12 = vld [vmem:[#allocation2 + $0x1f8] sm:$0xff] }
 0x245   :  { %v1904_v61 = vmul.f32 %v8861_v52, %v12641_v25  ;;  %v1395_v2 = vmul.f32 %v12672_v63, %v1137_v54  ;;  %v880_v4 = vmax.f32 %v12648_v38, %v11463_v0  ;;  %v1135_v1 = vmin.f32 %v12644_v37, %v879_v56  ;;  %v11471_v0 = vld [vmem:[#allocation2 + $0x1e8] sm:$0xff] }
 0x246   :  { %9417 = vxpose.xlu0.b32.cont [12/16] %v9416_v57, 128  ;;  %v8859_v6 = vround.rtne.f32 %v1390_v59  ;;  %v1901_v7 = vmul.f32 %v8858_v60, %v12641_v25  ;;  %v885_v5 = vmax.f32 %v12648_v38, %v11464_v10  ;;  %v1396_v16 = vmul.f32 %v12672_v63, %v1138_v62  ;;  %v11470_v59 = vld [vmem:[#allocation2 + $0x1e0] sm:$0xff] }
 0x247   :  { %v10314_v14 = vpack.i.bf16 %v1904_v61, %v1903_v58  ;;  %v8864_v13 = vround.rtne.f32 %v1395_v2  ;;  %v1136_v15 = vmin.f32 %v12644_v37, %v880_v4  ;;  %v1393_v18 = vmul.f32 %v12672_v63, %v1135_v1  ;;  %v11472_v10 = vld [vmem:[#allocation2 + $0x200] sm:$0xff] }
 0x248   :  { %v1902_v17 = vmul.f32 %v8859_v6, %v12641_v25  ;;  %v886_v22 = vmax.f32 %v12648_v38, %v11465_v19  ;;  %v1141_v24 = vmin.f32 %v12644_v37, %v885_v5  ;;  %v8865_v26 = vround.rtne.f32 %v1396_v16  ;;  %v11473_v19 = vld [vmem:[#allocation2 + $0x208] sm:$0xff] }
 0x249   :  { %10315 = vxpose.xlu1.b32.cont [13/16] %v10314_v14, 128  ;;  %v1907_v27 = vmul.f32 %v8864_v13, %v12641_v25  ;;  %v1394_v20 = vmul.f32 %v12672_v63, %v1136_v15  ;;  %v883_v28 = vmax.f32 %v12648_v38, %v11466_v21  ;;  %v8862_v31 = vround.rtne.f32 %v1393_v18  ;;  %v11474_v21 = vld [vmem:[#allocation2 + $0x210] sm:$0xff] }
 0x24a   :  { %v9418_v30 = vpack.i.bf16 %v1902_v17, %v1901_v7  ;;  %v1142_v32 = vmin.f32 %v12644_v37, %v886_v22  ;;  %v1399_v33 = vmul.f32 %v12672_v63, %v1141_v24  ;;  %v1908_v34 = vmul.f32 %v8865_v26, %v12641_v25 }
 0x24b   :  { %v8863_v35 = vround.rtne.f32 %v1394_v20  ;;  %v884_v29 = vmax.f32 %v12648_v38, %v11467_v23  ;;  %v1139_v36 = vmin.f32 %v12644_v37, %v883_v28  ;;  %v1905_v39 = vmul.f32 %v8862_v31, %v12641_v25  ;;  %v11475_v23 = vld [vmem:[#allocation2 + $0x218] sm:$0xff] }
 0x24c   :  { %9419 = vxpose.xlu0.b32.cont [13/16] %v9418_v30, 128  ;;  %v1400_v40 = vmul.f32 %v12672_v63, %v1142_v32  ;;  %v8868_v43 = vround.rtne.f32 %v1399_v33  ;;  %v889_v47 = vmax.f32 %v12648_v38, %v11468_v45  ;;  %v10316_v8 = vpack.i.bf16 %v1908_v34, %v1907_v27  ;;  %v11476_v45 = vld [vmem:[#allocation2 + $0x220] sm:$0xff] }
 0x24d   :  { %v1906_v11 = vmul.f32 %v8863_v35, %v12641_v25  ;;  %v1140_v49 = vmin.f32 %v12644_v37, %v884_v29  ;;  %v1397_v3 = vmul.f32 %v12672_v63, %v1139_v36  ;;  %v890_v54 = vmax.f32 %v12648_v38, %v11469_v12  ;;  %v11477_v12 = vld [vmem:[#allocation2 + $0x228] sm:$0xff] }
 0x24e   :  { %v8869_v52 = vround.rtne.f32 %v1400_v40  ;;  %v1911_v9 = vmul.f32 %v8868_v43, %v12641_v25  ;;  %v1145_v55 = vmin.f32 %v12644_v37, %v889_v47  ;;  %10317 = vxpose.xlu1.b32.cont [14/16] %v10316_v8, 128  ;;  %v887_v60 = vmax.f32 %v12648_v38, %v11470_v59  ;;  %v11478_v59 = vld [vmem:[#allocation2 + $0x230] sm:$0xff] }
 0x24f   :  { %v9420_v56 = vpack.i.bf16 %v1906_v11, %v1905_v39  ;;  %v1398_v57 = vmul.f32 %v12672_v63, %v1140_v49  ;;  %v8866_v58 = vround.rtne.f32 %v1397_v3  ;;  %v1146_v62 = vmin.f32 %v12644_v37, %v890_v54 }
 0x250   :  { %v1912_v61 = vmul.f32 %v8869_v52, %v12641_v25  ;;  %v1403_v2 = vmul.f32 %v12672_v63, %v1145_v55  ;;  %v888_v4 = vmax.f32 %v12648_v38, %v11471_v0  ;;  %v1143_v1 = vmin.f32 %v12644_v37, %v887_v60  ;;  %v11479_v0 = vld [vmem:[#allocation2 + $0x238] sm:$0xff] }
 0x251   :  { %9421 = vxpose.xlu0.b32.cont [14/16] %v9420_v56, 128  ;;  %v8867_v6 = vround.rtne.f32 %v1398_v57  ;;  %v1909_v7 = vmul.f32 %v8866_v58, %v12641_v25  ;;  %v891_v5 = vmax.f32 %v12648_v38, %v11472_v10  ;;  %v1404_v16 = vmul.f32 %v12672_v63, %v1146_v62  ;;  %v11480_v10 = vld [vmem:[#allocation2 + $0x240] sm:$0xff] }
 0x252   :  { %v10318_v14 = vpack.i.bf16 %v1912_v61, %v1911_v9  ;;  %v8872_v13 = vround.rtne.f32 %v1403_v2  ;;  %v1144_v15 = vmin.f32 %v12644_v37, %v888_v4  ;;  %v1401_v18 = vmul.f32 %v12672_v63, %v1143_v1 }
 0x253   :  { %v1910_v17 = vmul.f32 %v8867_v6, %v12641_v25  ;;  %v892_v22 = vmax.f32 %v12648_v38, %v11473_v19  ;;  %v1147_v24 = vmin.f32 %v12644_v37, %v891_v5  ;;  %v8873_v26 = vround.rtne.f32 %v1404_v16  ;;  %v11481_v19 = vld [vmem:[#allocation2 + $0x248] sm:$0xff] }
 0x254   :  { %10319 = vxpose.xlu1.b32.cont [15/16] %v10318_v14, 128  ;;  %v1915_v27 = vmul.f32 %v8872_v13, %v12641_v25  ;;  %v1402_v20 = vmul.f32 %v12672_v63, %v1144_v15  ;;  %v893_v28 = vmax.f32 %v12648_v38, %v11474_v21  ;;  %v8870_v31 = vround.rtne.f32 %v1401_v18  ;;  %v11482_v21 = vld [vmem:[#allocation2 + $0x250] sm:$0xff] }
 0x255   :  { %v9422_v30 = vpack.i.bf16 %v1910_v17, %v1909_v7  ;;  %v1148_v32 = vmin.f32 %v12644_v37, %v892_v22  ;;  %v1405_v33 = vmul.f32 %v12672_v63, %v1147_v24  ;;  %v1916_v34 = vmul.f32 %v8873_v26, %v12641_v25 }
 0x256   :  { %v8871_v35 = vround.rtne.f32 %v1402_v20  ;;  %v894_v29 = vmax.f32 %v12648_v38, %v11475_v23  ;;  %v1149_v36 = vmin.f32 %v12644_v37, %v893_v28  ;;  %v1913_v39 = vmul.f32 %v8870_v31, %v12641_v25  ;;  %v11483_v23 = vld [vmem:[#allocation2 + $0x258] sm:$0xff] }
 0x257   :  { %9423 = vxpose.xlu0.b32.cont [15/16] %v9422_v30, 128  ;;  %v1406_v40 = vmul.f32 %v12672_v63, %v1148_v32  ;;  %v8874_v43 = vround.rtne.f32 %v1405_v33  ;;  %v895_v47 = vmax.f32 %v12648_v38, %v11476_v45  ;;  %v10320_v8 = vpack.i.bf16 %v1916_v34, %v1915_v27  ;;  %v11484_v45 = vld [vmem:[#allocation2 + $0x260] sm:$0xff] }
 0x258   :  { %v1914_v11 = vmul.f32 %v8871_v35, %v12641_v25  ;;  %v1150_v49 = vmin.f32 %v12644_v37, %v894_v29  ;;  %v1407_v3 = vmul.f32 %v12672_v63, %v1149_v36  ;;  %v896_v54 = vmax.f32 %v12648_v38, %v11477_v12  ;;  %v11485_v12 = vld [vmem:[#allocation2 + $0x268] sm:$0xff] }
 0x259   :  { %v8875_v52 = vround.rtne.f32 %v1406_v40  ;;  %v1917_v9 = vmul.f32 %v8874_v43, %v12641_v25  ;;  %v1151_v55 = vmin.f32 %v12644_v37, %v895_v47  ;;  %10321 = vxpose.xlu1.b32.end [16/16] %v10320_v8, 128  ;;  %v897_v60 = vmax.f32 %v12648_v38, %v11478_v59  ;;  %v11486_v59 = vld [vmem:[#allocation2 + $0x270] sm:$0xff] }
 0x25a   :  { %v9424_v56 = vpack.i.bf16 %v1914_v11, %v1913_v39  ;;  %v1408_v57 = vmul.f32 %v12672_v63, %v1150_v49  ;;  %v8876_v58 = vround.rtne.f32 %v1407_v3  ;;  %v1152_v62 = vmin.f32 %v12644_v37, %v896_v54 }
 0x25b   :  { %v1918_v61 = vmul.f32 %v8875_v52, %v12641_v25  ;;  %v1409_v2 = vmul.f32 %v12672_v63, %v1151_v55  ;;  %v898_v4 = vmax.f32 %v12648_v38, %v11479_v0  ;;  %v1153_v1 = vmin.f32 %v12644_v37, %v897_v60  ;;  %v11487_v0 = vld [vmem:[#allocation2 + $0x278] sm:$0xff] }
 0x25c   :  { %9425 = vxpose.xlu0.b32.end [16/16] %v9424_v56, 128  ;;  %v8877_v6 = vround.rtne.f32 %v1408_v57  ;;  %v1919_v7 = vmul.f32 %v8876_v58, %v12641_v25  ;;  %v899_v5 = vmax.f32 %v12648_v38, %v11480_v10  ;;  %v1410_v16 = vmul.f32 %v12672_v63, %v1152_v62  ;;  %v11488_v10 = vld [vmem:[#allocation2 + $0x280] sm:$0xff] }
 0x25d   :  { %v10402_v14 = vpack.i.bf16 %v1918_v61, %v1917_v9  ;;  %v8878_v13 = vround.rtne.f32 %v1409_v2  ;;  %v1154_v15 = vmin.f32 %v12644_v37, %v898_v4  ;;  %v1411_v18 = vmul.f32 %v12672_v63, %v1153_v1 }
 0x25e   :  { %v1920_v17 = vmul.f32 %v8877_v6, %v12641_v25  ;;  %v900_v22 = vmax.f32 %v12648_v38, %v11481_v19  ;;  %v1155_v24 = vmin.f32 %v12644_v37, %v899_v5  ;;  %v8879_v26 = vround.rtne.f32 %v1410_v16  ;;  %v11489_v19 = vld [vmem:[#allocation2 + $0x288] sm:$0xff] }
 0x25f   :  { %10403 = vxpose.xlu1.b32.start [1/16] %v10402_v14, 128  ;;  %v1921_v27 = vmul.f32 %v8878_v13, %v12641_v25  ;;  %v1412_v20 = vmul.f32 %v12672_v63, %v1154_v15  ;;  %v901_v28 = vmax.f32 %v12648_v38, %v11482_v21  ;;  %v8880_v31 = vround.rtne.f32 %v1411_v18  ;;  %v11490_v21 = vld [vmem:[#allocation2 + $0x290] sm:$0xff] }
 0x260   :  { %v9506_v30 = vpack.i.bf16 %v1920_v17, %v1919_v7  ;;  %v1156_v32 = vmin.f32 %v12644_v37, %v900_v22  ;;  %v1413_v33 = vmul.f32 %v12672_v63, %v1155_v24  ;;  %v1922_v34 = vmul.f32 %v8879_v26, %v12641_v25 }
 0x261   :  { %v8881_v35 = vround.rtne.f32 %v1412_v20  ;;  %v902_v29 = vmax.f32 %v12648_v38, %v11483_v23  ;;  %v1157_v36 = vmin.f32 %v12644_v37, %v901_v28  ;;  %v1923_v39 = vmul.f32 %v8880_v31, %v12641_v25  ;;  %v11491_v23 = vld [vmem:[#allocation2 + $0x298] sm:$0xff] }
 0x262   :  { %9507 = vxpose.xlu0.b32.start [1/16] %v9506_v30, 128  ;;  %v1414_v40 = vmul.f32 %v12672_v63, %v1156_v32  ;;  %v8882_v43 = vround.rtne.f32 %v1413_v33  ;;  %v903_v47 = vmax.f32 %v12648_v38, %v11484_v45  ;;  %v10404_v8 = vpack.i.bf16 %v1922_v34, %v1921_v27  ;;  %v11492_v45 = vld [vmem:[#allocation2 + $0x2a0] sm:$0xff] }
 0x263   :  { %v1924_v11 = vmul.f32 %v8881_v35, %v12641_v25  ;;  %v1158_v49 = vmin.f32 %v12644_v37, %v902_v29  ;;  %v1415_v3 = vmul.f32 %v12672_v63, %v1157_v36  ;;  %v904_v54 = vmax.f32 %v12648_v38, %v11485_v12  ;;  %v11493_v12 = vld [vmem:[#allocation2 + $0x2a8] sm:$0xff] }
 0x264   :  { %v8883_v52 = vround.rtne.f32 %v1414_v40  ;;  %v1925_v9 = vmul.f32 %v8882_v43, %v12641_v25  ;;  %v1159_v55 = vmin.f32 %v12644_v37, %v903_v47  ;;  %10405 = vxpose.xlu1.b32.cont [2/16] %v10404_v8, 128  ;;  %v905_v60 = vmax.f32 %v12648_v38, %v11486_v59  ;;  %v11494_v59 = vld [vmem:[#allocation2 + $0x2b0] sm:$0xff] }
 0x265   :  { %v9508_v56 = vpack.i.bf16 %v1924_v11, %v1923_v39  ;;  %v1416_v57 = vmul.f32 %v12672_v63, %v1158_v49  ;;  %v8884_v58 = vround.rtne.f32 %v1415_v3  ;;  %v1160_v62 = vmin.f32 %v12644_v37, %v904_v54 }
 0x266   :  { %v1926_v61 = vmul.f32 %v8883_v52, %v12641_v25  ;;  %v1417_v2 = vmul.f32 %v12672_v63, %v1159_v55  ;;  %v906_v4 = vmax.f32 %v12648_v38, %v11487_v0  ;;  %v1161_v1 = vmin.f32 %v12644_v37, %v905_v60  ;;  %v11495_v0 = vld [vmem:[#allocation2 + $0x2b8] sm:$0xff] }
 0x267   :  { %9509 = vxpose.xlu0.b32.cont [2/16] %v9508_v56, 128  ;;  %v8885_v6 = vround.rtne.f32 %v1416_v57  ;;  %v1927_v7 = vmul.f32 %v8884_v58, %v12641_v25  ;;  %v907_v5 = vmax.f32 %v12648_v38, %v11488_v10  ;;  %v1418_v16 = vmul.f32 %v12672_v63, %v1160_v62  ;;  %v11496_v10 = vld [vmem:[#allocation2 + $0x2c0] sm:$0xff] }
 0x268   :  { %v10406_v14 = vpack.i.bf16 %v1926_v61, %v1925_v9  ;;  %v8886_v13 = vround.rtne.f32 %v1417_v2  ;;  %v1162_v15 = vmin.f32 %v12644_v37, %v906_v4  ;;  %v1419_v18 = vmul.f32 %v12672_v63, %v1161_v1 }
 0x269   :  { %v1928_v17 = vmul.f32 %v8885_v6, %v12641_v25  ;;  %v908_v22 = vmax.f32 %v12648_v38, %v11489_v19  ;;  %v1163_v24 = vmin.f32 %v12644_v37, %v907_v5  ;;  %v8887_v26 = vround.rtne.f32 %v1418_v16  ;;  %v11497_v19 = vld [vmem:[#allocation2 + $0x2c8] sm:$0xff] }
 0x26a   :  { %10407 = vxpose.xlu1.b32.cont [3/16] %v10406_v14, 128  ;;  %v1929_v27 = vmul.f32 %v8886_v13, %v12641_v25  ;;  %v1420_v20 = vmul.f32 %v12672_v63, %v1162_v15  ;;  %v909_v28 = vmax.f32 %v12648_v38, %v11490_v21  ;;  %v8888_v31 = vround.rtne.f32 %v1419_v18  ;;  %v11498_v21 = vld [vmem:[#allocation2 + $0x2d0] sm:$0xff] }
 0x26b   :  { %v9510_v30 = vpack.i.bf16 %v1928_v17, %v1927_v7  ;;  %v1164_v32 = vmin.f32 %v12644_v37, %v908_v22  ;;  %v1421_v33 = vmul.f32 %v12672_v63, %v1163_v24  ;;  %v1930_v34 = vmul.f32 %v8887_v26, %v12641_v25 }
 0x26c   :  { %v8889_v35 = vround.rtne.f32 %v1420_v20  ;;  %v910_v29 = vmax.f32 %v12648_v38, %v11491_v23  ;;  %v1165_v36 = vmin.f32 %v12644_v37, %v909_v28  ;;  %v1931_v39 = vmul.f32 %v8888_v31, %v12641_v25  ;;  %v11499_v23 = vld [vmem:[#allocation2 + $0x2d8] sm:$0xff] }
 0x26d   :  { %9511 = vxpose.xlu0.b32.cont [3/16] %v9510_v30, 128  ;;  %v1422_v40 = vmul.f32 %v12672_v63, %v1164_v32  ;;  %v8890_v43 = vround.rtne.f32 %v1421_v33  ;;  %v911_v47 = vmax.f32 %v12648_v38, %v11492_v45  ;;  %v10408_v8 = vpack.i.bf16 %v1930_v34, %v1929_v27  ;;  %v11500_v45 = vld [vmem:[#allocation2 + $0x2e0] sm:$0xff] }
 0x26e   :  { %v1932_v11 = vmul.f32 %v8889_v35, %v12641_v25  ;;  %v1166_v49 = vmin.f32 %v12644_v37, %v910_v29  ;;  %v1423_v3 = vmul.f32 %v12672_v63, %v1165_v36  ;;  %v912_v54 = vmax.f32 %v12648_v38, %v11493_v12  ;;  %v11501_v12 = vld [vmem:[#allocation2 + $0x2e8] sm:$0xff] }
 0x26f   :  { %v8891_v52 = vround.rtne.f32 %v1422_v40  ;;  %v1933_v9 = vmul.f32 %v8890_v43, %v12641_v25  ;;  %v1167_v55 = vmin.f32 %v12644_v37, %v911_v47  ;;  %10409 = vxpose.xlu1.b32.cont [4/16] %v10408_v8, 128  ;;  %v913_v60 = vmax.f32 %v12648_v38, %v11494_v59  ;;  %v11502_v59 = vld [vmem:[#allocation2 + $0x2f0] sm:$0xff] }
 0x270   :  { %v9512_v56 = vpack.i.bf16 %v1932_v11, %v1931_v39  ;;  %v1424_v57 = vmul.f32 %v12672_v63, %v1166_v49  ;;  %v8892_v58 = vround.rtne.f32 %v1423_v3  ;;  %v1168_v62 = vmin.f32 %v12644_v37, %v912_v54 }
 0x271   :  { %v1934_v61 = vmul.f32 %v8891_v52, %v12641_v25  ;;  %v1425_v2 = vmul.f32 %v12672_v63, %v1167_v55  ;;  %v914_v4 = vmax.f32 %v12648_v38, %v11495_v0  ;;  %v1169_v1 = vmin.f32 %v12644_v37, %v913_v60  ;;  %v11503_v0 = vld [vmem:[#allocation2 + $0x2f8] sm:$0xff] }
 0x272   :  { %9513 = vxpose.xlu0.b32.cont [4/16] %v9512_v56, 128  ;;  %v8893_v6 = vround.rtne.f32 %v1424_v57  ;;  %v1935_v7 = vmul.f32 %v8892_v58, %v12641_v25  ;;  %v915_v5 = vmax.f32 %v12648_v38, %v11496_v10  ;;  %v1426_v16 = vmul.f32 %v12672_v63, %v1168_v62  ;;  %v11504_v10 = vld [vmem:[#allocation2 + $0x300] sm:$0xff] }
 0x273   :  { %v10410_v14 = vpack.i.bf16 %v1934_v61, %v1933_v9  ;;  %v8894_v13 = vround.rtne.f32 %v1425_v2  ;;  %v1170_v15 = vmin.f32 %v12644_v37, %v914_v4  ;;  %v1427_v18 = vmul.f32 %v12672_v63, %v1169_v1 }
 0x274   :  { %v1936_v17 = vmul.f32 %v8893_v6, %v12641_v25  ;;  %v916_v22 = vmax.f32 %v12648_v38, %v11497_v19  ;;  %v1171_v24 = vmin.f32 %v12644_v37, %v915_v5  ;;  %v8895_v26 = vround.rtne.f32 %v1426_v16  ;;  %v11505_v19 = vld [vmem:[#allocation2 + $0x308] sm:$0xff] }
 0x275   :  { %10411 = vxpose.xlu1.b32.cont [5/16] %v10410_v14, 128  ;;  %v1937_v27 = vmul.f32 %v8894_v13, %v12641_v25  ;;  %v1428_v20 = vmul.f32 %v12672_v63, %v1170_v15  ;;  %v917_v28 = vmax.f32 %v12648_v38, %v11498_v21  ;;  %v8896_v31 = vround.rtne.f32 %v1427_v18  ;;  %v11506_v21 = vld [vmem:[#allocation2 + $0x310] sm:$0xff] }
 0x276   :  { %v9514_v30 = vpack.i.bf16 %v1936_v17, %v1935_v7  ;;  %v1172_v32 = vmin.f32 %v12644_v37, %v916_v22  ;;  %v1429_v33 = vmul.f32 %v12672_v63, %v1171_v24  ;;  %v1938_v34 = vmul.f32 %v8895_v26, %v12641_v25 }
 0x277   :  { %v8897_v35 = vround.rtne.f32 %v1428_v20  ;;  %v918_v29 = vmax.f32 %v12648_v38, %v11499_v23  ;;  %v1173_v36 = vmin.f32 %v12644_v37, %v917_v28  ;;  %v1939_v39 = vmul.f32 %v8896_v31, %v12641_v25  ;;  %v11507_v23 = vld [vmem:[#allocation2 + $0x318] sm:$0xff] }
 0x278   :  { %9515 = vxpose.xlu0.b32.cont [5/16] %v9514_v30, 128  ;;  %v1430_v40 = vmul.f32 %v12672_v63, %v1172_v32  ;;  %v8898_v43 = vround.rtne.f32 %v1429_v33  ;;  %v919_v47 = vmax.f32 %v12648_v38, %v11500_v45  ;;  %v10412_v8 = vpack.i.bf16 %v1938_v34, %v1937_v27  ;;  %v11508_v45 = vld [vmem:[#allocation2 + $0x320] sm:$0xff] }
 0x279   :  { %v1940_v11 = vmul.f32 %v8897_v35, %v12641_v25  ;;  %v1174_v49 = vmin.f32 %v12644_v37, %v918_v29  ;;  %v1431_v3 = vmul.f32 %v12672_v63, %v1173_v36  ;;  %v920_v54 = vmax.f32 %v12648_v38, %v11501_v12  ;;  %v11509_v12 = vld [vmem:[#allocation2 + $0x328] sm:$0xff] }
 0x27a   :  { %v8899_v52 = vround.rtne.f32 %v1430_v40  ;;  %v1941_v9 = vmul.f32 %v8898_v43, %v12641_v25  ;;  %v1175_v55 = vmin.f32 %v12644_v37, %v919_v47  ;;  %10413 = vxpose.xlu1.b32.cont [6/16] %v10412_v8, 128  ;;  %v921_v60 = vmax.f32 %v12648_v38, %v11502_v59  ;;  %v11510_v59 = vld [vmem:[#allocation2 + $0x330] sm:$0xff] }
 0x27b   :  { %v9516_v56 = vpack.i.bf16 %v1940_v11, %v1939_v39  ;;  %v1432_v57 = vmul.f32 %v12672_v63, %v1174_v49  ;;  %v8900_v58 = vround.rtne.f32 %v1431_v3  ;;  %v1176_v62 = vmin.f32 %v12644_v37, %v920_v54 }
 0x27c   :  { %v1942_v61 = vmul.f32 %v8899_v52, %v12641_v25  ;;  %v1433_v2 = vmul.f32 %v12672_v63, %v1175_v55  ;;  %v922_v4 = vmax.f32 %v12648_v38, %v11503_v0  ;;  %v1177_v1 = vmin.f32 %v12644_v37, %v921_v60  ;;  %v11511_v0 = vld [vmem:[#allocation2 + $0x338] sm:$0xff] }
 0x27d   :  { %9517 = vxpose.xlu0.b32.cont [6/16] %v9516_v56, 128  ;;  %v8901_v6 = vround.rtne.f32 %v1432_v57  ;;  %v1943_v7 = vmul.f32 %v8900_v58, %v12641_v25  ;;  %v923_v5 = vmax.f32 %v12648_v38, %v11504_v10  ;;  %v1434_v16 = vmul.f32 %v12672_v63, %v1176_v62  ;;  %v11512_v10 = vld [vmem:[#allocation2 + $0x340] sm:$0xff] }
 0x27e   :  { %v10414_v14 = vpack.i.bf16 %v1942_v61, %v1941_v9  ;;  %v8902_v13 = vround.rtne.f32 %v1433_v2  ;;  %v1178_v15 = vmin.f32 %v12644_v37, %v922_v4  ;;  %v1435_v18 = vmul.f32 %v12672_v63, %v1177_v1 }
 0x27f   :  { %v1944_v17 = vmul.f32 %v8901_v6, %v12641_v25  ;;  %v924_v22 = vmax.f32 %v12648_v38, %v11505_v19  ;;  %v1179_v24 = vmin.f32 %v12644_v37, %v923_v5  ;;  %v8903_v26 = vround.rtne.f32 %v1434_v16  ;;  %v11513_v19 = vld [vmem:[#allocation2 + $0x348] sm:$0xff] }
 0x280   :  { %10415 = vxpose.xlu1.b32.cont [7/16] %v10414_v14, 128  ;;  %v1945_v27 = vmul.f32 %v8902_v13, %v12641_v25  ;;  %v1436_v20 = vmul.f32 %v12672_v63, %v1178_v15  ;;  %v925_v28 = vmax.f32 %v12648_v38, %v11506_v21  ;;  %v8904_v31 = vround.rtne.f32 %v1435_v18  ;;  %v11514_v21 = vld [vmem:[#allocation2 + $0x350] sm:$0xff] }
 0x281   :  { %v9518_v30 = vpack.i.bf16 %v1944_v17, %v1943_v7  ;;  %v1180_v32 = vmin.f32 %v12644_v37, %v924_v22  ;;  %v1437_v33 = vmul.f32 %v12672_v63, %v1179_v24  ;;  %v1946_v34 = vmul.f32 %v8903_v26, %v12641_v25 }
 0x282   :  { %v8905_v35 = vround.rtne.f32 %v1436_v20  ;;  %v926_v29 = vmax.f32 %v12648_v38, %v11507_v23  ;;  %v1181_v36 = vmin.f32 %v12644_v37, %v925_v28  ;;  %v1947_v39 = vmul.f32 %v8904_v31, %v12641_v25  ;;  %v11515_v23 = vld [vmem:[#allocation2 + $0x358] sm:$0xff] }
 0x283   :  { %9519 = vxpose.xlu0.b32.cont [7/16] %v9518_v30, 128  ;;  %v1438_v40 = vmul.f32 %v12672_v63, %v1180_v32  ;;  %v8906_v43 = vround.rtne.f32 %v1437_v33  ;;  %v927_v47 = vmax.f32 %v12648_v38, %v11508_v45  ;;  %v10416_v8 = vpack.i.bf16 %v1946_v34, %v1945_v27  ;;  %v11516_v45 = vld [vmem:[#allocation2 + $0x360] sm:$0xff] }
 0x284   :  { %v1948_v11 = vmul.f32 %v8905_v35, %v12641_v25  ;;  %v1182_v49 = vmin.f32 %v12644_v37, %v926_v29  ;;  %v1439_v3 = vmul.f32 %v12672_v63, %v1181_v36  ;;  %v928_v54 = vmax.f32 %v12648_v38, %v11509_v12  ;;  %v11517_v12 = vld [vmem:[#allocation2 + $0x368] sm:$0xff] }
 0x285   :  { %v8907_v52 = vround.rtne.f32 %v1438_v40  ;;  %v1949_v9 = vmul.f32 %v8906_v43, %v12641_v25  ;;  %v1183_v55 = vmin.f32 %v12644_v37, %v927_v47  ;;  %10417 = vxpose.xlu1.b32.cont [8/16] %v10416_v8, 128  ;;  %v929_v60 = vmax.f32 %v12648_v38, %v11510_v59  ;;  %v11518_v59 = vld [vmem:[#allocation2 + $0x370] sm:$0xff] }
 0x286   :  { %v9520_v56 = vpack.i.bf16 %v1948_v11, %v1947_v39  ;;  %v1440_v57 = vmul.f32 %v12672_v63, %v1182_v49  ;;  %v8908_v58 = vround.rtne.f32 %v1439_v3  ;;  %v1184_v62 = vmin.f32 %v12644_v37, %v928_v54 }
 0x287   :  { %v1950_v61 = vmul.f32 %v8907_v52, %v12641_v25  ;;  %v1441_v2 = vmul.f32 %v12672_v63, %v1183_v55  ;;  %v930_v4 = vmax.f32 %v12648_v38, %v11511_v0  ;;  %v1185_v1 = vmin.f32 %v12644_v37, %v929_v60  ;;  %v11519_v0 = vld [vmem:[#allocation2 + $0x378] sm:$0xff] }
 0x288   :  { %9521 = vxpose.xlu0.b32.cont [8/16] %v9520_v56, 128  ;;  %v8909_v6 = vround.rtne.f32 %v1440_v57  ;;  %v1951_v7 = vmul.f32 %v8908_v58, %v12641_v25  ;;  %v931_v5 = vmax.f32 %v12648_v38, %v11512_v10  ;;  %v1442_v16 = vmul.f32 %v12672_v63, %v1184_v62  ;;  %v11520_v10 = vld [vmem:[#allocation2 + $0x380] sm:$0xff] }
 0x289   :  { %v10418_v14 = vpack.i.bf16 %v1950_v61, %v1949_v9  ;;  %v8910_v13 = vround.rtne.f32 %v1441_v2  ;;  %v1186_v15 = vmin.f32 %v12644_v37, %v930_v4  ;;  %v1443_v18 = vmul.f32 %v12672_v63, %v1185_v1 }
 0x28a   :  { %v1952_v17 = vmul.f32 %v8909_v6, %v12641_v25  ;;  %v932_v22 = vmax.f32 %v12648_v38, %v11513_v19  ;;  %v1187_v24 = vmin.f32 %v12644_v37, %v931_v5  ;;  %v8911_v26 = vround.rtne.f32 %v1442_v16  ;;  %v11521_v19 = vld [vmem:[#allocation2 + $0x388] sm:$0xff] }
 0x28b   :  { %10419 = vxpose.xlu1.b32.cont [9/16] %v10418_v14, 128  ;;  %v1953_v27 = vmul.f32 %v8910_v13, %v12641_v25  ;;  %v1444_v20 = vmul.f32 %v12672_v63, %v1186_v15  ;;  %v933_v28 = vmax.f32 %v12648_v38, %v11514_v21  ;;  %v8912_v31 = vround.rtne.f32 %v1443_v18  ;;  %v11522_v21 = vld [vmem:[#allocation2 + $0x390] sm:$0xff] }
 0x28c   :  { %v9522_v30 = vpack.i.bf16 %v1952_v17, %v1951_v7  ;;  %v1188_v32 = vmin.f32 %v12644_v37, %v932_v22  ;;  %v1445_v33 = vmul.f32 %v12672_v63, %v1187_v24  ;;  %v1954_v34 = vmul.f32 %v8911_v26, %v12641_v25 }
 0x28d   :  { %v8913_v35 = vround.rtne.f32 %v1444_v20  ;;  %v934_v29 = vmax.f32 %v12648_v38, %v11515_v23  ;;  %v1189_v36 = vmin.f32 %v12644_v37, %v933_v28  ;;  %v1955_v39 = vmul.f32 %v8912_v31, %v12641_v25  ;;  %v11523_v23 = vld [vmem:[#allocation2 + $0x398] sm:$0xff] }
 0x28e   :  { %9523 = vxpose.xlu0.b32.cont [9/16] %v9522_v30, 128  ;;  %v1446_v40 = vmul.f32 %v12672_v63, %v1188_v32  ;;  %v8914_v43 = vround.rtne.f32 %v1445_v33  ;;  %v935_v47 = vmax.f32 %v12648_v38, %v11516_v45  ;;  %v10420_v8 = vpack.i.bf16 %v1954_v34, %v1953_v27  ;;  %v11524_v45 = vld [vmem:[#allocation2 + $0x3a0] sm:$0xff] }
 0x28f   :  { %v1956_v11 = vmul.f32 %v8913_v35, %v12641_v25  ;;  %v1190_v49 = vmin.f32 %v12644_v37, %v934_v29  ;;  %v1447_v3 = vmul.f32 %v12672_v63, %v1189_v36  ;;  %v936_v54 = vmax.f32 %v12648_v38, %v11517_v12  ;;  %v11525_v12 = vld [vmem:[#allocation2 + $0x3a8] sm:$0xff] }
 0x290   :  { %v8915_v52 = vround.rtne.f32 %v1446_v40  ;;  %v1957_v9 = vmul.f32 %v8914_v43, %v12641_v25  ;;  %v1191_v55 = vmin.f32 %v12644_v37, %v935_v47  ;;  %10421 = vxpose.xlu1.b32.cont [10/16] %v10420_v8, 128  ;;  %v937_v60 = vmax.f32 %v12648_v38, %v11518_v59  ;;  %v11526_v59 = vld [vmem:[#allocation2 + $0x3b0] sm:$0xff] }
 0x291   :  { %v9524_v56 = vpack.i.bf16 %v1956_v11, %v1955_v39  ;;  %v1448_v57 = vmul.f32 %v12672_v63, %v1190_v49  ;;  %v8916_v58 = vround.rtne.f32 %v1447_v3  ;;  %v1192_v62 = vmin.f32 %v12644_v37, %v936_v54 }
 0x292   :  { %v1958_v61 = vmul.f32 %v8915_v52, %v12641_v25  ;;  %v1449_v2 = vmul.f32 %v12672_v63, %v1191_v55  ;;  %v938_v4 = vmax.f32 %v12648_v38, %v11519_v0  ;;  %v1193_v1 = vmin.f32 %v12644_v37, %v937_v60  ;;  %v11527_v0 = vld [vmem:[#allocation2 + $0x3b8] sm:$0xff] }
 0x293   :  { %9525 = vxpose.xlu0.b32.cont [10/16] %v9524_v56, 128  ;;  %v8917_v6 = vround.rtne.f32 %v1448_v57  ;;  %v1959_v7 = vmul.f32 %v8916_v58, %v12641_v25  ;;  %v939_v5 = vmax.f32 %v12648_v38, %v11520_v10  ;;  %v1450_v16 = vmul.f32 %v12672_v63, %v1192_v62 }
 0x294   :  { %v10422_v14 = vpack.i.bf16 %v1958_v61, %v1957_v9  ;;  %v8918_v13 = vround.rtne.f32 %v1449_v2  ;;  %v1194_v15 = vmin.f32 %v12644_v37, %v938_v4  ;;  %v1451_v18 = vmul.f32 %v12672_v63, %v1193_v1 }
 0x295   :  { %v1960_v17 = vmul.f32 %v8917_v6, %v12641_v25  ;;  %v940_v22 = vmax.f32 %v12648_v38, %v11521_v19  ;;  %v1195_v24 = vmin.f32 %v12644_v37, %v939_v5  ;;  %v8919_v26 = vround.rtne.f32 %v1450_v16  ;;  %v13137_v6 = vld [vmem:[#allocation2 + $0x7c0] sm:$0xff] }
 0x296   :  { %10423 = vxpose.xlu1.b32.cont [11/16] %v10422_v14, 128  ;;  %v1961_v27 = vmul.f32 %v8918_v13, %v12641_v25  ;;  %v1452_v20 = vmul.f32 %v12672_v63, %v1194_v15  ;;  %v941_v28 = vmax.f32 %v12648_v38, %v11522_v21  ;;  %v8920_v31 = vround.rtne.f32 %v1451_v18 }
 0x297   :  { %v9526_v30 = vpack.i.bf16 %v1960_v17, %v1959_v7  ;;  %v1196_v32 = vmin.f32 %v12644_v37, %v940_v22  ;;  %v1453_v33 = vmul.f32 %v12672_v63, %v1195_v24  ;;  %v1962_v34 = vmul.f32 %v8919_v26, %v12641_v25  ;;  %v13145_v17 = vld [vmem:[#allocation2 + $0x7c8] sm:$0xff]  ;;  %v11530_v24 = vld [vmem:[#allocation2 + $0x3c0] sm:$0xff] }
 0x298   :  { %v8921_v35 = vround.rtne.f32 %v1452_v20  ;;  %v942_v29 = vmax.f32 %v12648_v38, %v11523_v23  ;;  %v1197_v36 = vmin.f32 %v12644_v37, %v941_v28  ;;  %v1963_v39 = vmul.f32 %v8920_v31, %v12641_v25  ;;  %v11531_v28 = vld [vmem:[#allocation2 + $0x3c8] sm:$0xff] }
 0x299   :  { %9527 = vxpose.xlu0.b32.cont [11/16] %v9526_v30, 128  ;;  %v1454_v40 = vmul.f32 %v12672_v63, %v1196_v32  ;;  %v8922_v43 = vround.rtne.f32 %v1453_v33  ;;  %v943_v47 = vmax.f32 %v12648_v38, %v11524_v45  ;;  %v10424_v8 = vpack.i.bf16 %v1962_v34, %v1961_v27  ;;  %v13155_v33 = vpop.xlane.xlu1 %4284  ;;  %v13162_v45 = vld [vmem:[#allocation2 + $0x7d0] sm:$0xff] }
 0x29a   :  { %v1964_v11 = vmul.f32 %v8921_v35, %v12641_v25  ;;  %v1198_v49 = vmin.f32 %v12644_v37, %v942_v29  ;;  %v1455_v3 = vmul.f32 %v12672_v63, %v1197_v36  ;;  %v944_v54 = vmax.f32 %v12648_v38, %v11525_v12  ;;  %v11532_v35 = vld [vmem:[#allocation2 + $0x3d0] sm:$0xff]  ;;  %17349 = vst [vmem:[#allocation8_spill] sm:$0xff] %v13162_v45 }
 0x29b   :  { %v8923_v52 = vround.rtne.f32 %v1454_v40  ;;  %v1965_v9 = vmul.f32 %v8922_v43, %v12641_v25  ;;  %v1199_v55 = vmin.f32 %v12644_v37, %v943_v47  ;;  %10425 = vxpose.xlu1.b32.cont [12/16] %v10424_v8, 128  ;;  %v945_v60 = vmax.f32 %v12648_v38, %v11526_v59  ;;  %v11533_v40 = vld [vmem:[#allocation2 + $0x3d8] sm:$0xff] }
 0x29c   :  { %v9528_v56 = vpack.i.bf16 %v1964_v11, %v1963_v39  ;;  %v1456_v57 = vmul.f32 %v12672_v63, %v1198_v49  ;;  %v8924_v58 = vround.rtne.f32 %v1455_v3  ;;  %v1200_v62 = vmin.f32 %v12644_v37, %v944_v54  ;;  %v13172_v54 = vld [vmem:[#allocation2 + $0x7d8] sm:$0xff] }
 0x29d   :  { %v1966_v61 = vmul.f32 %v8923_v52, %v12641_v25  ;;  %v1457_v2 = vmul.f32 %v12672_v63, %v1199_v55  ;;  %v946_v4 = vmax.f32 %v12648_v38, %v11527_v0  ;;  %v1201_v5 = vmin.f32 %v12644_v37, %v945_v60  ;;  %17350 = vst [vmem:[#allocation9_spill] sm:$0xff] %v13172_v54  ;;  %v11567_v55 = vld [vmem:[#allocation2 + $0x4b8] sm:$0xff] }
 0x29e   :  { %9529 = vxpose.xlu0.b32.cont [12/16] %v9528_v56, 128  ;;  %v8925_v1 = vround.rtne.f32 %v1456_v57  ;;  %v1967_v10 = vmul.f32 %v8924_v58, %v12641_v25  ;;  %v1458_v16 = vmul.f32 %v12672_v63, %v1200_v62  ;;  %v947_v26 = vmax.f32 %v12648_v38, %v11530_v24  ;;  %v11536_v58 = vld [vmem:[#allocation2 + $0x3e0] sm:$0xff] }
 0x29f   :  { %v10426_v14 = vpack.i.bf16 %v1966_v61, %v1965_v9  ;;  %v8926_v13 = vround.rtne.f32 %v1457_v2  ;;  %v1202_v15 = vmin.f32 %v12644_v37, %v946_v4  ;;  %v1459_v22 = vmul.f32 %v12672_v63, %v1201_v5  ;;  %v11537_v2 = vld [vmem:[#allocation2 + $0x3e8] sm:$0xff]  ;;  %v11538_v4 = vld [vmem:[#allocation2 + $0x7e0] sm:$0xff] }
 0x2a0   :  { %v1968_v19 = vmul.f32 %v8925_v1, %v12641_v25  ;;  %v8927_v27 = vround.rtne.f32 %v1458_v16  ;;  %v948_v30 = vmax.f32 %v12648_v38, %v11531_v28  ;;  %v1203_v34 = vmin.f32 %v12644_v37, %v947_v26  ;;  %v11541_v28 = vld [vmem:[#allocation2 + $0x400] sm:$0xff] }
 0x2a1   :  { %10427 = vxpose.xlu1.b32.cont [13/16] %v10426_v14, 128  ;;  %v1969_v20 = vmul.f32 %v8926_v13, %v12641_v25  ;;  %v1460_v21 = vmul.f32 %v12672_v63, %v1202_v15  ;;  %v8928_v32 = vround.rtne.f32 %v1459_v22  ;;  %v949_v23 = vmax.f32 %v12648_v38, %v11532_v35  ;;  %v13182_v14 = vpop.xlane.xlu1 %7179  ;;  %v11539_v22 = vld [vmem:[#allocation2 + $0x3f0] sm:$0xff] }
 0x2a2   :  { %v9530_v31 = vpack.i.bf16 %v1968_v19, %v1967_v10  ;;  %v1970_v29 = vmul.f32 %v8927_v27, %v12641_v25  ;;  %v1204_v39 = vmin.f32 %v12644_v37, %v948_v30  ;;  %v950_v43 = vmax.f32 %v12648_v38, %v11533_v40 }
 0x2a3   :  { %v8929_v36 = vround.rtne.f32 %v1460_v21  ;;  %v1971_v8 = vmul.f32 %v8928_v32, %v12641_v25  ;;  %v1461_v11 = vmul.f32 %v12672_v63, %v1203_v34  ;;  %v1205_v49 = vmin.f32 %v12644_v37, %v949_v23 }
 0x2a4   :  { %9531 = vxpose.xlu0.b32.cont [13/16] %v9530_v31, 128  ;;  %v10428_v3 = vpack.i.bf16 %v1970_v29, %v1969_v20  ;;  %v1462_v9 = vmul.f32 %v12672_v63, %v1204_v39  ;;  %v1206_v12 = vmin.f32 %v12644_v37, %v950_v43  ;;  %v951_v59 = vmax.f32 %v12648_v38, %v11536_v58  ;;  %v11540_v20 = vld [vmem:[#allocation2 + $0x3f8] sm:$0xff]  ;;  %v11543_v43 = vld [vmem:[#allocation2 + $0x7e8] sm:$0xff] }
 0x2a5   :  { %v1972_v52 = vmul.f32 %v8929_v36, %v12641_v25  ;;  %v8930_v56 = vround.rtne.f32 %v1461_v11  ;;  %v1463_v57 = vmul.f32 %v12672_v63, %v1205_v49  ;;  %v952_v0 = vmax.f32 %v12648_v38, %v11537_v2  ;;  %v11542_v36 = vld [vmem:[#allocation2 + $0x408] sm:$0xff] }
 0x2a6   :  { %10429 = vxpose.xlu1.b32.cont [14/16] %v10428_v3, 128  ;;  %v8931_v61 = vround.rtne.f32 %v1462_v9  ;;  %v1464_v62 = vmul.f32 %v12672_v63, %v1206_v12  ;;  %v1079_v1 = vmax.f32 %v12648_v38, %v11538_v4  ;;  %v1207_v16 = vmin.f32 %v12644_v37, %v951_v59  ;;  %v13209_v4 = vpop.trf.xlu0 }
 0x2a7   :  { %v9532_v60 = vpack.i.bf16 %v1972_v52, %v1971_v8  ;;  %v1973_v10 = vmul.f32 %v8930_v56, %v12641_v25  ;;  %v8932_v5 = vround.rtne.f32 %v1463_v57  ;;  %v1208_v19 = vmin.f32 %v12644_v37, %v952_v0  ;;  %v13204_v57 = vpop.trf.xlu1 }
 0x2a8   :  { %v1974_v13 = vmul.f32 %v8931_v61, %v12641_v25  ;;  %v8933_v15 = vround.rtne.f32 %v1464_v62  ;;  %v953_v24 = vmax.f32 %v12648_v38, %v11539_v22  ;;  %v1465_v27 = vmul.f32 %v12672_v63, %v1207_v16  ;;  %v11545_v16 = vld [vmem:[#allocation2 + $0x410] sm:$0xff]  ;;  %v11547_v22 = vld [vmem:[#allocation2 + $0x7f8] sm:$0xff] }
 0x2a9   :  { %9533 = vxpose.xlu0.b32.cont [14/16] %v9532_v60, 128  ;;  %v1975_v26 = vmul.f32 %v8932_v5, %v12641_v25  ;;  %v954_v21 = vmax.f32 %v12648_v38, %v11540_v20  ;;  %v955_v30 = vmax.f32 %v12648_v38, %v11541_v28  ;;  %v1466_v34 = vmul.f32 %v12672_v63, %v1208_v19  ;;  %v11544_v60 = vld [vmem:[#allocation2 + $0x7f0] sm:$0xff] }
 0x2aa   :  { %v10430_v31 = vpack.i.bf16 %v1974_v13, %v1973_v10  ;;  %v1976_v32 = vmul.f32 %v8933_v15, %v12641_v25  ;;  %v1209_v35 = vmin.f32 %v12644_v37, %v953_v24  ;;  %v8934_v23 = vround.rtne.f32 %v1465_v27  ;;  %v11546_v15 = vld [vmem:[#allocation2 + $0x418] sm:$0xff] }
 0x2ab   :  { %v1210_v29 = vmin.f32 %v12644_v37, %v954_v21  ;;  %v956_v39 = vmax.f32 %v12648_v38, %v11542_v36  ;;  %v1211_v40 = vmin.f32 %v12644_v37, %v955_v30  ;;  %v1080_v8 = vmax.f32 %v12648_v38, %v11543_v43  ;;  %v13230_v43 = vpop.trf.xlu1 }
 0x2ac   :  { %10431 = vxpose.xlu1.b32.cont [15/16] %v10430_v31, 128  ;;  %v9534_v11 = vpack.i.bf16 %v1976_v32, %v1975_v26  ;;  %v8935_v49 = vround.rtne.f32 %v1466_v34  ;;  %v1467_v3 = vmul.f32 %v12672_v63, %v1209_v35  ;;  %v1977_v52 = vmul.f32 %v8934_v23, %v12641_v25  ;;  %v11548_v34 = vld [vmem:[#allocation2 + $0x420] sm:$0xff] }
 0x2ad   :  { %v1468_v9 = vmul.f32 %v12672_v63, %v1210_v29  ;;  %v1212_v12 = vmin.f32 %v12644_v37, %v956_v39  ;;  %v1469_v56 = vmul.f32 %v12672_v63, %v1211_v40  ;;  %v1081_v61 = vmax.f32 %v12648_v38, %v11544_v60  ;;  %v11549_v39 = vld [vmem:[#allocation2 + $0x428] sm:$0xff]  ;;  %v11551_v60 = vld [vmem:[#allocation2 + $0x438] sm:$0xff] }
 0x2ae   :  { %9535 = vxpose.xlu0.b32.cont [15/16] %v9534_v11, 128  ;;  %v1978_v58 = vmul.f32 %v8935_v49, %v12641_v25  ;;  %v8936_v59 = vround.rtne.f32 %v1467_v3  ;;  %v957_v13 = vmax.f32 %v12648_v38, %v11545_v16  ;;  %v958_v19 = vmax.f32 %v12648_v38, %v11546_v15  ;;  %v13233_v49 = vpop.trf.xlu0 }
 0x2af   :  { %v8937_v62 = vround.rtne.f32 %v1468_v9  ;;  %v1470_v2 = vmul.f32 %v12672_v63, %v1212_v12  ;;  %v8938_v0 = vround.rtne.f32 %v1469_v56  ;;  %v1082_v24 = vmax.f32 %v12648_v38, %v11547_v22  ;;  %v11552_v22 = vld [vmem:[#allocation2 + $0x440] sm:$0xff] }
 0x2b0   :  { %v10432_v10 = vpack.i.bf16 %v1978_v58, %v1977_v52  ;;  %v1979_v5 = vmul.f32 %v8936_v59, %v12641_v25  ;;  %v1213_v21 = vmin.f32 %v12644_v37, %v957_v13  ;;  %v1214_v28 = vmin.f32 %v12644_v37, %v958_v19  ;;  %v11550_v58 = vld [vmem:[#allocation2 + $0x430] sm:$0xff] }
 0x2b1   :  { %v1980_v26 = vmul.f32 %v8937_v62, %v12641_v25  ;;  %v8939_v27 = vround.rtne.f32 %v1470_v2  ;;  %v1981_v20 = vmul.f32 %v8938_v0, %v12641_v25  ;;  %v13220_v30 = vmin.f32 %v12644_v37, %v1079_v1 }
 0x2b2   :  { %10433 = vxpose.xlu1.b32.end [16/16] %v10432_v10, 128  ;;  %v959_v35 = vmax.f32 %v12648_v38, %v11548_v34  ;;  %v13225_v23 = vmin.f32 %v12644_v37, %v1080_v8  ;;  %v1471_v29 = vmul.f32 %v12672_v63, %v1213_v21  ;;  %v1472_v36 = vmul.f32 %v12672_v63, %v1214_v28  ;;  %v11553_v21 = vld [vmem:[#allocation2 + $0x448] sm:$0xff] }
 0x2b3   :  { %17351 = vst [vmem:[#allocation10_spill] sm:$0xff] %v13220_v30  ;;  %v9536_v31 = vpack.i.bf16 %v1980_v26, %v1979_v5  ;;  %v1982_v32 = vmul.f32 %v8939_v27, %v12641_v25  ;;  %v960_v40 = vmax.f32 %v12648_v38, %v11549_v39  ;;  %v13236_v3 = vmin.f32 %v12644_v37, %v1081_v61  ;;  %v11608_v30 = vld [vmem:[#allocation2 + $0x600] sm:$0xff] }
 0x2b4   :  { %17352 = vst [vmem:[#allocation11_spill] sm:$0xff] %v13225_v23  ;;  %v1215_v11 = vmin.f32 %v12644_v37, %v959_v35  ;;  %v8940_v8 = vround.rtne.f32 %v1471_v29  ;;  %v8941_v52 = vround.rtne.f32 %v1472_v36  ;;  %v13240_v12 = vmin.f32 %v12644_v37, %v1082_v24  ;;  %v11607_v23 = vld [vmem:[#allocation2 + $0x5f8] sm:$0xff] }
 0x2b5   :  { %9537 = vxpose.xlu0.b32.end [16/16] %v9536_v31, 128  ;;  %v10514_v1 = vpack.i.bf16 %v1982_v32, %v1981_v20  ;;  %17353 = vst [vmem:[#allocation12_spill] sm:$0xff] %v13236_v3  ;;  %v1216_v9 = vmin.f32 %v12644_v37, %v960_v40  ;;  %v961_v59 = vmax.f32 %v12648_v38, %v11550_v58  ;;  %v7181_v13 = vrot.slane %v13182_v14, 4  ;;  %v13256_v31 = vpop.trf.xlu1  ;;  %v13262_v40 = vpop.trf.xlu0 }
 0x2b6   :  { %17354 = vst [vmem:[#allocation13_spill] sm:$0xff] %v13240_v12  ;;  %v1473_v56 = vmul.f32 %v12672_v63, %v1215_v11  ;;  %v962_v62 = vmax.f32 %v12648_v38, %v11551_v60  ;;  %v1983_v2 = vmul.f32 %v8940_v8, %v12641_v25  ;;  %v1984_v61 = vmul.f32 %v8941_v52, %v12641_v25  ;;  %v11554_v52 = vld [vmem:[#allocation2 + $0x450] sm:$0xff]  ;;  %v11555_v60 = vld [vmem:[#allocation2 + $0x458] sm:$0xff] }
 0x2b7   :  { %10515 = vxpose.xlu1.b32.start [1/16] %v10514_v1, 128  ;;  %v1474_v0 = vmul.f32 %v12672_v63, %v1216_v9  ;;  %v1217_v5 = vmin.f32 %v12644_v37, %v961_v59  ;;  %v963_v24 = vmax.f32 %v12648_v38, %v11552_v22  ;;  %v964_v28 = vmax.f32 %v12648_v38, %v11553_v21 }
 0x2b8   :  { %v8942_v10 = vround.rtne.f32 %v1473_v56  ;;  %v1218_v16 = vmin.f32 %v12644_v37, %v962_v62  ;;  %v9618_v15 = vpack.i.bf16 %v1984_v61, %v1983_v2  ;;  %v4286_v32 = vrot.slane %v13155_v33, 4 }
 0x2b9   :  { %v8943_v19 = vround.rtne.f32 %v1474_v0  ;;  %v1475_v27 = vmul.f32 %v12672_v63, %v1217_v5  ;;  %v1219_v35 = vmin.f32 %v12644_v37, %v963_v24  ;;  %v1220_v39 = vmin.f32 %v12644_v37, %v964_v28  ;;  %v13286_v21 = vpop.trf.xlu1 }
 0x2ba   :  { %v1985_v26 = vmul.f32 %v8942_v10, %v12641_v25  ;;  %v1476_v20 = vmul.f32 %v12672_v63, %v1218_v16  ;;  %9619 = vxpose.xlu0.b32.start [1/16] %v9618_v15, 128  ;;  %v13265_v1 = vmax.f32 %v13182_v14, %v7181_v13  ;;  %v965_v9 = vmax.f32 %v12648_v38, %v11554_v52  ;;  %v11558_v52 = vld [vmem:[#allocation2 + $0x470] sm:$0xff] }
 0x2bb   :  { %v1986_v34 = vmul.f32 %v8943_v19, %v12641_v25  ;;  %v8944_v29 = vround.rtne.f32 %v1475_v27  ;;  %v1477_v8 = vmul.f32 %v12672_v63, %v1219_v35  ;;  %v1478_v59 = vmul.f32 %v12672_v63, %v1220_v39  ;;  %v11556_v19 = vld [vmem:[#allocation2 + $0x460] sm:$0xff]  ;;  %v11557_v27 = vld [vmem:[#allocation2 + $0x468] sm:$0xff] }
 0x2bc   :  { %v8945_v36 = vround.rtne.f32 %v1476_v20  ;;  %v966_v62 = vmax.f32 %v12648_v38, %v11555_v60  ;;  %v13274_v2 = vmax.f32 %v13155_v33, %v4286_v32  ;;  %v1221_v61 = vmin.f32 %v12644_v37, %v965_v9 }
 0x2bd   :  { %v10516_v11 = vpack.i.bf16 %v1986_v34, %v1985_v26  ;;  %v1987_v56 = vmul.f32 %v8944_v29, %v12641_v25  ;;  %v8946_v14 = vround.rtne.f32 %v1477_v8  ;;  %v8947_v10 = vround.rtne.f32 %v1478_v59  ;;  %v13289_v34 = vpop.trf.xlu0 }
 0x2be   :  { %v1988_v58 = vmul.f32 %v8945_v36, %v12641_v25  ;;  %v1222_v5 = vmin.f32 %v12644_v37, %v966_v62  ;;  %v1479_v15 = vmul.f32 %v12672_v63, %v1221_v61  ;;  %v967_v22 = vmax.f32 %v12648_v38, %v11556_v19 }
 0x2bf   :  { %10517 = vxpose.xlu1.b32.cont [2/16] %v10516_v11, 128  ;;  %v1989_v13 = vmul.f32 %v8946_v14, %v12641_v25  ;;  %v1990_v24 = vmul.f32 %v8947_v10, %v12641_v25  ;;  %v968_v20 = vmax.f32 %v12648_v38, %v11557_v27  ;;  %v969_v9 = vmax.f32 %v12648_v38, %v11558_v52  ;;  %v11561_v27 = vld [vmem:[#allocation2 + $0x488] sm:$0xff] }
 0x2c0   :  { %v9620_v0 = vpack.i.bf16 %v1988_v58, %v1987_v56  ;;  %v1480_v26 = vmul.f32 %v12672_v63, %v1222_v5  ;;  %v8948_v28 = vround.rtne.f32 %v1479_v15  ;;  %v1223_v32 = vmin.f32 %v12644_v37, %v967_v22  ;;  %v11559_v56 = vld [vmem:[#allocation2 + $0x478] sm:$0xff]  ;;  %v11560_v15 = vld [vmem:[#allocation2 + $0x480] sm:$0xff] }
 0x2c1   :  { %v10518_v29 = vpack.i.bf16 %v1990_v24, %v1989_v13  ;;  %v1224_v39 = vmin.f32 %v12644_v37, %v968_v20  ;;  %v970_v58 = vmax.f32 %v12648_v38, %v11559_v56  ;;  %v1225_v61 = vmin.f32 %v12644_v37, %v969_v9  ;;  %v13314_v52 = vpop.trf.xlu0 }
 0x2c2   :  { %9621 = vxpose.xlu0.b32.cont [2/16] %v9620_v0, 128  ;;  %v8949_v36 = vround.rtne.f32 %v1480_v26  ;;  %v1991_v11 = vmul.f32 %v8948_v28, %v12641_v25  ;;  %v1481_v8 = vmul.f32 %v12672_v63, %v1223_v32  ;;  %v971_v19 = vmax.f32 %v12648_v38, %v11560_v15  ;;  %v13308_v28 = vpop.trf.xlu1  ;;  %v11590_v32 = vld [vmem:[#allocation2 + $0x570] sm:$0xff] }
 0x2c3   :  { %10519 = vxpose.xlu1.b32.cont [3/16] %v10518_v29, 128  ;;  %v1482_v62 = vmul.f32 %v12672_v63, %v1224_v39  ;;  %v1226_v0 = vmin.f32 %v12644_v37, %v970_v58  ;;  %v1483_v24 = vmul.f32 %v12672_v63, %v1225_v61  ;;  %v972_v20 = vmax.f32 %v12648_v38, %v11561_v27 }
 0x2c4   :  { %v1992_v60 = vmul.f32 %v8949_v36, %v12641_v25  ;;  %v8950_v14 = vround.rtne.f32 %v1481_v8  ;;  %v1227_v36 = vmin.f32 %v12644_v37, %v971_v19 }
 0x2c5   :  { %v8951_v13 = vround.rtne.f32 %v1482_v62  ;;  %v1484_v26 = vmul.f32 %v12672_v63, %v1226_v0  ;;  %v8952_v39 = vround.rtne.f32 %v1483_v24  ;;  %v1228_v8 = vmin.f32 %v12644_v37, %v972_v20  ;;  %v11591_v20 = vld [vmem:[#allocation2 + $0x578] sm:$0xff] }
 0x2c6   :  { %v9622_v5 = vpack.i.bf16 %v1992_v60, %v1991_v11  ;;  %v1993_v22 = vmul.f32 %v8950_v14, %v12641_v25  ;;  %v1485_v58 = vmul.f32 %v12672_v63, %v1227_v36  ;;  %v11562_v60 = vld [vmem:[#allocation2 + $0x490] sm:$0xff] }
 0x2c7   :  { %v1994_v29 = vmul.f32 %v8951_v13, %v12641_v25  ;;  %v8953_v11 = vround.rtne.f32 %v1484_v26  ;;  %v973_v62 = vmax.f32 %v12648_v38, %v11562_v60  ;;  %v1995_v14 = vmul.f32 %v8952_v39, %v12641_v25  ;;  %v11564_v39 = vld [vmem:[#allocation2 + $0x4a0] sm:$0xff]  ;;  %v11565_v60 = vld [vmem:[#allocation2 + $0x4a8] sm:$0xff] }
 0x2c8   :  { %9623 = vxpose.xlu0.b32.cont [3/16] %v9622_v5, 128  ;;  %v1486_v0 = vmul.f32 %v12672_v63, %v1228_v8  ;;  %v11563_v5 = vld [vmem:[#allocation2 + $0x498] sm:$0xff]  ;;  %v8954_v19 = vround.rtne.f32 %v1485_v58 }
 0x2c9   :  { %v10520_v56 = vpack.i.bf16 %v1994_v29, %v1993_v22  ;;  %v1996_v61 = vmul.f32 %v8953_v11, %v12641_v25  ;;  %v974_v13 = vmax.f32 %v12648_v38, %v11563_v5  ;;  %v1229_v22 = vmin.f32 %v12644_v37, %v973_v62  ;;  %v13337_v5 = vpop.trf.xlu0 }
 0x2ca   :  { %v8955_v26 = vround.rtne.f32 %v1486_v0  ;;  %v1997_v29 = vmul.f32 %v8954_v19, %v12641_v25  ;;  %v975_v11 = vmax.f32 %v12648_v38, %v11564_v39  ;;  %v976_v62 = vmax.f32 %v12648_v38, %v11565_v60  ;;  %v11566_v39 = vld [vmem:[#allocation2 + $0x4b0] sm:$0xff] }
 0x2cb   :  { %10521 = vxpose.xlu1.b32.cont [4/16] %v10520_v56, 128  ;;  %v9624_v24 = vpack.i.bf16 %v1996_v61, %v1995_v14  ;;  %v1230_v27 = vmin.f32 %v12644_v37, %v974_v13  ;;  %v1487_v36 = vmul.f32 %v12672_v63, %v1229_v22  ;;  %v13334_v14 = vpop.trf.xlu1  ;;  %v977_v60 = vmax.f32 %v12648_v38, %v11566_v39  ;;  %v11568_v39 = vld [vmem:[#allocation2 + $0x4c0] sm:$0xff] }
 0x2cc   :  { %v1998_v56 = vmul.f32 %v8955_v26, %v12641_v25  ;;  %v1231_v0 = vmin.f32 %v12644_v37, %v975_v11  ;;  %v979_v7 = vmax.f32 %v12648_v38, %v11568_v39 }
 0x2cd   :  { %9625 = vxpose.xlu0.b32.cont [4/16] %v9624_v24, 128  ;;  %v1488_v58 = vmul.f32 %v12672_v63, %v1230_v27  ;;  %v8956_v61 = vround.rtne.f32 %v1487_v36  ;;  %v1232_v24 = vmin.f32 %v12644_v37, %v976_v62  ;;  %v978_v36 = vmax.f32 %v12648_v38, %v11567_v55  ;;  %v13362_v39 = vpop.trf.xlu0 }
 0x2ce   :  { %v10522_v19 = vpack.i.bf16 %v1998_v56, %v1997_v29  ;;  %v1489_v27 = vmul.f32 %v12672_v63, %v1231_v0 }
 0x2cf   :  { %v8957_v22 = vround.rtne.f32 %v1488_v58  ;;  %v1999_v26 = vmul.f32 %v8956_v61, %v12641_v25  ;;  %v1490_v29 = vmul.f32 %v12672_v63, %v1232_v24  ;;  %v1233_v58 = vmin.f32 %v12644_v37, %v977_v60 }
 0x2d0   :  { %10523 = vxpose.xlu1.b32.cont [5/16] %v10522_v19, 128  ;;  %v8958_v56 = vround.rtne.f32 %v1489_v27  ;;  %v1234_v62 = vmin.f32 %v12644_v37, %v978_v36  ;;  %v980_v24 = vmax.f32 %v12648_v38, %v11569_v53  ;;  %v13356_v27 = vpop.trf.xlu1 }
 0x2d1   :  { %v2000_v47 = vmul.f32 %v8957_v22, %v12641_v25  ;;  %v8959_v18 = vround.rtne.f32 %v1490_v29  ;;  %v1491_v19 = vmul.f32 %v12672_v63, %v1233_v58 }
 0x2d2   :  { %v2001_v55 = vmul.f32 %v8958_v56, %v12641_v25  ;;  %v1492_v22 = vmul.f32 %v12672_v63, %v1234_v62  ;;  %v1236_v56 = vmin.f32 %v12644_v37, %v980_v24 }
 0x2d3   :  { %v9626_v0 = vpack.i.bf16 %v2000_v47, %v1999_v26  ;;  %v2002_v47 = vmul.f32 %v8959_v18, %v12641_v25  ;;  %v1235_v26 = vmin.f32 %v12644_v37, %v979_v7  ;;  %v8960_v36 = vround.rtne.f32 %v1491_v19  ;;  %v11571_v19 = vld [vmem:[#allocation2 + $0x4d8] sm:$0xff] }
 0x2d4   :  { %v8961_v29 = vround.rtne.f32 %v1492_v22  ;;  %v1494_v7 = vmul.f32 %v12672_v63, %v1236_v56  ;;  %v982_v22 = vmax.f32 %v12648_v38, %v11571_v19  ;;  %v11572_v56 = vld [vmem:[#allocation2 + $0x4e0] sm:$0xff]  ;;  %v11574_v19 = vld [vmem:[#allocation2 + $0x4f0] sm:$0xff] }
 0x2d5   :  { %9627 = vxpose.xlu0.b32.cont [5/16] %v9626_v0, 128  ;;  %v10524_v62 = vpack.i.bf16 %v2002_v47, %v2001_v55  ;;  %v1493_v53 = vmul.f32 %v12672_v63, %v1235_v26  ;;  %v2003_v0 = vmul.f32 %v8960_v36, %v12641_v25  ;;  %v1237_v55 = vmin.f32 %v12644_v37, %v981_v42 }
 0x2d6   :  { %v2004_v18 = vmul.f32 %v8961_v29, %v12641_v25  ;;  %v8963_v26 = vround.rtne.f32 %v1494_v7  ;;  %v1238_v16 = vmin.f32 %v12644_v37, %v982_v22  ;;  %v983_v58 = vmax.f32 %v12648_v38, %v11572_v56  ;;  %v13385_v22 = vpop.trf.xlu0 }
 0x2d7   :  { %10525 = vxpose.xlu1.b32.cont [6/16] %v10524_v62, 128  ;;  %v8962_v41 = vround.rtne.f32 %v1493_v53  ;;  %v1495_v29 = vmul.f32 %v12672_v63, %v1237_v55  ;;  %v11573_v53 = vld [vmem:[#allocation2 + $0x4e8] sm:$0xff] }
 0x2d8   :  { %v9628_v47 = vpack.i.bf16 %v2004_v18, %v2003_v0  ;;  %v2006_v62 = vmul.f32 %v8963_v26, %v12641_v25  ;;  %v1496_v42 = vmul.f32 %v12672_v63, %v1238_v16  ;;  %v984_v0 = vmax.f32 %v12648_v38, %v11573_v53  ;;  %v13382_v18 = vpop.trf.xlu1 }
 0x2d9   :  { %v2005_v36 = vmul.f32 %v8962_v41, %v12641_v25  ;;  %v8964_v7 = vround.rtne.f32 %v1495_v29  ;;  %v1239_v41 = vmin.f32 %v12644_v37, %v983_v58  ;;  %v985_v53 = vmax.f32 %v12648_v38, %v11574_v19  ;;  %v11576_v19 = vld [vmem:[#allocation2 + $0x500] sm:$0xff]  ;;  %v11577_v58 = vld [vmem:[#allocation2 + $0x508] sm:$0xff] }
 0x2da   :  { %9629 = vxpose.xlu0.b32.cont [6/16] %v9628_v47, 128  ;;  %v8965_v60 = vround.rtne.f32 %v1496_v42  ;;  %v1240_v47 = vmin.f32 %v12644_v37, %v984_v0  ;;  %v986_v29 = vmax.f32 %v12648_v38, %v11575_v51  ;;  %v987_v13 = vmax.f32 %v12648_v38, %v11576_v19  ;;  %v13410_v19 = vpop.trf.xlu0 }
 0x2db   :  { %v10526_v56 = vpack.i.bf16 %v2006_v62, %v2005_v36  ;;  %v2007_v26 = vmul.f32 %v8964_v7, %v12641_v25  ;;  %v1497_v16 = vmul.f32 %v12672_v63, %v1239_v41  ;;  %v1241_v42 = vmin.f32 %v12644_v37, %v985_v53  ;;  %v11578_v7 = vld [vmem:[#allocation2 + $0x510] sm:$0xff] }
 0x2dc   :  { %v2008_v24 = vmul.f32 %v8965_v60, %v12641_v25  ;;  %v1498_v36 = vmul.f32 %v12672_v63, %v1240_v47  ;;  %v1242_v0 = vmin.f32 %v12644_v37, %v986_v29  ;;  %v988_v47 = vmax.f32 %v12648_v38, %v11577_v58 }
 0x2dd   :  { %10527 = vxpose.xlu1.b32.cont [7/16] %v10526_v56, 128  ;;  %v8966_v62 = vround.rtne.f32 %v1497_v16  ;;  %v1499_v56 = vmul.f32 %v12672_v63, %v1241_v42  ;;  %v13404_v16 = vpop.trf.xlu1  ;;  %v989_v8 = vmax.f32 %v12648_v38, %v11578_v7 }
 0x2de   :  { %v9630_v41 = vpack.i.bf16 %v2008_v24, %v2007_v26  ;;  %v8967_v55 = vround.rtne.f32 %v1498_v36  ;;  %v1500_v60 = vmul.f32 %v12672_v63, %v1242_v0  ;;  %v1243_v26 = vmin.f32 %v12644_v37, %v987_v13 }
 0x2df   :  { %v2009_v51 = vmul.f32 %v8966_v62, %v12641_v25  ;;  %v8968_v29 = vround.rtne.f32 %v1499_v56  ;;  %v1244_v62 = vmin.f32 %v12644_v37, %v988_v47  ;;  %v11579_v56 = vld [vmem:[#allocation2 + $0x518] sm:$0xff] }
 0x2e0   :  { %9631 = vxpose.xlu0.b32.cont [7/16] %v9630_v41, 128  ;;  %v2010_v24 = vmul.f32 %v8967_v55, %v12641_v25  ;;  %v8969_v36 = vround.rtne.f32 %v1500_v60  ;;  %v1501_v58 = vmul.f32 %v12672_v63, %v1243_v26  ;;  %v990_v60 = vmax.f32 %v12648_v38, %v11579_v56 }
 0x2e1   :  { %v2011_v41 = vmul.f32 %v8968_v29, %v12641_v25  ;;  %v1502_v13 = vmul.f32 %v12672_v63, %v1244_v62  ;;  %v4288_v62 = vrot.slane %v13274_v2, 2 }
 0x2e2   :  { %v10528_v0 = vpack.i.bf16 %v2010_v24, %v2009_v51  ;;  %v2012_v55 = vmul.f32 %v8969_v36, %v12641_v25  ;;  %v8970_v53 = vround.rtne.f32 %v1501_v58  ;;  %v1245_v51 = vmin.f32 %v12644_v37, %v989_v8  ;;  %v11580_v58 = vld [vmem:[#allocation2 + $0x520] sm:$0xff] }
 0x2e3   :  { %v8971_v26 = vround.rtne.f32 %v1502_v13  ;;  %v1246_v42 = vmin.f32 %v12644_v37, %v990_v60  ;;  %v991_v8 = vmax.f32 %v12648_v38, %v11580_v58  ;;  %v13430_v13 = vpop.trf.xlu1 }
 0x2e4   :  { %10529 = vxpose.xlu1.b32.cont [8/16] %v10528_v0, 128  ;;  %v9632_v24 = vpack.i.bf16 %v2012_v55, %v2011_v41  ;;  %v2013_v29 = vmul.f32 %v8970_v53, %v12641_v25  ;;  %v1503_v36 = vmul.f32 %v12672_v63, %v1245_v51  ;;  %v11581_v41 = vld [vmem:[#allocation2 + $0x528] sm:$0xff]  ;;  %v4289_v51 = vmax.f32 %v13274_v2, %v4288_v62 }
 0x2e5   :  { %v2014_v56 = vmul.f32 %v8971_v26, %v12641_v25  ;;  %v1504_v0 = vmul.f32 %v12672_v63, %v1246_v42  ;;  %v992_v55 = vmax.f32 %v12648_v38, %v11581_v41  ;;  %v13436_v42 = vpop.trf.xlu0 }
 0x2e6   :  { %9633 = vxpose.xlu0.b32.cont [8/16] %v9632_v24, 128  ;;  %v8972_v53 = vround.rtne.f32 %v1503_v36  ;;  %v1247_v24 = vmin.f32 %v12644_v37, %v991_v8  ;;  %v4290_v41 = vrot.slane %v4289_v51, 1  ;;  %v11583_v8 = vld [vmem:[#allocation2 + $0x538] sm:$0xff] }
 0x2e7   :  { %v10530_v7 = vpack.i.bf16 %v2014_v56, %v2013_v29  ;;  %v8973_v47 = vround.rtne.f32 %v1504_v0  ;;  %v1248_v26 = vmin.f32 %v12644_v37, %v992_v55  ;;  %v11582_v29 = vld [vmem:[#allocation2 + $0x530] sm:$0xff]  ;;  %v994_v55 = vmax.f32 %v12648_v38, %v11583_v8 }
 0x2e8   :  { %v2015_v61 = vmul.f32 %v8972_v53, %v12641_v25  ;;  %v1505_v36 = vmul.f32 %v12672_v63, %v1247_v24  ;;  %v993_v62 = vmax.f32 %v12648_v38, %v11582_v29  ;;  %v4291_v0 = vmax.f32 %v4289_v51, %v4290_v41 }
 0x2e9   :  { %10531 = vxpose.xlu1.b32.cont [9/16] %v10530_v7, 128  ;;  %v2016_v11 = vmul.f32 %v8973_v47, %v12641_v25  ;;  %v1506_v2 = vmul.f32 %v12672_v63, %v1248_v26  ;;  %v1250_v24 = vmin.f32 %v12644_v37, %v994_v55  ;;  %v11584_v26 = vld [vmem:[#allocation2 + $0x540] sm:$0xff] }
 0x2ea   :  { %v8974_v60 = vround.rtne.f32 %v1505_v36  ;;  %v1249_v7 = vmin.f32 %v12644_v37, %v993_v62  ;;  %9066 = vpush %v4291_v0  ;;  %v995_v9 = vmax.f32 %v12648_v38, %v11584_v26  ;;  %v13454_v36 = vpop.trf.xlu1 }
 0x2eb   :  { %v9634_v58 = vpack.i.bf16 %v2016_v11, %v2015_v61  ;;  %v8975_v53 = vround.rtne.f32 %v1506_v2  ;;  %v11585_v11 = vld [vmem:[#allocation2 + $0x548] sm:$0xff]  ;;  %v1508_v62 = vmul.f32 %v12672_v63, %v1250_v24  ;;  %v11588_v2 = vld [vmem:[#allocation2 + $0x560] sm:$0xff] }
 0x2ec   :  { %v2017_v29 = vmul.f32 %v8974_v60, %v12641_v25  ;;  %v1507_v41 = vmul.f32 %v12672_v63, %v1249_v7  ;;  %v996_v61 = vmax.f32 %v12648_v38, %v11585_v11  ;;  %v1251_v0 = vmin.f32 %v12644_v37, %v995_v9  ;;  %v13460_v60 = vpop.trf.xlu0  ;;  %v11586_v11 = vld [vmem:[#allocation2 + $0x550] sm:$0xff] }
 0x2ed   :  { %9635 = vxpose.xlu0.b32.cont [9/16] %v9634_v58, 128  ;;  %v2018_v51 = vmul.f32 %v8975_v53, %v12641_v25  ;;  %v8977_v7 = vround.rtne.f32 %v1508_v62  ;;  %v997_v47 = vmax.f32 %v12648_v38, %v11586_v11 }
 0x2ee   :  { %v8976_v55 = vround.rtne.f32 %v1507_v41  ;;  %v1252_v58 = vmin.f32 %v12644_v37, %v996_v61  ;;  %v1509_v26 = vmul.f32 %v12672_v63, %v1251_v0 }
 0x2ef   :  { %v10532_v8 = vpack.i.bf16 %v2018_v51, %v2017_v29  ;;  %v11587_v29 = vld [vmem:[#allocation2 + $0x558] sm:$0xff]  ;;  %v2020_v41 = vmul.f32 %v8977_v7, %v12641_v25  ;;  %v1253_v62 = vmin.f32 %v12644_v37, %v997_v47  ;;  %v11589_v47 = vld [vmem:[#allocation2 + $0x568] sm:$0xff] }
 0x2f0   :  { %v2019_v24 = vmul.f32 %v8976_v55, %v12641_v25  ;;  %v1510_v9 = vmul.f32 %v12672_v63, %v1252_v58  ;;  %v998_v51 = vmax.f32 %v12648_v38, %v11587_v29  ;;  %v8978_v61 = vround.rtne.f32 %v1509_v26 }
 0x2f1   :  { %10533 = vxpose.xlu1.b32.cont [10/16] %v10532_v8, 128  ;;  %v1511_v55 = vmul.f32 %v12672_v63, %v1253_v62  ;;  %v999_v58 = vmax.f32 %v12648_v38, %v11588_v2  ;;  %v1000_v0 = vmax.f32 %v12648_v38, %v11589_v47  ;;  %v1001_v47 = vmax.f32 %v12648_v38, %v11590_v32  ;;  %v11592_v32 = vld [vmem:[#allocation2 + $0x580] sm:$0xff] }
 0x2f2   :  { %v8979_v53 = vround.rtne.f32 %v1510_v9  ;;  %v1254_v11 = vmin.f32 %v12644_v37, %v998_v51  ;;  %v9636_v56 = vpack.i.bf16 %v2020_v41, %v2019_v24  ;;  %v2021_v8 = vmul.f32 %v8978_v61, %v12641_v25  ;;  %v13480_v9 = vpop.trf.xlu1  ;;  %v13483_v41 = vpop.trf.xlu0 }
 0x2f3   :  { %v8980_v24 = vround.rtne.f32 %v1511_v55  ;;  %v1255_v51 = vmin.f32 %v12644_v37, %v999_v58  ;;  %v1256_v29 = vmin.f32 %v12644_v37, %v1000_v0  ;;  %v1257_v0 = vmin.f32 %v12644_v37, %v1001_v47  ;;  %v11593_v55 = vld [vmem:[#allocation2 + $0x588] sm:$0xff] }
 0x2f4   :  { %v2022_v7 = vmul.f32 %v8979_v53, %v12641_v25  ;;  %v1512_v26 = vmul.f32 %v12672_v63, %v1254_v11  ;;  %9637 = vxpose.xlu0.b32.cont [10/16] %v9636_v56, 128  ;;  %v1002_v56 = vmax.f32 %v12648_v38, %v11591_v20  ;;  %v1003_v15 = vmax.f32 %v12648_v38, %v11592_v32 }
 0x2f5   :  { %v2023_v53 = vmul.f32 %v8980_v24, %v12641_v25  ;;  %v1513_v11 = vmul.f32 %v12672_v63, %v1255_v51  ;;  %v11594_v24 = vld [vmem:[#allocation2 + $0x590] sm:$0xff] }
 0x2f6   :  { %v10534_v2 = vpack.i.bf16 %v2022_v7, %v2021_v8  ;;  %v8981_v62 = vround.rtne.f32 %v1512_v26  ;;  %v1514_v8 = vmul.f32 %v12672_v63, %v1256_v29  ;;  %v1258_v26 = vmin.f32 %v12644_v37, %v1002_v56  ;;  %v13508_v32 = vpop.trf.xlu0 }
 0x2f7   :  { %v8982_v7 = vround.rtne.f32 %v1513_v11  ;;  %v1004_v29 = vmax.f32 %v12648_v38, %v11593_v55  ;;  %v13502_v11 = vpop.trf.xlu1  ;;  %v1259_v56 = vmin.f32 %v12644_v37, %v1003_v15  ;;  %v1005_v35 = vmax.f32 %v12648_v38, %v11594_v24 }
 0x2f8   :  { %10535 = vxpose.xlu1.b32.cont [11/16] %v10534_v2, 128  ;;  %v2024_v58 = vmul.f32 %v8981_v62, %v12641_v25  ;;  %v8983_v61 = vround.rtne.f32 %v1514_v8  ;;  %v1515_v2 = vmul.f32 %v12672_v63, %v1257_v0  ;;  %v1516_v62 = vmul.f32 %v12672_v63, %v1258_v26 }
 0x2f9   :  { %v2025_v20 = vmul.f32 %v8982_v7, %v12641_v25  ;;  %v1260_v7 = vmin.f32 %v12644_v37, %v1004_v29  ;;  %v1517_v55 = vmul.f32 %v12672_v63, %v1259_v56  ;;  %v11599_v29 = vld [vmem:[#allocation2 + $0x5b8] sm:$0xff] }
 0x2fa   :  { %v9638_v51 = vpack.i.bf16 %v2024_v58, %v2023_v53  ;;  %v2026_v53 = vmul.f32 %v8983_v61, %v12641_v25  ;;  %v8984_v58 = vround.rtne.f32 %v1515_v2  ;;  %v8985_v8 = vround.rtne.f32 %v1516_v62  ;;  %v11595_v2 = vld [vmem:[#allocation2 + $0x598] sm:$0xff] }
 0x2fb   :  { %v1518_v15 = vmul.f32 %v12672_v63, %v1260_v7  ;;  %v1006_v62 = vmax.f32 %v12648_v38, %v11595_v2  ;;  %v8986_v47 = vround.rtne.f32 %v1517_v55  ;;  %v11596_v7 = vld [vmem:[#allocation2 + $0x5a0] sm:$0xff]  ;;  %v11597_v55 = vld [vmem:[#allocation2 + $0x5a8] sm:$0xff]  ;;  %v11598_v2 = vld [vmem:[#allocation2 + $0x5b0] sm:$0xff] }
 0x2fc   :  { %9639 = vxpose.xlu0.b32.cont [11/16] %v9638_v51, 128  ;;  %v10536_v26 = vpack.i.bf16 %v2026_v53, %v2025_v20  ;;  %v2027_v51 = vmul.f32 %v8984_v58, %v12641_v25  ;;  %v2028_v61 = vmul.f32 %v8985_v8, %v12641_v25  ;;  %v1261_v20 = vmin.f32 %v12644_v37, %v1005_v35 }
 0x2fd   :  { %v8987_v56 = vround.rtne.f32 %v1518_v15  ;;  %v1262_v0 = vmin.f32 %v12644_v37, %v1006_v62  ;;  %v2029_v58 = vmul.f32 %v8986_v47, %v12641_v25  ;;  %v1007_v33 = vmax.f32 %v12648_v38, %v11596_v7  ;;  %v13531_v62 = vpop.trf.xlu0 }
 0x2fe   :  { %10537 = vxpose.xlu1.b32.cont [12/16] %v10536_v26, 128  ;;  %v9640_v53 = vpack.i.bf16 %v2028_v61, %v2027_v51  ;;  %v1519_v8 = vmul.f32 %v12672_v63, %v1261_v20  ;;  %v1008_v51 = vmax.f32 %v12648_v38, %v11597_v55  ;;  %v13528_v61 = vpop.trf.xlu1  ;;  %v1009_v55 = vmax.f32 %v12648_v38, %v11598_v2  ;;  %v11600_v2 = vld [vmem:[#allocation2 + $0x5c0] sm:$0xff] }
 0x2ff   :  { %v2030_v26 = vmul.f32 %v8987_v56, %v12641_v25  ;;  %v1520_v35 = vmul.f32 %v12672_v63, %v1262_v0  ;;  %v1263_v47 = vmin.f32 %v12644_v37, %v1007_v33  ;;  %v1011_v59 = vmax.f32 %v12648_v38, %v11600_v2  ;;  %v11601_v33 = vld [vmem:[#allocation2 + $0x5c8] sm:$0xff] }
 0x300   :  { %9641 = vxpose.xlu0.b32.cont [12/16] %v9640_v53, 128  ;;  %v8988_v15 = vround.rtne.f32 %v1519_v8  ;;  %v1264_v53 = vmin.f32 %v12644_v37, %v1008_v51  ;;  %v1010_v8 = vmax.f32 %v12648_v38, %v11599_v29 }
 0x301   :  { %v10538_v7 = vpack.i.bf16 %v2030_v26, %v2029_v58  ;;  %v8989_v24 = vround.rtne.f32 %v1520_v35  ;;  %v1521_v0 = vmul.f32 %v12672_v63, %v1263_v47  ;;  %v1265_v35 = vmin.f32 %v12644_v37, %v1009_v55  ;;  %v13556_v2 = vpop.trf.xlu0 }
 0x302   :  { %v2031_v56 = vmul.f32 %v8988_v15, %v12641_v25  ;;  %v1522_v58 = vmul.f32 %v12672_v63, %v1264_v53  ;;  %v1266_v51 = vmin.f32 %v12644_v37, %v1010_v8  ;;  %v1012_v53 = vmax.f32 %v12648_v38, %v11601_v33  ;;  %v11602_v15 = vld [vmem:[#allocation2 + $0x5d0] sm:$0xff] }
 0x303   :  { %10539 = vxpose.xlu1.b32.cont [13/16] %v10538_v7, 128  ;;  %v2032_v10 = vmul.f32 %v8989_v24, %v12641_v25  ;;  %v8990_v26 = vround.rtne.f32 %v1521_v0  ;;  %v1523_v7 = vmul.f32 %v12672_v63, %v1265_v35  ;;  %v13550_v0 = vpop.trf.xlu1  ;;  %v1013_v12 = vmax.f32 %v12648_v38, %v11602_v15 }
 0x304   :  { %v8991_v20 = vround.rtne.f32 %v1522_v58  ;;  %v1524_v24 = vmul.f32 %v12672_v63, %v1266_v51 }
 0x305   :  { %v9642_v47 = vpack.i.bf16 %v2032_v10, %v2031_v56  ;;  %v2033_v29 = vmul.f32 %v8990_v26, %v12641_v25  ;;  %v1267_v56 = vmin.f32 %v12644_v37, %v1011_v59  ;;  %v8992_v8 = vround.rtne.f32 %v1523_v7  ;;  %v11603_v7 = vld [vmem:[#allocation2 + $0x5d8] sm:$0xff] }
 0x306   :  { %v2034_v10 = vmul.f32 %v8991_v20, %v12641_v25  ;;  %v8993_v58 = vround.rtne.f32 %v1524_v24  ;;  %v1268_v26 = vmin.f32 %v12644_v37, %v1012_v53  ;;  %v1014_v24 = vmax.f32 %v12648_v38, %v11603_v7 }
 0x307   :  { %9643 = vxpose.xlu0.b32.cont [13/16] %v9642_v47, 128  ;;  %v1525_v33 = vmul.f32 %v12672_v63, %v1267_v56  ;;  %v2035_v47 = vmul.f32 %v8992_v8, %v12641_v25  ;;  %v13572_v7 = vpop.trf.xlu1 }
 0x308   :  { %v10540_v51 = vpack.i.bf16 %v2034_v10, %v2033_v29  ;;  %v2036_v20 = vmul.f32 %v8993_v58, %v12641_v25  ;;  %v1526_v59 = vmul.f32 %v12672_v63, %v1268_v26  ;;  %v1269_v29 = vmin.f32 %v12644_v37, %v1013_v12  ;;  %v11604_v26 = vld [vmem:[#allocation2 + $0x5e0] sm:$0xff] }
 0x309   :  { %v8994_v55 = vround.rtne.f32 %v1525_v33  ;;  %v1270_v35 = vmin.f32 %v12644_v37, %v1014_v24  ;;  %v1015_v3 = vmax.f32 %v12648_v38, %v11604_v26  ;;  %v13579_v24 = vpop.trf.xlu0 }
 0x30a   :  { %10541 = vxpose.xlu1.b32.cont [14/16] %v10540_v51, 128  ;;  %v9644_v10 = vpack.i.bf16 %v2036_v20, %v2035_v47  ;;  %v8995_v56 = vround.rtne.f32 %v1526_v59  ;;  %v1527_v58 = vmul.f32 %v12672_v63, %v1269_v29  ;;  %v11605_v47 = vld [vmem:[#allocation2 + $0x5e8] sm:$0xff]  ;;  %v11606_v51 = vld [vmem:[#allocation2 + $0x5f0] sm:$0xff] }
 0x30b   :  { %v2037_v8 = vmul.f32 %v8994_v55, %v12641_v25  ;;  %v1528_v33 = vmul.f32 %v12672_v63, %v1270_v35  ;;  %v1016_v20 = vmax.f32 %v12648_v38, %v11605_v47  ;;  %v1271_v55 = vmin.f32 %v12644_v37, %v1015_v3 }
 0x30c   :  { %9645 = vxpose.xlu0.b32.cont [14/16] %v9644_v10, 128  ;;  %v2038_v12 = vmul.f32 %v8995_v56, %v12641_v25  ;;  %v8996_v59 = vround.rtne.f32 %v1527_v58  ;;  %v1017_v35 = vmax.f32 %v12648_v38, %v11606_v51  ;;  %v1018_v58 = vmax.f32 %v12648_v38, %v11607_v23 }
 0x30d   :  { %v8997_v15 = vround.rtne.f32 %v1528_v33  ;;  %v1272_v53 = vmin.f32 %v12644_v37, %v1016_v20  ;;  %v1529_v56 = vmul.f32 %v12672_v63, %v1271_v55  ;;  %v1019_v23 = vmax.f32 %v12648_v38, %v11608_v30  ;;  %v9538_v30 = vpop.trf.xlu0 }
 0x30e   :  { %v10542_v26 = vpack.i.bf16 %v2038_v12, %v2037_v8  ;;  %v2039_v10 = vmul.f32 %v8996_v59, %v12641_v25  ;;  %v1273_v33 = vmin.f32 %v12644_v37, %v1017_v35  ;;  %v1274_v20 = vmin.f32 %v12644_v37, %v1018_v58  ;;  %v10434_v59 = vpop.trf.xlu1 }
 0x30f   :  { %v2040_v47 = vmul.f32 %v8997_v15, %v12641_v25  ;;  %v1530_v8 = vmul.f32 %v12672_v63, %v1272_v53  ;;  %v8998_v12 = vround.rtne.f32 %v1529_v56  ;;  %v11609_v53 = vld [vmem:[#allocation2 + $0x608] sm:$0xff]  ;;  %v1275_v58 = vmin.f32 %v12644_v37, %v1019_v23  ;;  %v11610_v23 = vld [vmem:[#allocation2 + $0x610] sm:$0xff] }
 0x310   :  { %10543 = vxpose.xlu1.b32.cont [15/16] %v10542_v26, 128  ;;  %v1531_v26 = vmul.f32 %v12672_v63, %v1273_v33  ;;  %v1532_v15 = vmul.f32 %v12672_v63, %v1274_v20  ;;  %v1020_v56 = vmax.f32 %v12648_v38, %v11609_v53  ;;  %v10438_v55 = vunpack.i.h.bf16 %v10434_v59 }
 0x311   :  { %v9646_v29 = vpack.i.bf16 %v2040_v47, %v2039_v10  ;;  %v8999_v51 = vround.rtne.f32 %v1530_v8  ;;  %v2041_v3 = vmul.f32 %v8998_v12, %v12641_v25  ;;  %v1533_v12 = vmul.f32 %v12672_v63, %v1275_v58 }
 0x312   :  { %v9000_v10 = vround.rtne.f32 %v1531_v26  ;;  %v9001_v47 = vround.rtne.f32 %v1532_v15  ;;  %v1276_v8 = vmin.f32 %v12644_v37, %v1020_v56  ;;  %v10435_v33 = vunpack.i.l.bf16 %v10434_v59  ;;  %v11611_v59 = vld [vmem:[#allocation2 + $0x618] sm:$0xff] }
 0x313   :  { %9647 = vxpose.xlu0.b32.cont [15/16] %v9646_v29, 128  ;;  %v2042_v35 = vmul.f32 %v8999_v51, %v12641_v25  ;;  %v17355_v20 = vunpack.i.h.bf16 %v13209_v4  ;;  %v1021_v26 = vmax.f32 %v12648_v38, %v11610_v23  ;;  %v9002_v15 = vround.rtne.f32 %v1533_v12 }
 0x314   :  { %v2043_v53 = vmul.f32 %v9000_v10, %v12641_v25  ;;  %v2044_v29 = vmul.f32 %v9001_v47, %v12641_v25  ;;  %v1534_v51 = vmul.f32 %v12672_v63, %v1276_v8  ;;  %v17356_v56 = vunpack.i.l.bf16 %v13209_v4  ;;  %v10439_v8 = vpop.trf.xlu1 }
 0x315   :  { %v10544_v54 = vpack.i.bf16 %v2042_v35, %v2041_v3  ;;  %v8329_v45 = vpack.c.bf16 %v10438_v55, %v17355_v20  ;;  %v1022_v55 = vmax.f32 %v12648_v38, %v11611_v59  ;;  %v9542_v35 = vunpack.i.h.bf16 %v9538_v30 }
 0x316   :  { %v8297_v3 = vpack.c.bf16 %v10435_v33, %v17356_v56  ;;  %v9648_v58 = vpack.i.bf16 %v2044_v29, %v2043_v53  ;;  %v9003_v10 = vround.rtne.f32 %v1534_v51  ;;  %v1277_v47 = vmin.f32 %v12644_v37, %v1021_v26  ;;  %v11612_v29 = vld [vmem:[#allocation2 + $0x620] sm:$0xff]  ;;  %v11613_v26 = vld [vmem:[#allocation2 + $0x628] sm:$0xff] }
 0x317   :  { %10545 = vxpose.xlu1.b32.end [16/16] %v10544_v54, 128  ;;  %3421 = vst [vmem:[%s17335_s3 + $0x100] sm:$0xff] %v8329_v45  ;;  %v2045_v20 = vmul.f32 %v9002_v15, %v12641_v25  ;;  %v1278_v54 = vmin.f32 %v12644_v37, %v1022_v55  ;;  %v17357_v4 = vunpack.i.h.bf16 %v13204_v57  ;;  %v9539_v53 = vunpack.i.l.bf16 %v9538_v30 }
 0x318   :  { %3389 = vst [vmem:[%s17335_s3] sm:$0xff] %v8297_v3  ;;  %9649 = vxpose.xlu0.b32.end [16/16] %v9648_v58, 128  ;;  %v2046_v12 = vmul.f32 %v9003_v10, %v12641_v25  ;;  %v1535_v33 = vmul.f32 %v12672_v63, %v1277_v47  ;;  %v1023_v51 = vmax.f32 %v12648_v38, %v11612_v29  ;;  %v10443_v56 = vunpack.i.h.bf16 %v10439_v8 }
 0x319   :  { %v8393_v45 = vpack.c.bf16 %v9542_v35, %v17357_v4  ;;  %v1536_v23 = vmul.f32 %v12672_v63, %v1278_v54  ;;  %v1024_v15 = vmax.f32 %v12648_v38, %v11613_v26  ;;  %v17358_v55 = vunpack.i.l.bf16 %v13204_v57  ;;  %v9543_v54 = vpop.trf.xlu0 }
 0x31a   :  { %v10626_v3 = vpack.i.bf16 %v2046_v12, %v2045_v20  ;;  %v9004_v59 = vround.rtne.f32 %v1535_v33  ;;  %v1279_v30 = vmin.f32 %v12644_v37, %v1023_v51  ;;  %v10440_v47 = vunpack.i.l.bf16 %v10439_v8  ;;  %v11614_v12 = vld [vmem:[#allocation2 + $0x630] sm:$0xff] }
 0x31b   :  { %3485 = vst [vmem:[%s17335_s3 + $0x300] sm:$0xff] %v8393_v45  ;;  %v8361_v35 = vpack.c.bf16 %v9539_v53, %v17358_v55  ;;  %v9005_v58 = vround.rtne.f32 %v1536_v23  ;;  %v1280_v10 = vmin.f32 %v12644_v37, %v1024_v15  ;;  %v17359_v45 = vunpack.i.h.bf16 %v13233_v49  ;;  %v11615_v23 = vld [vmem:[#allocation2 + $0x638] sm:$0xff]  ;;  %s9067_s18 = spop %9066 }
 0x31c   :  { %10627 = vxpose.xlu1.b32.start [1/16] %v10626_v3, 128  ;;  %v2047_v4 = vmul.f32 %v9004_v59, %v12641_v25  ;;  %v1537_v20 = vmul.f32 %v12672_v63, %v1279_v30  ;;  %v1025_v33 = vmax.f32 %v12648_v38, %v11614_v12  ;;  %v17360_v29 = vunpack.i.l.bf16 %v13233_v49 }
 0x31d   :  { %3453 = vst [vmem:[%s17335_s3 + $0x200] sm:$0xff] %v8361_v35  ;;  %v8331_v57 = vpack.c.bf16 %v10443_v56, %v17359_v45  ;;  %v2048_v53 = vmul.f32 %v9005_v58, %v12641_v25  ;;  %v1538_v8 = vmul.f32 %v12672_v63, %v1280_v10  ;;  %v1026_v26 = vmax.f32 %v12648_v38, %v11615_v23  ;;  %v10444_v35 = vpop.trf.xlu1 }
 0x31e   :  { %v8299_v51 = vpack.c.bf16 %v10440_v47, %v17360_v29  ;;  %v9006_v15 = vround.rtne.f32 %v1537_v20  ;;  %v1281_v56 = vmin.f32 %v12644_v37, %v1025_v33  ;;  %v9547_v3 = vunpack.i.h.bf16 %v9543_v54  ;;  %v11617_v33 = vld [vmem:[#allocation2 + $0x648] sm:$0xff] }
 0x31f   :  { %3423 = vst [vmem:[%s17335_s3 + $0x110] sm:$0xff] %v8331_v57  ;;  %v9730_v59 = vpack.i.bf16 %v2048_v53, %v2047_v4  ;;  %v9007_v55 = vround.rtne.f32 %v1538_v8  ;;  %v1282_v49 = vmin.f32 %v12644_v37, %v1026_v26  ;;  %v17361_v10 = vunpack.i.h.bf16 %v13230_v43  ;;  %v11616_v57 = vld [vmem:[#allocation2 + $0x640] sm:$0xff] }
 0x320   :  { %3391 = vst [vmem:[%s17335_s3 + $0x10] sm:$0xff] %v8299_v51  ;;  %v2049_v30 = vmul.f32 %v9006_v15, %v12641_v25  ;;  %v1539_v58 = vmul.f32 %v12672_v63, %v1281_v56  ;;  %v9544_v20 = vunpack.i.l.bf16 %v9543_v54  ;;  %v1027_v12 = vmax.f32 %v12648_v38, %v11616_v57 }
 0x321   :  { %v8395_v47 = vpack.c.bf16 %v9547_v3, %v17361_v10  ;;  %9731 = vxpose.xlu0.b32.start [1/16] %v9730_v59, 128  ;;  %v2050_v45 = vmul.f32 %v9007_v55, %v12641_v25  ;;  %v1540_v4 = vmul.f32 %v12672_v63, %v1282_v49  ;;  %v1028_v53 = vmax.f32 %v12648_v38, %v11617_v33  ;;  %v9548_v3 = vpop.trf.xlu0 }
 0x322   :  { %v9008_v8 = vround.rtne.f32 %v1539_v58  ;;  %v17362_v29 = vunpack.i.l.bf16 %v13230_v43  ;;  %v10448_v54 = vunpack.i.h.bf16 %v10444_v35  ;;  %v1283_v15 = vmin.f32 %v12644_v37, %v1027_v12 }
 0x323   :  { %3487 = vst [vmem:[%s17335_s3 + $0x310] sm:$0xff] %v8395_v47  ;;  %v10628_v23 = vpack.i.bf16 %v2050_v45, %v2049_v30  ;;  %v9009_v26 = vround.rtne.f32 %v1540_v4  ;;  %v1284_v56 = vmin.f32 %v12644_v37, %v1028_v53  ;;  %v10445_v55 = vunpack.i.l.bf16 %v10444_v35  ;;  %v11618_v47 = vld [vmem:[#allocation2 + $0x650] sm:$0xff]  ;;  %v11619_v35 = vld [vmem:[#allocation2 + $0x658] sm:$0xff] }
 0x324   :  { %v8363_v51 = vpack.c.bf16 %v9544_v20, %v17362_v29  ;;  %v2051_v59 = vmul.f32 %v9008_v8, %v12641_v25  ;;  %v17363_v49 = vunpack.i.h.bf16 %v13262_v40  ;;  %v1541_v30 = vmul.f32 %v12672_v63, %v1283_v15 }
 0x325   :  { %10629 = vxpose.xlu1.b32.cont [2/16] %v10628_v23, 128  ;;  %v2052_v43 = vmul.f32 %v9009_v26, %v12641_v25  ;;  %v1542_v10 = vmul.f32 %v12672_v63, %v1284_v56  ;;  %v1029_v20 = vmax.f32 %v12648_v38, %v11618_v47  ;;  %v17364_v45 = vunpack.i.l.bf16 %v13262_v40 }
 0x326   :  { %3455 = vst [vmem:[%s17335_s3 + $0x210] sm:$0xff] %v8363_v51  ;;  %v8333_v58 = vpack.c.bf16 %v10448_v54, %v17363_v49  ;;  %v1030_v57 = vmax.f32 %v12648_v38, %v11619_v35  ;;  %v9552_v12 = vunpack.i.h.bf16 %v9548_v3  ;;  %v9010_v53 = vround.rtne.f32 %v1541_v30  ;;  %v10449_v51 = vpop.trf.xlu1 }
 0x327   :  { %v8301_v4 = vpack.c.bf16 %v10445_v55, %v17364_v45  ;;  %v9732_v33 = vpack.i.bf16 %v2052_v43, %v2051_v59  ;;  %v9011_v8 = vround.rtne.f32 %v1542_v10  ;;  %v1285_v29 = vmin.f32 %v12644_v37, %v1029_v20  ;;  %v11620_v55 = vld [vmem:[#allocation2 + $0x660] sm:$0xff] }
 0x328   :  { %3425 = vst [vmem:[%s17335_s3 + $0x120] sm:$0xff] %v8333_v58  ;;  %v1286_v40 = vmin.f32 %v12644_v37, %v1030_v57  ;;  %v17365_v54 = vunpack.i.h.bf16 %v13256_v31  ;;  %v9549_v26 = vunpack.i.l.bf16 %v9548_v3  ;;  %v2053_v15 = vmul.f32 %v9010_v53, %v12641_v25  ;;  %v11621_v3 = vld [vmem:[#allocation2 + $0x668] sm:$0xff] }
 0x329   :  { %3393 = vst [vmem:[%s17335_s3 + $0x20] sm:$0xff] %v8301_v4  ;;  %9733 = vxpose.xlu0.b32.cont [2/16] %v9732_v33, 128  ;;  %v2054_v56 = vmul.f32 %v9011_v8, %v12641_v25  ;;  %v1543_v59 = vmul.f32 %v12672_v63, %v1285_v29  ;;  %v1031_v49 = vmax.f32 %v12648_v38, %v11620_v55  ;;  %v17366_v43 = vunpack.i.l.bf16 %v13256_v31  ;;  %v9553_v33 = vpop.trf.xlu0 }
 0x32a   :  { %v8397_v23 = vpack.c.bf16 %v9552_v12, %v17365_v54  ;;  %v1544_v58 = vmul.f32 %v12672_v63, %v1286_v40  ;;  %v1032_v10 = vmax.f32 %v12648_v38, %v11621_v3  ;;  %v10453_v47 = vunpack.i.h.bf16 %v10449_v51  ;;  %v11622_v40 = vld [vmem:[#allocation2 + $0x670] sm:$0xff]  ;;  %v10454_v3 = vpop.trf.xlu1 }
 0x32b   :  { %v8365_v30 = vpack.c.bf16 %v9549_v26, %v17366_v43  ;;  %v10630_v20 = vpack.i.bf16 %v2054_v56, %v2053_v15  ;;  %v9012_v45 = vround.rtne.f32 %v1543_v59  ;;  %v1287_v4 = vmin.f32 %v12644_v37, %v1031_v49 }
 0x32c   :  { %3489 = vst [vmem:[%s17335_s3 + $0x320] sm:$0xff] %v8397_v23  ;;  %v9013_v35 = vround.rtne.f32 %v1544_v58  ;;  %v1288_v57 = vmin.f32 %v12644_v37, %v1032_v10  ;;  %v10450_v12 = vunpack.i.l.bf16 %v10449_v51  ;;  %v17367_v8 = vunpack.i.h.bf16 %v13289_v34  ;;  %v11623_v51 = vld [vmem:[#allocation2 + $0x678] sm:$0xff] }
 0x32d   :  { %3457 = vst [vmem:[%s17335_s3 + $0x220] sm:$0xff] %v8365_v30  ;;  %10631 = vxpose.xlu1.b32.cont [3/16] %v10630_v20, 128  ;;  %v2055_v31 = vmul.f32 %v9012_v45, %v12641_v25  ;;  %v1545_v53 = vmul.f32 %v12672_v63, %v1287_v4  ;;  %v1033_v54 = vmax.f32 %v12648_v38, %v11622_v40  ;;  %v17368_v15 = vunpack.i.l.bf16 %v13289_v34 }
 0x32e   :  { %v8335_v29 = vpack.c.bf16 %v10453_v47, %v17367_v8  ;;  %v2056_v23 = vmul.f32 %v9013_v35, %v12641_v25  ;;  %v1546_v26 = vmul.f32 %v12672_v63, %v1288_v57  ;;  %v1034_v59 = vmax.f32 %v12648_v38, %v11623_v51  ;;  %v9558_v51 = vpop.trf.xlu0 }
 0x32f   :  { %v8303_v56 = vpack.c.bf16 %v10450_v12, %v17368_v15  ;;  %v9014_v55 = vround.rtne.f32 %v1545_v53  ;;  %v1289_v49 = vmin.f32 %v12644_v37, %v1033_v54  ;;  %v9557_v58 = vunpack.i.h.bf16 %v9553_v33  ;;  %v11624_v12 = vld [vmem:[#allocation2 + $0x680] sm:$0xff]  ;;  %v11625_v53 = vld [vmem:[#allocation2 + $0x688] sm:$0xff] }
 0x330   :  { %3427 = vst [vmem:[%s17335_s3 + $0x130] sm:$0xff] %v8335_v29  ;;  %v9734_v43 = vpack.i.bf16 %v2056_v23, %v2055_v31  ;;  %v9015_v30 = vround.rtne.f32 %v1546_v26  ;;  %v1290_v34 = vmin.f32 %v12644_v37, %v1034_v59  ;;  %v17369_v20 = vunpack.i.h.bf16 %v13286_v21 }
 0x331   :  { %3395 = vst [vmem:[%s17335_s3 + $0x30] sm:$0xff] %v8303_v56  ;;  %v2057_v10 = vmul.f32 %v9014_v55, %v12641_v25  ;;  %v1547_v47 = vmul.f32 %v12672_v63, %v1289_v49  ;;  %v9554_v4 = vunpack.i.l.bf16 %v9553_v33  ;;  %v1035_v31 = vmax.f32 %v12648_v38, %v11624_v12 }
 0x332   :  { %v8399_v45 = vpack.c.bf16 %v9557_v58, %v17369_v20  ;;  %9735 = vxpose.xlu0.b32.cont [3/16] %v9734_v43, 128  ;;  %v2058_v35 = vmul.f32 %v9015_v30, %v12641_v25  ;;  %v1548_v57 = vmul.f32 %v12672_v63, %v1290_v34  ;;  %v1036_v8 = vmax.f32 %v12648_v38, %v11625_v53  ;;  %v11626_v34 = vld [vmem:[#allocation2 + $0x690] sm:$0xff] }
 0x333   :  { %v9016_v29 = vround.rtne.f32 %v1547_v47  ;;  %v17370_v40 = vunpack.i.l.bf16 %v13286_v21  ;;  %v10458_v33 = vunpack.i.h.bf16 %v10454_v3  ;;  %v1291_v15 = vmin.f32 %v12644_v37, %v1035_v31 }
 0x334   :  { %3491 = vst [vmem:[%s17335_s3 + $0x330] sm:$0xff] %v8399_v45  ;;  %v10632_v23 = vpack.i.bf16 %v2058_v35, %v2057_v10  ;;  %v9017_v26 = vround.rtne.f32 %v1548_v57  ;;  %v1292_v56 = vmin.f32 %v12644_v37, %v1036_v8  ;;  %v10455_v55 = vunpack.i.l.bf16 %v10454_v3  ;;  %v11627_v3 = vld [vmem:[#allocation2 + $0x698] sm:$0xff] }
 0x335   :  { %v8367_v54 = vpack.c.bf16 %v9554_v4, %v17370_v40  ;;  %v2059_v59 = vmul.f32 %v9016_v29, %v12641_v25  ;;  %v17371_v49 = vunpack.i.h.bf16 %v13314_v52  ;;  %v1549_v43 = vmul.f32 %v12672_v63, %v1291_v15 }
 0x336   :  { %10633 = vxpose.xlu1.b32.cont [4/16] %v10632_v23, 128  ;;  %v2060_v21 = vmul.f32 %v9017_v26, %v12641_v25  ;;  %v1550_v30 = vmul.f32 %v12672_v63, %v1292_v56  ;;  %v1037_v10 = vmax.f32 %v12648_v38, %v11626_v34  ;;  %v17372_v47 = vunpack.i.l.bf16 %v13314_v52  ;;  %v10459_v26 = vpop.trf.xlu1  ;;  %v11629_v34 = vld [vmem:[#allocation2 + $0x6a8] sm:$0xff] }
 0x337   :  { %3459 = vst [vmem:[%s17335_s3 + $0x230] sm:$0xff] %v8367_v54  ;;  %v8337_v58 = vpack.c.bf16 %v10458_v33, %v17371_v49  ;;  %v1038_v45 = vmax.f32 %v12648_v38, %v11627_v3  ;;  %v9562_v4 = vunpack.i.h.bf16 %v9558_v51  ;;  %v9018_v57 = vround.rtne.f32 %v1549_v43  ;;  %v11628_v43 = vld [vmem:[#allocation2 + $0x6a0] sm:$0xff] }
 0x338   :  { %v8305_v20 = vpack.c.bf16 %v10455_v55, %v17372_v47  ;;  %v9736_v35 = vpack.i.bf16 %v2060_v21, %v2059_v59  ;;  %v9019_v12 = vround.rtne.f32 %v1550_v30  ;;  %v1293_v31 = vmin.f32 %v12644_v37, %v1037_v10 }
 0x339   :  { %3429 = vst [vmem:[%s17335_s3 + $0x140] sm:$0xff] %v8337_v58  ;;  %v1294_v52 = vmin.f32 %v12644_v37, %v1038_v45  ;;  %v17373_v53 = vunpack.i.h.bf16 %v13308_v28  ;;  %v9559_v29 = vunpack.i.l.bf16 %v9558_v51  ;;  %v2061_v40 = vmul.f32 %v9018_v57, %v12641_v25 }
 0x33a   :  { %3397 = vst [vmem:[%s17335_s3 + $0x40] sm:$0xff] %v8305_v20  ;;  %9737 = vxpose.xlu0.b32.cont [4/16] %v9736_v35, 128  ;;  %v2062_v54 = vmul.f32 %v9019_v12, %v12641_v25  ;;  %v1551_v33 = vmul.f32 %v12672_v63, %v1293_v31  ;;  %v4293_v23 = vstv %s9067_s18  ;;  %v17374_v56 = vunpack.i.l.bf16 %v13308_v28 }
 0x33b   :  { %v8401_v8 = vpack.c.bf16 %v9562_v4, %v17373_v53  ;;  %v1552_v15 = vmul.f32 %v12672_v63, %v1294_v52  ;;  %v4294_v55 = vmul.f32 0.007874016, %v4293_v23  ;;  %v17375_v51 = vrot.slane %v13265_v1, 2  ;;  %v11630_v23 = vld [vmem:[#allocation2 + $0x6b0] sm:$0xff] }
 0x33c   :  { %v8369_v59 = vpack.c.bf16 %v9559_v29, %v17374_v56  ;;  %v10634_v58 = vpack.i.bf16 %v2062_v54, %v2061_v40  ;;  %v9020_v21 = vround.rtne.f32 %v1551_v33  ;;  %v1039_v30 = vmax.f32 %v12648_v38, %v11628_v43  ;;  %v9563_v56 = vpop.trf.xlu0 }
 0x33d   :  { %3493 = vst [vmem:[%s17335_s3 + $0x340] sm:$0xff] %v8401_v8  ;;  %v7184_v49 = vmax.f32 %v13265_v1, %v17375_v51  ;;  %v1040_v10 = vmax.f32 %v12648_v38, %v11629_v34  ;;  %v9021_v47 = vround.rtne.f32 %v1552_v15  ;;  %v13782_v28 = vmax.f32 %v4294_v55, 1e-12 }
 0x33e   :  { %3461 = vst [vmem:[%s17335_s3 + $0x240] sm:$0xff] %v8369_v59  ;;  %v10463_v3 = vunpack.i.h.bf16 %v10459_v26  ;;  %10635 = vxpose.xlu1.b32.cont [5/16] %v10634_v58, 128  ;;  %v2063_v1 = vmul.f32 %v9020_v21, %v12641_v25  ;;  %v1295_v45 = vmin.f32 %v12644_v37, %v1039_v30  ;;  %v10460_v53 = vunpack.i.l.bf16 %v10459_v26  ;;  %v11631_v26 = vld [vmem:[#allocation2 + $0x6b8] sm:$0xff] }
 0x33f   :  { %v7185_v20 = vrot.slane %v7184_v49, 1  ;;  %v1296_v4 = vmin.f32 %v12644_v37, %v1040_v10  ;;  %v2064_v35 = vmul.f32 %v9021_v47, %v12641_v25  ;;  %v13789_v57 = vmul.f32 127.0, %v13782_v28 }
 0x340   :  { %v1553_v31 = vmul.f32 %v12672_v63, %v1295_v45  ;;  %v17376_v8 = vunpack.i.h.bf16 %v13337_v5  ;;  %v10391_v40 = vunpack.i.h.bf16 %v13528_v61  ;;  %v10388_v54 = vunpack.i.l.bf16 %v13528_v61  ;;  %v17414_v61 = vld [vmem:[#allocation8_spill] sm:$0xff] }
 0x341   :  { %v7186_v12 = vmax.f32 %v7184_v49, %v7185_v20  ;;  %v1554_v52 = vmul.f32 %v12672_v63, %v1296_v4  ;;  %v9738_v33 = vpack.i.bf16 %v2064_v35, %v2063_v1  ;;  %v1041_v15 = vmax.f32 %v12648_v38, %v11630_v23  ;;  %v13832_v23 = vld [vmem:[#allocation4 + $0x7c0] sm:$0xff] }
 0x342   :  { %v8339_v29 = vpack.c.bf16 %v10463_v3, %v17376_v8  ;;  %v9022_v59 = vround.rtne.f32 %v1553_v31  ;;  %v17377_v51 = vunpack.i.l.bf16 %v13337_v5  ;;  %v1042_v58 = vmax.f32 %v12648_v38, %v11631_v26  ;;  %v11636_v3 = vld [vmem:[#allocation2 + $0x6c0] sm:$0xff] }
 0x343   :  { %9324 = vpush %v7186_v12  ;;  %v9023_v55 = vround.rtne.f32 %v1554_v52  ;;  %v9495_v21 = vunpack.i.h.bf16 %v13531_v62  ;;  %v9492_v43 = vunpack.i.l.bf16 %v13531_v62  ;;  %9739 = vxpose.xlu0.b32.cont [5/16] %v9738_v33, 128  ;;  %v13808_v34 = vsub.f32 0.0, %v13789_v57 }
 0x344   :  { %v8307_v49 = vpack.c.bf16 %v10460_v53, %v17377_v51  ;;  %3431 = vst [vmem:[%s17335_s3 + $0x150] sm:$0xff] %v8339_v29  ;;  %v9500_v10 = vunpack.i.h.bf16 %v13556_v2  ;;  %v9497_v47 = vunpack.i.l.bf16 %v13556_v2  ;;  %v9567_v20 = vunpack.i.h.bf16 %v9563_v56  ;;  %v13824_v53 = vld [vmem:[#allocation4 + $0x7a0] sm:$0xff]  ;;  %v13828_v29 = vld [vmem:[#allocation4 + $0x7a8] sm:$0xff]  ;;  %v10464_v51 = vpop.trf.xlu1 }
 0x345   :  { %v2065_v35 = vmul.f32 %v9022_v59, %v12641_v25  ;;  %v2066_v12 = vmul.f32 %v9023_v55, %v12641_v25  ;;  %v1297_v31 = vmin.f32 %v12644_v37, %v1041_v15  ;;  %v1298_v52 = vmin.f32 %v12644_v37, %v1042_v58  ;;  %v13836_v55 = vld [vmem:[#allocation4 + $0x7c8] sm:$0xff] }
 0x346   :  { %3399 = vst [vmem:[%s17335_s3 + $0x50] sm:$0xff] %v8307_v49  ;;  %v17378_v8 = vunpack.i.h.bf16 %v13334_v14  ;;  %v9564_v33 = vunpack.i.l.bf16 %v9563_v56  ;;  %v1043_v4 = vmax.f32 %v12648_v38, %v11636_v3  ;;  %v11637_v15 = vld [vmem:[#allocation2 + $0x6c8] sm:$0xff]  ;;  %v9568_v56 = vpop.trf.xlu0  ;;  %11412 = vrcp.f32 %v13782_v28 }
 0x347   :  { %v10636_v49 = vpack.i.bf16 %v2066_v12, %v2065_v35  ;;  %v1555_v26 = vmul.f32 %v12672_v63, %v1297_v31  ;;  %v1556_v58 = vmul.f32 %v12672_v63, %v1298_v52  ;;  %v1044_v35 = vmax.f32 %v12648_v38, %v11637_v15 }
 0x348   :  { %v8403_v1 = vpack.c.bf16 %v9567_v20, %v17378_v8  ;;  %v10468_v12 = vunpack.i.h.bf16 %v10464_v51  ;;  %v17379_v31 = vunpack.i.l.bf16 %v13334_v14  ;;  %v1299_v20 = vmin.f32 %v12644_v37, %v1043_v4 }
 0x349   :  { %10637 = vxpose.xlu1.b32.cont [6/16] %v10636_v49, 128  ;;  %v9024_v59 = vround.rtne.f32 %v1555_v26  ;;  %v9025_v45 = vround.rtne.f32 %v1556_v58  ;;  %v1300_v49 = vmin.f32 %v12644_v37, %v1044_v35  ;;  %v10465_v26 = vunpack.i.l.bf16 %v10464_v51  ;;  %v11639_v58 = vld [vmem:[#allocation2 + $0x6d8] sm:$0xff] }
 0x34a   :  { %3495 = vst [vmem:[%s17335_s3 + $0x350] sm:$0xff] %v8403_v1  ;;  %v8371_v52 = vpack.c.bf16 %v9564_v33, %v17379_v31  ;;  %v1557_v1 = vmul.f32 %v12672_v63, %v1299_v20  ;;  %v17380_v15 = vunpack.i.h.bf16 %v13362_v39  ;;  %v11638_v33 = vld [vmem:[#allocation2 + $0x6d0] sm:$0xff]  ;;  %v17381_v51 = vunpack.i.l.bf16 %v13362_v39  ;;  %v10469_v20 = vpop.trf.xlu1 }
 0x34b   :  { %v2067_v8 = vmul.f32 %v9024_v59, %v12641_v25  ;;  %v2068_v3 = vmul.f32 %v9025_v45, %v12641_v25  ;;  %v1045_v4 = vmax.f32 %v12648_v38, %v11638_v33  ;;  %v1046_v59 = vmax.f32 %v12648_v38, %v11639_v58 }
 0x34c   :  { %3463 = vst [vmem:[%s17335_s3 + $0x250] sm:$0xff] %v8371_v52  ;;  %v8341_v14 = vpack.c.bf16 %v10468_v12, %v17380_v15  ;;  %v1558_v45 = vmul.f32 %v12672_v63, %v1300_v49  ;;  %v8309_v35 = vpack.c.bf16 %v10465_v26, %v17381_v51  ;;  %v9572_v5 = vunpack.i.h.bf16 %v9568_v56 }
 0x34d   :  { %v9740_v31 = vpack.i.bf16 %v2068_v3, %v2067_v8  ;;  %v9026_v30 = vround.rtne.f32 %v1557_v1  ;;  %v1301_v12 = vmin.f32 %v12644_v37, %v1045_v4  ;;  %v1302_v52 = vmin.f32 %v12644_v37, %v1046_v59 }
 0x34e   :  { %3433 = vst [vmem:[%s17335_s3 + $0x160] sm:$0xff] %v8341_v14  ;;  %v9027_v15 = vround.rtne.f32 %v1558_v45  ;;  %3401 = vst [vmem:[%s17335_s3 + $0x60] sm:$0xff] %v8309_v35  ;;  %v17382_v39 = vunpack.i.h.bf16 %v13356_v27  ;;  %v9569_v3 = vunpack.i.l.bf16 %v9568_v56  ;;  %v11640_v14 = vld [vmem:[#allocation2 + $0x6e0] sm:$0xff]  ;;  %v17383_v58 = vunpack.i.l.bf16 %v13356_v27 }
 0x34f   :  { %9741 = vxpose.xlu0.b32.cont [6/16] %v9740_v31, 128  ;;  %v2069_v49 = vmul.f32 %v9026_v30, %v12641_v25  ;;  %v1559_v26 = vmul.f32 %v12672_v63, %v1301_v12  ;;  %v1560_v1 = vmul.f32 %v12672_v63, %v1302_v52  ;;  %v1047_v33 = vmax.f32 %v12648_v38, %v11640_v14 }
 0x350   :  { %v8405_v8 = vpack.c.bf16 %v9572_v5, %v17382_v39  ;;  %v2070_v4 = vmul.f32 %v9027_v15, %v12641_v25  ;;  %v8373_v59 = vpack.c.bf16 %v9569_v3, %v17383_v58  ;;  %v11641_v5 = vld [vmem:[#allocation2 + $0x6e8] sm:$0xff]  ;;  %v10473_v30 = vunpack.i.h.bf16 %v10469_v20  ;;  %v9573_v15 = vpop.trf.xlu0 }
 0x351   :  { %v1048_v56 = vmax.f32 %v12648_v38, %v11641_v5  ;;  %v9028_v31 = vround.rtne.f32 %v1559_v26  ;;  %v9029_v45 = vround.rtne.f32 %v1560_v1  ;;  %v1303_v51 = vmin.f32 %v12644_v37, %v1047_v33  ;;  %v11642_v33 = vld [vmem:[#allocation2 + $0x6f0] sm:$0xff] }
 0x352   :  { %3497 = vst [vmem:[%s17335_s3 + $0x360] sm:$0xff] %v8405_v8  ;;  %v10638_v35 = vpack.i.bf16 %v2070_v4, %v2069_v49  ;;  %3465 = vst [vmem:[%s17335_s3 + $0x260] sm:$0xff] %v8373_v59  ;;  %v10470_v52 = vunpack.i.l.bf16 %v10469_v20  ;;  %v17384_v3 = vunpack.i.h.bf16 %v13385_v22  ;;  %v17385_v1 = vunpack.i.l.bf16 %v13385_v22  ;;  %v11643_v20 = vld [vmem:[#allocation2 + $0x6f8] sm:$0xff] }
 0x353   :  { %v1304_v12 = vmin.f32 %v12644_v37, %v1048_v56  ;;  %v2071_v27 = vmul.f32 %v9028_v31, %v12641_v25  ;;  %v2072_v39 = vmul.f32 %v9029_v45, %v12641_v25  ;;  %v1561_v8 = vmul.f32 %v12672_v63, %v1303_v51  ;;  %v10474_v45 = vpop.trf.xlu1 }
 0x354   :  { %v8343_v26 = vpack.c.bf16 %v10473_v30, %v17384_v3  ;;  %10639 = vxpose.xlu1.b32.cont [7/16] %v10638_v35, 128  ;;  %v8311_v14 = vpack.c.bf16 %v10470_v52, %v17385_v1  ;;  %v1049_v4 = vmax.f32 %v12648_v38, %v11642_v33  ;;  %v1050_v58 = vmax.f32 %v12648_v38, %v11643_v20 }
 0x355   :  { %v1562_v49 = vmul.f32 %v12672_v63, %v1304_v12  ;;  %v9742_v59 = vpack.i.bf16 %v2072_v39, %v2071_v27  ;;  %v9030_v5 = vround.rtne.f32 %v1561_v8  ;;  %v9577_v56 = vunpack.i.h.bf16 %v9573_v15  ;;  %v11644_v27 = vld [vmem:[#allocation2 + $0x700] sm:$0xff] }
 0x356   :  { %3435 = vst [vmem:[%s17335_s3 + $0x170] sm:$0xff] %v8343_v26  ;;  %3403 = vst [vmem:[%s17335_s3 + $0x70] sm:$0xff] %v8311_v14  ;;  %v1305_v22 = vmin.f32 %v12644_v37, %v1049_v4  ;;  %v1306_v31 = vmin.f32 %v12644_v37, %v1050_v58  ;;  %v17386_v35 = vunpack.i.h.bf16 %v13382_v18  ;;  %v9574_v52 = vunpack.i.l.bf16 %v9573_v15 }
 0x357   :  { %v9031_v30 = vround.rtne.f32 %v1562_v49  ;;  %9743 = vxpose.xlu0.b32.cont [7/16] %v9742_v59, 128  ;;  %v2073_v51 = vmul.f32 %v9030_v5, %v12641_v25  ;;  %v1051_v39 = vmax.f32 %v12648_v38, %v11644_v27  ;;  %v11645_v49 = vld [vmem:[#allocation2 + $0x708] sm:$0xff]  ;;  %v17387_v14 = vunpack.i.l.bf16 %v13382_v18 }
 0x358   :  { %v8407_v12 = vpack.c.bf16 %v9577_v56, %v17386_v35  ;;  %v1563_v3 = vmul.f32 %v12672_v63, %v1305_v22  ;;  %v1564_v26 = vmul.f32 %v12672_v63, %v1306_v31  ;;  %v1052_v1 = vmax.f32 %v12648_v38, %v11645_v49  ;;  %v9578_v56 = vpop.trf.xlu0 }
 0x359   :  { %v2074_v8 = vmul.f32 %v9031_v30, %v12641_v25  ;;  %v8375_v33 = vpack.c.bf16 %v9574_v52, %v17387_v14  ;;  %v1307_v15 = vmin.f32 %v12644_v37, %v1051_v39  ;;  %v10478_v4 = vunpack.i.h.bf16 %v10474_v45  ;;  %v11646_v52 = vld [vmem:[#allocation2 + $0x710] sm:$0xff] }
 0x35a   :  { %3499 = vst [vmem:[%s17335_s3 + $0x370] sm:$0xff] %v8407_v12  ;;  %v9032_v58 = vround.rtne.f32 %v1563_v3  ;;  %v9033_v59 = vround.rtne.f32 %v1564_v26  ;;  %v1308_v5 = vmin.f32 %v12644_v37, %v1052_v1  ;;  %v10475_v22 = vunpack.i.l.bf16 %v10474_v45  ;;  %v11647_v45 = vld [vmem:[#allocation2 + $0x718] sm:$0xff] }
 0x35b   :  { %v10640_v20 = vpack.i.bf16 %v2074_v8, %v2073_v51  ;;  %3467 = vst [vmem:[%s17335_s3 + $0x270] sm:$0xff] %v8375_v33  ;;  %v1565_v30 = vmul.f32 %v12672_v63, %v1307_v15  ;;  %v17388_v31 = vunpack.i.h.bf16 %v13410_v19  ;;  %v1053_v27 = vmax.f32 %v12648_v38, %v11646_v52  ;;  %v10479_v15 = vpop.trf.xlu1 }
 0x35c   :  { %v2075_v35 = vmul.f32 %v9032_v58, %v12641_v25  ;;  %v2076_v51 = vmul.f32 %v9033_v59, %v12641_v25  ;;  %v1566_v12 = vmul.f32 %v12672_v63, %v1308_v5  ;;  %v17389_v8 = vunpack.i.l.bf16 %v13410_v19 }
 0x35d   :  { %v8345_v18 = vpack.c.bf16 %v10478_v4, %v17388_v31  ;;  %10641 = vxpose.xlu1.b32.cont [8/16] %v10640_v20, 128  ;;  %v9034_v39 = vround.rtne.f32 %v1565_v30  ;;  %v1054_v26 = vmax.f32 %v12648_v38, %v11647_v45  ;;  %v9582_v49 = vunpack.i.h.bf16 %v9578_v56 }
 0x35e   :  { %v8313_v3 = vpack.c.bf16 %v10475_v22, %v17389_v8  ;;  %v9744_v1 = vpack.i.bf16 %v2076_v51, %v2075_v35  ;;  %v9035_v14 = vround.rtne.f32 %v1566_v12  ;;  %v1309_v33 = vmin.f32 %v12644_v37, %v1053_v27  ;;  %v11648_v22 = vld [vmem:[#allocation2 + $0x720] sm:$0xff]  ;;  %v11649_v35 = vld [vmem:[#allocation2 + $0x728] sm:$0xff] }
 0x35f   :  { %3437 = vst [vmem:[%s17335_s3 + $0x180] sm:$0xff] %v8345_v18  ;;  %v2077_v4 = vmul.f32 %v9034_v39, %v12641_v25  ;;  %v1310_v19 = vmin.f32 %v12644_v37, %v1054_v26  ;;  %v17390_v20 = vunpack.i.h.bf16 %v13404_v16  ;;  %v9579_v30 = vunpack.i.l.bf16 %v9578_v56 }
 0x360   :  { %3405 = vst [vmem:[%s17335_s3 + $0x80] sm:$0xff] %v8313_v3  ;;  %9745 = vxpose.xlu0.b32.cont [8/16] %v9744_v1, 128  ;;  %v2078_v59 = vmul.f32 %v9035_v14, %v12641_v25  ;;  %v1567_v5 = vmul.f32 %v12672_v63, %v1309_v33  ;;  %v1055_v31 = vmax.f32 %v12648_v38, %v11648_v22  ;;  %v10483_v12 = vunpack.i.h.bf16 %v10479_v15 }
 0x361   :  { %v8409_v58 = vpack.c.bf16 %v9582_v49, %v17390_v20  ;;  %v1568_v18 = vmul.f32 %v12672_v63, %v1310_v19  ;;  %v1056_v51 = vmax.f32 %v12648_v38, %v11649_v35  ;;  %v17391_v39 = vunpack.i.l.bf16 %v13404_v16  ;;  %v9583_v49 = vpop.trf.xlu0 }
 0x362   :  { %v10642_v52 = vpack.i.bf16 %v2078_v59, %v2077_v4  ;;  %v9036_v27 = vround.rtne.f32 %v1567_v5  ;;  %v1311_v56 = vmin.f32 %v12644_v37, %v1055_v31  ;;  %v10480_v26 = vunpack.i.l.bf16 %v10479_v15  ;;  %v11650_v4 = vld [vmem:[#allocation2 + $0x730] sm:$0xff]  ;;  %v11651_v5 = vld [vmem:[#allocation2 + $0x738] sm:$0xff] }
 0x363   :  { %3501 = vst [vmem:[%s17335_s3 + $0x380] sm:$0xff] %v8409_v58  ;;  %v8377_v8 = vpack.c.bf16 %v9579_v30, %v17391_v39  ;;  %v9037_v3 = vround.rtne.f32 %v1568_v18  ;;  %v1312_v45 = vmin.f32 %v12644_v37, %v1056_v51  ;;  %v17392_v33 = vunpack.i.h.bf16 %v13436_v42 }
 0x364   :  { %10643 = vxpose.xlu1.b32.cont [9/16] %v10642_v52, 128  ;;  %v2079_v1 = vmul.f32 %v9036_v27, %v12641_v25  ;;  %v1569_v14 = vmul.f32 %v12672_v63, %v1311_v56  ;;  %v1057_v19 = vmax.f32 %v12648_v38, %v11650_v4  ;;  %v17393_v58 = vunpack.i.l.bf16 %v13436_v42 }
 0x365   :  { %3469 = vst [vmem:[%s17335_s3 + $0x280] sm:$0xff] %v8377_v8  ;;  %v8347_v16 = vpack.c.bf16 %v10483_v12, %v17392_v33  ;;  %v2080_v20 = vmul.f32 %v9037_v3, %v12641_v25  ;;  %v1570_v15 = vmul.f32 %v12672_v63, %v1312_v45  ;;  %v1058_v30 = vmax.f32 %v12648_v38, %v11651_v5  ;;  %v10484_v12 = vpop.trf.xlu1  ;;  %v9588_v5 = vpop.trf.xlu0 }
 0x366   :  { %v8315_v59 = vpack.c.bf16 %v10480_v26, %v17393_v58  ;;  %v9038_v22 = vround.rtne.f32 %v1569_v14  ;;  %v1313_v31 = vmin.f32 %v12644_v37, %v1057_v19  ;;  %v9587_v18 = vunpack.i.h.bf16 %v9583_v49  ;;  %v11652_v26 = vld [vmem:[#allocation2 + $0x740] sm:$0xff]  ;;  %v11653_v14 = vld [vmem:[#allocation2 + $0x748] sm:$0xff] }
 0x367   :  { %3439 = vst [vmem:[%s17335_s3 + $0x190] sm:$0xff] %v8347_v16  ;;  %v9746_v35 = vpack.i.bf16 %v2080_v20, %v2079_v1  ;;  %v9039_v51 = vround.rtne.f32 %v1570_v15  ;;  %v1314_v42 = vmin.f32 %v12644_v37, %v1058_v30  ;;  %v17394_v39 = vunpack.i.h.bf16 %v13430_v13 }
 0x368   :  { %3407 = vst [vmem:[%s17335_s3 + $0x90] sm:$0xff] %v8315_v59  ;;  %v2081_v52 = vmul.f32 %v9038_v22, %v12641_v25  ;;  %v1571_v27 = vmul.f32 %v12672_v63, %v1313_v31  ;;  %v9584_v56 = vunpack.i.l.bf16 %v9583_v49  ;;  %v1059_v1 = vmax.f32 %v12648_v38, %v11652_v26 }
 0x369   :  { %v8411_v8 = vpack.c.bf16 %v9587_v18, %v17394_v39  ;;  %9747 = vxpose.xlu0.b32.cont [9/16] %v9746_v35, 128  ;;  %v2082_v3 = vmul.f32 %v9039_v51, %v12641_v25  ;;  %v1572_v45 = vmul.f32 %v12672_v63, %v1314_v42  ;;  %v1060_v33 = vmax.f32 %v12648_v38, %v11653_v14  ;;  %v11654_v42 = vld [vmem:[#allocation2 + $0x750] sm:$0xff]  ;;  %v10489_v14 = vpop.trf.xlu1 }
 0x36a   :  { %v9040_v16 = vround.rtne.f32 %v1571_v27  ;;  %v17395_v4 = vunpack.i.l.bf16 %v13430_v13  ;;  %v10488_v49 = vunpack.i.h.bf16 %v10484_v12  ;;  %v1315_v58 = vmin.f32 %v12644_v37, %v1059_v1 }
 0x36b   :  { %3503 = vst [vmem:[%s17335_s3 + $0x390] sm:$0xff] %v8411_v8  ;;  %v10644_v20 = vpack.i.bf16 %v2082_v3, %v2081_v52  ;;  %v9041_v15 = vround.rtne.f32 %v1572_v45  ;;  %v1316_v59 = vmin.f32 %v12644_v37, %v1060_v33  ;;  %v10485_v22 = vunpack.i.l.bf16 %v10484_v12  ;;  %v11655_v12 = vld [vmem:[#allocation2 + $0x758] sm:$0xff] }
 0x36c   :  { %v8379_v19 = vpack.c.bf16 %v9584_v56, %v17395_v4  ;;  %v2083_v30 = vmul.f32 %v9040_v16, %v12641_v25  ;;  %v17396_v31 = vunpack.i.h.bf16 %v13460_v60  ;;  %v1573_v35 = vmul.f32 %v12672_v63, %v1315_v58 }
 0x36d   :  { %10645 = vxpose.xlu1.b32.cont [10/16] %v10644_v20, 128  ;;  %v2084_v13 = vmul.f32 %v9041_v15, %v12641_v25  ;;  %v1574_v51 = vmul.f32 %v12672_v63, %v1316_v59  ;;  %v1061_v52 = vmax.f32 %v12648_v38, %v11654_v42  ;;  %v17397_v27 = vunpack.i.l.bf16 %v13460_v60  ;;  %v11656_v15 = vld [vmem:[#allocation2 + $0x760] sm:$0xff] }
 0x36e   :  { %3471 = vst [vmem:[%s17335_s3 + $0x290] sm:$0xff] %v8379_v19  ;;  %v8349_v18 = vpack.c.bf16 %v10488_v49, %v17396_v31  ;;  %v1062_v8 = vmax.f32 %v12648_v38, %v11655_v12  ;;  %v9592_v56 = vunpack.i.h.bf16 %v9588_v5  ;;  %v9042_v45 = vround.rtne.f32 %v1573_v35 }
 0x36f   :  { %v8317_v39 = vpack.c.bf16 %v10485_v22, %v17397_v27  ;;  %v9748_v3 = vpack.i.bf16 %v2084_v13, %v2083_v30  ;;  %v9043_v26 = vround.rtne.f32 %v1574_v51  ;;  %v1317_v1 = vmin.f32 %v12644_v37, %v1061_v52 }
 0x370   :  { %3441 = vst [vmem:[%s17335_s3 + $0x1a0] sm:$0xff] %v8349_v18  ;;  %v1318_v60 = vmin.f32 %v12644_v37, %v1062_v8  ;;  %v17398_v33 = vunpack.i.h.bf16 %v13454_v36  ;;  %v9589_v4 = vunpack.i.l.bf16 %v9588_v5  ;;  %v2085_v19 = vmul.f32 %v9042_v45, %v12641_v25  ;;  %v11657_v5 = vld [vmem:[#allocation2 + $0x768] sm:$0xff] }
 0x371   :  { %3409 = vst [vmem:[%s17335_s3 + $0xa0] sm:$0xff] %v8317_v39  ;;  %9749 = vxpose.xlu0.b32.cont [10/16] %v9748_v3, 128  ;;  %v2086_v49 = vmul.f32 %v9043_v26, %v12641_v25  ;;  %v1575_v20 = vmul.f32 %v12672_v63, %v1317_v1  ;;  %v1063_v58 = vmax.f32 %v12648_v38, %v11656_v15  ;;  %v17399_v30 = vunpack.i.l.bf16 %v13454_v36  ;;  %v9593_v39 = vpop.trf.xlu0  ;;  %v11658_v3 = vld [vmem:[#allocation2 + $0x770] sm:$0xff] }
 0x372   :  { %v8413_v16 = vpack.c.bf16 %v9592_v56, %v17398_v33  ;;  %v1576_v59 = vmul.f32 %v12672_v63, %v1318_v60  ;;  %v1064_v31 = vmax.f32 %v12648_v38, %v11657_v5  ;;  %v10493_v18 = vunpack.i.h.bf16 %v10489_v14 }
 0x373   :  { %v8381_v22 = vpack.c.bf16 %v9589_v4, %v17399_v30  ;;  %v10646_v13 = vpack.i.bf16 %v2086_v49, %v2085_v19  ;;  %v9044_v35 = vround.rtne.f32 %v1575_v20  ;;  %v1319_v51 = vmin.f32 %v12644_v37, %v1063_v58  ;;  %v10494_v58 = vpop.trf.xlu1 }
 0x374   :  { %3505 = vst [vmem:[%s17335_s3 + $0x3a0] sm:$0xff] %v8413_v16  ;;  %v9045_v42 = vround.rtne.f32 %v1576_v59  ;;  %v1320_v52 = vmin.f32 %v12644_v37, %v1064_v31  ;;  %v10490_v27 = vunpack.i.l.bf16 %v10489_v14  ;;  %v17400_v8 = vunpack.i.h.bf16 %v13483_v41  ;;  %v11659_v14 = vld [vmem:[#allocation2 + $0x778] sm:$0xff]  ;;  %s14245_s7 = spop %9324 }
 0x375   :  { %3473 = vst [vmem:[%s17335_s3 + $0x2a0] sm:$0xff] %v8381_v22  ;;  %10647 = vxpose.xlu1.b32.cont [11/16] %v10646_v13, 128  ;;  %v2087_v36 = vmul.f32 %v9044_v35, %v12641_v25  ;;  %v1577_v12 = vmul.f32 %v12672_v63, %v1319_v51  ;;  %v1065_v45 = vmax.f32 %v12648_v38, %v11658_v3  ;;  %v17401_v60 = vunpack.i.l.bf16 %v13483_v41  ;;  %v11660_v35 = vld [vmem:[#allocation2 + $0x780] sm:$0xff] }
 0x376   :  { %v8351_v56 = vpack.c.bf16 %v10493_v18, %v17400_v8  ;;  %v2088_v26 = vmul.f32 %v9045_v42, %v12641_v25  ;;  %v1578_v1 = vmul.f32 %v12672_v63, %v1320_v52  ;;  %v1066_v16 = vmax.f32 %v12648_v38, %v11659_v14  ;;  %v11661_v42 = vld [vmem:[#allocation2 + $0x788] sm:$0xff] }
 0x377   :  { %v8319_v33 = vpack.c.bf16 %v10490_v27, %v17401_v60  ;;  %v9046_v4 = vround.rtne.f32 %v1577_v12  ;;  %v1321_v19 = vmin.f32 %v12644_v37, %v1065_v45  ;;  %v9597_v49 = vunpack.i.h.bf16 %v9593_v39 }
 0x378   :  { %3443 = vst [vmem:[%s17335_s3 + $0x1b0] sm:$0xff] %v8351_v56  ;;  %v9750_v20 = vpack.i.bf16 %v2088_v26, %v2087_v36  ;;  %v9047_v15 = vround.rtne.f32 %v1578_v1  ;;  %v1322_v41 = vmin.f32 %v12644_v37, %v1066_v16  ;;  %v17402_v22 = vunpack.i.h.bf16 %v13480_v9  ;;  %v9598_v26 = vpop.trf.xlu0 }
 0x379   :  { %3411 = vst [vmem:[%s17335_s3 + $0xb0] sm:$0xff] %v8319_v33  ;;  %v2089_v59 = vmul.f32 %v9046_v4, %v12641_v25  ;;  %v1579_v30 = vmul.f32 %v12672_v63, %v1321_v19  ;;  %v9594_v31 = vunpack.i.l.bf16 %v9593_v39  ;;  %v1067_v51 = vmax.f32 %v12648_v38, %v11660_v35  ;;  %v11662_v19 = vld [vmem:[#allocation2 + $0x790] sm:$0xff] }
 0x37a   :  { %v8415_v5 = vpack.c.bf16 %v9597_v49, %v17402_v22  ;;  %9751 = vxpose.xlu0.b32.cont [11/16] %v9750_v20, 128  ;;  %v2090_v18 = vmul.f32 %v9047_v15, %v12641_v25  ;;  %v1580_v13 = vmul.f32 %v12672_v63, %v1322_v41  ;;  %v1068_v52 = vmax.f32 %v12648_v38, %v11661_v42  ;;  %v11663_v41 = vld [vmem:[#allocation2 + $0x798] sm:$0xff] }
 0x37b   :  { %v9048_v27 = vround.rtne.f32 %v1579_v30  ;;  %v17403_v36 = vunpack.i.l.bf16 %v13480_v9  ;;  %v10498_v39 = vunpack.i.h.bf16 %v10494_v58  ;;  %v1323_v3 = vmin.f32 %v12644_v37, %v1067_v51 }
 0x37c   :  { %3507 = vst [vmem:[%s17335_s3 + $0x3b0] sm:$0xff] %v8415_v5  ;;  %v10648_v8 = vpack.i.bf16 %v2090_v18, %v2089_v59  ;;  %v9049_v56 = vround.rtne.f32 %v1580_v13  ;;  %v1324_v45 = vmin.f32 %v12644_v37, %v1068_v52  ;;  %v10495_v60 = vunpack.i.l.bf16 %v10494_v58  ;;  %v10499_v18 = vpop.trf.xlu1 }
 0x37d   :  { %v8383_v12 = vpack.c.bf16 %v9594_v31, %v17403_v36  ;;  %v2091_v1 = vmul.f32 %v9048_v27, %v12641_v25  ;;  %v17404_v33 = vunpack.i.h.bf16 %v13508_v32  ;;  %v1581_v16 = vmul.f32 %v12672_v63, %v1323_v3 }
 0x37e   :  { %10649 = vxpose.xlu1.b32.cont [12/16] %v10648_v8, 128  ;;  %v2092_v9 = vmul.f32 %v9049_v56, %v12641_v25  ;;  %v1582_v4 = vmul.f32 %v12672_v63, %v1324_v45  ;;  %v1069_v49 = vmax.f32 %v12648_v38, %v11662_v19  ;;  %v17405_v20 = vunpack.i.l.bf16 %v13508_v32 }
 0x37f   :  { %3475 = vst [vmem:[%s17335_s3 + $0x2b0] sm:$0xff] %v8383_v12  ;;  %v8353_v14 = vpack.c.bf16 %v10498_v39, %v17404_v33  ;;  %v1070_v58 = vmax.f32 %v12648_v38, %v11663_v41  ;;  %v9602_v59 = vunpack.i.h.bf16 %v9598_v26  ;;  %v9050_v22 = vround.rtne.f32 %v1581_v16 }
 0x380   :  { %v8321_v15 = vpack.c.bf16 %v10495_v60, %v17405_v20  ;;  %v9752_v30 = vpack.i.bf16 %v2092_v9, %v2091_v1  ;;  %v9051_v5 = vround.rtne.f32 %v1582_v4  ;;  %v1325_v31 = vmin.f32 %v12644_v37, %v1069_v49 }
 0x381   :  { %3445 = vst [vmem:[%s17335_s3 + $0x1c0] sm:$0xff] %v8353_v14  ;;  %v1326_v32 = vmin.f32 %v12644_v37, %v1070_v58  ;;  %v17406_v13 = vunpack.i.h.bf16 %v13502_v11  ;;  %v9599_v51 = vunpack.i.l.bf16 %v9598_v26  ;;  %v2093_v42 = vmul.f32 %v9050_v22, %v12641_v25  ;;  %v10504_v22 = vpop.trf.xlu1 }
 0x382   :  { %3413 = vst [vmem:[%s17335_s3 + $0xc0] sm:$0xff] %v8321_v15  ;;  %9753 = vxpose.xlu0.b32.cont [12/16] %v9752_v30, 128  ;;  %v2094_v52 = vmul.f32 %v9051_v5, %v12641_v25  ;;  %v1583_v27 = vmul.f32 %v12672_v63, %v1325_v31  ;;  %v17407_v36 = vmax.f32 %v12648_v38, %v12377_v44  ;;  %v17408_v8 = vunpack.i.l.bf16 %v13502_v11  ;;  %v9603_v11 = vpop.trf.xlu0 }
 0x383   :  { %v8417_v35 = vpack.c.bf16 %v9602_v59, %v17406_v13  ;;  %v1584_v39 = vmul.f32 %v12672_v63, %v1326_v32  ;;  %v17409_v3 = vmax.f32 %v12648_v38, %v12379_v46  ;;  %v10503_v26 = vunpack.i.h.bf16 %v10499_v18 }
 0x384   :  { %v1327_v12 = vmin.f32 %v12644_v37, %v17407_v36  ;;  %v8385_v56 = vpack.c.bf16 %v9599_v51, %v17408_v8  ;;  %v10650_v1 = vpack.i.bf16 %v2094_v52, %v2093_v42  ;;  %v9052_v60 = vround.rtne.f32 %v1583_v27 }
 0x385   :  { %3509 = vst [vmem:[%s17335_s3 + $0x3c0] sm:$0xff] %v8417_v35  ;;  %v1328_v45 = vmin.f32 %v12644_v37, %v17409_v3  ;;  %v9053_v33 = vround.rtne.f32 %v1584_v39  ;;  %v10500_v9 = vunpack.i.l.bf16 %v10499_v18  ;;  %v8355_v4 = vpack.c.bf16 %v10503_v26, %v9495_v21  ;;  %v17416_v26 = vld [vmem:[#allocation9_spill] sm:$0xff] }
 0x386   :  { %v1585_v44 = vmul.f32 %v12672_v63, %v1327_v12  ;;  %3477 = vst [vmem:[%s17335_s3 + $0x2c0] sm:$0xff] %v8385_v56  ;;  %10651 = vxpose.xlu1.b32.cont [13/16] %v10650_v1, 128  ;;  %v2095_v16 = vmul.f32 %v9052_v60, %v12641_v25  ;;  %v17410_v19 = vmax.f32 %v12648_v38, %v12381_v48  ;;  %v9607_v21 = vunpack.i.h.bf16 %v9603_v11  ;;  %v9608_v12 = vpop.trf.xlu0 }
 0x387   :  { %v1586_v14 = vmul.f32 %v12672_v63, %v1328_v45  ;;  %v2096_v20 = vmul.f32 %v9053_v33, %v12641_v25  ;;  %v8323_v41 = vpack.c.bf16 %v10500_v9, %v9492_v43  ;;  %v17411_v58 = vmax.f32 %v12648_v38, %v12383_v50  ;;  %3447 = vst [vmem:[%s17335_s3 + $0x1d0] sm:$0xff] %v8355_v4 }
 0x388   :  { %v9054_v46 = vround.rtne.f32 %v1585_v44  ;;  %v1329_v49 = vmin.f32 %v12644_v37, %v17410_v19  ;;  %v8419_v43 = vpack.c.bf16 %v9607_v21, %v10391_v40  ;;  %v9604_v18 = vunpack.i.l.bf16 %v9603_v11 }
 0x389   :  { %v9055_v15 = vround.rtne.f32 %v1586_v14  ;;  %v1330_v59 = vmin.f32 %v12644_v37, %v17411_v58  ;;  %v9754_v5 = vpack.i.bf16 %v2096_v20, %v2095_v16  ;;  %3415 = vst [vmem:[%s17335_s3 + $0xd0] sm:$0xff] %v8323_v41  ;;  %v17412_v32 = vmax.f32 %v12648_v38, %v13137_v6 }
 0x38a   :  { %v2097_v30 = vmul.f32 %v9054_v46, %v12641_v25  ;;  %v1587_v48 = vmul.f32 %v12672_v63, %v1329_v49  ;;  %v17413_v42 = vmax.f32 %v12648_v38, %v13145_v17  ;;  %v10508_v27 = vunpack.i.h.bf16 %v10504_v22  ;;  %3511 = vst [vmem:[%s17335_s3 + $0x3d0] sm:$0xff] %v8419_v43  ;;  %v10509_v46 = vpop.trf.xlu1  ;;  %v17419_v49 = vld [vmem:[#allocation10_spill] sm:$0xff]  ;;  %v9613_v58 = vpop.trf.xlu0 }
 0x38b   :  { %v2098_v31 = vmul.f32 %v9055_v15, %v12641_v25  ;;  %v1588_v50 = vmul.f32 %v12672_v63, %v1330_v59  ;;  %v1331_v13 = vmin.f32 %v12644_v37, %v17412_v32  ;;  %9755 = vxpose.xlu0.b32.cont [13/16] %v9754_v5, 128  ;;  %v8387_v6 = vpack.c.bf16 %v9604_v18, %v10388_v54  ;;  %v17420_v15 = vld [vmem:[#allocation11_spill] sm:$0xff]  ;;  %v17423_v32 = vld [vmem:[#allocation12_spill] sm:$0xff] }
 0x38c   :  { %v9056_v62 = vround.rtne.f32 %v1587_v48  ;;  %v1332_v52 = vmin.f32 %v12644_v37, %v17413_v42  ;;  %v10505_v8 = vunpack.i.l.bf16 %v10504_v22  ;;  %v8357_v3 = vpack.c.bf16 %v10508_v27, %v9500_v10  ;;  %v17424_v42 = vld [vmem:[#allocation13_spill] sm:$0xff] }
 0x38d   :  { %v10652_v35 = vpack.i.bf16 %v2098_v31, %v2097_v30  ;;  %v9057_v51 = vround.rtne.f32 %v1588_v50  ;;  %v1589_v40 = vmul.f32 %v12672_v63, %v1331_v13  ;;  %3479 = vst [vmem:[%s17335_s3 + $0x2d0] sm:$0xff] %v8387_v6  ;;  %v17415_v54 = vmax.f32 %v12648_v38, %v17414_v61  ;;  %v11664_v61 = vld [vmem:[#allocation4] sm:$0xff] }
 0x38e   :  { %v2099_v36 = vmul.f32 %v9056_v62, %v12641_v25  ;;  %v1590_v17 = vmul.f32 %v12672_v63, %v1332_v52  ;;  %v17417_v1 = vmax.f32 %v12648_v38, %v17416_v26  ;;  %v8325_v14 = vpack.c.bf16 %v10505_v8, %v9497_v47  ;;  %3449 = vst [vmem:[%s17335_s3 + $0x1e0] sm:$0xff] %v8357_v3  ;;  %v14206_v27 = vpop.trf.xlu1 }
 0x38f   :  { %10653 = vxpose.xlu1.b32.cont [14/16] %v10652_v35, 128  ;;  %v2100_v39 = vmul.f32 %v9057_v51, %v12641_v25  ;;  %v9058_v56 = vround.rtne.f32 %v1589_v40  ;;  %v1333_v45 = vmin.f32 %v12644_v37, %v17415_v54  ;;  %v9612_v9 = vunpack.i.h.bf16 %v9608_v12 }
 0x390   :  { %v1334_v60 = vmin.f32 %v12644_v37, %v17417_v1  ;;  %v9059_v33 = vround.rtne.f32 %v1590_v17  ;;  %3417 = vst [vmem:[%s17335_s3 + $0xe0] sm:$0xff] %v8325_v14  ;;  %v17418_v38 = vunpack.i.h.bf16 %v13550_v0  ;;  %v9609_v47 = vunpack.i.l.bf16 %v9608_v12  ;;  %v14223_v1 = vld [vmem:[#allocation4 + $0x7e0] sm:$0xff] }
 0x391   :  { %v9756_v44 = vpack.i.bf16 %v2100_v39, %v2099_v36  ;;  %v2101_v11 = vmul.f32 %v9058_v56, %v12641_v25  ;;  %v1591_v10 = vmul.f32 %v12672_v63, %v1333_v45  ;;  %v1593_v20 = vmul.f32 %v12672_v63, %v17419_v49  ;;  %v14213_v56 = vpop.trf.xlu0  ;;  %v11665_v45 = vld [vmem:[#allocation4 + $0x8] sm:$0xff] }
 0x392   :  { %v1592_v16 = vmul.f32 %v12672_v63, %v1334_v60  ;;  %v2102_v37 = vmul.f32 %v9059_v33, %v12641_v25  ;;  %v8421_v2 = vpack.c.bf16 %v9612_v9, %v17418_v38  ;;  %v1594_v41 = vmul.f32 %v12672_v63, %v17420_v15  ;;  %v14231_v9 = vld [vmem:[#allocation4 + $0x7e8] sm:$0xff]  ;;  %v11670_v15 = vld [vmem:[#allocation4 + $0x20] sm:$0xff] }
 0x393   :  { %9757 = vxpose.xlu0.b32.cont [14/16] %v9756_v44, 128  ;;  %v9060_v4 = vround.rtne.f32 %v1591_v10  ;;  %v17421_v30 = vunpack.i.l.bf16 %v13550_v0  ;;  %v10513_v21 = vunpack.i.h.bf16 %v10509_v46  ;;  %v9062_v31 = vround.rtne.f32 %v1593_v20 }
 0x394   :  { %v9061_v19 = vround.rtne.f32 %v1592_v16  ;;  %v10654_v59 = vpack.i.bf16 %v2102_v37, %v2101_v11  ;;  %3513 = vst [vmem:[%s17335_s3 + $0x3e0] sm:$0xff] %v8421_v2  ;;  %v9063_v50 = vround.rtne.f32 %v1594_v41  ;;  %v10510_v62 = vunpack.i.l.bf16 %v10509_v46  ;;  %v11669_v37 = vld [vmem:[#allocation4 + $0x18] sm:$0xff]  ;;  %v14247_v2 = vpop.trf.xlu1  ;;  %v11692_v11 = vld [vmem:[#allocation4 + $0xd0] sm:$0xff] }
 0x395   :  { %v8389_v48 = vpack.c.bf16 %v9609_v47, %v17421_v30  ;;  %v2103_v22 = vmul.f32 %v9060_v4, %v12641_v25  ;;  %v17422_v43 = vunpack.i.h.bf16 %v13579_v24  ;;  %v1595_v0 = vmul.f32 %v12672_v63, %v17423_v32 }
 0x396   :  { %v2104_v5 = vmul.f32 %v9061_v19, %v12641_v25  ;;  %10655 = vxpose.xlu1.b32.cont [15/16] %v10654_v59, 128  ;;  %v2105_v35 = vmul.f32 %v9062_v31, %v12641_v25  ;;  %v2106_v51 = vmul.f32 %v9063_v50, %v12641_v25  ;;  %v1596_v52 = vmul.f32 %v12672_v63, %v17424_v42  ;;  %v11672_v31 = vld [vmem:[#allocation4 + $0x30] sm:$0xff] }
 0x397   :  { %3481 = vst [vmem:[%s17335_s3 + $0x2e0] sm:$0xff] %v8389_v48  ;;  %v8359_v18 = vpack.c.bf16 %v10513_v21, %v17422_v43  ;;  %v17425_v36 = vunpack.i.l.bf16 %v13579_v24  ;;  %v9064_v40 = vround.rtne.f32 %v1595_v0  ;;  %v9617_v12 = vunpack.i.h.bf16 %v9613_v58  ;;  %v11671_v48 = vld [vmem:[#allocation4 + $0x28] sm:$0xff] }
 0x398   :  { %v9758_v13 = vpack.i.bf16 %v2104_v5, %v2103_v22  ;;  %v10656_v39 = vpack.i.bf16 %v2106_v51, %v2105_v35  ;;  %v9065_v17 = vround.rtne.f32 %v1596_v52  ;;  %v9614_v8 = vunpack.i.l.bf16 %v9613_v58  ;;  %v14255_v58 = vpop.trf.xlu0  ;;  %v14269_v51 = vpop.trf.xlu1  ;;  %v11674_v52 = vld [vmem:[#allocation4 + $0x40] sm:$0xff]  ;;  %v11729_v5 = vld [vmem:[#allocation4 + $0x1f8] sm:$0xff] }
 0x399   :  { %v8327_v6 = vpack.c.bf16 %v10510_v62, %v17425_v36  ;;  %3451 = vst [vmem:[%s17335_s3 + $0x1f0] sm:$0xff] %v8359_v18  ;;  %v2107_v63 = vmul.f32 %v9064_v40, %v12641_v25  ;;  %v17426_v24 = vunpack.i.h.bf16 %v13572_v7  ;;  %v4298_v54 = vmax.f32 %v13808_v34, %v11664_v61  ;;  %v11673_v18 = vld [vmem:[#allocation4 + $0x38] sm:$0xff] }
 0x39a   :  { %9759 = vxpose.xlu0.b32.cont [15/16] %v9758_v13, 128  ;;  %v4299_v26 = vmax.f32 %v13808_v34, %v11665_v45  ;;  %10657 = vxpose.xlu1.b32.end [16/16] %v10656_v39, 128  ;;  %v2108_v44 = vmul.f32 %v9065_v17, %v12641_v25  ;;  %v17427_v33 = vunpack.i.l.bf16 %v13572_v7  ;;  %v10550_v10 = vunpack.i.h.bf16 %v14206_v27  ;;  %v11668_v7 = vld [vmem:[#allocation4 + $0x10] sm:$0xff]  ;;  %v14275_v39 = vpop.eup %11412 }
 0x39b   :  { %3419 = vst [vmem:[%s17335_s3 + $0xf0] sm:$0xff] %v8327_v6  ;;  %v8423_v3 = vpack.c.bf16 %v9617_v12, %v17426_v24  ;;  %v4554_v25 = vmin.f32 %v13789_v57, %v4298_v54  ;;  %v4300_v46 = vmax.f32 %v13808_v34, %v11668_v7  ;;  %v4301_v38 = vmax.f32 %v13808_v34, %v11669_v37  ;;  %v11675_v6 = vld [vmem:[#allocation4 + $0x48] sm:$0xff]  ;;  %v11721_v12 = vld [vmem:[#allocation4 + $0x1b8] sm:$0xff] }
 0x39c   :  { %v8391_v14 = vpack.c.bf16 %v9614_v8, %v17427_v33  ;;  %v9760_v16 = vpack.i.bf16 %v2108_v44, %v2107_v63  ;;  %v4555_v47 = vmin.f32 %v13789_v57, %v4299_v26  ;;  %v10547_v4 = vunpack.i.l.bf16 %v14206_v27  ;;  %v11676_v8 = vld [vmem:[#allocation4 + $0x50] sm:$0xff] }
 0x39d   :  { %3515 = vst [vmem:[%s17335_s3 + $0x3f0] sm:$0xff] %v8423_v3  ;;  %v4556_v19 = vmin.f32 %v13789_v57, %v4300_v46  ;;  %v4302_v41 = vmax.f32 %v13808_v34, %v11670_v15  ;;  %v4557_v59 = vmin.f32 %v13789_v57, %v4301_v38  ;;  %v4303_v21 = vmax.f32 %v13808_v34, %v11671_v48 }
 0x39e   :  { %3483 = vst [vmem:[%s17335_s3 + $0x2f0] sm:$0xff] %v8391_v14  ;;  %9761 = vxpose.xlu0.b32.end [16/16] %v9760_v16, 128  ;;  %v4304_v50 = vmax.f32 %v13808_v34, %v11672_v31  ;;  %v4305_v32 = vmax.f32 %v13808_v34, %v11673_v18  ;;  %v4306_v36 = vmax.f32 %v13808_v34, %v11674_v52 }
 0x39f   :  { %v4558_v22 = vmin.f32 %v13789_v57, %v4302_v41  ;;  %v4559_v62 = vmin.f32 %v13789_v57, %v4303_v21  ;;  %v4307_v40 = vmax.f32 %v13808_v34, %v11675_v6  ;;  %v4308_v63 = vmax.f32 %v13808_v34, %v11676_v8  ;;  %v11677_v6 = vld [vmem:[#allocation4 + $0x58] sm:$0xff] }
 0x3a0   :  { %v4560_v13 = vmin.f32 %v13789_v57, %v4304_v50  ;;  %v4561_v42 = vmin.f32 %v13789_v57, %v4305_v32  ;;  %v4812_v24 = vmul.f32 %v14275_v39, %v4554_v25  ;;  %v4813_v3 = vmul.f32 %v14275_v39, %v4555_v47  ;;  %v14295_v50 = vpop.trf.xlu0 }
 0x3a1   :  { %v4814_v61 = vmul.f32 %v14275_v39, %v4556_v19  ;;  %v4815_v54 = vmul.f32 %v14275_v39, %v4557_v59  ;;  %v4816_v45 = vmul.f32 %v14275_v39, %v4558_v22  ;;  %v4817_v26 = vmul.f32 %v14275_v39, %v4559_v62 }
 0x3a2   :  { %v4818_v44 = vmul.f32 %v14275_v39, %v4560_v13  ;;  %v4819_v33 = vmul.f32 %v14275_v39, %v4561_v42  ;;  %v9068_v14 = vround.rtne.f32 %v4812_v24  ;;  %v9069_v16 = vround.rtne.f32 %v4813_v3 }
 0x3a3   :  { %v9070_v7 = vround.rtne.f32 %v4814_v61  ;;  %v9071_v46 = vround.rtne.f32 %v4815_v54  ;;  %v9072_v37 = vround.rtne.f32 %v4816_v45  ;;  %v9073_v25 = vround.rtne.f32 %v4817_v26 }
 0x3a4   :  { %v9074_v38 = vround.rtne.f32 %v4818_v44  ;;  %v9075_v47 = vround.rtne.f32 %v4819_v33  ;;  %v5324_v19 = vmul.f32 %v9068_v14, %v13782_v28  ;;  %v5325_v15 = vmul.f32 %v9069_v16, %v13782_v28  ;;  %v11678_v33 = vld [vmem:[#allocation4 + $0x60] sm:$0xff] }
 0x3a5   :  { %v5326_v41 = vmul.f32 %v9070_v7, %v13782_v28  ;;  %v5327_v59 = vmul.f32 %v9071_v46, %v13782_v28  ;;  %v5328_v48 = vmul.f32 %v9072_v37, %v13782_v28  ;;  %v5329_v21 = vmul.f32 %v9073_v25, %v13782_v28  ;;  %v14309_v7 = vpop.trf.xlu1  ;;  %v11713_v25 = vld [vmem:[#allocation4 + $0x178] sm:$0xff] }
 0x3a6   :  { %v5330_v22 = vmul.f32 %v9074_v38, %v13782_v28  ;;  %v5331_v31 = vmul.f32 %v9075_v47, %v13782_v28  ;;  %v10738_v62 = vpack.i.bf16 %v5325_v15, %v5324_v19  ;;  %v4562_v32 = vmin.f32 %v13789_v57, %v4306_v36  ;;  %v14316_v15 = vpop.trf.xlu0 }
 0x3a7   :  { %v9842_v18 = vpack.i.bf16 %v5327_v59, %v5326_v41  ;;  %v4563_v13 = vmin.f32 %v13789_v57, %v4307_v40  ;;  %v10740_v42 = vpack.i.bf16 %v5329_v21, %v5328_v48  ;;  %v4309_v8 = vmax.f32 %v13808_v34, %v11677_v6 }
 0x3a8   :  { %v9844_v52 = vpack.i.bf16 %v5331_v31, %v5330_v22  ;;  %v4564_v24 = vmin.f32 %v13789_v57, %v4308_v63  ;;  %10739 = vxpose.xlu1.b32.start [1/16] %v10738_v62, 128  ;;  %v4820_v3 = vmul.f32 %v14275_v39, %v4562_v32  ;;  %v4310_v14 = vmax.f32 %v13808_v34, %v11678_v33  ;;  %v11679_v63 = vld [vmem:[#allocation4 + $0x68] sm:$0xff]  ;;  %v11680_v62 = vld [vmem:[#allocation4 + $0x70] sm:$0xff]  ;;  %v11681_v32 = vld [vmem:[#allocation4 + $0x78] sm:$0xff] }
 0x3a9   :  { %9843 = vxpose.xlu0.b32.start [1/16] %v9842_v18, 128  ;;  %v4821_v61 = vmul.f32 %v14275_v39, %v4563_v13  ;;  %v4565_v45 = vmin.f32 %v13789_v57, %v4309_v8  ;;  %v4311_v16 = vmax.f32 %v13808_v34, %v11679_v63  ;;  %v4312_v18 = vmax.f32 %v13808_v34, %v11680_v62 }
 0x3aa   :  { %v4822_v36 = vmul.f32 %v14275_v39, %v4564_v24  ;;  %v9076_v26 = vround.rtne.f32 %v4820_v3  ;;  %v4566_v19 = vmin.f32 %v13789_v57, %v4310_v14  ;;  %v4313_v13 = vmax.f32 %v13808_v34, %v11681_v32  ;;  %v11684_v32 = vld [vmem:[#allocation4 + $0x90] sm:$0xff] }
 0x3ab   :  { %v9077_v44 = vround.rtne.f32 %v4821_v61  ;;  %v4823_v46 = vmul.f32 %v14275_v39, %v4565_v45  ;;  %v4567_v48 = vmin.f32 %v13789_v57, %v4311_v16  ;;  %v4568_v24 = vmin.f32 %v13789_v57, %v4312_v18  ;;  %v11683_v16 = vld [vmem:[#allocation4 + $0x88] sm:$0xff] }
 0x3ac   :  { %v9078_v37 = vround.rtne.f32 %v4822_v36  ;;  %10741 = vxpose.xlu1.b32.cont [2/16] %v10740_v42, 128  ;;  %v5332_v38 = vmul.f32 %v9076_v26, %v13782_v28  ;;  %v4824_v31 = vmul.f32 %v14275_v39, %v4566_v19  ;;  %v4569_v3 = vmin.f32 %v13789_v57, %v4313_v13  ;;  %v11682_v26 = vld [vmem:[#allocation4 + $0x80] sm:$0xff]  ;;  %v11705_v19 = vld [vmem:[#allocation4 + $0x138] sm:$0xff] }
 0x3ad   :  { %9845 = vxpose.xlu0.b32.cont [2/16] %v9844_v52, 128  ;;  %v5333_v47 = vmul.f32 %v9077_v44, %v13782_v28  ;;  %v9079_v41 = vround.rtne.f32 %v4823_v46  ;;  %v4825_v52 = vmul.f32 %v14275_v39, %v4567_v48  ;;  %v4314_v44 = vmax.f32 %v13808_v34, %v11682_v26 }
 0x3ae   :  { %v5334_v59 = vmul.f32 %v9078_v37, %v13782_v28  ;;  %v9080_v8 = vround.rtne.f32 %v4824_v31  ;;  %v4826_v14 = vmul.f32 %v14275_v39, %v4568_v24  ;;  %v4827_v63 = vmul.f32 %v14275_v39, %v4569_v3  ;;  %v14335_v37 = vpop.trf.xlu1  ;;  %v11685_v24 = vld [vmem:[#allocation4 + $0x98] sm:$0xff] }
 0x3af   :  { %v10742_v22 = vpack.i.bf16 %v5333_v47, %v5332_v38  ;;  %v5335_v42 = vmul.f32 %v9079_v41, %v13782_v28  ;;  %v9081_v45 = vround.rtne.f32 %v4825_v52  ;;  %v4315_v46 = vmax.f32 %v13808_v34, %v11683_v16 }
 0x3b0   :  { %v5336_v33 = vmul.f32 %v9080_v8, %v13782_v28  ;;  %v4570_v47 = vmin.f32 %v13789_v57, %v4314_v44  ;;  %v9082_v41 = vround.rtne.f32 %v4826_v14  ;;  %v4316_v13 = vmax.f32 %v13808_v34, %v11684_v32  ;;  %v11697_v32 = vld [vmem:[#allocation4 + $0xf8] sm:$0xff] }
 0x3b1   :  { %10743 = vxpose.xlu1.b32.cont [3/16] %v10742_v22, 128  ;;  %v9846_v61 = vpack.i.bf16 %v5335_v42, %v5334_v59  ;;  %v5337_v38 = vmul.f32 %v9081_v45, %v13782_v28  ;;  %v9083_v59 = vround.rtne.f32 %v4827_v63  ;;  %v4571_v48 = vmin.f32 %v13789_v57, %v4315_v46  ;;  %v14341_v22 = vpop.trf.xlu0 }
 0x3b2   :  { %v4828_v62 = vmul.f32 %v14275_v39, %v4570_v47  ;;  %v5338_v42 = vmul.f32 %v9082_v41, %v13782_v28  ;;  %v4317_v3 = vmax.f32 %v13808_v34, %v11685_v24  ;;  %v4572_v45 = vmin.f32 %v13789_v57, %v4316_v13  ;;  %v14357_v41 = vpop.trf.xlu1 }
 0x3b3   :  { %9847 = vxpose.xlu0.b32.cont [3/16] %v9846_v61, 128  ;;  %v10744_v31 = vpack.i.bf16 %v5337_v38, %v5336_v33  ;;  %v5339_v52 = vmul.f32 %v9083_v59, %v13782_v28  ;;  %v4829_v8 = vmul.f32 %v14275_v39, %v4571_v48  ;;  %v11686_v38 = vld [vmem:[#allocation4 + $0xa0] sm:$0xff] }
 0x3b4   :  { %v9084_v61 = vround.rtne.f32 %v4828_v62  ;;  %v4573_v14 = vmin.f32 %v13789_v57, %v4317_v3  ;;  %v4830_v16 = vmul.f32 %v14275_v39, %v4572_v45  ;;  %v4318_v47 = vmax.f32 %v13808_v34, %v11686_v38  ;;  %v11689_v38 = vld [vmem:[#allocation4 + $0xb8] sm:$0xff] }
 0x3b5   :  { %10745 = vxpose.xlu1.b32.cont [4/16] %v10744_v31, 128  ;;  %v9848_v44 = vpack.i.bf16 %v5339_v52, %v5338_v42  ;;  %v9085_v33 = vround.rtne.f32 %v4829_v8  ;;  %v11687_v31 = vld [vmem:[#allocation4 + $0xa8] sm:$0xff]  ;;  %v14364_v52 = vpop.trf.xlu0 }
 0x3b6   :  { %v5340_v63 = vmul.f32 %v9084_v61, %v13782_v28  ;;  %v4831_v48 = vmul.f32 %v14275_v39, %v4573_v14  ;;  %v4319_v62 = vmax.f32 %v13808_v34, %v11687_v31  ;;  %v9086_v13 = vround.rtne.f32 %v4830_v16  ;;  %v14383_v60 = vpop.trf.xlu1 }
 0x3b7   :  { %9849 = vxpose.xlu0.b32.cont [4/16] %v9848_v44, 128  ;;  %v5341_v59 = vmul.f32 %v9085_v33, %v13782_v28  ;;  %v4574_v42 = vmin.f32 %v13789_v57, %v4318_v47  ;;  %v11688_v33 = vld [vmem:[#allocation4 + $0xb0] sm:$0xff]  ;;  %v4321_v16 = vmax.f32 %v13808_v34, %v11689_v38  ;;  %v11691_v38 = vld [vmem:[#allocation4 + $0xc8] sm:$0xff] }
 0x3b8   :  { %v9087_v24 = vround.rtne.f32 %v4831_v48  ;;  %v4575_v3 = vmin.f32 %v13789_v57, %v4319_v62  ;;  %v5342_v45 = vmul.f32 %v9086_v13, %v13782_v28  ;;  %v4320_v14 = vmax.f32 %v13808_v34, %v11688_v33  ;;  %v11690_v33 = vld [vmem:[#allocation4 + $0xc0] sm:$0xff] }
 0x3b9   :  { %v10746_v8 = vpack.i.bf16 %v5341_v59, %v5340_v63  ;;  %v4832_v44 = vmul.f32 %v14275_v39, %v4574_v42  ;;  %v4577_v62 = vmin.f32 %v13789_v57, %v4321_v16  ;;  %v4322_v30 = vmax.f32 %v13808_v34, %v11690_v33  ;;  %v14389_v33 = vpop.trf.xlu0 }
 0x3ba   :  { %v5343_v47 = vmul.f32 %v9087_v24, %v13782_v28  ;;  %v4833_v63 = vmul.f32 %v14275_v39, %v4575_v3  ;;  %v4576_v31 = vmin.f32 %v13789_v57, %v4320_v14 }
 0x3bb   :  { %10747 = vxpose.xlu1.b32.cont [5/16] %v10746_v8, 128  ;;  %v9088_v48 = vround.rtne.f32 %v4832_v44  ;;  %v4835_v3 = vmul.f32 %v14275_v39, %v4577_v62  ;;  %v4323_v44 = vmax.f32 %v13808_v34, %v11691_v38  ;;  %v4578_v14 = vmin.f32 %v13789_v57, %v4322_v30 }
 0x3bc   :  { %v9850_v13 = vpack.i.bf16 %v5343_v47, %v5342_v45  ;;  %v9089_v42 = vround.rtne.f32 %v4833_v63  ;;  %v4834_v24 = vmul.f32 %v14275_v39, %v4576_v31 }
 0x3bd   :  { %v5344_v8 = vmul.f32 %v9088_v48, %v13782_v28  ;;  %v9091_v63 = vround.rtne.f32 %v4835_v3  ;;  %v4579_v48 = vmin.f32 %v13789_v57, %v4323_v44  ;;  %v4836_v62 = vmul.f32 %v14275_v39, %v4578_v14 }
 0x3be   :  { %9851 = vxpose.xlu0.b32.cont [5/16] %v9850_v13, 128  ;;  %v5345_v45 = vmul.f32 %v9089_v42, %v13782_v28  ;;  %v9090_v47 = vround.rtne.f32 %v4834_v24  ;;  %v4324_v13 = vmax.f32 %v13808_v34, %v11692_v11  ;;  %v11693_v24 = vld [vmem:[#allocation4 + $0xd8] sm:$0xff] }
 0x3bf   :  { %v5347_v30 = vmul.f32 %v9091_v63, %v13782_v28  ;;  %v4837_v16 = vmul.f32 %v14275_v39, %v4579_v48  ;;  %v4325_v3 = vmax.f32 %v13808_v34, %v11693_v24  ;;  %v9092_v44 = vround.rtne.f32 %v4836_v62  ;;  %v11694_v48 = vld [vmem:[#allocation4 + $0xe0] sm:$0xff]  ;;  %v14405_v24 = vpop.trf.xlu1 }
 0x3c0   :  { %v10748_v31 = vpack.i.bf16 %v5345_v45, %v5344_v8  ;;  %v5346_v42 = vmul.f32 %v9090_v47, %v13782_v28  ;;  %v4580_v8 = vmin.f32 %v13789_v57, %v4324_v13  ;;  %v4326_v61 = vmax.f32 %v13808_v34, %v11694_v48  ;;  %v11695_v13 = vld [vmem:[#allocation4 + $0xe8] sm:$0xff]  ;;  %v11696_v45 = vld [vmem:[#allocation4 + $0xf0] sm:$0xff] }
 0x3c1   :  { %v9093_v38 = vround.rtne.f32 %v4837_v16  ;;  %v4581_v59 = vmin.f32 %v13789_v57, %v4325_v3  ;;  %v5348_v11 = vmul.f32 %v9092_v44, %v13782_v28  ;;  %v4327_v16 = vmax.f32 %v13808_v34, %v11695_v13  ;;  %v14412_v44 = vpop.trf.xlu0 }
 0x3c2   :  { %10749 = vxpose.xlu1.b32.cont [6/16] %v10748_v31, 128  ;;  %v9852_v14 = vpack.i.bf16 %v5347_v30, %v5346_v42  ;;  %v4838_v47 = vmul.f32 %v14275_v39, %v4580_v8  ;;  %v4582_v3 = vmin.f32 %v13789_v57, %v4326_v61  ;;  %v4328_v13 = vmax.f32 %v13808_v34, %v11696_v45  ;;  %v11698_v45 = vld [vmem:[#allocation4 + $0x100] sm:$0xff]  ;;  %v11700_v42 = vld [vmem:[#allocation4 + $0x110] sm:$0xff] }
 0x3c3   :  { %v5349_v31 = vmul.f32 %v9093_v38, %v13782_v28  ;;  %v4839_v62 = vmul.f32 %v14275_v39, %v4581_v59  ;;  %v4583_v48 = vmin.f32 %v13789_v57, %v4327_v16  ;;  %v4330_v46 = vmax.f32 %v13808_v34, %v11698_v45 }
 0x3c4   :  { %9853 = vxpose.xlu0.b32.cont [6/16] %v9852_v14, 128  ;;  %v9094_v30 = vround.rtne.f32 %v4838_v47  ;;  %v4840_v59 = vmul.f32 %v14275_v39, %v4582_v3  ;;  %v4329_v47 = vmax.f32 %v13808_v34, %v11697_v32  ;;  %v4584_v16 = vmin.f32 %v13789_v57, %v4328_v13 }
 0x3c5   :  { %v10750_v8 = vpack.i.bf16 %v5349_v31, %v5348_v11  ;;  %v9095_v63 = vround.rtne.f32 %v4839_v62  ;;  %v4841_v11 = vmul.f32 %v14275_v39, %v4583_v48  ;;  %v11699_v48 = vld [vmem:[#allocation4 + $0x108] sm:$0xff]  ;;  %v14431_v31 = vpop.trf.xlu1  ;;  %v4586_v13 = vmin.f32 %v13789_v57, %v4330_v46  ;;  %v14437_v45 = vpop.trf.xlu0 }
 0x3c6   :  { %v5350_v38 = vmul.f32 %v9094_v30, %v13782_v28  ;;  %v9096_v62 = vround.rtne.f32 %v4840_v59  ;;  %v4585_v30 = vmin.f32 %v13789_v57, %v4329_v47  ;;  %v4331_v59 = vmax.f32 %v13808_v34, %v11699_v48 }
 0x3c7   :  { %10751 = vxpose.xlu1.b32.cont [7/16] %v10750_v8, 128  ;;  %v5351_v61 = vmul.f32 %v9095_v63, %v13782_v28  ;;  %v9097_v3 = vround.rtne.f32 %v4841_v11  ;;  %v4842_v63 = vmul.f32 %v14275_v39, %v4584_v16 }
 0x3c8   :  { %v5352_v32 = vmul.f32 %v9096_v62, %v13782_v28  ;;  %v4843_v8 = vmul.f32 %v14275_v39, %v4585_v30  ;;  %v4587_v62 = vmin.f32 %v13789_v57, %v4331_v59  ;;  %v4844_v30 = vmul.f32 %v14275_v39, %v4586_v13 }
 0x3c9   :  { %v9854_v14 = vpack.i.bf16 %v5351_v61, %v5350_v38  ;;  %v5353_v38 = vmul.f32 %v9097_v3, %v13782_v28  ;;  %v9098_v61 = vround.rtne.f32 %v4842_v63  ;;  %v11701_v63 = vld [vmem:[#allocation4 + $0x118] sm:$0xff] }
 0x3ca   :  { %v9099_v11 = vround.rtne.f32 %v4843_v8  ;;  %v4845_v47 = vmul.f32 %v14275_v39, %v4587_v62  ;;  %v4333_v8 = vmax.f32 %v13808_v34, %v11701_v63  ;;  %v9100_v59 = vround.rtne.f32 %v4844_v30  ;;  %v11702_v62 = vld [vmem:[#allocation4 + $0x120] sm:$0xff]  ;;  %v14453_v63 = vpop.trf.xlu1 }
 0x3cb   :  { %9855 = vxpose.xlu0.b32.cont [7/16] %v9854_v14, 128  ;;  %v10752_v16 = vpack.i.bf16 %v5353_v38, %v5352_v32  ;;  %v4332_v14 = vmax.f32 %v13808_v34, %v11700_v42  ;;  %v5354_v3 = vmul.f32 %v9098_v61, %v13782_v28  ;;  %v4334_v18 = vmax.f32 %v13808_v34, %v11702_v62  ;;  %v11704_v38 = vld [vmem:[#allocation4 + $0x130] sm:$0xff] }
 0x3cc   :  { %v5355_v46 = vmul.f32 %v9099_v11, %v13782_v28  ;;  %v9101_v48 = vround.rtne.f32 %v4845_v47  ;;  %v4589_v26 = vmin.f32 %v13789_v57, %v4333_v8  ;;  %v5356_v42 = vmul.f32 %v9100_v59, %v13782_v28  ;;  %v14460_v59 = vpop.trf.xlu0 }
 0x3cd   :  { %10753 = vxpose.xlu1.b32.cont [8/16] %v10752_v16, 128  ;;  %v4588_v32 = vmin.f32 %v13789_v57, %v4332_v14  ;;  %v11703_v14 = vld [vmem:[#allocation4 + $0x128] sm:$0xff]  ;;  %v4590_v8 = vmin.f32 %v13789_v57, %v4334_v18 }
 0x3ce   :  { %v9856_v13 = vpack.i.bf16 %v5355_v46, %v5354_v3  ;;  %v5357_v16 = vmul.f32 %v9101_v48, %v13782_v28  ;;  %v4847_v30 = vmul.f32 %v14275_v39, %v4589_v26  ;;  %v4335_v47 = vmax.f32 %v13808_v34, %v11703_v14  ;;  %v11708_v3 = vld [vmem:[#allocation4 + $0x150] sm:$0xff] }
 0x3cf   :  { %v4846_v61 = vmul.f32 %v14275_v39, %v4588_v32  ;;  %v4848_v26 = vmul.f32 %v14275_v39, %v4590_v8  ;;  %v4336_v14 = vmax.f32 %v13808_v34, %v11704_v38  ;;  %v11706_v38 = vld [vmem:[#allocation4 + $0x140] sm:$0xff] }
 0x3d0   :  { %9857 = vxpose.xlu0.b32.cont [8/16] %v9856_v13, 128  ;;  %v10754_v32 = vpack.i.bf16 %v5357_v16, %v5356_v42  ;;  %v9103_v11 = vround.rtne.f32 %v4847_v30  ;;  %v4591_v62 = vmin.f32 %v13789_v57, %v4335_v47  ;;  %v4338_v36 = vmax.f32 %v13808_v34, %v11706_v38  ;;  %v14479_v16 = vpop.trf.xlu1  ;;  %v14485_v38 = vpop.trf.xlu0 }
 0x3d1   :  { %v9102_v46 = vround.rtne.f32 %v4846_v61  ;;  %v4337_v61 = vmax.f32 %v13808_v34, %v11705_v19  ;;  %v9104_v30 = vround.rtne.f32 %v4848_v26  ;;  %v4592_v47 = vmin.f32 %v13789_v57, %v4336_v14 }
 0x3d2   :  { %10755 = vxpose.xlu1.b32.cont [9/16] %v10754_v32, 128  ;;  %v5359_v18 = vmul.f32 %v9103_v11, %v13782_v28  ;;  %v4849_v42 = vmul.f32 %v14275_v39, %v4591_v62  ;;  %v11707_v62 = vld [vmem:[#allocation4 + $0x148] sm:$0xff]  ;;  %v4594_v14 = vmin.f32 %v13789_v57, %v4338_v36 }
 0x3d3   :  { %v5358_v48 = vmul.f32 %v9102_v46, %v13782_v28  ;;  %v4593_v46 = vmin.f32 %v13789_v57, %v4337_v61  ;;  %v5360_v19 = vmul.f32 %v9104_v30, %v13782_v28  ;;  %v4850_v11 = vmul.f32 %v14275_v39, %v4592_v47 }
 0x3d4   :  { %v9105_v8 = vround.rtne.f32 %v4849_v42  ;;  %v4339_v26 = vmax.f32 %v13808_v34, %v11707_v62 }
 0x3d5   :  { %v9858_v13 = vpack.i.bf16 %v5359_v18, %v5358_v48  ;;  %v4851_v32 = vmul.f32 %v14275_v39, %v4593_v46  ;;  %v9106_v18 = vround.rtne.f32 %v4850_v11  ;;  %v4852_v46 = vmul.f32 %v14275_v39, %v4594_v14  ;;  %v11709_v11 = vld [vmem:[#allocation4 + $0x158] sm:$0xff] }
 0x3d6   :  { %v5361_v48 = vmul.f32 %v9105_v8, %v13782_v28  ;;  %v4595_v30 = vmin.f32 %v13789_v57, %v4339_v26 }
 0x3d7   :  { %9859 = vxpose.xlu0.b32.cont [9/16] %v9858_v13, 128  ;;  %v9107_v42 = vround.rtne.f32 %v4851_v32  ;;  %v4340_v13 = vmax.f32 %v13808_v34, %v11708_v3  ;;  %v5362_v8 = vmul.f32 %v9106_v18, %v13782_v28  ;;  %v4341_v32 = vmax.f32 %v13808_v34, %v11709_v11  ;;  %v14501_v11 = vpop.trf.xlu1 }
 0x3d8   :  { %v10756_v47 = vpack.i.bf16 %v5361_v48, %v5360_v19  ;;  %v4853_v61 = vmul.f32 %v14275_v39, %v4595_v30  ;;  %v9108_v26 = vround.rtne.f32 %v4852_v46  ;;  %v11710_v30 = vld [vmem:[#allocation4 + $0x160] sm:$0xff]  ;;  %v11712_v48 = vld [vmem:[#allocation4 + $0x170] sm:$0xff] }
 0x3d9   :  { %v5363_v36 = vmul.f32 %v9107_v42, %v13782_v28  ;;  %v4596_v19 = vmin.f32 %v13789_v57, %v4340_v13  ;;  %v4597_v6 = vmin.f32 %v13789_v57, %v4341_v32  ;;  %v4342_v21 = vmax.f32 %v13808_v34, %v11710_v30  ;;  %v11711_v13 = vld [vmem:[#allocation4 + $0x168] sm:$0xff] }
 0x3da   :  { %10757 = vxpose.xlu1.b32.cont [10/16] %v10756_v47, 128  ;;  %v9109_v62 = vround.rtne.f32 %v4853_v61  ;;  %v5364_v3 = vmul.f32 %v9108_v26, %v13782_v28  ;;  %v4343_v61 = vmax.f32 %v13808_v34, %v11711_v13  ;;  %v14508_v26 = vpop.trf.xlu0  ;;  %v4344_v13 = vmax.f32 %v13808_v34, %v11712_v48  ;;  %v11714_v48 = vld [vmem:[#allocation4 + $0x180] sm:$0xff] }
 0x3db   :  { %v9860_v14 = vpack.i.bf16 %v5363_v36, %v5362_v8  ;;  %v4854_v18 = vmul.f32 %v14275_v39, %v4596_v19  ;;  %v4855_v46 = vmul.f32 %v14275_v39, %v4597_v6  ;;  %v4598_v32 = vmin.f32 %v13789_v57, %v4342_v21  ;;  %v11716_v8 = vld [vmem:[#allocation4 + $0x190] sm:$0xff] }
 0x3dc   :  { %v5365_v47 = vmul.f32 %v9109_v62, %v13782_v28  ;;  %v4599_v30 = vmin.f32 %v13789_v57, %v4343_v61  ;;  %v4600_v61 = vmin.f32 %v13789_v57, %v4344_v13  ;;  %v4346_v40 = vmax.f32 %v13808_v34, %v11714_v48 }
 0x3dd   :  { %9861 = vxpose.xlu0.b32.cont [10/16] %v9860_v14, 128  ;;  %v9110_v36 = vround.rtne.f32 %v4854_v18  ;;  %v9111_v42 = vround.rtne.f32 %v4855_v46  ;;  %v4856_v6 = vmul.f32 %v14275_v39, %v4598_v32  ;;  %v4345_v18 = vmax.f32 %v13808_v34, %v11713_v25 }
 0x3de   :  { %v10758_v19 = vpack.i.bf16 %v5365_v47, %v5364_v3  ;;  %v4857_v3 = vmul.f32 %v14275_v39, %v4599_v30  ;;  %v11715_v30 = vld [vmem:[#allocation4 + $0x188] sm:$0xff]  ;;  %v14527_v47 = vpop.trf.xlu1  ;;  %v4602_v13 = vmin.f32 %v13789_v57, %v4346_v40  ;;  %v14533_v48 = vpop.trf.xlu0 }
 0x3df   :  { %v5366_v62 = vmul.f32 %v9110_v36, %v13782_v28  ;;  %v5367_v21 = vmul.f32 %v9111_v42, %v13782_v28  ;;  %v9112_v46 = vround.rtne.f32 %v4856_v6  ;;  %v4601_v36 = vmin.f32 %v13789_v57, %v4345_v18 }
 0x3e0   :  { %10759 = vxpose.xlu1.b32.cont [11/16] %v10758_v19, 128  ;;  %v9113_v32 = vround.rtne.f32 %v4857_v3  ;;  %v4858_v42 = vmul.f32 %v14275_v39, %v4600_v61  ;;  %v4347_v6 = vmax.f32 %v13808_v34, %v11715_v30 }
 0x3e1   :  { %v9862_v14 = vpack.i.bf16 %v5367_v21, %v5366_v62  ;;  %v5368_v25 = vmul.f32 %v9112_v46, %v13782_v28  ;;  %v4859_v19 = vmul.f32 %v14275_v39, %v4601_v36  ;;  %v4860_v36 = vmul.f32 %v14275_v39, %v4602_v13 }
 0x3e2   :  { %v5369_v62 = vmul.f32 %v9113_v32, %v13782_v28  ;;  %v9114_v21 = vround.rtne.f32 %v4858_v42  ;;  %v4603_v46 = vmin.f32 %v13789_v57, %v4347_v6  ;;  %v11717_v42 = vld [vmem:[#allocation4 + $0x198] sm:$0xff] }
 0x3e3   :  { %9863 = vxpose.xlu0.b32.cont [11/16] %v9862_v14, 128  ;;  %v9115_v3 = vround.rtne.f32 %v4859_v19  ;;  %v4348_v14 = vmax.f32 %v13808_v34, %v11716_v8  ;;  %v4349_v19 = vmax.f32 %v13808_v34, %v11717_v42  ;;  %v9116_v6 = vround.rtne.f32 %v4860_v36  ;;  %v14549_v42 = vpop.trf.xlu1 }
 0x3e4   :  { %v10760_v61 = vpack.i.bf16 %v5369_v62, %v5368_v25  ;;  %v5370_v32 = vmul.f32 %v9114_v21, %v13782_v28  ;;  %v4861_v18 = vmul.f32 %v14275_v39, %v4603_v46  ;;  %v11718_v46 = vld [vmem:[#allocation4 + $0x1a0] sm:$0xff]  ;;  %v11720_v62 = vld [vmem:[#allocation4 + $0x1b0] sm:$0xff] }
 0x3e5   :  { %v5371_v40 = vmul.f32 %v9115_v3, %v13782_v28  ;;  %v4604_v25 = vmin.f32 %v13789_v57, %v4348_v14  ;;  %v4605_v54 = vmin.f32 %v13789_v57, %v4349_v19  ;;  %v5372_v8 = vmul.f32 %v9116_v6, %v13782_v28  ;;  %v11719_v14 = vld [vmem:[#allocation4 + $0x1a8] sm:$0xff]  ;;  %v14556_v6 = vpop.trf.xlu0 }
 0x3e6   :  { %10761 = vxpose.xlu1.b32.cont [12/16] %v10760_v61, 128  ;;  %v9117_v30 = vround.rtne.f32 %v4861_v18  ;;  %v4350_v17 = vmax.f32 %v13808_v34, %v11718_v46  ;;  %v4351_v18 = vmax.f32 %v13808_v34, %v11719_v14  ;;  %v4352_v14 = vmax.f32 %v13808_v34, %v11720_v62  ;;  %v11722_v62 = vld [vmem:[#allocation4 + $0x1c0] sm:$0xff] }
 0x3e7   :  { %v9864_v13 = vpack.i.bf16 %v5371_v40, %v5370_v32  ;;  %v4862_v21 = vmul.f32 %v14275_v39, %v4604_v25  ;;  %v4863_v36 = vmul.f32 %v14275_v39, %v4605_v54  ;;  %v4354_v35 = vmax.f32 %v13808_v34, %v11722_v62  ;;  %v11724_v32 = vld [vmem:[#allocation4 + $0x1d0] sm:$0xff] }
 0x3e8   :  { %v5373_v61 = vmul.f32 %v9117_v30, %v13782_v28  ;;  %v4606_v19 = vmin.f32 %v13789_v57, %v4350_v17  ;;  %v4607_v46 = vmin.f32 %v13789_v57, %v4351_v18  ;;  %v4608_v18 = vmin.f32 %v13789_v57, %v4352_v14 }
 0x3e9   :  { %9865 = vxpose.xlu0.b32.cont [12/16] %v9864_v13, 128  ;;  %v9118_v40 = vround.rtne.f32 %v4862_v21  ;;  %v9119_v3 = vround.rtne.f32 %v4863_v36  ;;  %v4353_v21 = vmax.f32 %v13808_v34, %v11721_v12  ;;  %v4610_v14 = vmin.f32 %v13789_v57, %v4354_v35  ;;  %v14581_v62 = vpop.trf.xlu0 }
 0x3ea   :  { %v10762_v25 = vpack.i.bf16 %v5373_v61, %v5372_v8  ;;  %v4864_v54 = vmul.f32 %v14275_v39, %v4606_v19  ;;  %v4865_v8 = vmul.f32 %v14275_v39, %v4607_v46  ;;  %v11723_v46 = vld [vmem:[#allocation4 + $0x1c8] sm:$0xff]  ;;  %v14575_v61 = vpop.trf.xlu1 }
 0x3eb   :  { %v5374_v30 = vmul.f32 %v9118_v40, %v13782_v28  ;;  %v5375_v17 = vmul.f32 %v9119_v3, %v13782_v28  ;;  %v4609_v40 = vmin.f32 %v13789_v57, %v4353_v21  ;;  %v4866_v3 = vmul.f32 %v14275_v39, %v4608_v18 }
 0x3ec   :  { %10763 = vxpose.xlu1.b32.cont [13/16] %v10762_v25, 128  ;;  %v9120_v36 = vround.rtne.f32 %v4864_v54  ;;  %v9121_v19 = vround.rtne.f32 %v4865_v8  ;;  %v4355_v54 = vmax.f32 %v13808_v34, %v11723_v46 }
 0x3ed   :  { %v9866_v13 = vpack.i.bf16 %v5375_v17, %v5374_v30  ;;  %v4867_v25 = vmul.f32 %v14275_v39, %v4609_v40  ;;  %v9122_v17 = vround.rtne.f32 %v4866_v3  ;;  %v4868_v40 = vmul.f32 %v14275_v39, %v4610_v14  ;;  %v11725_v3 = vld [vmem:[#allocation4 + $0x1d8] sm:$0xff] }
 0x3ee   :  { %v5376_v12 = vmul.f32 %v9120_v36, %v13782_v28  ;;  %v5377_v30 = vmul.f32 %v9121_v19, %v13782_v28  ;;  %v4611_v36 = vmin.f32 %v13789_v57, %v4355_v54 }
 0x3ef   :  { %9867 = vxpose.xlu0.b32.cont [13/16] %v9866_v13, 128  ;;  %v9123_v8 = vround.rtne.f32 %v4867_v25  ;;  %v4356_v13 = vmax.f32 %v13808_v34, %v11724_v32  ;;  %v5378_v19 = vmul.f32 %v9122_v17, %v13782_v28  ;;  %v4357_v25 = vmax.f32 %v13808_v34, %v11725_v3  ;;  %v14597_v3 = vpop.trf.xlu1 }
 0x3f0   :  { %v10764_v18 = vpack.i.bf16 %v5377_v30, %v5376_v12  ;;  %v4869_v21 = vmul.f32 %v14275_v39, %v4611_v36  ;;  %v9124_v54 = vround.rtne.f32 %v4868_v40  ;;  %v11726_v36 = vld [vmem:[#allocation4 + $0x1e0] sm:$0xff]  ;;  %v11728_v30 = vld [vmem:[#allocation4 + $0x1f0] sm:$0xff] }
 0x3f1   :  { %v5379_v35 = vmul.f32 %v9123_v8, %v13782_v28  ;;  %v4612_v12 = vmin.f32 %v13789_v57, %v4356_v13  ;;  %v4613_v0 = vmin.f32 %v13789_v57, %v4357_v25  ;;  %v4358_v43 = vmax.f32 %v13808_v34, %v11726_v36  ;;  %v11727_v13 = vld [vmem:[#allocation4 + $0x1e8] sm:$0xff] }
 0x3f2   :  { %10765 = vxpose.xlu1.b32.cont [14/16] %v10764_v18, 128  ;;  %v9125_v46 = vround.rtne.f32 %v4869_v21  ;;  %v5380_v32 = vmul.f32 %v9124_v54, %v13782_v28  ;;  %v4359_v21 = vmax.f32 %v13808_v34, %v11727_v13  ;;  %v14604_v54 = vpop.trf.xlu0  ;;  %v4360_v13 = vmax.f32 %v13808_v34, %v11728_v30  ;;  %v11730_v30 = vld [vmem:[#allocation4 + $0x210] sm:$0xff] }
 0x3f3   :  { %v9868_v14 = vpack.i.bf16 %v5379_v35, %v5378_v19  ;;  %v4870_v17 = vmul.f32 %v14275_v39, %v4612_v12  ;;  %v4871_v40 = vmul.f32 %v14275_v39, %v4613_v0  ;;  %v4614_v25 = vmin.f32 %v13789_v57, %v4358_v43 }
 0x3f4   :  { %v5381_v18 = vmul.f32 %v9125_v46, %v13782_v28  ;;  %v4615_v36 = vmin.f32 %v13789_v57, %v4359_v21  ;;  %v4616_v21 = vmin.f32 %v13789_v57, %v4360_v13  ;;  %v4364_v20 = vmax.f32 %v13808_v34, %v11730_v30 }
 0x3f5   :  { %9869 = vxpose.xlu0.b32.cont [14/16] %v9868_v14, 128  ;;  %v9126_v35 = vround.rtne.f32 %v4870_v17  ;;  %v9127_v8 = vround.rtne.f32 %v4871_v40  ;;  %v4872_v0 = vmul.f32 %v14275_v39, %v4614_v25  ;;  %v4361_v17 = vmax.f32 %v13808_v34, %v11729_v5 }
 0x3f6   :  { %v10766_v12 = vpack.i.bf16 %v5381_v18, %v5380_v32  ;;  %v4873_v32 = vmul.f32 %v14275_v39, %v4615_v36  ;;  %v11731_v36 = vld [vmem:[#allocation4 + $0x218] sm:$0xff]  ;;  %v10658_v18 = vpop.trf.xlu1  ;;  %v9762_v19 = vpop.trf.xlu0 }
 0x3f7   :  { %v5382_v46 = vmul.f32 %v9126_v35, %v13782_v28  ;;  %v5383_v43 = vmul.f32 %v9127_v8, %v13782_v28  ;;  %v9128_v40 = vround.rtne.f32 %v4872_v0  ;;  %v4617_v35 = vmin.f32 %v13789_v57, %v4361_v17 }
 0x3f8   :  { %10767 = vxpose.xlu1.b32.cont [15/16] %v10766_v12, 128  ;;  %v9129_v25 = vround.rtne.f32 %v4873_v32  ;;  %v4874_v8 = vmul.f32 %v14275_v39, %v4616_v21  ;;  %v4365_v0 = vmax.f32 %v13808_v34, %v11731_v36  ;;  %v10662_v17 = vunpack.i.h.bf16 %v10658_v18 }
 0x3f9   :  { %v9870_v14 = vpack.i.bf16 %v5383_v43, %v5382_v46  ;;  %v5384_v5 = vmul.f32 %v9128_v40, %v13782_v28  ;;  %v4875_v12 = vmul.f32 %v14275_v39, %v4617_v35  ;;  %v4620_v46 = vmin.f32 %v13789_v57, %v4364_v20  ;;  %v11732_v20 = vld [vmem:[#allocation4 + $0x200] sm:$0xff] }
 0x3fa   :  { %v5385_v13 = vmul.f32 %v9129_v25, %v13782_v28  ;;  %v9130_v43 = vround.rtne.f32 %v4874_v8  ;;  %v4621_v30 = vmin.f32 %v13789_v57, %v4365_v0  ;;  %v10659_v49 = vunpack.i.l.bf16 %v10658_v18  ;;  %v11733_v18 = vld [vmem:[#allocation4 + $0x208] sm:$0xff] }
 0x3fb   :  { %9871 = vxpose.xlu0.b32.cont [15/16] %v9870_v14, 128  ;;  %v9131_v32 = vround.rtne.f32 %v4875_v12  ;;  %v4878_v21 = vmul.f32 %v14275_v39, %v4620_v46  ;;  %v8330_v35 = vpack.c.bf16 %v10662_v17, %v10550_v10  ;;  %v4362_v8 = vmax.f32 %v13808_v34, %v11732_v20 }
 0x3fc   :  { %v10768_v40 = vpack.i.bf16 %v5385_v13, %v5384_v5  ;;  %v5386_v36 = vmul.f32 %v9130_v43, %v13782_v28  ;;  %v4879_v25 = vmul.f32 %v14275_v39, %v4621_v30  ;;  %v8298_v5 = vpack.c.bf16 %v10659_v49, %v10547_v4 }
 0x3fd   :  { %v5387_v14 = vmul.f32 %v9131_v32, %v13782_v28  ;;  %v9134_v12 = vround.rtne.f32 %v4878_v21  ;;  %3422 = vst [vmem:[%s17335_s3 + $0x108] sm:$0xff] %v8330_v35  ;;  %v4363_v10 = vmax.f32 %v13808_v34, %v11733_v18  ;;  %v9766_v0 = vunpack.i.h.bf16 %v9762_v19  ;;  %v11734_v21 = vld [vmem:[#allocation4 + $0x230] sm:$0xff] }
 0x3fe   :  { %10769 = vxpose.xlu1.b32.end [16/16] %v10768_v40, 128  ;;  %v9135_v46 = vround.rtne.f32 %v4879_v25  ;;  %v4618_v17 = vmin.f32 %v13789_v57, %v4362_v8  ;;  %3390 = vst [vmem:[%s17335_s3 + $0x8] sm:$0xff] %v8298_v5  ;;  %v9763_v4 = vunpack.i.l.bf16 %v9762_v19  ;;  %v17428_v30 = vunpack.i.h.bf16 %v14213_v56  ;;  %v11735_v8 = vld [vmem:[#allocation4 + $0x238] sm:$0xff] }
 0x3ff   :  { %v9872_v13 = vpack.i.bf16 %v5387_v14, %v5386_v36  ;;  %v5390_v43 = vmul.f32 %v9134_v12, %v13782_v28  ;;  %v4619_v27 = vmin.f32 %v13789_v57, %v4363_v10  ;;  %v4368_v35 = vmax.f32 %v13808_v34, %v11734_v21  ;;  %v10663_v36 = vpop.trf.xlu1 }
 0x400   :  { %v5391_v49 = vmul.f32 %v9135_v46, %v13782_v28  ;;  %v4876_v32 = vmul.f32 %v14275_v39, %v4618_v17  ;;  %v8394_v40 = vpack.c.bf16 %v9766_v0, %v17428_v30  ;;  %v17429_v25 = vunpack.i.l.bf16 %v14213_v56  ;;  %v9767_v46 = vpop.trf.xlu0 }
 0x401   :  { %9873 = vxpose.xlu0.b32.end [16/16] %v9872_v13, 128  ;;  %v4877_v14 = vmul.f32 %v14275_v39, %v4619_v27  ;;  %v4369_v19 = vmax.f32 %v13808_v34, %v11735_v8  ;;  %v10667_v12 = vunpack.i.h.bf16 %v10663_v36  ;;  %v4624_v10 = vmin.f32 %v13789_v57, %v4368_v35 }
 0x402   :  { %v8362_v20 = vpack.c.bf16 %v9763_v4, %v17429_v25  ;;  %v10850_v5 = vpack.i.bf16 %v5391_v49, %v5390_v43  ;;  %v9132_v18 = vround.rtne.f32 %v4876_v32  ;;  %3486 = vst [vmem:[%s17335_s3 + $0x308] sm:$0xff] %v8394_v40  ;;  %v10664_v13 = vunpack.i.l.bf16 %v10663_v36  ;;  %v11736_v49 = vld [vmem:[#allocation4 + $0x220] sm:$0xff]  ;;  %v11737_v36 = vld [vmem:[#allocation4 + $0x228] sm:$0xff] }
 0x403   :  { %v9133_v0 = vround.rtne.f32 %v4877_v14  ;;  %v4625_v56 = vmin.f32 %v13789_v57, %v4369_v19  ;;  %v4882_v43 = vmul.f32 %v14275_v39, %v4624_v10  ;;  %v17430_v27 = vunpack.i.h.bf16 %v14247_v2 }
 0x404   :  { %3454 = vst [vmem:[%s17335_s3 + $0x208] sm:$0xff] %v8362_v20  ;;  %10851 = vxpose.xlu1.b32.start [1/16] %v10850_v5, 128  ;;  %v5388_v17 = vmul.f32 %v9132_v18, %v13782_v28  ;;  %v4366_v32 = vmax.f32 %v13808_v34, %v11736_v49  ;;  %v17431_v21 = vunpack.i.l.bf16 %v14247_v2  ;;  %v4367_v14 = vmax.f32 %v13808_v34, %v11737_v36 }
 0x405   :  { %v8332_v4 = vpack.c.bf16 %v10667_v12, %v17430_v27  ;;  %v5389_v30 = vmul.f32 %v9133_v0, %v13782_v28  ;;  %v4883_v40 = vmul.f32 %v14275_v39, %v4625_v56  ;;  %v9138_v25 = vround.rtne.f32 %v4882_v43  ;;  %v11738_v43 = vld [vmem:[#allocation4 + $0x250] sm:$0xff] }
 0x406   :  { %v8300_v35 = vpack.c.bf16 %v10664_v13, %v17431_v21  ;;  %v4622_v20 = vmin.f32 %v13789_v57, %v4366_v32  ;;  %v9771_v8 = vunpack.i.h.bf16 %v9767_v46  ;;  %v4623_v2 = vmin.f32 %v13789_v57, %v4367_v14  ;;  %v10668_v32 = vpop.trf.xlu1 }
 0x407   :  { %3424 = vst [vmem:[%s17335_s3 + $0x118] sm:$0xff] %v8332_v4  ;;  %v9954_v19 = vpack.i.bf16 %v5389_v30, %v5388_v17  ;;  %v9139_v12 = vround.rtne.f32 %v4883_v40  ;;  %v5394_v5 = vmul.f32 %v9138_v25, %v13782_v28  ;;  %v9768_v10 = vunpack.i.l.bf16 %v9767_v46  ;;  %v11739_v4 = vld [vmem:[#allocation4 + $0x258] sm:$0xff] }
 0x408   :  { %3392 = vst [vmem:[%s17335_s3 + $0x18] sm:$0xff] %v8300_v35  ;;  %v4880_v18 = vmul.f32 %v14275_v39, %v4622_v20  ;;  %v17432_v0 = vunpack.i.h.bf16 %v14255_v58  ;;  %v4881_v17 = vmul.f32 %v14275_v39, %v4623_v2  ;;  %v4372_v27 = vmax.f32 %v13808_v34, %v11738_v43  ;;  %v9772_v20 = vpop.trf.xlu0 }
 0x409   :  { %9955 = vxpose.xlu0.b32.start [1/16] %v9954_v19, 128  ;;  %v5395_v13 = vmul.f32 %v9139_v12, %v13782_v28  ;;  %v4373_v49 = vmax.f32 %v13808_v34, %v11739_v4  ;;  %v17433_v40 = vunpack.i.l.bf16 %v14255_v58  ;;  %v10672_v46 = vunpack.i.h.bf16 %v10668_v32 }
 0x40a   :  { %v8396_v56 = vpack.c.bf16 %v9771_v8, %v17432_v0  ;;  %v9136_v30 = vround.rtne.f32 %v4880_v18  ;;  %v9137_v36 = vround.rtne.f32 %v4881_v17  ;;  %v4628_v14 = vmin.f32 %v13789_v57, %v4372_v27  ;;  %v11741_v17 = vld [vmem:[#allocation4 + $0x248] sm:$0xff] }
 0x40b   :  { %v8364_v21 = vpack.c.bf16 %v9768_v10, %v17433_v40  ;;  %v10852_v35 = vpack.i.bf16 %v5395_v13, %v5394_v5  ;;  %v4629_v25 = vmin.f32 %v13789_v57, %v4373_v49  ;;  %v10669_v58 = vunpack.i.l.bf16 %v10668_v32  ;;  %v11740_v10 = vld [vmem:[#allocation4 + $0x240] sm:$0xff] }
 0x40c   :  { %3488 = vst [vmem:[%s17335_s3 + $0x318] sm:$0xff] %v8396_v56  ;;  %v5392_v8 = vmul.f32 %v9136_v30, %v13782_v28  ;;  %v17434_v19 = vunpack.i.h.bf16 %v14269_v51  ;;  %v5393_v2 = vmul.f32 %v9137_v36, %v13782_v28  ;;  %v4886_v5 = vmul.f32 %v14275_v39, %v4628_v14 }
 0x40d   :  { %3456 = vst [vmem:[%s17335_s3 + $0x218] sm:$0xff] %v8364_v21  ;;  %10853 = vxpose.xlu1.b32.cont [2/16] %v10852_v35, 128  ;;  %v4887_v18 = vmul.f32 %v14275_v39, %v4629_v25  ;;  %v4370_v0 = vmax.f32 %v13808_v34, %v11740_v10  ;;  %v17435_v56 = vunpack.i.l.bf16 %v14269_v51  ;;  %v4371_v43 = vmax.f32 %v13808_v34, %v11741_v17  ;;  %v11742_v25 = vld [vmem:[#allocation4 + $0x270] sm:$0xff] }
 0x40e   :  { %v8334_v12 = vpack.c.bf16 %v10672_v46, %v17434_v19  ;;  %v9776_v27 = vunpack.i.h.bf16 %v9772_v20  ;;  %v9956_v4 = vpack.i.bf16 %v5393_v2, %v5392_v8  ;;  %v9142_v49 = vround.rtne.f32 %v4886_v5 }
 0x40f   :  { %v8302_v13 = vpack.c.bf16 %v10669_v58, %v17435_v56  ;;  %v9143_v32 = vround.rtne.f32 %v4887_v18  ;;  %v4626_v30 = vmin.f32 %v13789_v57, %v4370_v0  ;;  %v4627_v51 = vmin.f32 %v13789_v57, %v4371_v43  ;;  %v10673_v58 = vpop.trf.xlu1  ;;  %v9777_v43 = vpop.trf.xlu0 }
 0x410   :  { %3426 = vst [vmem:[%s17335_s3 + $0x128] sm:$0xff] %v8334_v12  ;;  %v9773_v40 = vunpack.i.l.bf16 %v9772_v20  ;;  %v17436_v21 = vunpack.i.h.bf16 %v14295_v50  ;;  %9957 = vxpose.xlu0.b32.cont [2/16] %v9956_v4, 128  ;;  %v5398_v35 = vmul.f32 %v9142_v49, %v13782_v28  ;;  %v4376_v8 = vmax.f32 %v13808_v34, %v11742_v25  ;;  %v11743_v20 = vld [vmem:[#allocation4 + $0x278] sm:$0xff] }
 0x411   :  { %3394 = vst [vmem:[%s17335_s3 + $0x28] sm:$0xff] %v8302_v13  ;;  %v5399_v36 = vmul.f32 %v9143_v32, %v13782_v28  ;;  %v4884_v14 = vmul.f32 %v14275_v39, %v4626_v30  ;;  %v4885_v19 = vmul.f32 %v14275_v39, %v4627_v51  ;;  %v17437_v12 = vunpack.i.l.bf16 %v14295_v50  ;;  %v11744_v30 = vld [vmem:[#allocation4 + $0x260] sm:$0xff] }
 0x412   :  { %v8398_v46 = vpack.c.bf16 %v9776_v27, %v17436_v21  ;;  %v4377_v5 = vmax.f32 %v13808_v34, %v11743_v20  ;;  %v10677_v18 = vunpack.i.h.bf16 %v10673_v58  ;;  %v4632_v56 = vmin.f32 %v13789_v57, %v4376_v8 }
 0x413   :  { %v8366_v2 = vpack.c.bf16 %v9773_v40, %v17437_v12  ;;  %v10854_v10 = vpack.i.bf16 %v5399_v36, %v5398_v35  ;;  %v9140_v0 = vround.rtne.f32 %v4884_v14  ;;  %v9141_v13 = vround.rtne.f32 %v4885_v19  ;;  %v11745_v36 = vld [vmem:[#allocation4 + $0x268] sm:$0xff] }
 0x414   :  { %3490 = vst [vmem:[%s17335_s3 + $0x328] sm:$0xff] %v8398_v46  ;;  %v4633_v50 = vmin.f32 %v13789_v57, %v4377_v5  ;;  %v10674_v17 = vunpack.i.l.bf16 %v10673_v58  ;;  %v4890_v4 = vmul.f32 %v14275_v39, %v4632_v56  ;;  %v17438_v49 = vunpack.i.h.bf16 %v14309_v7 }
 0x415   :  { %3458 = vst [vmem:[%s17335_s3 + $0x228] sm:$0xff] %v8366_v2  ;;  %10855 = vxpose.xlu1.b32.cont [3/16] %v10854_v10, 128  ;;  %v5396_v27 = vmul.f32 %v9140_v0, %v13782_v28  ;;  %v4374_v51 = vmax.f32 %v13808_v34, %v11744_v30  ;;  %v5397_v40 = vmul.f32 %v9141_v13, %v13782_v28  ;;  %v17439_v46 = vunpack.i.l.bf16 %v14309_v7  ;;  %v11746_v13 = vld [vmem:[#allocation4 + $0x290] sm:$0xff] }
 0x416   :  { %v8336_v32 = vpack.c.bf16 %v10677_v18, %v17438_v49  ;;  %v4891_v21 = vmul.f32 %v14275_v39, %v4633_v50  ;;  %v4375_v14 = vmax.f32 %v13808_v34, %v11745_v36  ;;  %v9146_v25 = vround.rtne.f32 %v4890_v4  ;;  %v10678_v4 = vpop.trf.xlu1 }
 0x417   :  { %v8304_v35 = vpack.c.bf16 %v10674_v17, %v17439_v46  ;;  %v4630_v8 = vmin.f32 %v13789_v57, %v4374_v51  ;;  %v9781_v58 = vunpack.i.h.bf16 %v9777_v43  ;;  %v9958_v19 = vpack.i.bf16 %v5397_v40, %v5396_v27  ;;  %v11747_v17 = vld [vmem:[#allocation4 + $0x298] sm:$0xff] }
 0x418   :  { %3428 = vst [vmem:[%s17335_s3 + $0x138] sm:$0xff] %v8336_v32  ;;  %v9147_v12 = vround.rtne.f32 %v4891_v21  ;;  %v4631_v7 = vmin.f32 %v13789_v57, %v4375_v14  ;;  %v5402_v2 = vmul.f32 %v9146_v25, %v13782_v28  ;;  %v9778_v5 = vunpack.i.l.bf16 %v9777_v43 }
 0x419   :  { %3396 = vst [vmem:[%s17335_s3 + $0x38] sm:$0xff] %v8304_v35  ;;  %v4888_v20 = vmul.f32 %v14275_v39, %v4630_v8  ;;  %v17440_v18 = vunpack.i.h.bf16 %v14316_v15  ;;  %9959 = vxpose.xlu0.b32.cont [3/16] %v9958_v19, 128  ;;  %v4380_v50 = vmax.f32 %v13808_v34, %v11746_v13  ;;  %v4381_v27 = vmax.f32 %v13808_v34, %v11747_v17  ;;  %v9782_v35 = vpop.trf.xlu0 }
 0x41a   :  { %v5403_v0 = vmul.f32 %v9147_v12, %v13782_v28  ;;  %v4889_v56 = vmul.f32 %v14275_v39, %v4631_v7  ;;  %v17441_v32 = vunpack.i.l.bf16 %v14316_v15  ;;  %v10682_v43 = vunpack.i.h.bf16 %v10678_v4  ;;  %v11748_v12 = vld [vmem:[#allocation4 + $0x280] sm:$0xff] }
 0x41b   :  { %v8400_v10 = vpack.c.bf16 %v9781_v58, %v17440_v18  ;;  %v9144_v49 = vround.rtne.f32 %v4888_v20  ;;  %v4636_v21 = vmin.f32 %v13789_v57, %v4380_v50  ;;  %v4637_v46 = vmin.f32 %v13789_v57, %v4381_v27 }
 0x41c   :  { %v8368_v30 = vpack.c.bf16 %v9778_v5, %v17441_v32  ;;  %v10856_v51 = vpack.i.bf16 %v5403_v0, %v5402_v2  ;;  %v9145_v40 = vround.rtne.f32 %v4889_v56  ;;  %v10679_v15 = vunpack.i.l.bf16 %v10678_v4  ;;  %v11749_v5 = vld [vmem:[#allocation4 + $0x288] sm:$0xff] }
 0x41d   :  { %3492 = vst [vmem:[%s17335_s3 + $0x338] sm:$0xff] %v8400_v10  ;;  %v5400_v36 = vmul.f32 %v9144_v49, %v13782_v28  ;;  %v17442_v14 = vunpack.i.h.bf16 %v14335_v37  ;;  %v4894_v58 = vmul.f32 %v14275_v39, %v4636_v21  ;;  %v4895_v19 = vmul.f32 %v14275_v39, %v4637_v46 }
 0x41e   :  { %3460 = vst [vmem:[%s17335_s3 + $0x238] sm:$0xff] %v8368_v30  ;;  %10857 = vxpose.xlu1.b32.cont [4/16] %v10856_v51, 128  ;;  %v5401_v8 = vmul.f32 %v9145_v40, %v13782_v28  ;;  %v4378_v7 = vmax.f32 %v13808_v34, %v11748_v12  ;;  %v17443_v2 = vunpack.i.l.bf16 %v14335_v37  ;;  %v4379_v18 = vmax.f32 %v13808_v34, %v11749_v5  ;;  %v10683_v40 = vpop.trf.xlu1 }
 0x41f   :  { %v8338_v25 = vpack.c.bf16 %v10682_v43, %v17442_v14  ;;  %v9786_v10 = vunpack.i.h.bf16 %v9782_v35  ;;  %v9150_v56 = vround.rtne.f32 %v4894_v58  ;;  %v9151_v13 = vround.rtne.f32 %v4895_v19  ;;  %v11750_v43 = vld [vmem:[#allocation4 + $0x2b0] sm:$0xff] }
 0x420   :  { %v8306_v20 = vpack.c.bf16 %v10679_v15, %v17443_v2  ;;  %v9960_v0 = vpack.i.bf16 %v5401_v8, %v5400_v36  ;;  %v4634_v50 = vmin.f32 %v13789_v57, %v4378_v7  ;;  %v4635_v37 = vmin.f32 %v13789_v57, %v4379_v18  ;;  %v9787_v7 = vpop.trf.xlu0 }
 0x421   :  { %3430 = vst [vmem:[%s17335_s3 + $0x148] sm:$0xff] %v8338_v25  ;;  %v9783_v17 = vunpack.i.l.bf16 %v9782_v35  ;;  %v17444_v27 = vunpack.i.h.bf16 %v14341_v22  ;;  %v5406_v49 = vmul.f32 %v9150_v56, %v13782_v28  ;;  %v5407_v32 = vmul.f32 %v9151_v13, %v13782_v28  ;;  %v11751_v35 = vld [vmem:[#allocation4 + $0x2b8] sm:$0xff] }
 0x422   :  { %3398 = vst [vmem:[%s17335_s3 + $0x48] sm:$0xff] %v8306_v20  ;;  %9961 = vxpose.xlu0.b32.cont [4/16] %v9960_v0, 128  ;;  %v4892_v30 = vmul.f32 %v14275_v39, %v4634_v50  ;;  %v4384_v51 = vmax.f32 %v13808_v34, %v11750_v43  ;;  %v4893_v21 = vmul.f32 %v14275_v39, %v4635_v37  ;;  %v17445_v46 = vunpack.i.l.bf16 %v14341_v22 }
 0x423   :  { %v8402_v4 = vpack.c.bf16 %v9786_v10, %v17444_v27  ;;  %v4385_v15 = vmax.f32 %v13808_v34, %v11751_v35  ;;  %v10687_v14 = vunpack.i.h.bf16 %v10683_v40  ;;  %v10858_v25 = vpack.i.bf16 %v5407_v32, %v5406_v49  ;;  %v11752_v10 = vld [vmem:[#allocation4 + $0x2a0] sm:$0xff] }
 0x424   :  { %v8370_v36 = vpack.c.bf16 %v9783_v17, %v17445_v46  ;;  %v9148_v8 = vround.rtne.f32 %v4892_v30  ;;  %v4640_v58 = vmin.f32 %v13789_v57, %v4384_v51  ;;  %v9149_v19 = vround.rtne.f32 %v4893_v21  ;;  %v11753_v17 = vld [vmem:[#allocation4 + $0x2a8] sm:$0xff] }
 0x425   :  { %3494 = vst [vmem:[%s17335_s3 + $0x348] sm:$0xff] %v8402_v4  ;;  %v4641_v22 = vmin.f32 %v13789_v57, %v4385_v15  ;;  %v10684_v12 = vunpack.i.l.bf16 %v10683_v40  ;;  %10859 = vxpose.xlu1.b32.cont [5/16] %v10858_v25, 128  ;;  %v17446_v5 = vunpack.i.h.bf16 %v14357_v41  ;;  %v4382_v0 = vmax.f32 %v13808_v34, %v11752_v10 }
 0x426   :  { %3462 = vst [vmem:[%s17335_s3 + $0x248] sm:$0xff] %v8370_v36  ;;  %v5404_v2 = vmul.f32 %v9148_v8, %v13782_v28  ;;  %v4898_v20 = vmul.f32 %v14275_v39, %v4640_v58  ;;  %v5405_v56 = vmul.f32 %v9149_v19, %v13782_v28  ;;  %v17447_v50 = vunpack.i.l.bf16 %v14357_v41  ;;  %v11755_v8 = vld [vmem:[#allocation4 + $0x2d8] sm:$0xff]  ;;  %v10688_v19 = vpop.trf.xlu1 }
 0x427   :  { %v8340_v18 = vpack.c.bf16 %v10687_v14, %v17446_v5  ;;  %v4899_v13 = vmul.f32 %v14275_v39, %v4641_v22  ;;  %v4383_v27 = vmax.f32 %v13808_v34, %v11753_v17  ;;  %v4638_v49 = vmin.f32 %v13789_v57, %v4382_v0  ;;  %v11754_v14 = vld [vmem:[#allocation4 + $0x2d0] sm:$0xff]  ;;  %v9792_v0 = vpop.trf.xlu0 }
 0x428   :  { %v8308_v37 = vpack.c.bf16 %v10684_v12, %v17447_v50  ;;  %v9154_v4 = vround.rtne.f32 %v4898_v20  ;;  %v9791_v32 = vunpack.i.h.bf16 %v9787_v7  ;;  %v9962_v30 = vpack.i.bf16 %v5405_v56, %v5404_v2 }
 0x429   :  { %3432 = vst [vmem:[%s17335_s3 + $0x158] sm:$0xff] %v8340_v18  ;;  %v9155_v43 = vround.rtne.f32 %v4899_v13  ;;  %v4639_v41 = vmin.f32 %v13789_v57, %v4383_v27  ;;  %v4896_v40 = vmul.f32 %v14275_v39, %v4638_v49  ;;  %v9788_v21 = vunpack.i.l.bf16 %v9787_v7 }
 0x42a   :  { %3400 = vst [vmem:[%s17335_s3 + $0x58] sm:$0xff] %v8308_v37  ;;  %v5410_v51 = vmul.f32 %v9154_v4, %v13782_v28  ;;  %v17448_v46 = vunpack.i.h.bf16 %v14364_v52  ;;  %9963 = vxpose.xlu0.b32.cont [5/16] %v9962_v30, 128  ;;  %v4388_v25 = vmax.f32 %v13808_v34, %v11754_v14  ;;  %v4389_v58 = vmax.f32 %v13808_v34, %v11755_v8  ;;  %v11756_v4 = vld [vmem:[#allocation4 + $0x2c0] sm:$0xff] }
 0x42b   :  { %v5411_v35 = vmul.f32 %v9155_v43, %v13782_v28  ;;  %v4897_v15 = vmul.f32 %v14275_v39, %v4639_v41  ;;  %v9152_v22 = vround.rtne.f32 %v4896_v40  ;;  %v17449_v12 = vunpack.i.l.bf16 %v14364_v52  ;;  %v11757_v43 = vld [vmem:[#allocation4 + $0x2c8] sm:$0xff] }
 0x42c   :  { %v8404_v36 = vpack.c.bf16 %v9791_v32, %v17448_v46  ;;  %v10692_v7 = vunpack.i.h.bf16 %v10688_v19  ;;  %v4644_v18 = vmin.f32 %v13789_v57, %v4388_v25  ;;  %v4645_v10 = vmin.f32 %v13789_v57, %v4389_v58 }
 0x42d   :  { %v8372_v2 = vpack.c.bf16 %v9788_v21, %v17449_v12  ;;  %v10860_v20 = vpack.i.bf16 %v5411_v35, %v5410_v51  ;;  %v9153_v5 = vround.rtne.f32 %v4897_v15  ;;  %v5408_v56 = vmul.f32 %v9152_v22, %v13782_v28  ;;  %v10693_v12 = vpop.trf.xlu1 }
 0x42e   :  { %3496 = vst [vmem:[%s17335_s3 + $0x358] sm:$0xff] %v8404_v36  ;;  %v10689_v52 = vunpack.i.l.bf16 %v10688_v19  ;;  %v17450_v13 = vunpack.i.h.bf16 %v14383_v60  ;;  %v4902_v17 = vmul.f32 %v14275_v39, %v4644_v18  ;;  %v4903_v27 = vmul.f32 %v14275_v39, %v4645_v10  ;;  %v11758_v19 = vld [vmem:[#allocation4 + $0x2f0] sm:$0xff] }
 0x42f   :  { %3464 = vst [vmem:[%s17335_s3 + $0x258] sm:$0xff] %v8372_v2  ;;  %10861 = vxpose.xlu1.b32.cont [6/16] %v10860_v20, 128  ;;  %v5409_v37 = vmul.f32 %v9153_v5, %v13782_v28  ;;  %v4386_v49 = vmax.f32 %v13808_v34, %v11756_v4  ;;  %v17451_v32 = vunpack.i.l.bf16 %v14383_v60  ;;  %v4387_v41 = vmax.f32 %v13808_v34, %v11757_v43  ;;  %v11759_v5 = vld [vmem:[#allocation4 + $0x2f8] sm:$0xff] }
 0x430   :  { %v8342_v50 = vpack.c.bf16 %v10692_v7, %v17450_v13  ;;  %v9796_v51 = vunpack.i.h.bf16 %v9792_v0  ;;  %v9158_v21 = vround.rtne.f32 %v4902_v17  ;;  %v9159_v46 = vround.rtne.f32 %v4903_v27 }
 0x431   :  { %v8310_v30 = vpack.c.bf16 %v10689_v52, %v17451_v32  ;;  %v9964_v40 = vpack.i.bf16 %v5409_v37, %v5408_v56  ;;  %v4642_v36 = vmin.f32 %v13789_v57, %v4386_v49  ;;  %v4643_v60 = vmin.f32 %v13789_v57, %v4387_v41  ;;  %v9797_v37 = vpop.trf.xlu0  ;;  %v11760_v32 = vld [vmem:[#allocation4 + $0x2e0] sm:$0xff] }
 0x432   :  { %3434 = vst [vmem:[%s17335_s3 + $0x168] sm:$0xff] %v8342_v50  ;;  %v9793_v35 = vunpack.i.l.bf16 %v9792_v0  ;;  %v17452_v15 = vunpack.i.h.bf16 %v14389_v33  ;;  %v5414_v25 = vmul.f32 %v9158_v21, %v13782_v28  ;;  %v5415_v8 = vmul.f32 %v9159_v46, %v13782_v28  ;;  %v11761_v21 = vld [vmem:[#allocation4 + $0x2e8] sm:$0xff] }
 0x433   :  { %3402 = vst [vmem:[%s17335_s3 + $0x68] sm:$0xff] %v8310_v30  ;;  %9965 = vxpose.xlu0.b32.cont [6/16] %v9964_v40, 128  ;;  %v4900_v58 = vmul.f32 %v14275_v39, %v4642_v36  ;;  %v4392_v22 = vmax.f32 %v13808_v34, %v11758_v19  ;;  %v4901_v2 = vmul.f32 %v14275_v39, %v4643_v60  ;;  %v17453_v7 = vunpack.i.l.bf16 %v14389_v33 }
 0x434   :  { %v8406_v14 = vpack.c.bf16 %v9796_v51, %v17452_v15  ;;  %v4393_v18 = vmax.f32 %v13808_v34, %v11759_v5  ;;  %v10697_v10 = vunpack.i.h.bf16 %v10693_v12  ;;  %v10862_v0 = vpack.i.bf16 %v5415_v8, %v5414_v25  ;;  %v11763_v5 = vld [vmem:[#allocation4 + $0x318] sm:$0xff] }
 0x435   :  { %v8374_v20 = vpack.c.bf16 %v9793_v35, %v17453_v7  ;;  %v9156_v56 = vround.rtne.f32 %v4900_v58  ;;  %v4648_v52 = vmin.f32 %v13789_v57, %v4392_v22  ;;  %v9157_v13 = vround.rtne.f32 %v4901_v2  ;;  %v11762_v7 = vld [vmem:[#allocation4 + $0x310] sm:$0xff] }
 0x436   :  { %3498 = vst [vmem:[%s17335_s3 + $0x368] sm:$0xff] %v8406_v14  ;;  %v4649_v33 = vmin.f32 %v13789_v57, %v4393_v18  ;;  %v10694_v50 = vunpack.i.l.bf16 %v10693_v12  ;;  %10863 = vxpose.xlu1.b32.cont [7/16] %v10862_v0, 128  ;;  %v17454_v4 = vunpack.i.h.bf16 %v14405_v24  ;;  %v4390_v30 = vmax.f32 %v13808_v34, %v11760_v32 }
 0x437   :  { %3466 = vst [vmem:[%s17335_s3 + $0x268] sm:$0xff] %v8374_v20  ;;  %v5412_v17 = vmul.f32 %v9156_v56, %v13782_v28  ;;  %v4906_v27 = vmul.f32 %v14275_v39, %v4648_v52  ;;  %v5413_v43 = vmul.f32 %v9157_v13, %v13782_v28  ;;  %v17455_v51 = vunpack.i.l.bf16 %v14405_v24 }
 0x438   :  { %v8344_v49 = vpack.c.bf16 %v10697_v10, %v17454_v4  ;;  %v4907_v41 = vmul.f32 %v14275_v39, %v4649_v33  ;;  %v4391_v46 = vmax.f32 %v13808_v34, %v11761_v21  ;;  %v4646_v60 = vmin.f32 %v13789_v57, %v4390_v30  ;;  %v10698_v10 = vpop.trf.xlu1 }
 0x439   :  { %v8312_v40 = vpack.c.bf16 %v10694_v50, %v17455_v51  ;;  %v9162_v36 = vround.rtne.f32 %v4906_v27  ;;  %v9801_v35 = vunpack.i.h.bf16 %v9797_v37  ;;  %v9966_v15 = vpack.i.bf16 %v5413_v43, %v5412_v17  ;;  %v9802_v27 = vpop.trf.xlu0  ;;  %v11764_v51 = vld [vmem:[#allocation4 + $0x300] sm:$0xff] }
 0x43a   :  { %3436 = vst [vmem:[%s17335_s3 + $0x178] sm:$0xff] %v8344_v49  ;;  %v9163_v14 = vround.rtne.f32 %v4907_v41  ;;  %v4647_v24 = vmin.f32 %v13789_v57, %v4391_v46  ;;  %v4904_v8 = vmul.f32 %v14275_v39, %v4646_v60  ;;  %v9798_v58 = vunpack.i.l.bf16 %v9797_v37 }
 0x43b   :  { %3404 = vst [vmem:[%s17335_s3 + $0x78] sm:$0xff] %v8312_v40  ;;  %v5418_v25 = vmul.f32 %v9162_v36, %v13782_v28  ;;  %v17456_v19 = vunpack.i.h.bf16 %v14412_v44  ;;  %9967 = vxpose.xlu0.b32.cont [7/16] %v9966_v15, 128  ;;  %v4396_v20 = vmax.f32 %v13808_v34, %v11762_v7  ;;  %v4397_v18 = vmax.f32 %v13808_v34, %v11763_v5  ;;  %v11765_v36 = vld [vmem:[#allocation4 + $0x308] sm:$0xff]  ;;  %v11766_v7 = vld [vmem:[#allocation4 + $0x330] sm:$0xff] }
 0x43c   :  { %v5419_v12 = vmul.f32 %v9163_v14, %v13782_v28  ;;  %v4905_v2 = vmul.f32 %v14275_v39, %v4647_v24  ;;  %v9160_v0 = vround.rtne.f32 %v4904_v8  ;;  %v17457_v56 = vunpack.i.l.bf16 %v14412_v44  ;;  %v10703_v5 = vpop.trf.xlu1 }
 0x43d   :  { %v8408_v22 = vpack.c.bf16 %v9801_v35, %v17456_v19  ;;  %v10702_v13 = vunpack.i.h.bf16 %v10698_v10  ;;  %v4652_v37 = vmin.f32 %v13789_v57, %v4396_v20  ;;  %v4653_v17 = vmin.f32 %v13789_v57, %v4397_v18 }
 0x43e   :  { %v8376_v52 = vpack.c.bf16 %v9798_v58, %v17457_v56  ;;  %v10864_v33 = vpack.i.bf16 %v5419_v12, %v5418_v25  ;;  %v9161_v50 = vround.rtne.f32 %v4905_v2  ;;  %v5416_v4 = vmul.f32 %v9160_v0, %v13782_v28  ;;  %v11767_v56 = vld [vmem:[#allocation4 + $0x338] sm:$0xff] }
 0x43f   :  { %3500 = vst [vmem:[%s17335_s3 + $0x378] sm:$0xff] %v8408_v22  ;;  %v10699_v44 = vunpack.i.l.bf16 %v10698_v10  ;;  %v17458_v49 = vunpack.i.h.bf16 %v14431_v31  ;;  %v4910_v43 = vmul.f32 %v14275_v39, %v4652_v37  ;;  %v4911_v41 = vmul.f32 %v14275_v39, %v4653_v17 }
 0x440   :  { %3468 = vst [vmem:[%s17335_s3 + $0x278] sm:$0xff] %v8376_v52  ;;  %10865 = vxpose.xlu1.b32.cont [8/16] %v10864_v33, 128  ;;  %v5417_v30 = vmul.f32 %v9161_v50, %v13782_v28  ;;  %v4394_v40 = vmax.f32 %v13808_v34, %v11764_v51  ;;  %v17459_v21 = vunpack.i.l.bf16 %v14431_v31  ;;  %v4395_v60 = vmax.f32 %v13808_v34, %v11765_v36  ;;  %v11769_v36 = vld [vmem:[#allocation4 + $0x328] sm:$0xff] }
 0x441   :  { %v8346_v32 = vpack.c.bf16 %v10702_v13, %v17458_v49  ;;  %v9806_v35 = vunpack.i.h.bf16 %v9802_v27  ;;  %v9166_v14 = vround.rtne.f32 %v4910_v43  ;;  %v9167_v24 = vround.rtne.f32 %v4911_v41  ;;  %v11768_v43 = vld [vmem:[#allocation4 + $0x320] sm:$0xff] }
 0x442   :  { %v8314_v46 = vpack.c.bf16 %v10699_v44, %v17459_v21  ;;  %v9968_v15 = vpack.i.bf16 %v5417_v30, %v5416_v4  ;;  %v4650_v25 = vmin.f32 %v13789_v57, %v4394_v40  ;;  %v4651_v31 = vmin.f32 %v13789_v57, %v4395_v60  ;;  %v9807_v4 = vpop.trf.xlu0 }
 0x443   :  { %3438 = vst [vmem:[%s17335_s3 + $0x188] sm:$0xff] %v8346_v32  ;;  %v9803_v8 = vunpack.i.l.bf16 %v9802_v27  ;;  %v17460_v58 = vunpack.i.h.bf16 %v14437_v45  ;;  %v5422_v22 = vmul.f32 %v9166_v14, %v13782_v28  ;;  %v5423_v12 = vmul.f32 %v9167_v24, %v13782_v28 }
 0x444   :  { %3406 = vst [vmem:[%s17335_s3 + $0x88] sm:$0xff] %v8314_v46  ;;  %9969 = vxpose.xlu0.b32.cont [8/16] %v9968_v15, 128  ;;  %v4908_v2 = vmul.f32 %v14275_v39, %v4650_v25  ;;  %v4400_v20 = vmax.f32 %v13808_v34, %v11766_v7  ;;  %v4909_v18 = vmul.f32 %v14275_v39, %v4651_v31  ;;  %v17461_v10 = vunpack.i.l.bf16 %v14437_v45  ;;  %v11770_v7 = vld [vmem:[#allocation4 + $0x350] sm:$0xff] }
 0x445   :  { %v8410_v19 = vpack.c.bf16 %v9806_v35, %v17460_v58  ;;  %v4401_v52 = vmax.f32 %v13808_v34, %v11767_v56  ;;  %v10707_v13 = vunpack.i.h.bf16 %v10703_v5  ;;  %v10866_v33 = vpack.i.bf16 %v5423_v12, %v5422_v22 }
 0x446   :  { %v8378_v0 = vpack.c.bf16 %v9803_v8, %v17461_v10  ;;  %v9164_v50 = vround.rtne.f32 %v4908_v2  ;;  %v4656_v37 = vmin.f32 %v13789_v57, %v4400_v20  ;;  %v9165_v17 = vround.rtne.f32 %v4909_v18  ;;  %v10708_v10 = vpop.trf.xlu1 }
 0x447   :  { %3502 = vst [vmem:[%s17335_s3 + $0x388] sm:$0xff] %v8410_v19  ;;  %v4657_v45 = vmin.f32 %v13789_v57, %v4401_v52  ;;  %v10704_v27 = vunpack.i.l.bf16 %v10703_v5  ;;  %10867 = vxpose.xlu1.b32.cont [9/16] %v10866_v33, 128  ;;  %v17462_v32 = vunpack.i.h.bf16 %v14453_v63  ;;  %v4398_v41 = vmax.f32 %v13808_v34, %v11768_v43  ;;  %v11771_v5 = vld [vmem:[#allocation4 + $0x358] sm:$0xff]  ;;  %v11772_v43 = vld [vmem:[#allocation4 + $0x340] sm:$0xff] }
 0x448   :  { %3470 = vst [vmem:[%s17335_s3 + $0x288] sm:$0xff] %v8378_v0  ;;  %v5420_v44 = vmul.f32 %v9164_v50, %v13782_v28  ;;  %v4914_v49 = vmul.f32 %v14275_v39, %v4656_v37  ;;  %v5421_v51 = vmul.f32 %v9165_v17, %v13782_v28  ;;  %v17463_v21 = vunpack.i.l.bf16 %v14453_v63 }
 0x449   :  { %v8348_v30 = vpack.c.bf16 %v10707_v13, %v17462_v32  ;;  %v4915_v40 = vmul.f32 %v14275_v39, %v4657_v45  ;;  %v4399_v60 = vmax.f32 %v13808_v34, %v11769_v36  ;;  %v4654_v15 = vmin.f32 %v13789_v57, %v4398_v41  ;;  %v9812_v45 = vpop.trf.xlu0 }
 0x44a   :  { %v8316_v46 = vpack.c.bf16 %v10704_v27, %v17463_v21  ;;  %v9170_v35 = vround.rtne.f32 %v4914_v49  ;;  %v9811_v14 = vunpack.i.h.bf16 %v9807_v4  ;;  %v9970_v24 = vpack.i.bf16 %v5421_v51, %v5420_v44  ;;  %v11773_v21 = vld [vmem:[#allocation4 + $0x348] sm:$0xff] }
 0x44b   :  { %3440 = vst [vmem:[%s17335_s3 + $0x198] sm:$0xff] %v8348_v30  ;;  %v9171_v25 = vround.rtne.f32 %v4915_v40  ;;  %v4655_v63 = vmin.f32 %v13789_v57, %v4399_v60  ;;  %v4912_v8 = vmul.f32 %v14275_v39, %v4654_v15  ;;  %v9808_v58 = vunpack.i.l.bf16 %v9807_v4 }
 0x44c   :  { %3408 = vst [vmem:[%s17335_s3 + $0x98] sm:$0xff] %v8316_v46  ;;  %v5426_v31 = vmul.f32 %v9170_v35, %v13782_v28  ;;  %v17464_v19 = vunpack.i.h.bf16 %v14460_v59  ;;  %9971 = vxpose.xlu0.b32.cont [9/16] %v9970_v24, 128  ;;  %v4404_v20 = vmax.f32 %v13808_v34, %v11770_v7  ;;  %v4405_v18 = vmax.f32 %v13808_v34, %v11771_v5  ;;  %v11775_v5 = vld [vmem:[#allocation4 + $0x378] sm:$0xff] }
 0x44d   :  { %v5427_v12 = vmul.f32 %v9171_v25, %v13782_v28  ;;  %v4913_v2 = vmul.f32 %v14275_v39, %v4655_v63  ;;  %v9168_v0 = vround.rtne.f32 %v4912_v8  ;;  %v17465_v56 = vunpack.i.l.bf16 %v14460_v59 }
 0x44e   :  { %v8412_v22 = vpack.c.bf16 %v9811_v14, %v17464_v19  ;;  %v10712_v13 = vunpack.i.h.bf16 %v10708_v10  ;;  %v4660_v37 = vmin.f32 %v13789_v57, %v4404_v20  ;;  %v4661_v17 = vmin.f32 %v13789_v57, %v4405_v18  ;;  %v11774_v19 = vld [vmem:[#allocation4 + $0x370] sm:$0xff] }
 0x44f   :  { %v8380_v52 = vpack.c.bf16 %v9808_v58, %v17465_v56  ;;  %v10868_v33 = vpack.i.bf16 %v5427_v12, %v5426_v31  ;;  %v9169_v50 = vround.rtne.f32 %v4913_v2  ;;  %v5424_v27 = vmul.f32 %v9168_v0, %v13782_v28  ;;  %v10713_v12 = vpop.trf.xlu1 }
 0x450   :  { %3504 = vst [vmem:[%s17335_s3 + $0x398] sm:$0xff] %v8412_v22  ;;  %v10709_v59 = vunpack.i.l.bf16 %v10708_v10  ;;  %v17466_v4 = vunpack.i.h.bf16 %v14479_v16  ;;  %v4918_v32 = vmul.f32 %v14275_v39, %v4660_v37  ;;  %v4919_v30 = vmul.f32 %v14275_v39, %v4661_v17 }
 0x451   :  { %3472 = vst [vmem:[%s17335_s3 + $0x298] sm:$0xff] %v8380_v52  ;;  %10869 = vxpose.xlu1.b32.cont [10/16] %v10868_v33, 128  ;;  %v5425_v49 = vmul.f32 %v9169_v50, %v13782_v28  ;;  %v4402_v41 = vmax.f32 %v13808_v34, %v11772_v43  ;;  %v17467_v51 = vunpack.i.l.bf16 %v14479_v16  ;;  %v4403_v46 = vmax.f32 %v13808_v34, %v11773_v21  ;;  %v9817_v50 = vpop.trf.xlu0  ;;  %v11777_v43 = vld [vmem:[#allocation4 + $0x368] sm:$0xff] }
 0x452   :  { %v8350_v44 = vpack.c.bf16 %v10712_v13, %v17466_v4  ;;  %v9816_v36 = vunpack.i.h.bf16 %v9812_v45  ;;  %v9174_v35 = vround.rtne.f32 %v4918_v32  ;;  %v9175_v15 = vround.rtne.f32 %v4919_v30 }
 0x453   :  { %v8318_v40 = vpack.c.bf16 %v10709_v59, %v17467_v51  ;;  %v9972_v60 = vpack.i.bf16 %v5425_v49, %v5424_v27  ;;  %v4658_v14 = vmin.f32 %v13789_v57, %v4402_v41  ;;  %v4659_v16 = vmin.f32 %v13789_v57, %v4403_v46  ;;  %v11776_v59 = vld [vmem:[#allocation4 + $0x360] sm:$0xff] }
 0x454   :  { %3442 = vst [vmem:[%s17335_s3 + $0x1a8] sm:$0xff] %v8350_v44  ;;  %v9813_v24 = vunpack.i.l.bf16 %v9812_v45  ;;  %v17468_v25 = vunpack.i.h.bf16 %v14485_v38  ;;  %v5430_v31 = vmul.f32 %v9174_v35, %v13782_v28  ;;  %v5431_v8 = vmul.f32 %v9175_v15, %v13782_v28 }
 0x455   :  { %3410 = vst [vmem:[%s17335_s3 + $0xa8] sm:$0xff] %v8318_v40  ;;  %9973 = vxpose.xlu0.b32.cont [10/16] %v9972_v60, 128  ;;  %v4916_v58 = vmul.f32 %v14275_v39, %v4658_v14  ;;  %v4408_v22 = vmax.f32 %v13808_v34, %v11774_v19  ;;  %v4917_v2 = vmul.f32 %v14275_v39, %v4659_v16  ;;  %v17469_v7 = vunpack.i.l.bf16 %v14485_v38  ;;  %v10718_v19 = vpop.trf.xlu1 }
 0x456   :  { %v8414_v63 = vpack.c.bf16 %v9816_v36, %v17468_v25  ;;  %v4409_v18 = vmax.f32 %v13808_v34, %v11775_v5  ;;  %v10717_v10 = vunpack.i.h.bf16 %v10713_v12  ;;  %v10870_v0 = vpack.i.bf16 %v5431_v8, %v5430_v31  ;;  %v11779_v8 = vld [vmem:[#allocation4 + $0x398] sm:$0xff] }
 0x457   :  { %v8382_v20 = vpack.c.bf16 %v9813_v24, %v17469_v7  ;;  %v9172_v56 = vround.rtne.f32 %v4916_v58  ;;  %v4664_v52 = vmin.f32 %v13789_v57, %v4408_v22  ;;  %v9173_v13 = vround.rtne.f32 %v4917_v2 }
 0x458   :  { %3506 = vst [vmem:[%s17335_s3 + $0x3a8] sm:$0xff] %v8414_v63  ;;  %v4665_v38 = vmin.f32 %v13789_v57, %v4409_v18  ;;  %v10714_v33 = vunpack.i.l.bf16 %v10713_v12  ;;  %10871 = vxpose.xlu1.b32.cont [11/16] %v10870_v0, 128  ;;  %v17470_v45 = vunpack.i.h.bf16 %v14501_v11  ;;  %v4406_v4 = vmax.f32 %v13808_v34, %v11776_v59  ;;  %v11778_v63 = vld [vmem:[#allocation4 + $0x390] sm:$0xff]  ;;  %v9822_v0 = vpop.trf.xlu0  ;;  %v11781_v59 = vld [vmem:[#allocation4 + $0x388] sm:$0xff] }
 0x459   :  { %3474 = vst [vmem:[%s17335_s3 + $0x2a8] sm:$0xff] %v8382_v20  ;;  %v5428_v37 = vmul.f32 %v9172_v56, %v13782_v28  ;;  %v4922_v17 = vmul.f32 %v14275_v39, %v4664_v52  ;;  %v5429_v44 = vmul.f32 %v9173_v13, %v13782_v28  ;;  %v17471_v32 = vunpack.i.l.bf16 %v14501_v11 }
 0x45a   :  { %v8352_v27 = vpack.c.bf16 %v10717_v10, %v17470_v45  ;;  %v4923_v49 = vmul.f32 %v14275_v39, %v4665_v38  ;;  %v4407_v41 = vmax.f32 %v13808_v34, %v11777_v43  ;;  %v4662_v40 = vmin.f32 %v13789_v57, %v4406_v4 }
 0x45b   :  { %v8320_v30 = vpack.c.bf16 %v10714_v33, %v17471_v32  ;;  %v9178_v51 = vround.rtne.f32 %v4922_v17  ;;  %v9821_v21 = vunpack.i.h.bf16 %v9817_v50  ;;  %v9974_v46 = vpack.i.bf16 %v5429_v44, %v5428_v37  ;;  %v11780_v37 = vld [vmem:[#allocation4 + $0x380] sm:$0xff] }
 0x45c   :  { %3444 = vst [vmem:[%s17335_s3 + $0x1b8] sm:$0xff] %v8352_v27  ;;  %v9179_v36 = vround.rtne.f32 %v4923_v49  ;;  %v4663_v11 = vmin.f32 %v13789_v57, %v4407_v41  ;;  %v4920_v35 = vmul.f32 %v14275_v39, %v4662_v40  ;;  %v9818_v15 = vunpack.i.l.bf16 %v9817_v50 }
 0x45d   :  { %3412 = vst [vmem:[%s17335_s3 + $0xb8] sm:$0xff] %v8320_v30  ;;  %v5434_v60 = vmul.f32 %v9178_v51, %v13782_v28  ;;  %v17472_v14 = vunpack.i.h.bf16 %v14508_v26  ;;  %9975 = vxpose.xlu0.b32.cont [11/16] %v9974_v46, 128  ;;  %v4412_v31 = vmax.f32 %v13808_v34, %v11778_v63  ;;  %v4413_v58 = vmax.f32 %v13808_v34, %v11779_v8 }
 0x45e   :  { %v5435_v24 = vmul.f32 %v9179_v36, %v13782_v28  ;;  %v4921_v25 = vmul.f32 %v14275_v39, %v4663_v11  ;;  %v9176_v22 = vround.rtne.f32 %v4920_v35  ;;  %v17473_v12 = vunpack.i.l.bf16 %v14508_v26  ;;  %v11782_v11 = vld [vmem:[#allocation4 + $0x3b0] sm:$0xff]  ;;  %v10723_v35 = vpop.trf.xlu1 }
 0x45f   :  { %v8416_v16 = vpack.c.bf16 %v9821_v21, %v17472_v14  ;;  %v10722_v7 = vunpack.i.h.bf16 %v10718_v19  ;;  %v4668_v18 = vmin.f32 %v13789_v57, %v4412_v31  ;;  %v4669_v10 = vmin.f32 %v13789_v57, %v4413_v58 }
 0x460   :  { %v8384_v2 = vpack.c.bf16 %v9818_v15, %v17473_v12  ;;  %v10872_v20 = vpack.i.bf16 %v5435_v24, %v5434_v60  ;;  %v9177_v5 = vround.rtne.f32 %v4921_v25  ;;  %v5432_v56 = vmul.f32 %v9176_v22, %v13782_v28  ;;  %v11783_v24 = vld [vmem:[#allocation4 + $0x3b8] sm:$0xff]  ;;  %v9827_v12 = vpop.trf.xlu0 }
 0x461   :  { %3508 = vst [vmem:[%s17335_s3 + $0x3b8] sm:$0xff] %v8416_v16  ;;  %v10719_v26 = vunpack.i.l.bf16 %v10718_v19  ;;  %v17474_v52 = vunpack.i.h.bf16 %v14527_v47  ;;  %v4926_v33 = vmul.f32 %v14275_v39, %v4668_v18  ;;  %v4927_v50 = vmul.f32 %v14275_v39, %v4669_v10  ;;  %v11784_v18 = vld [vmem:[#allocation4 + $0x3a0] sm:$0xff] }
 0x462   :  { %3476 = vst [vmem:[%s17335_s3 + $0x2b8] sm:$0xff] %v8384_v2  ;;  %10873 = vxpose.xlu1.b32.cont [12/16] %v10872_v20, 128  ;;  %v5433_v38 = vmul.f32 %v9177_v5, %v13782_v28  ;;  %v4410_v17 = vmax.f32 %v13808_v34, %v11780_v37  ;;  %v17475_v45 = vunpack.i.l.bf16 %v14527_v47  ;;  %v4411_v4 = vmax.f32 %v13808_v34, %v11781_v59 }
 0x463   :  { %v8354_v13 = vpack.c.bf16 %v10722_v7, %v17474_v52  ;;  %v9826_v44 = vunpack.i.h.bf16 %v9822_v0  ;;  %v9182_v32 = vround.rtne.f32 %v4926_v33  ;;  %v9183_v30 = vround.rtne.f32 %v4927_v50 }
 0x464   :  { %v8322_v27 = vpack.c.bf16 %v10719_v26, %v17475_v45  ;;  %v9976_v49 = vpack.i.bf16 %v5433_v38, %v5432_v56  ;;  %v4666_v43 = vmin.f32 %v13789_v57, %v4410_v17  ;;  %v4667_v47 = vmin.f32 %v13789_v57, %v4411_v4 }
 0x465   :  { %3446 = vst [vmem:[%s17335_s3 + $0x1c8] sm:$0xff] %v8354_v13  ;;  %v9823_v41 = vunpack.i.l.bf16 %v9822_v0  ;;  %v17476_v51 = vunpack.i.h.bf16 %v14533_v48  ;;  %v5438_v21 = vmul.f32 %v9182_v32, %v13782_v28  ;;  %v5439_v46 = vmul.f32 %v9183_v30, %v13782_v28  ;;  %v11785_v13 = vld [vmem:[#allocation4 + $0x3a8] sm:$0xff] }
 0x466   :  { %3414 = vst [vmem:[%s17335_s3 + $0xc8] sm:$0xff] %v8322_v27  ;;  %9977 = vxpose.xlu0.b32.cont [12/16] %v9976_v49, 128  ;;  %v4924_v36 = vmul.f32 %v14275_v39, %v4666_v43  ;;  %v4416_v60 = vmax.f32 %v13808_v34, %v11782_v11  ;;  %v4925_v15 = vmul.f32 %v14275_v39, %v4667_v47  ;;  %v17477_v14 = vunpack.i.l.bf16 %v14533_v48  ;;  %v11786_v43 = vld [vmem:[#allocation4 + $0x3d0] sm:$0xff] }
 0x467   :  { %v8418_v40 = vpack.c.bf16 %v9826_v44, %v17476_v51  ;;  %v4417_v25 = vmax.f32 %v13808_v34, %v11783_v24  ;;  %v10727_v63 = vunpack.i.h.bf16 %v10723_v35  ;;  %v10874_v31 = vpack.i.bf16 %v5439_v46, %v5438_v21 }
 0x468   :  { %v8386_v16 = vpack.c.bf16 %v9823_v41, %v17477_v14  ;;  %v9180_v8 = vround.rtne.f32 %v4924_v36  ;;  %v4672_v58 = vmin.f32 %v13789_v57, %v4416_v60  ;;  %v9181_v19 = vround.rtne.f32 %v4925_v15  ;;  %v11787_v41 = vld [vmem:[#allocation4 + $0x3d8] sm:$0xff] }
 0x469   :  { %3510 = vst [vmem:[%s17335_s3 + $0x3c8] sm:$0xff] %v8418_v40  ;;  %v4673_v48 = vmin.f32 %v13789_v57, %v4417_v25  ;;  %v10724_v22 = vunpack.i.l.bf16 %v10723_v35  ;;  %10875 = vxpose.xlu1.b32.cont [13/16] %v10874_v31, 128  ;;  %v17478_v20 = vunpack.i.h.bf16 %v14549_v42  ;;  %v4414_v10 = vmax.f32 %v13808_v34, %v11784_v18  ;;  %v10728_v40 = vpop.trf.xlu1 }
 0x46a   :  { %3478 = vst [vmem:[%s17335_s3 + $0x2c8] sm:$0xff] %v8386_v16  ;;  %v5436_v2 = vmul.f32 %v9180_v8, %v13782_v28  ;;  %v4930_v7 = vmul.f32 %v14275_v39, %v4672_v58  ;;  %v5437_v0 = vmul.f32 %v9181_v19, %v13782_v28  ;;  %v17479_v26 = vunpack.i.l.bf16 %v14549_v42  ;;  %v9832_v16 = vpop.trf.xlu0  ;;  %v11788_v19 = vld [vmem:[#allocation4 + $0x3c0] sm:$0xff] }
 0x46b   :  { %v8356_v5 = vpack.c.bf16 %v10727_v63, %v17478_v20  ;;  %v4931_v56 = vmul.f32 %v14275_v39, %v4673_v48  ;;  %v4415_v38 = vmax.f32 %v13808_v34, %v11785_v13  ;;  %v4670_v50 = vmin.f32 %v13789_v57, %v4414_v10 }
 0x46c   :  { %v8324_v52 = vpack.c.bf16 %v10724_v22, %v17479_v26  ;;  %v9186_v33 = vround.rtne.f32 %v4930_v7  ;;  %v9831_v37 = vunpack.i.h.bf16 %v9827_v12  ;;  %v9978_v17 = vpack.i.bf16 %v5437_v0, %v5436_v2  ;;  %v11789_v2 = vld [vmem:[#allocation4 + $0x3c8] sm:$0xff] }
 0x46d   :  { %3448 = vst [vmem:[%s17335_s3 + $0x1d8] sm:$0xff] %v8356_v5  ;;  %v9187_v45 = vround.rtne.f32 %v4931_v56  ;;  %v4671_v42 = vmin.f32 %v13789_v57, %v4415_v38  ;;  %v4928_v59 = vmul.f32 %v14275_v39, %v4670_v50  ;;  %v9828_v4 = vunpack.i.l.bf16 %v9827_v12  ;;  %v11790_v50 = vld [vmem:[#allocation4 + $0x3f0] sm:$0xff] }
 0x46e   :  { %3416 = vst [vmem:[%s17335_s3 + $0xd8] sm:$0xff] %v8324_v52  ;;  %v5442_v27 = vmul.f32 %v9186_v33, %v13782_v28  ;;  %v17480_v44 = vunpack.i.h.bf16 %v14556_v6  ;;  %9979 = vxpose.xlu0.b32.cont [13/16] %v9978_v17, 128  ;;  %v4420_v47 = vmax.f32 %v13808_v34, %v11786_v43  ;;  %v4421_v51 = vmax.f32 %v13808_v34, %v11787_v41  ;;  %v10733_v17 = vpop.trf.xlu1  ;;  %v9837_v41 = vpop.trf.xlu0 }
 0x46f   :  { %v5443_v32 = vmul.f32 %v9187_v45, %v13782_v28  ;;  %v4929_v30 = vmul.f32 %v14275_v39, %v4671_v42  ;;  %v9184_v21 = vround.rtne.f32 %v4928_v59  ;;  %v17481_v46 = vunpack.i.l.bf16 %v14556_v6  ;;  %v11791_v59 = vld [vmem:[#allocation4 + $0x3f8] sm:$0xff] }
 0x470   :  { %v8420_v49 = vpack.c.bf16 %v9831_v37, %v17480_v44  ;;  %v10732_v11 = vunpack.i.h.bf16 %v10728_v40  ;;  %v4676_v15 = vmin.f32 %v13789_v57, %v4420_v47  ;;  %v4677_v14 = vmin.f32 %v13789_v57, %v4421_v51 }
 0x471   :  { %v8388_v36 = vpack.c.bf16 %v9828_v4, %v17481_v46  ;;  %v10876_v60 = vpack.i.bf16 %v5443_v32, %v5442_v27  ;;  %v9185_v35 = vround.rtne.f32 %v4929_v30  ;;  %v5440_v24 = vmul.f32 %v9184_v21, %v13782_v28 }
 0x472   :  { %3512 = vst [vmem:[%s17335_s3 + $0x3d8] sm:$0xff] %v8420_v49  ;;  %v10729_v6 = vunpack.i.l.bf16 %v10728_v40  ;;  %v17482_v25 = vunpack.i.h.bf16 %v14575_v61  ;;  %v4934_v8 = vmul.f32 %v14275_v39, %v4676_v15  ;;  %v4935_v58 = vmul.f32 %v14275_v39, %v4677_v14 }
 0x473   :  { %3480 = vst [vmem:[%s17335_s3 + $0x2d8] sm:$0xff] %v8388_v36  ;;  %10877 = vxpose.xlu1.b32.cont [14/16] %v10876_v60, 128  ;;  %v5441_v31 = vmul.f32 %v9185_v35, %v13782_v28  ;;  %v4418_v48 = vmax.f32 %v13808_v34, %v11788_v19  ;;  %v17483_v22 = vunpack.i.l.bf16 %v14575_v61  ;;  %v4419_v7 = vmax.f32 %v13808_v34, %v11789_v2  ;;  %v11792_v36 = vld [vmem:[#allocation4 + $0x3e0] sm:$0xff] }
 0x474   :  { %v8358_v63 = vpack.c.bf16 %v10732_v11, %v17482_v25  ;;  %v9836_v20 = vunpack.i.h.bf16 %v9832_v16  ;;  %v9190_v18 = vround.rtne.f32 %v4934_v8  ;;  %v9191_v10 = vround.rtne.f32 %v4935_v58 }
 0x475   :  { %v8326_v12 = vpack.c.bf16 %v10729_v6, %v17483_v22  ;;  %v9980_v5 = vpack.i.bf16 %v5441_v31, %v5440_v24  ;;  %v4674_v0 = vmin.f32 %v13789_v57, %v4418_v48  ;;  %v4675_v61 = vmin.f32 %v13789_v57, %v4419_v7 }
 0x476   :  { %3450 = vst [vmem:[%s17335_s3 + $0x1e8] sm:$0xff] %v8358_v63  ;;  %v9833_v56 = vunpack.i.l.bf16 %v9832_v16  ;;  %v17484_v26 = vunpack.i.h.bf16 %v14581_v62  ;;  %v5446_v13 = vmul.f32 %v9190_v18, %v13782_v28  ;;  %v5447_v38 = vmul.f32 %v9191_v10, %v13782_v28  ;;  %v11793_v16 = vld [vmem:[#allocation4 + $0x3e8] sm:$0xff]  ;;  %v11795_v18 = vld [vmem:[#allocation4 + $0x418] sm:$0xff] }
 0x477   :  { %3418 = vst [vmem:[%s17335_s3 + $0xe8] sm:$0xff] %v8326_v12  ;;  %9981 = vxpose.xlu0.b32.cont [14/16] %v9980_v5, 128  ;;  %v4932_v33 = vmul.f32 %v14275_v39, %v4674_v0  ;;  %v4424_v37 = vmax.f32 %v13808_v34, %v11790_v50  ;;  %v4933_v45 = vmul.f32 %v14275_v39, %v4675_v61  ;;  %v17485_v42 = vunpack.i.l.bf16 %v14581_v62  ;;  %v15192_v0 = vpop.trf.xlu1 }
 0x478   :  { %v8422_v52 = vpack.c.bf16 %v9836_v20, %v17484_v26  ;;  %v4425_v4 = vmax.f32 %v13808_v34, %v11791_v59  ;;  %v10737_v44 = vunpack.i.h.bf16 %v10733_v17  ;;  %v10878_v49 = vpack.i.bf16 %v5447_v38, %v5446_v13  ;;  %v11794_v20 = vld [vmem:[#allocation4 + $0x410] sm:$0xff] }
 0x479   :  { %v8390_v27 = vpack.c.bf16 %v9833_v56, %v17485_v42  ;;  %v9188_v32 = vround.rtne.f32 %v4932_v33  ;;  %v4680_v30 = vmin.f32 %v13789_v57, %v4424_v37  ;;  %v9189_v43 = vround.rtne.f32 %v4933_v45 }
 0x47a   :  { %3514 = vst [vmem:[%s17335_s3 + $0x3e8] sm:$0xff] %v8422_v52  ;;  %v4681_v62 = vmin.f32 %v13789_v57, %v4425_v4  ;;  %v10734_v47 = vunpack.i.l.bf16 %v10733_v17  ;;  %10879 = vxpose.xlu1.b32.cont [15/16] %v10878_v49, 128  ;;  %v17486_v21 = vunpack.i.h.bf16 %v14597_v3  ;;  %v4422_v11 = vmax.f32 %v13808_v34, %v11792_v36  ;;  %v15207_v17 = vpop.trf.xlu0  ;;  %v11797_v49 = vld [vmem:[#allocation4 + $0x408] sm:$0xff]  ;;  %v11798_v36 = vld [vmem:[#allocation4 + $0x430] sm:$0xff] }
 0x47b   :  { %3482 = vst [vmem:[%s17335_s3 + $0x2e8] sm:$0xff] %v8390_v27  ;;  %v5444_v51 = vmul.f32 %v9188_v32, %v13782_v28  ;;  %v4938_v40 = vmul.f32 %v14275_v39, %v4680_v30  ;;  %v5445_v60 = vmul.f32 %v9189_v43, %v13782_v28  ;;  %v17487_v15 = vunpack.i.l.bf16 %v14597_v3 }
 0x47c   :  { %v8360_v46 = vpack.c.bf16 %v10737_v44, %v17486_v21  ;;  %v4939_v35 = vmul.f32 %v14275_v39, %v4681_v62  ;;  %v4423_v24 = vmax.f32 %v13808_v34, %v11793_v16  ;;  %v4678_v25 = vmin.f32 %v13789_v57, %v4422_v11 }
 0x47d   :  { %v8328_v14 = vpack.c.bf16 %v10734_v47, %v17487_v15  ;;  %v9194_v6 = vround.rtne.f32 %v4938_v40  ;;  %v9841_v63 = vunpack.i.h.bf16 %v9837_v41  ;;  %v9982_v31 = vpack.i.bf16 %v5445_v60, %v5444_v51  ;;  %v11799_v60 = vld [vmem:[#allocation4 + $0x438] sm:$0xff] }
 0x47e   :  { %3452 = vst [vmem:[%s17335_s3 + $0x1f8] sm:$0xff] %v8360_v46  ;;  %v9195_v8 = vround.rtne.f32 %v4939_v35  ;;  %v4679_v3 = vmin.f32 %v13789_v57, %v4423_v24  ;;  %v4936_v19 = vmul.f32 %v14275_v39, %v4678_v25  ;;  %v9838_v48 = vunpack.i.l.bf16 %v9837_v41  ;;  %v15237_v24 = vpop.trf.xlu1 }
 0x47f   :  { %3420 = vst [vmem:[%s17335_s3 + $0xf8] sm:$0xff] %v8328_v14  ;;  %v5450_v58 = vmul.f32 %v9194_v6, %v13782_v28  ;;  %v17488_v22 = vunpack.i.h.bf16 %v14604_v54  ;;  %9983 = vxpose.xlu0.b32.cont [15/16] %v9982_v31, 128  ;;  %v4428_v5 = vmax.f32 %v13808_v34, %v11794_v20  ;;  %v4429_v10 = vmax.f32 %v13808_v34, %v11795_v18  ;;  %v15241_v31 = vpop.trf.xlu0  ;;  %v15619_v14 = vld [vmem:[%s17334_s2 + $0x1c0] sm:$0xff] }
 0x480   :  { %v5451_v2 = vmul.f32 %v9195_v8, %v13782_v28  ;;  %v4937_v7 = vmul.f32 %v14275_v39, %v4679_v3  ;;  %v17489_v61 = vmax.f32 %v13808_v34, %v14223_v1  ;;  %v9192_v26 = vround.rtne.f32 %v4936_v19 }
 0x481   :  { %v8424_v12 = vpack.c.bf16 %v9841_v63, %v17488_v22  ;;  %v17491_v52 = vunpack.i.l.bf16 %v14604_v54  ;;  %v4684_v50 = vmin.f32 %v13789_v57, %v4428_v5  ;;  %v4685_v37 = vmin.f32 %v13789_v57, %v4429_v10  ;;  %v11796_v54 = vld [vmem:[#allocation4 + $0x400] sm:$0xff]  ;;  %v11801_v5 = vld [vmem:[#allocation4 + $0x428] sm:$0xff] }
 0x482   :  { %v15198_v56 = vmin.f32 %v13789_v57, %v17489_v61  ;;  %v10880_v38 = vpack.i.bf16 %v5451_v2, %v5450_v58  ;;  %v9193_v33 = vround.rtne.f32 %v4937_v7  ;;  %v17492_v1 = vstv %s14245_s7 }
 0x483   :  { %v8392_v13 = vpack.c.bf16 %v9838_v48, %v17491_v52  ;;  %3516 = vst [vmem:[%s17335_s3 + $0x3f8] sm:$0xff] %v8424_v12  ;;  %v7189_v45 = vmul.f32 0.007874016, %v17492_v1  ;;  %v5448_v42 = vmul.f32 %v9192_v26, %v13782_v28  ;;  %v4426_v27 = vmax.f32 %v13808_v34, %v11796_v54  ;;  %v11800_v12 = vld [vmem:[#allocation4 + $0x420] sm:$0xff] }
 0x484   :  { %17490 = vst [vmem:[#allocation8_spill] sm:$0xff] %v15198_v56  ;;  %10881 = vxpose.xlu1.b32.end [16/16] %v10880_v38, 128  ;;  %v5449_v59 = vmul.f32 %v9193_v33, %v13782_v28  ;;  %v4942_v4 = vmul.f32 %v14275_v39, %v4684_v50  ;;  %v4943_v44 = vmul.f32 %v14275_v39, %v4685_v37  ;;  %v9878_v20 = vunpack.i.h.bf16 %v15207_v17  ;;  %v11802_v33 = vld [vmem:[#allocation4 + $0x450] sm:$0xff] }
 0x485   :  { %3484 = vst [vmem:[%s17335_s3 + $0x2f8] sm:$0xff] %v8392_v13  ;;  %v4427_v32 = vmax.f32 %v13808_v34, %v11797_v49  ;;  %v17493_v30 = vmax.f32 %v13808_v34, %v14231_v9  ;;  %v4682_v62 = vmin.f32 %v13789_v57, %v4426_v27  ;;  %v15228_v21 = vmax.f32 %v7189_v45, 1e-12  ;;  %v15259_v27 = vpop.trf.xlu1 }
 0x486   :  { %v9984_v47 = vpack.i.bf16 %v5449_v59, %v5448_v42  ;;  %v9198_v41 = vround.rtne.f32 %v4942_v4  ;;  %v9199_v51 = vround.rtne.f32 %v4943_v44  ;;  %v4432_v11 = vmax.f32 %v13808_v34, %v11798_v36  ;;  %v11803_v42 = vld [vmem:[#allocation4 + $0x458] sm:$0xff] }
 0x487   :  { %v15224_v43 = vmin.f32 %v13789_v57, %v17493_v30  ;;  %v4683_v40 = vmin.f32 %v13789_v57, %v4427_v32  ;;  %v4940_v46 = vmul.f32 %v14275_v39, %v4682_v62  ;;  %v4433_v9 = vmax.f32 %v13808_v34, %v11799_v60  ;;  %v15265_v62 = vpop.trf.xlu0 }
 0x488   :  { %9985 = vxpose.xlu0.b32.end [16/16] %v9984_v47, 128  ;;  %v5454_v35 = vmul.f32 %v9198_v41, %v13782_v28  ;;  %v5455_v15 = vmul.f32 %v9199_v51, %v13782_v28  ;;  %v4688_v25 = vmin.f32 %v13789_v57, %v4432_v11  ;;  %v4430_v2 = vmax.f32 %v13808_v34, %v11800_v12 }
 0x489   :  { %17494 = vst [vmem:[#allocation9_spill] sm:$0xff] %v15224_v43  ;;  %v4941_v16 = vmul.f32 %v14275_v39, %v4683_v40  ;;  %v9196_v6 = vround.rtne.f32 %v4940_v46  ;;  %v4689_v63 = vmin.f32 %v13789_v57, %v4433_v9  ;;  %v4431_v18 = vmax.f32 %v13808_v34, %v11801_v5  ;;  %v11804_v40 = vld [vmem:[#allocation4 + $0x440] sm:$0xff]  ;;  %v11805_v9 = vld [vmem:[#allocation4 + $0x448] sm:$0xff] }
 0x48a   :  { %v10962_v8 = vpack.i.bf16 %v5455_v15, %v5454_v35  ;;  %v4946_v48 = vmul.f32 %v14275_v39, %v4688_v25  ;;  %v4686_v26 = vmin.f32 %v13789_v57, %v4430_v2  ;;  %v9875_v13 = vunpack.i.l.bf16 %v15207_v17 }
 0x48b   :  { %v9197_v58 = vround.rtne.f32 %v4941_v16  ;;  %v5452_v19 = vmul.f32 %v9196_v6, %v13782_v28  ;;  %v4947_v22 = vmul.f32 %v14275_v39, %v4689_v63  ;;  %v4687_v38 = vmin.f32 %v13789_v57, %v4431_v18  ;;  %v11807_v18 = vld [vmem:[#allocation4 + $0x478] sm:$0xff] }
 0x48c   :  { %10963 = vxpose.xlu1.b32.start [1/16] %v10962_v8, 128  ;;  %v9202_v10 = vround.rtne.f32 %v4946_v48  ;;  %v4436_v50 = vmax.f32 %v13808_v34, %v11802_v33  ;;  %v4944_v45 = vmul.f32 %v14275_v39, %v4686_v26  ;;  %v4437_v54 = vmax.f32 %v13808_v34, %v11803_v42 }
 0x48d   :  { %v5453_v7 = vmul.f32 %v9197_v58, %v13782_v28  ;;  %v9203_v61 = vround.rtne.f32 %v4947_v22  ;;  %v4945_v4 = vmul.f32 %v14275_v39, %v4687_v38  ;;  %v4434_v46 = vmax.f32 %v13808_v34, %v11804_v40  ;;  %v11806_v22 = vld [vmem:[#allocation4 + $0x470] sm:$0xff]  ;;  %v15288_v38 = vpop.trf.xlu0 }
 0x48e   :  { %v5458_v37 = vmul.f32 %v9202_v10, %v13782_v28  ;;  %v4692_v44 = vmin.f32 %v13789_v57, %v4436_v50  ;;  %v9200_v32 = vround.rtne.f32 %v4944_v45  ;;  %v4693_v30 = vmin.f32 %v13789_v57, %v4437_v54  ;;  %v11808_v54 = vld [vmem:[#allocation4 + $0x460] sm:$0xff] }
 0x48f   :  { %v10066_v52 = vpack.i.bf16 %v5453_v7, %v5452_v19  ;;  %v5459_v1 = vmul.f32 %v9203_v61, %v13782_v28  ;;  %v9201_v41 = vround.rtne.f32 %v4945_v4  ;;  %v4435_v35 = vmax.f32 %v13808_v34, %v11805_v9  ;;  %v15285_v61 = vpop.trf.xlu1 }
 0x490   :  { %v4950_v51 = vmul.f32 %v14275_v39, %v4692_v44  ;;  %v5456_v36 = vmul.f32 %v9200_v32, %v13782_v28  ;;  %v4951_v60 = vmul.f32 %v14275_v39, %v4693_v30  ;;  %v4690_v6 = vmin.f32 %v13789_v57, %v4434_v46  ;;  %v11809_v44 = vld [vmem:[#allocation4 + $0x468] sm:$0xff] }
 0x491   :  { %10067 = vxpose.xlu0.b32.start [1/16] %v10066_v52, 128  ;;  %v10964_v49 = vpack.i.bf16 %v5459_v1, %v5458_v37  ;;  %v5457_v15 = vmul.f32 %v9201_v41, %v13782_v28  ;;  %v4691_v8 = vmin.f32 %v13789_v57, %v4435_v35  ;;  %v4440_v12 = vmax.f32 %v13808_v34, %v11806_v22  ;;  %v11810_v35 = vld [vmem:[#allocation4 + $0x490] sm:$0xff] }
 0x492   :  { %v9206_v16 = vround.rtne.f32 %v4950_v51  ;;  %v9207_v63 = vround.rtne.f32 %v4951_v60  ;;  %v4948_v48 = vmul.f32 %v14275_v39, %v4690_v6  ;;  %v4441_v10 = vmax.f32 %v13808_v34, %v11807_v18 }
 0x493   :  { %10965 = vxpose.xlu1.b32.cont [2/16] %v10964_v49, 128  ;;  %v10068_v58 = vpack.i.bf16 %v5457_v15, %v5456_v36  ;;  %v4949_v5 = vmul.f32 %v14275_v39, %v4691_v8  ;;  %v4696_v52 = vmin.f32 %v13789_v57, %v4440_v12  ;;  %v4438_v4 = vmax.f32 %v13808_v34, %v11808_v54  ;;  %v11811_v8 = vld [vmem:[#allocation4 + $0x498] sm:$0xff] }
 0x494   :  { %v5462_v19 = vmul.f32 %v9206_v16, %v13782_v28  ;;  %v5463_v2 = vmul.f32 %v9207_v63, %v13782_v28  ;;  %v9204_v26 = vround.rtne.f32 %v4948_v48  ;;  %v4697_v1 = vmin.f32 %v13789_v57, %v4441_v10  ;;  %v15313_v10 = vpop.trf.xlu0 }
 0x495   :  { %10069 = vxpose.xlu0.b32.cont [2/16] %v10068_v58, 128  ;;  %v9205_v37 = vround.rtne.f32 %v4949_v5  ;;  %v4954_v42 = vmul.f32 %v14275_v39, %v4696_v52  ;;  %v4439_v49 = vmax.f32 %v13808_v34, %v11809_v44  ;;  %v4694_v40 = vmin.f32 %v13789_v57, %v4438_v4  ;;  %v11813_v4 = vld [vmem:[#allocation4 + $0x488] sm:$0xff] }
 0x496   :  { %v10966_v33 = vpack.i.bf16 %v5463_v2, %v5462_v19  ;;  %v5460_v45 = vmul.f32 %v9204_v26, %v13782_v28  ;;  %v4955_v41 = vmul.f32 %v14275_v39, %v4697_v1  ;;  %v4444_v15 = vmax.f32 %v13808_v34, %v11810_v35  ;;  %v15307_v19 = vpop.trf.xlu1 }
 0x497   :  { %v5461_v32 = vmul.f32 %v9205_v37, %v13782_v28  ;;  %v9210_v51 = vround.rtne.f32 %v4954_v42  ;;  %v4695_v46 = vmin.f32 %v13789_v57, %v4439_v49  ;;  %v4952_v6 = vmul.f32 %v14275_v39, %v4694_v40  ;;  %v11812_v37 = vld [vmem:[#allocation4 + $0x480] sm:$0xff] }
 0x498   :  { %10967 = vxpose.xlu1.b32.cont [3/16] %v10966_v33, 128  ;;  %v9211_v9 = vround.rtne.f32 %v4955_v41  ;;  %v4445_v58 = vmax.f32 %v13808_v34, %v11811_v8  ;;  %v4700_v12 = vmin.f32 %v13789_v57, %v4444_v15  ;;  %v4442_v1 = vmax.f32 %v13808_v34, %v11812_v37  ;;  %v11814_v15 = vld [vmem:[#allocation4 + $0x4b0] sm:$0xff] }
 0x499   :  { %v10070_v36 = vpack.i.bf16 %v5461_v32, %v5460_v45  ;;  %v5466_v16 = vmul.f32 %v9210_v51, %v13782_v28  ;;  %v4953_v63 = vmul.f32 %v14275_v39, %v4695_v46  ;;  %v9208_v2 = vround.rtne.f32 %v4952_v6 }
 0x49a   :  { %v5467_v48 = vmul.f32 %v9211_v9, %v13782_v28  ;;  %v4701_v18 = vmin.f32 %v13789_v57, %v4445_v58  ;;  %v4958_v33 = vmul.f32 %v14275_v39, %v4700_v12  ;;  %v4443_v44 = vmax.f32 %v13808_v34, %v11813_v4  ;;  %v11815_v58 = vld [vmem:[#allocation4 + $0x4b8] sm:$0xff]  ;;  %v15333_v12 = vpop.trf.xlu1 }
 0x49b   :  { %10071 = vxpose.xlu0.b32.cont [3/16] %v10070_v36, 128  ;;  %v9209_v5 = vround.rtne.f32 %v4953_v63  ;;  %v5464_v45 = vmul.f32 %v9208_v2, %v13782_v28  ;;  %v4698_v41 = vmin.f32 %v13789_v57, %v4442_v1  ;;  %11414 = vrcp.f32 %v15228_v21 }
 0x49c   :  { %v10968_v26 = vpack.i.bf16 %v5467_v48, %v5466_v16  ;;  %v4959_v54 = vmul.f32 %v14275_v39, %v4701_v18  ;;  %v9214_v32 = vround.rtne.f32 %v4958_v33  ;;  %v4699_v46 = vmin.f32 %v13789_v57, %v4443_v44  ;;  %v15336_v18 = vpop.trf.xlu0  ;;  %v11817_v44 = vld [vmem:[#allocation4 + $0x4a8] sm:$0xff] }
 0x49d   :  { %v5465_v42 = vmul.f32 %v9209_v5, %v13782_v28  ;;  %v4956_v35 = vmul.f32 %v14275_v39, %v4698_v41  ;;  %v4448_v16 = vmax.f32 %v13808_v34, %v11814_v15  ;;  %v4449_v48 = vmax.f32 %v13808_v34, %v11815_v58 }
 0x49e   :  { %10969 = vxpose.xlu1.b32.cont [4/16] %v10968_v26, 128  ;;  %v9215_v40 = vround.rtne.f32 %v4959_v54  ;;  %v5470_v9 = vmul.f32 %v9214_v32, %v13782_v28  ;;  %v4957_v8 = vmul.f32 %v14275_v39, %v4699_v46  ;;  %v11816_v54 = vld [vmem:[#allocation4 + $0x4a0] sm:$0xff]  ;;  %v4447_v32 = vmax.f32 %v13808_v34, %v11817_v44 }
 0x49f   :  { %v10072_v51 = vpack.i.bf16 %v5465_v42, %v5464_v45  ;;  %v9212_v2 = vround.rtne.f32 %v4956_v35  ;;  %v4704_v5 = vmin.f32 %v13789_v57, %v4448_v16  ;;  %v4705_v1 = vmin.f32 %v13789_v57, %v4449_v48 }
 0x4a0   :  { %v5471_v6 = vmul.f32 %v9215_v40, %v13782_v28  ;;  %v9213_v37 = vround.rtne.f32 %v4957_v8  ;;  %v4446_v4 = vmax.f32 %v13808_v34, %v11816_v54  ;;  %v4703_v35 = vmin.f32 %v13789_v57, %v4447_v32  ;;  %v11818_v8 = vld [vmem:[#allocation4 + $0x4d0] sm:$0xff] }
 0x4a1   :  { %10073 = vxpose.xlu0.b32.cont [4/16] %v10072_v51, 128  ;;  %v5468_v45 = vmul.f32 %v9212_v2, %v13782_v28  ;;  %v4962_v42 = vmul.f32 %v14275_v39, %v4704_v5  ;;  %v4963_v40 = vmul.f32 %v14275_v39, %v4705_v1  ;;  %v4452_v58 = vmax.f32 %v13808_v34, %v11818_v8  ;;  %v15355_v1 = vpop.trf.xlu1 }
 0x4a2   :  { %v10970_v26 = vpack.i.bf16 %v5471_v6, %v5470_v9  ;;  %v5469_v41 = vmul.f32 %v9213_v37, %v13782_v28  ;;  %v4702_v9 = vmin.f32 %v13789_v57, %v4446_v4  ;;  %v4961_v5 = vmul.f32 %v14275_v39, %v4703_v35  ;;  %v11820_v35 = vld [vmem:[#allocation4 + $0x4c0] sm:$0xff] }
 0x4a3   :  { %v9218_v46 = vround.rtne.f32 %v4962_v42  ;;  %v9219_v6 = vround.rtne.f32 %v4963_v40  ;;  %v4708_v54 = vmin.f32 %v13789_v57, %v4452_v58 }
 0x4a4   :  { %10971 = vxpose.xlu1.b32.cont [5/16] %v10970_v26, 128  ;;  %v10074_v15 = vpack.i.bf16 %v5469_v41, %v5468_v45  ;;  %v4960_v2 = vmul.f32 %v14275_v39, %v4702_v9  ;;  %v11819_v26 = vld [vmem:[#allocation4 + $0x4d8] sm:$0xff]  ;;  %v9217_v44 = vround.rtne.f32 %v4961_v5  ;;  %v15361_v41 = vpop.trf.xlu0 }
 0x4a5   :  { %v5474_v48 = vmul.f32 %v9218_v46, %v13782_v28  ;;  %v4453_v37 = vmax.f32 %v13808_v34, %v11819_v26  ;;  %v5475_v45 = vmul.f32 %v9219_v6, %v13782_v28  ;;  %v4966_v9 = vmul.f32 %v14275_v39, %v4708_v54  ;;  %v11825_v26 = vld [vmem:[#allocation4 + $0x4e8] sm:$0xff] }
 0x4a6   :  { %10075 = vxpose.xlu0.b32.cont [5/16] %v10074_v15, 128  ;;  %v9216_v4 = vround.rtne.f32 %v4960_v2  ;;  %v4450_v15 = vmax.f32 %v13808_v34, %v11820_v35  ;;  %v5473_v8 = vmul.f32 %v9217_v44, %v13782_v28  ;;  %v11821_v2 = vld [vmem:[#allocation4 + $0x4c8] sm:$0xff]  ;;  %v11824_v35 = vld [vmem:[#allocation4 + $0x4e0] sm:$0xff] }
 0x4a7   :  { %v4709_v32 = vmin.f32 %v13789_v57, %v4453_v37  ;;  %v10972_v40 = vpack.i.bf16 %v5475_v45, %v5474_v48  ;;  %v4451_v5 = vmax.f32 %v13808_v34, %v11821_v2  ;;  %v9222_v48 = vround.rtne.f32 %v4966_v9 }
 0x4a8   :  { %v5472_v6 = vmul.f32 %v9216_v4, %v13782_v28  ;;  %v4706_v37 = vmin.f32 %v13789_v57, %v4450_v15 }
 0x4a9   :  { %v4967_v58 = vmul.f32 %v14275_v39, %v4709_v32  ;;  %10973 = vxpose.xlu1.b32.cont [6/16] %v10972_v40, 128  ;;  %v4707_v46 = vmin.f32 %v13789_v57, %v4451_v5  ;;  %v5478_v4 = vmul.f32 %v9222_v48, %v13782_v28  ;;  %v11822_v32 = vld [vmem:[#allocation4 + $0x4f0] sm:$0xff]  ;;  %v15384_v48 = vpop.trf.xlu0 }
 0x4aa   :  { %v10076_v45 = vpack.i.bf16 %v5473_v8, %v5472_v6  ;;  %v4964_v44 = vmul.f32 %v14275_v39, %v4706_v37  ;;  %v4456_v42 = vmax.f32 %v13808_v34, %v11822_v32  ;;  %v11823_v6 = vld [vmem:[#allocation4 + $0x4f8] sm:$0xff] }
 0x4ab   :  { %v9223_v54 = vround.rtne.f32 %v4967_v58  ;;  %v4965_v15 = vmul.f32 %v14275_v39, %v4707_v46  ;;  %v4457_v8 = vmax.f32 %v13808_v34, %v11823_v6  ;;  %v15381_v58 = vpop.trf.xlu1  ;;  %v4454_v6 = vmax.f32 %v13808_v34, %v11824_v35  ;;  %v11826_v35 = vld [vmem:[#allocation4 + $0x510] sm:$0xff] }
 0x4ac   :  { %10077 = vxpose.xlu0.b32.cont [6/16] %v10076_v45, 128  ;;  %v9220_v2 = vround.rtne.f32 %v4964_v44  ;;  %v4712_v5 = vmin.f32 %v13789_v57, %v4456_v42  ;;  %v4455_v44 = vmax.f32 %v13808_v34, %v11825_v26  ;;  %v4460_v63 = vmax.f32 %v13808_v34, %v11826_v35 }
 0x4ad   :  { %v5479_v40 = vmul.f32 %v9223_v54, %v13782_v28  ;;  %v9221_v45 = vround.rtne.f32 %v4965_v15  ;;  %v4713_v54 = vmin.f32 %v13789_v57, %v4457_v8  ;;  %v4710_v8 = vmin.f32 %v13789_v57, %v4454_v6  ;;  %v15409_v35 = vpop.trf.xlu0 }
 0x4ae   :  { %v5476_v9 = vmul.f32 %v9220_v2, %v13782_v28  ;;  %v4970_v46 = vmul.f32 %v14275_v39, %v4712_v5  ;;  %v4711_v2 = vmin.f32 %v13789_v57, %v4455_v44  ;;  %v4716_v44 = vmin.f32 %v13789_v57, %v4460_v63  ;;  %v11828_v5 = vld [vmem:[#allocation4 + $0x500] sm:$0xff] }
 0x4af   :  { %v10974_v37 = vpack.i.bf16 %v5479_v40, %v5478_v4  ;;  %v5477_v42 = vmul.f32 %v9221_v45, %v13782_v28  ;;  %v4971_v40 = vmul.f32 %v14275_v39, %v4713_v54  ;;  %v11827_v4 = vld [vmem:[#allocation4 + $0x518] sm:$0xff] }
 0x4b0   :  { %v9226_v15 = vround.rtne.f32 %v4970_v46  ;;  %v4969_v45 = vmul.f32 %v14275_v39, %v4711_v2  ;;  %v4461_v54 = vmax.f32 %v13808_v34, %v11827_v4  ;;  %v15403_v46 = vpop.trf.xlu1  ;;  %v4974_v4 = vmul.f32 %v14275_v39, %v4716_v44 }
 0x4b1   :  { %10975 = vxpose.xlu1.b32.cont [7/16] %v10974_v37, 128  ;;  %v10078_v32 = vpack.i.bf16 %v5477_v42, %v5476_v9  ;;  %v9227_v33 = vround.rtne.f32 %v4971_v40  ;;  %v4968_v37 = vmul.f32 %v14275_v39, %v4710_v8 }
 0x4b2   :  { %v5482_v26 = vmul.f32 %v9226_v15, %v13782_v28  ;;  %v9225_v40 = vround.rtne.f32 %v4969_v45  ;;  %v4717_v15 = vmin.f32 %v13789_v57, %v4461_v54  ;;  %v11833_v54 = vld [vmem:[#allocation4 + $0x528] sm:$0xff] }
 0x4b3   :  { %10079 = vxpose.xlu0.b32.cont [7/16] %v10078_v32, 128  ;;  %v5483_v9 = vmul.f32 %v9227_v33, %v13782_v28  ;;  %v9224_v42 = vround.rtne.f32 %v4968_v37  ;;  %v4458_v32 = vmax.f32 %v13808_v34, %v11828_v5  ;;  %v11829_v37 = vld [vmem:[#allocation4 + $0x508] sm:$0xff]  ;;  %v11832_v5 = vld [vmem:[#allocation4 + $0x520] sm:$0xff] }
 0x4b4   :  { %v5481_v6 = vmul.f32 %v9225_v40, %v13782_v28  ;;  %v4975_v63 = vmul.f32 %v14275_v39, %v4717_v15  ;;  %v4459_v45 = vmax.f32 %v13808_v34, %v11829_v37  ;;  %v11830_v15 = vld [vmem:[#allocation4 + $0x530] sm:$0xff] }
 0x4b5   :  { %v10976_v8 = vpack.i.bf16 %v5483_v9, %v5482_v26  ;;  %v5480_v33 = vmul.f32 %v9224_v42, %v13782_v28  ;;  %v9230_v26 = vround.rtne.f32 %v4974_v4  ;;  %v4714_v9 = vmin.f32 %v13789_v57, %v4458_v32 }
 0x4b6   :  { %v9231_v44 = vround.rtne.f32 %v4975_v63  ;;  %v4715_v16 = vmin.f32 %v13789_v57, %v4459_v45  ;;  %v4464_v51 = vmax.f32 %v13808_v34, %v11830_v15  ;;  %v15429_v63 = vpop.trf.xlu1 }
 0x4b7   :  { %10977 = vxpose.xlu1.b32.cont [8/16] %v10976_v8, 128  ;;  %v10080_v2 = vpack.i.bf16 %v5481_v6, %v5480_v33  ;;  %v5486_v42 = vmul.f32 %v9230_v26, %v13782_v28  ;;  %v4972_v40 = vmul.f32 %v14275_v39, %v4714_v9  ;;  %v11831_v6 = vld [vmem:[#allocation4 + $0x538] sm:$0xff]  ;;  %v15432_v26 = vpop.trf.xlu0 }
 0x4b8   :  { %v5487_v8 = vmul.f32 %v9231_v44, %v13782_v28  ;;  %v4973_v32 = vmul.f32 %v14275_v39, %v4715_v16  ;;  %v4465_v33 = vmax.f32 %v13808_v34, %v11831_v6  ;;  %v4720_v45 = vmin.f32 %v13789_v57, %v4464_v51 }
 0x4b9   :  { %10081 = vxpose.xlu0.b32.cont [8/16] %v10080_v2, 128  ;;  %v9228_v37 = vround.rtne.f32 %v4972_v40  ;;  %v4462_v6 = vmax.f32 %v13808_v34, %v11832_v5  ;;  %v4463_v40 = vmax.f32 %v13808_v34, %v11833_v54  ;;  %v11834_v5 = vld [vmem:[#allocation4 + $0x550] sm:$0xff] }
 0x4ba   :  { %v10978_v9 = vpack.i.bf16 %v5487_v8, %v5486_v42  ;;  %v9229_v2 = vround.rtne.f32 %v4973_v32  ;;  %v4721_v44 = vmin.f32 %v13789_v57, %v4465_v33  ;;  %v4978_v16 = vmul.f32 %v14275_v39, %v4720_v45  ;;  %v11835_v42 = vld [vmem:[#allocation4 + $0x558] sm:$0xff]  ;;  %v11836_v45 = vld [vmem:[#allocation4 + $0x540] sm:$0xff] }
 0x4bb   :  { %v5484_v4 = vmul.f32 %v9228_v37, %v13782_v28  ;;  %v4718_v33 = vmin.f32 %v13789_v57, %v4462_v6  ;;  %v4719_v37 = vmin.f32 %v13789_v57, %v4463_v40  ;;  %v4468_v22 = vmax.f32 %v13808_v34, %v11834_v5  ;;  %v15457_v5 = vpop.trf.xlu0 }
 0x4bc   :  { %10979 = vxpose.xlu1.b32.cont [9/16] %v10978_v9, 128  ;;  %v5485_v51 = vmul.f32 %v9229_v2, %v13782_v28  ;;  %v4979_v8 = vmul.f32 %v14275_v39, %v4721_v44  ;;  %v9234_v32 = vround.rtne.f32 %v4978_v16  ;;  %v4469_v44 = vmax.f32 %v13808_v34, %v11835_v42  ;;  %v15451_v16 = vpop.trf.xlu1 }
 0x4bd   :  { %v4976_v9 = vmul.f32 %v14275_v39, %v4718_v33  ;;  %v4977_v2 = vmul.f32 %v14275_v39, %v4719_v37  ;;  %v4724_v40 = vmin.f32 %v13789_v57, %v4468_v22 }
 0x4be   :  { %v10082_v15 = vpack.i.bf16 %v5485_v51, %v5484_v4  ;;  %v9235_v52 = vround.rtne.f32 %v4979_v8  ;;  %v5490_v54 = vmul.f32 %v9234_v32, %v13782_v28  ;;  %v4725_v32 = vmin.f32 %v13789_v57, %v4469_v44  ;;  %v11841_v44 = vld [vmem:[#allocation4 + $0x568] sm:$0xff] }
 0x4bf   :  { %v9232_v51 = vround.rtne.f32 %v4976_v9  ;;  %v9233_v8 = vround.rtne.f32 %v4977_v2  ;;  %v4982_v42 = vmul.f32 %v14275_v39, %v4724_v40  ;;  %v11837_v9 = vld [vmem:[#allocation4 + $0x548] sm:$0xff] }
 0x4c0   :  { %10083 = vxpose.xlu0.b32.cont [9/16] %v10082_v15, 128  ;;  %v5491_v4 = vmul.f32 %v9235_v52, %v13782_v28  ;;  %v4466_v15 = vmax.f32 %v13808_v34, %v11836_v45  ;;  %v4983_v22 = vmul.f32 %v14275_v39, %v4725_v32  ;;  %v4467_v2 = vmax.f32 %v13808_v34, %v11837_v9  ;;  %v11838_v32 = vld [vmem:[#allocation4 + $0x570] sm:$0xff]  ;;  %v11840_v45 = vld [vmem:[#allocation4 + $0x560] sm:$0xff] }
 0x4c1   :  { %v5488_v52 = vmul.f32 %v9232_v51, %v13782_v28  ;;  %v5489_v6 = vmul.f32 %v9233_v8, %v13782_v28  ;;  %v4472_v49 = vmax.f32 %v13808_v34, %v11838_v32 }
 0x4c2   :  { %v10980_v33 = vpack.i.bf16 %v5491_v4, %v5490_v54  ;;  %v9238_v54 = vround.rtne.f32 %v4982_v42  ;;  %v4722_v4 = vmin.f32 %v13789_v57, %v4466_v15  ;;  %v9239_v40 = vround.rtne.f32 %v4983_v22  ;;  %v15477_v22 = vpop.trf.xlu1 }
 0x4c3   :  { %v10084_v37 = vpack.i.bf16 %v5489_v6, %v5488_v52  ;;  %v4723_v36 = vmin.f32 %v13789_v57, %v4467_v2  ;;  %v11839_v6 = vld [vmem:[#allocation4 + $0x578] sm:$0xff]  ;;  %v4728_v2 = vmin.f32 %v13789_v57, %v4472_v49 }
 0x4c4   :  { %10981 = vxpose.xlu1.b32.cont [10/16] %v10980_v33, 128  ;;  %v5494_v51 = vmul.f32 %v9238_v54, %v13782_v28  ;;  %v4980_v8 = vmul.f32 %v14275_v39, %v4722_v4  ;;  %v5495_v33 = vmul.f32 %v9239_v40, %v13782_v28  ;;  %v4473_v52 = vmax.f32 %v13808_v34, %v11839_v6  ;;  %v15480_v54 = vpop.trf.xlu0 }
 0x4c5   :  { %10085 = vxpose.xlu0.b32.cont [10/16] %v10084_v37, 128  ;;  %v4981_v15 = vmul.f32 %v14275_v39, %v4723_v36  ;;  %v4986_v36 = vmul.f32 %v14275_v39, %v4728_v2  ;;  %v4470_v6 = vmax.f32 %v13808_v34, %v11840_v45  ;;  %v11842_v45 = vld [vmem:[#allocation4 + $0x590] sm:$0xff]  ;;  %v11844_v2 = vld [vmem:[#allocation4 + $0x580] sm:$0xff] }
 0x4c6   :  { %v9236_v9 = vround.rtne.f32 %v4980_v8  ;;  %v10982_v4 = vpack.i.bf16 %v5495_v33, %v5494_v51  ;;  %v4729_v40 = vmin.f32 %v13789_v57, %v4473_v52  ;;  %v4471_v8 = vmax.f32 %v13808_v34, %v11841_v44  ;;  %v11843_v51 = vld [vmem:[#allocation4 + $0x598] sm:$0xff] }
 0x4c7   :  { %v9237_v37 = vround.rtne.f32 %v4981_v15  ;;  %v9242_v15 = vround.rtne.f32 %v4986_v36  ;;  %v4726_v52 = vmin.f32 %v13789_v57, %v4470_v6  ;;  %v4476_v7 = vmax.f32 %v13808_v34, %v11842_v45  ;;  %v15499_v36 = vpop.trf.xlu1 }
 0x4c8   :  { %v5492_v42 = vmul.f32 %v9236_v9, %v13782_v28  ;;  %10983 = vxpose.xlu1.b32.cont [11/16] %v10982_v4, 128  ;;  %v4987_v33 = vmul.f32 %v14275_v39, %v4729_v40  ;;  %v4727_v9 = vmin.f32 %v13789_v57, %v4471_v8  ;;  %v4477_v40 = vmax.f32 %v13808_v34, %v11843_v51  ;;  %v15505_v45 = vpop.trf.xlu0 }
 0x4c9   :  { %v5493_v49 = vmul.f32 %v9237_v37, %v13782_v28  ;;  %v5498_v44 = vmul.f32 %v9242_v15, %v13782_v28  ;;  %v4984_v4 = vmul.f32 %v14275_v39, %v4726_v52  ;;  %v4732_v8 = vmin.f32 %v13789_v57, %v4476_v7 }
 0x4ca   :  { %v9243_v50 = vround.rtne.f32 %v4987_v33  ;;  %v4985_v37 = vmul.f32 %v14275_v39, %v4727_v9  ;;  %v4733_v15 = vmin.f32 %v13789_v57, %v4477_v40  ;;  %v11849_v40 = vld [vmem:[#allocation4 + $0x5a8] sm:$0xff] }
 0x4cb   :  { %v10086_v32 = vpack.i.bf16 %v5493_v49, %v5492_v42  ;;  %v9240_v49 = vround.rtne.f32 %v4984_v4  ;;  %v4990_v51 = vmul.f32 %v14275_v39, %v4732_v8  ;;  %v11845_v4 = vld [vmem:[#allocation4 + $0x588] sm:$0xff] }
 0x4cc   :  { %v5499_v42 = vmul.f32 %v9243_v50, %v13782_v28  ;;  %v9241_v33 = vround.rtne.f32 %v4985_v37  ;;  %v4991_v7 = vmul.f32 %v14275_v39, %v4733_v15  ;;  %v4475_v37 = vmax.f32 %v13808_v34, %v11845_v4  ;;  %v11846_v15 = vld [vmem:[#allocation4 + $0x5b0] sm:$0xff] }
 0x4cd   :  { %10087 = vxpose.xlu0.b32.cont [11/16] %v10086_v32, 128  ;;  %v4474_v32 = vmax.f32 %v13808_v34, %v11844_v2  ;;  %v5496_v50 = vmul.f32 %v9240_v49, %v13782_v28  ;;  %v4480_v30 = vmax.f32 %v13808_v34, %v11846_v15  ;;  %v11848_v2 = vld [vmem:[#allocation4 + $0x5a0] sm:$0xff] }
 0x4ce   :  { %v10984_v52 = vpack.i.bf16 %v5499_v42, %v5498_v44  ;;  %v5497_v6 = vmul.f32 %v9241_v33, %v13782_v28  ;;  %v9246_v44 = vround.rtne.f32 %v4990_v51  ;;  %v9247_v8 = vround.rtne.f32 %v4991_v7  ;;  %v15525_v7 = vpop.trf.xlu1 }
 0x4cf   :  { %v4730_v42 = vmin.f32 %v13789_v57, %v4474_v32  ;;  %v4731_v60 = vmin.f32 %v13789_v57, %v4475_v37  ;;  %v4736_v37 = vmin.f32 %v13789_v57, %v4480_v30 }
 0x4d0   :  { %10985 = vxpose.xlu1.b32.cont [12/16] %v10984_v52, 128  ;;  %v10088_v9 = vpack.i.bf16 %v5497_v6, %v5496_v50  ;;  %v5502_v49 = vmul.f32 %v9246_v44, %v13782_v28  ;;  %v5503_v52 = vmul.f32 %v9247_v8, %v13782_v28  ;;  %v11847_v6 = vld [vmem:[#allocation4 + $0x5b8] sm:$0xff]  ;;  %v15528_v44 = vpop.trf.xlu0 }
 0x4d1   :  { %v4988_v33 = vmul.f32 %v14275_v39, %v4730_v42  ;;  %v4989_v32 = vmul.f32 %v14275_v39, %v4731_v60  ;;  %v4481_v50 = vmax.f32 %v13808_v34, %v11847_v6  ;;  %v4994_v60 = vmul.f32 %v14275_v39, %v4736_v37  ;;  %v11852_v37 = vld [vmem:[#allocation4 + $0x5c0] sm:$0xff] }
 0x4d2   :  { %10089 = vxpose.xlu0.b32.cont [12/16] %v10088_v9, 128  ;;  %v10986_v42 = vpack.i.bf16 %v5503_v52, %v5502_v49  ;;  %v4478_v6 = vmax.f32 %v13808_v34, %v11848_v2  ;;  %v11850_v2 = vld [vmem:[#allocation4 + $0x5d0] sm:$0xff]  ;;  %v11851_v49 = vld [vmem:[#allocation4 + $0x5d8] sm:$0xff] }
 0x4d3   :  { %v9244_v4 = vround.rtne.f32 %v4988_v33  ;;  %v9245_v9 = vround.rtne.f32 %v4989_v32  ;;  %v4737_v8 = vmin.f32 %v13789_v57, %v4481_v50  ;;  %v4479_v33 = vmax.f32 %v13808_v34, %v11849_v40 }
 0x4d4   :  { %10987 = vxpose.xlu1.b32.cont [13/16] %v10986_v42, 128  ;;  %v9250_v32 = vround.rtne.f32 %v4994_v60  ;;  %v4734_v50 = vmin.f32 %v13789_v57, %v4478_v6  ;;  %v4484_v59 = vmax.f32 %v13808_v34, %v11850_v2  ;;  %v15547_v60 = vpop.trf.xlu1  ;;  %v15553_v2 = vpop.trf.xlu0 }
 0x4d5   :  { %v5500_v51 = vmul.f32 %v9244_v4, %v13782_v28  ;;  %v5501_v30 = vmul.f32 %v9245_v9, %v13782_v28  ;;  %v4995_v52 = vmul.f32 %v14275_v39, %v4737_v8  ;;  %v4735_v4 = vmin.f32 %v13789_v57, %v4479_v33  ;;  %17495 = vst [vmem:[#allocation10_spill] sm:$0xff] %v15547_v60 }
 0x4d6   :  { %v5506_v40 = vmul.f32 %v9250_v32, %v13782_v28  ;;  %v4992_v42 = vmul.f32 %v14275_v39, %v4734_v50  ;;  %v4485_v8 = vmax.f32 %v13808_v34, %v11851_v49  ;;  %v4740_v33 = vmin.f32 %v13789_v57, %v4484_v59 }
 0x4d7   :  { %v10090_v15 = vpack.i.bf16 %v5501_v30, %v5500_v51  ;;  %v9251_v47 = vround.rtne.f32 %v4995_v52  ;;  %v4993_v9 = vmul.f32 %v14275_v39, %v4735_v4 }
 0x4d8   :  { %v9248_v30 = vround.rtne.f32 %v4992_v42  ;;  %v4741_v32 = vmin.f32 %v13789_v57, %v4485_v8  ;;  %v4998_v49 = vmul.f32 %v14275_v39, %v4740_v33  ;;  %v11853_v42 = vld [vmem:[#allocation4 + $0x5c8] sm:$0xff] }
 0x4d9   :  { %10091 = vxpose.xlu0.b32.cont [13/16] %v10090_v15, 128  ;;  %v5507_v51 = vmul.f32 %v9251_v47, %v13782_v28  ;;  %v9249_v52 = vround.rtne.f32 %v4993_v9  ;;  %v4482_v15 = vmax.f32 %v13808_v34, %v11852_v37  ;;  %v4483_v9 = vmax.f32 %v13808_v34, %v11853_v42  ;;  %v11856_v37 = vld [vmem:[#allocation4 + $0x5e0] sm:$0xff]  ;;  %v11857_v8 = vld [vmem:[#allocation4 + $0x5e8] sm:$0xff] }
 0x4da   :  { %v5504_v47 = vmul.f32 %v9248_v30, %v13782_v28  ;;  %v4999_v59 = vmul.f32 %v14275_v39, %v4741_v32  ;;  %v11854_v32 = vld [vmem:[#allocation4 + $0x5f0] sm:$0xff] }
 0x4db   :  { %v10988_v50 = vpack.i.bf16 %v5507_v51, %v5506_v40  ;;  %v5505_v6 = vmul.f32 %v9249_v52, %v13782_v28  ;;  %v9254_v40 = vround.rtne.f32 %v4998_v49  ;;  %v4738_v51 = vmin.f32 %v13789_v57, %v4482_v15 }
 0x4dc   :  { %v9255_v33 = vround.rtne.f32 %v4999_v59  ;;  %v4739_v11 = vmin.f32 %v13789_v57, %v4483_v9  ;;  %v4488_v25 = vmax.f32 %v13808_v34, %v11854_v32  ;;  %v15573_v59 = vpop.trf.xlu1 }
 0x4dd   :  { %10989 = vxpose.xlu1.b32.cont [14/16] %v10988_v50, 128  ;;  %v10092_v4 = vpack.i.bf16 %v5505_v6, %v5504_v47  ;;  %v5510_v30 = vmul.f32 %v9254_v40, %v13782_v28  ;;  %v4996_v52 = vmul.f32 %v14275_v39, %v4738_v51  ;;  %v11855_v6 = vld [vmem:[#allocation4 + $0x5f8] sm:$0xff]  ;;  %17496 = vst [vmem:[#allocation11_spill] sm:$0xff] %v15573_v59  ;;  %v15576_v40 = vpop.trf.xlu0 }
 0x4de   :  { %v5511_v50 = vmul.f32 %v9255_v33, %v13782_v28  ;;  %v4997_v15 = vmul.f32 %v14275_v39, %v4739_v11  ;;  %v4489_v47 = vmax.f32 %v13808_v34, %v11855_v6  ;;  %v4744_v9 = vmin.f32 %v13789_v57, %v4488_v25  ;;  %17497 = vst [vmem:[#allocation12_spill] sm:$0xff] %v15576_v40 }
 0x4df   :  { %10093 = vxpose.xlu0.b32.cont [14/16] %v10092_v4, 128  ;;  %v9252_v42 = vround.rtne.f32 %v4996_v52  ;;  %v4486_v6 = vmax.f32 %v13808_v34, %v11856_v37  ;;  %v4487_v52 = vmax.f32 %v13808_v34, %v11857_v8  ;;  %v15591_v37 = vmul.f32 127.0, %v15228_v21 }
 0x4e0   :  { %v10990_v51 = vpack.i.bf16 %v5511_v50, %v5510_v30  ;;  %v9253_v4 = vround.rtne.f32 %v4997_v15  ;;  %v4745_v33 = vmin.f32 %v13789_v57, %v4489_v47  ;;  %v5002_v11 = vmul.f32 %v14275_v39, %v4744_v9  ;;  %v10882_v8 = vpop.trf.xlu1  ;;  %v15641_v9 = vld [vmem:[%s17334_s2 + $0x1e8] sm:$0xff] }
 0x4e1   :  { %v5508_v49 = vmul.f32 %v9252_v42, %v13782_v28  ;;  %v4742_v47 = vmin.f32 %v13789_v57, %v4486_v6  ;;  %v4743_v42 = vmin.f32 %v13789_v57, %v4487_v52  ;;  %17499 = vst [vmem:[#allocation14_spill] sm:$0xff] %v15641_v9 }
 0x4e2   :  { %10991 = vxpose.xlu1.b32.cont [15/16] %v10990_v51, 128  ;;  %v5509_v25 = vmul.f32 %v9253_v4, %v13782_v28  ;;  %v5003_v50 = vmul.f32 %v14275_v39, %v4745_v33  ;;  %v9258_v15 = vround.rtne.f32 %v5002_v11  ;;  %v15600_v11 = vsub.f32 0.0, %v15591_v37 }
 0x4e3   :  { %v5000_v4 = vmul.f32 %v14275_v39, %v4742_v47  ;;  %v5001_v30 = vmul.f32 %v14275_v39, %v4743_v42  ;;  %v10883_v42 = vunpack.i.l.bf16 %v10882_v8 }
 0x4e4   :  { %v10094_v32 = vpack.i.bf16 %v5509_v25, %v5508_v49  ;;  %v9259_v3 = vround.rtne.f32 %v5003_v50  ;;  %v5514_v51 = vmul.f32 %v9258_v15, %v13782_v28  ;;  %v10886_v25 = vunpack.i.h.bf16 %v10882_v8  ;;  %v11858_v15 = vld [vmem:[%s17334_s2] sm:$0xff]  ;;  %v11865_v8 = vld [vmem:[#allocation4 + $0x608] sm:$0xff]  ;;  %v10887_v59 = vpop.trf.xlu1 }
 0x4e5   :  { %v9256_v6 = vround.rtne.f32 %v5000_v4  ;;  %v9257_v52 = vround.rtne.f32 %v5001_v30  ;;  %v7193_v47 = vmax.f32 %v15600_v11, %v11858_v15  ;;  %v4491_v49 = vmax.f32 %v13808_v34, %v11865_v8  ;;  %v15667_v8 = vpop.eup %11414 }
 0x4e6   :  { %10095 = vxpose.xlu0.b32.cont [15/16] %v10094_v32, 128  ;;  %v5515_v33 = vmul.f32 %v9259_v3, %v13782_v28  ;;  %v11859_v32 = vld [vmem:[%s17334_s2 + $0x8] sm:$0xff] }
 0x4e7   :  { %v7194_v3 = vmax.f32 %v15600_v11, %v11859_v32  ;;  %v5512_v4 = vmul.f32 %v9256_v6, %v13782_v28  ;;  %v5513_v30 = vmul.f32 %v9257_v52, %v13782_v28  ;;  %v7257_v15 = vmin.f32 %v15591_v37, %v7193_v47  ;;  %v15626_v6 = vld [vmem:[%s17334_s2 + $0x1c8] sm:$0xff]  ;;  %v15634_v47 = vld [vmem:[%s17334_s2 + $0x1e0] sm:$0xff] }
 0x4e8   :  { %v10992_v50 = vpack.i.bf16 %v5515_v33, %v5514_v51  ;;  %v9986_v33 = vpop.trf.xlu0  ;;  %17498 = vst [vmem:[#allocation13_spill] sm:$0xff] %v15634_v47  ;;  %v17503_v47 = vunpack.i.h.bf16 %v15241_v31 }
 0x4e9   :  { %v7258_v32 = vmin.f32 %v15591_v37, %v7194_v3  ;;  %v8521_v3 = vpack.c.bf16 %v10886_v25, %v9878_v20  ;;  %v9990_v43 = vunpack.i.h.bf16 %v9986_v33  ;;  %v9987_v56 = vunpack.i.l.bf16 %v9986_v33 }
 0x4ea   :  { %10993 = vxpose.xlu1.b32.end [16/16] %v10992_v50, 128  ;;  %v10096_v50 = vpack.i.bf16 %v5513_v30, %v5512_v4  ;;  %v8489_v4 = vpack.c.bf16 %v10883_v42, %v9875_v13  ;;  %v11864_v30 = vld [vmem:[#allocation4 + $0x600] sm:$0xff]  ;;  %v4747_v20 = vmin.f32 %v13789_v57, %v4491_v49  ;;  %v11867_v42 = vld [vmem:[%s17334_s2 + $0x28] sm:$0xff]  ;;  %v7323_v51 = vmul.f32 %v15667_v8, %v7257_v15 }
 0x4eb   :  { %v4490_v52 = vmax.f32 %v13808_v34, %v11864_v30  ;;  %6956 = vst [vmem:[%s17336_s4 + $0x300] sm:$0xff] %v8521_v3  ;;  %v11866_v13 = vld [vmem:[%s17334_s2 + $0x20] sm:$0xff]  ;;  %v7198_v33 = vmax.f32 %v15600_v11, %v11867_v42  ;;  %v10891_v3 = vunpack.i.h.bf16 %v10887_v59 }
 0x4ec   :  { %10097 = vxpose.xlu0.b32.end [16/16] %v10096_v50, 128  ;;  %6924 = vst [vmem:[%s17336_s4 + $0x200] sm:$0xff] %v8489_v4  ;;  %v7197_v25 = vmax.f32 %v15600_v11, %v11866_v13  ;;  %v17500_v50 = vunpack.i.h.bf16 %v15192_v0  ;;  %v9991_v30 = vpop.trf.xlu0  ;;  %v7324_v13 = vmul.f32 %v15667_v8, %v7258_v32  ;;  %v5005_v9 = vmul.f32 %v14275_v39, %v4747_v20 }
 0x4ed   :  { %v4746_v17 = vmin.f32 %v13789_v57, %v4490_v52  ;;  %v17501_v52 = vunpack.i.l.bf16 %v15192_v0  ;;  %v9326_v15 = vround.rtne.f32 %v7323_v51  ;;  %v8523_v60 = vpack.c.bf16 %v10891_v3, %v17503_v47 }
 0x4ee   :  { %v8457_v4 = vpack.c.bf16 %v9990_v43, %v17500_v50  ;;  %v7261_v0 = vmin.f32 %v15591_v37, %v7197_v25  ;;  %v10888_v43 = vunpack.i.l.bf16 %v10887_v59  ;;  %v9327_v42 = vround.rtne.f32 %v7324_v13 }
 0x4ef   :  { %v8425_v49 = vpack.c.bf16 %v9987_v56, %v17501_v52  ;;  %v5004_v40 = vmul.f32 %v14275_v39, %v4746_v17  ;;  %v7262_v56 = vmin.f32 %v15591_v37, %v7198_v33  ;;  %v9261_v50 = vround.rtne.f32 %v5005_v9  ;;  %6958 = vst [vmem:[%s17336_s4 + $0x310] sm:$0xff] %v8523_v60  ;;  %v11869_v33 = vld [vmem:[#allocation4 + $0x628] sm:$0xff]  ;;  %v10892_v60 = vpop.trf.xlu1 }
 0x4f0   :  { %6892 = vst [vmem:[%s17336_s4 + $0x100] sm:$0xff] %v8457_v4  ;;  %v7327_v17 = vmul.f32 %v15667_v8, %v7261_v0  ;;  %v17502_v52 = vunpack.i.l.bf16 %v15241_v31  ;;  %v7452_v25 = vmul.f32 %v9327_v42, %v15228_v21  ;;  %v11868_v31 = vld [vmem:[#allocation4 + $0x620] sm:$0xff]  ;;  %v4495_v3 = vmax.f32 %v13808_v34, %v11869_v33  ;;  %v15703_v13 = vpop.trf.xlu0 }
 0x4f1   :  { %6860 = vst [vmem:[%s17336_s4] sm:$0xff] %v8425_v49  ;;  %v9260_v32 = vround.rtne.f32 %v5004_v40  ;;  %v7328_v20 = vmul.f32 %v15667_v8, %v7262_v56  ;;  %v7451_v49 = vmul.f32 %v9326_v15, %v15228_v21  ;;  %v5517_v51 = vmul.f32 %v9261_v50, %v13782_v28 }
 0x4f2   :  { %v8491_v4 = vpack.c.bf16 %v10888_v43, %v17502_v52  ;;  %v9330_v40 = vround.rtne.f32 %v7327_v17  ;;  %v4494_v47 = vmax.f32 %v13808_v34, %v11868_v31  ;;  %v9995_v43 = vunpack.i.h.bf16 %v9991_v30 }
 0x4f3   :  { %v5516_v59 = vmul.f32 %v9260_v32, %v13782_v28  ;;  %v9331_v9 = vround.rtne.f32 %v7328_v20  ;;  %v11186_v0 = vpack.i.bf16 %v7452_v25, %v7451_v49  ;;  %v4751_v50 = vmin.f32 %v13789_v57, %v4495_v3 }
 0x4f4   :  { %6926 = vst [vmem:[%s17336_s4 + $0x210] sm:$0xff] %v8491_v4  ;;  %v7455_v15 = vmul.f32 %v9330_v40, %v15228_v21  ;;  %v4750_v32 = vmin.f32 %v13789_v57, %v4494_v47  ;;  %v17504_v17 = vunpack.i.h.bf16 %v15237_v24  ;;  %v9992_v52 = vunpack.i.l.bf16 %v9991_v30  ;;  %v11870_v4 = vld [vmem:[%s17334_s2 + $0x40] sm:$0xff]  ;;  %v11871_v40 = vld [vmem:[%s17334_s2 + $0x48] sm:$0xff] }
 0x4f5   :  { %v10178_v56 = vpack.i.bf16 %v5517_v51, %v5516_v59  ;;  %v7456_v42 = vmul.f32 %v9331_v9, %v15228_v21  ;;  %11187 = vxpose.xlu1.b32.start [1/16] %v11186_v0, 128  ;;  %v7201_v49 = vmax.f32 %v15600_v11, %v11870_v4  ;;  %v5009_v51 = vmul.f32 %v14275_v39, %v4751_v50  ;;  %v11872_v50 = vld [vmem:[#allocation4 + $0x640] sm:$0xff] }
 0x4f6   :  { %v8459_v20 = vpack.c.bf16 %v9995_v43, %v17504_v17  ;;  %v5008_v59 = vmul.f32 %v14275_v39, %v4750_v32  ;;  %v7202_v9 = vmax.f32 %v15600_v11, %v11871_v40  ;;  %v17505_v30 = vunpack.i.l.bf16 %v15237_v24  ;;  %v15728_v43 = vpop.trf.xlu0 }
 0x4f7   :  { %10179 = vxpose.xlu0.b32.start [1/16] %v10178_v56, 128  ;;  %v11188_v25 = vpack.i.bf16 %v7456_v42, %v7455_v15  ;;  %v7265_v47 = vmin.f32 %v15591_v37, %v7201_v49  ;;  %v10896_v33 = vunpack.i.h.bf16 %v10892_v60  ;;  %v9265_v0 = vround.rtne.f32 %v5009_v51  ;;  %v11873_v49 = vld [vmem:[#allocation4 + $0x648] sm:$0xff] }
 0x4f8   :  { %6894 = vst [vmem:[%s17336_s4 + $0x110] sm:$0xff] %v8459_v20  ;;  %v8427_v31 = vpack.c.bf16 %v9992_v52, %v17505_v30  ;;  %v9264_v3 = vround.rtne.f32 %v5008_v59  ;;  %v7266_v56 = vmin.f32 %v15591_v37, %v7202_v9  ;;  %v10893_v42 = vunpack.i.l.bf16 %v10892_v60 }
 0x4f9   :  { %11189 = vxpose.xlu1.b32.cont [2/16] %v11188_v25, 128  ;;  %v7331_v15 = vmul.f32 %v15667_v8, %v7265_v47  ;;  %v17506_v24 = vunpack.i.h.bf16 %v15265_v62  ;;  %v4498_v17 = vmax.f32 %v13808_v34, %v11872_v50  ;;  %v5521_v52 = vmul.f32 %v9265_v0, %v13782_v28 }
 0x4fa   :  { %6862 = vst [vmem:[%s17336_s4 + $0x10] sm:$0xff] %v8427_v31  ;;  %v5520_v20 = vmul.f32 %v9264_v3, %v13782_v28  ;;  %v7332_v4 = vmul.f32 %v15667_v8, %v7266_v56  ;;  %v4499_v25 = vmax.f32 %v13808_v34, %v11873_v49  ;;  %v17507_v51 = vunpack.i.l.bf16 %v15265_v62 }
 0x4fb   :  { %v8525_v32 = vpack.c.bf16 %v10896_v33, %v17506_v24  ;;  %v9334_v59 = vround.rtne.f32 %v7331_v15  ;;  %v4754_v60 = vmin.f32 %v13789_v57, %v4498_v17  ;;  %v10000_v9 = vunpack.i.h.bf16 %v15703_v13  ;;  %v10897_v33 = vpop.trf.xlu1  ;;  %v15763_v17 = vpop.trf.xlu0 }
 0x4fc   :  { %v8493_v40 = vpack.c.bf16 %v10893_v42, %v17507_v51  ;;  %v10180_v30 = vpack.i.bf16 %v5521_v52, %v5520_v20  ;;  %v9335_v31 = vround.rtne.f32 %v7332_v4  ;;  %v4755_v47 = vmin.f32 %v13789_v57, %v4499_v25  ;;  %v11875_v52 = vld [vmem:[%s17334_s2 + $0x68] sm:$0xff] }
 0x4fd   :  { %6960 = vst [vmem:[%s17336_s4 + $0x320] sm:$0xff] %v8525_v32  ;;  %v7459_v3 = vmul.f32 %v9334_v59, %v15228_v21  ;;  %v5012_v62 = vmul.f32 %v14275_v39, %v4754_v60  ;;  %v17508_v0 = vunpack.i.h.bf16 %v15259_v27  ;;  %v9997_v24 = vunpack.i.l.bf16 %v15703_v13  ;;  %v11874_v32 = vld [vmem:[%s17334_s2 + $0x60] sm:$0xff] }
 0x4fe   :  { %6928 = vst [vmem:[%s17336_s4 + $0x220] sm:$0xff] %v8493_v40  ;;  %10181 = vxpose.xlu0.b32.cont [2/16] %v10180_v30, 128  ;;  %v7460_v15 = vmul.f32 %v9335_v31, %v15228_v21  ;;  %v5013_v42 = vmul.f32 %v14275_v39, %v4755_v47  ;;  %v7205_v50 = vmax.f32 %v15600_v11, %v11874_v32  ;;  %v10901_v13 = vunpack.i.h.bf16 %v10897_v33 }
 0x4ff   :  { %v8461_v56 = vpack.c.bf16 %v10000_v9, %v17508_v0  ;;  %v9268_v20 = vround.rtne.f32 %v5012_v62  ;;  %v7206_v4 = vmax.f32 %v15600_v11, %v11875_v52  ;;  %v17509_v59 = vunpack.i.l.bf16 %v15259_v27  ;;  %v11876_v62 = vld [vmem:[#allocation4 + $0x660] sm:$0xff] }
 0x500   :  { %v11190_v49 = vpack.i.bf16 %v7460_v15, %v7459_v3  ;;  %v9269_v25 = vround.rtne.f32 %v5013_v42  ;;  %v7269_v40 = vmin.f32 %v15591_v37, %v7205_v50  ;;  %v10898_v30 = vunpack.i.l.bf16 %v10897_v33  ;;  %v11877_v42 = vld [vmem:[#allocation4 + $0x668] sm:$0xff] }
 0x501   :  { %6896 = vst [vmem:[%s17336_s4 + $0x120] sm:$0xff] %v8461_v56  ;;  %v8429_v51 = vpack.c.bf16 %v9997_v24, %v17509_v59  ;;  %v5524_v60 = vmul.f32 %v9268_v20, %v13782_v28  ;;  %v7270_v9 = vmin.f32 %v15591_v37, %v7206_v4  ;;  %v17510_v3 = vunpack.i.h.bf16 %v15288_v38  ;;  %v10902_v4 = vpop.trf.xlu1 }
 0x502   :  { %11191 = vxpose.xlu1.b32.cont [3/16] %v11190_v49, 128  ;;  %v5525_v31 = vmul.f32 %v9269_v25, %v13782_v28  ;;  %v7335_v47 = vmul.f32 %v15667_v8, %v7269_v40  ;;  %v4502_v0 = vmax.f32 %v13808_v34, %v11876_v62  ;;  %v17511_v15 = vunpack.i.l.bf16 %v15288_v38 }
 0x503   :  { %6864 = vst [vmem:[%s17336_s4 + $0x20] sm:$0xff] %v8429_v51  ;;  %v8527_v27 = vpack.c.bf16 %v10901_v13, %v17510_v3  ;;  %v7336_v56 = vmul.f32 %v15667_v8, %v7270_v9  ;;  %v4503_v24 = vmax.f32 %v13808_v34, %v11877_v42  ;;  %v10005_v32 = vunpack.i.h.bf16 %v15728_v43  ;;  %v15794_v13 = vpop.trf.xlu0  ;;  %v11878_v9 = vld [vmem:[%s17334_s2 + $0x80] sm:$0xff]  ;;  %v11879_v3 = vld [vmem:[%s17334_s2 + $0x88] sm:$0xff] }
 0x504   :  { %v8495_v33 = vpack.c.bf16 %v10898_v30, %v17511_v15  ;;  %v10182_v50 = vpack.i.bf16 %v5525_v31, %v5524_v60  ;;  %v9338_v20 = vround.rtne.f32 %v7335_v47  ;;  %v4758_v52 = vmin.f32 %v13789_v57, %v4502_v0 }
 0x505   :  { %6962 = vst [vmem:[%s17336_s4 + $0x330] sm:$0xff] %v8527_v27  ;;  %v9339_v49 = vround.rtne.f32 %v7336_v56  ;;  %v4759_v38 = vmin.f32 %v13789_v57, %v4503_v24  ;;  %v17512_v25 = vunpack.i.h.bf16 %v15285_v61  ;;  %v10002_v60 = vunpack.i.l.bf16 %v15728_v43 }
 0x506   :  { %6930 = vst [vmem:[%s17336_s4 + $0x230] sm:$0xff] %v8495_v33  ;;  %10183 = vxpose.xlu0.b32.cont [3/16] %v10182_v50, 128  ;;  %v7463_v51 = vmul.f32 %v9338_v20, %v15228_v21  ;;  %v5016_v40 = vmul.f32 %v14275_v39, %v4758_v52  ;;  %v7209_v30 = vmax.f32 %v15600_v11, %v11878_v9  ;;  %v10906_v27 = vunpack.i.h.bf16 %v10902_v4 }
 0x507   :  { %v8463_v59 = vpack.c.bf16 %v10005_v32, %v17512_v25  ;;  %v7464_v31 = vmul.f32 %v9339_v49, %v15228_v21  ;;  %v5017_v47 = vmul.f32 %v14275_v39, %v4759_v38  ;;  %v7210_v43 = vmax.f32 %v15600_v11, %v11879_v3 }
 0x508   :  { %v9272_v62 = vround.rtne.f32 %v5016_v40  ;;  %v17513_v0 = vunpack.i.l.bf16 %v15285_v61  ;;  %v7273_v15 = vmin.f32 %v15591_v37, %v7209_v30  ;;  %v10903_v20 = vunpack.i.l.bf16 %v10902_v4  ;;  %v15829_v61 = vpop.trf.xlu0  ;;  %v11881_v40 = vld [vmem:[#allocation4 + $0x688] sm:$0xff] }
 0x509   :  { %6898 = vst [vmem:[%s17336_s4 + $0x130] sm:$0xff] %v8463_v59  ;;  %v11192_v33 = vpack.i.bf16 %v7464_v31, %v7463_v51  ;;  %v9273_v42 = vround.rtne.f32 %v5017_v47  ;;  %v7274_v24 = vmin.f32 %v15591_v37, %v7210_v43  ;;  %v17514_v52 = vunpack.i.h.bf16 %v15313_v10  ;;  %v11880_v59 = vld [vmem:[#allocation4 + $0x680] sm:$0xff] }
 0x50a   :  { %v8431_v56 = vpack.c.bf16 %v10002_v60, %v17513_v0  ;;  %v5528_v32 = vmul.f32 %v9272_v62, %v13782_v28  ;;  %v7339_v50 = vmul.f32 %v15667_v8, %v7273_v15  ;;  %v4506_v51 = vmax.f32 %v13808_v34, %v11880_v59  ;;  %v10907_v62 = vpop.trf.xlu1 }
 0x50b   :  { %v8529_v49 = vpack.c.bf16 %v10906_v27, %v17514_v52  ;;  %11193 = vxpose.xlu1.b32.cont [4/16] %v11192_v33, 128  ;;  %v5529_v38 = vmul.f32 %v9273_v42, %v13782_v28  ;;  %v7340_v25 = vmul.f32 %v15667_v8, %v7274_v24  ;;  %v4507_v60 = vmax.f32 %v13808_v34, %v11881_v40  ;;  %v11883_v52 = vld [vmem:[%s17334_s2 + $0xa8] sm:$0xff] }
 0x50c   :  { %6866 = vst [vmem:[%s17336_s4 + $0x30] sm:$0xff] %v8431_v56  ;;  %v9342_v9 = vround.rtne.f32 %v7339_v50  ;;  %v17515_v30 = vunpack.i.l.bf16 %v15313_v10  ;;  %v10010_v31 = vunpack.i.h.bf16 %v15763_v17  ;;  %v4762_v43 = vmin.f32 %v13789_v57, %v4506_v51 }
 0x50d   :  { %6964 = vst [vmem:[%s17336_s4 + $0x340] sm:$0xff] %v8529_v49  ;;  %v10184_v47 = vpack.i.bf16 %v5529_v38, %v5528_v32  ;;  %v9343_v3 = vround.rtne.f32 %v7340_v25  ;;  %v4763_v27 = vmin.f32 %v13789_v57, %v4507_v60  ;;  %v17516_v10 = vunpack.i.h.bf16 %v15307_v19  ;;  %v11882_v32 = vld [vmem:[%s17334_s2 + $0xa0] sm:$0xff]  ;;  %v15866_v25 = vpop.trf.xlu0 }
 0x50e   :  { %v8497_v4 = vpack.c.bf16 %v10903_v20, %v17515_v30  ;;  %v7467_v0 = vmul.f32 %v9342_v9, %v15228_v21  ;;  %v10007_v15 = vunpack.i.l.bf16 %v15763_v17  ;;  %v5020_v42 = vmul.f32 %v14275_v39, %v4762_v43  ;;  %v11884_v43 = vld [vmem:[#allocation4 + $0x6a0] sm:$0xff] }
 0x50f   :  { %v8465_v56 = vpack.c.bf16 %v10010_v31, %v17516_v10  ;;  %10185 = vxpose.xlu0.b32.cont [4/16] %v10184_v47, 128  ;;  %v7468_v33 = vmul.f32 %v9343_v3, %v15228_v21  ;;  %v5021_v24 = vmul.f32 %v14275_v39, %v4763_v27  ;;  %v7213_v50 = vmax.f32 %v15600_v11, %v11882_v32 }
 0x510   :  { %6932 = vst [vmem:[%s17336_s4 + $0x240] sm:$0xff] %v8497_v4  ;;  %v17517_v20 = vunpack.i.l.bf16 %v15307_v19  ;;  %v7214_v49 = vmax.f32 %v15600_v11, %v11883_v52  ;;  %v10911_v38 = vunpack.i.h.bf16 %v10907_v62  ;;  %v9276_v51 = vround.rtne.f32 %v5020_v42 }
 0x511   :  { %6900 = vst [vmem:[%s17336_s4 + $0x140] sm:$0xff] %v8465_v56  ;;  %v11194_v59 = vpack.i.bf16 %v7468_v33, %v7467_v0  ;;  %v9277_v40 = vround.rtne.f32 %v5021_v24  ;;  %v7277_v60 = vmin.f32 %v15591_v37, %v7213_v50  ;;  %v10908_v9 = vunpack.i.l.bf16 %v10907_v62  ;;  %v11885_v62 = vld [vmem:[#allocation4 + $0x6a8] sm:$0xff]  ;;  %v10912_v50 = vpop.trf.xlu1 }
 0x512   :  { %v8433_v17 = vpack.c.bf16 %v10007_v15, %v17517_v20  ;;  %v7278_v19 = vmin.f32 %v15591_v37, %v7214_v49  ;;  %v17518_v30 = vunpack.i.h.bf16 %v15336_v18  ;;  %v5532_v31 = vmul.f32 %v9276_v51, %v13782_v28  ;;  %v15894_v49 = vpop.trf.xlu0 }
 0x513   :  { %11195 = vxpose.xlu1.b32.cont [5/16] %v11194_v59, 128  ;;  %v5533_v47 = vmul.f32 %v9277_v40, %v13782_v28  ;;  %v7343_v3 = vmul.f32 %v15667_v8, %v7277_v60  ;;  %v4510_v27 = vmax.f32 %v13808_v34, %v11884_v43  ;;  %v17519_v10 = vunpack.i.l.bf16 %v15336_v18  ;;  %v11886_v40 = vld [vmem:[%s17334_s2 + $0xc0] sm:$0xff] }
 0x514   :  { %6868 = vst [vmem:[%s17336_s4 + $0x40] sm:$0xff] %v8433_v17  ;;  %v8531_v4 = vpack.c.bf16 %v10911_v38, %v17518_v30  ;;  %v7344_v0 = vmul.f32 %v15667_v8, %v7278_v19  ;;  %v4511_v15 = vmax.f32 %v13808_v34, %v11885_v62  ;;  %v10015_v33 = vunpack.i.h.bf16 %v15794_v13  ;;  %v11887_v30 = vld [vmem:[%s17334_s2 + $0xc8] sm:$0xff] }
 0x515   :  { %v8499_v56 = vpack.c.bf16 %v10908_v9, %v17519_v10  ;;  %v10186_v42 = vpack.i.bf16 %v5533_v47, %v5532_v31  ;;  %v9346_v24 = vround.rtne.f32 %v7343_v3  ;;  %v4766_v32 = vmin.f32 %v13789_v57, %v4510_v27 }
 0x516   :  { %6966 = vst [vmem:[%s17336_s4 + $0x350] sm:$0xff] %v8531_v4  ;;  %v9347_v20 = vround.rtne.f32 %v7344_v0  ;;  %v4767_v18 = vmin.f32 %v13789_v57, %v4511_v15  ;;  %v17520_v17 = vunpack.i.h.bf16 %v15333_v12  ;;  %v10012_v51 = vunpack.i.l.bf16 %v15794_v13 }
 0x517   :  { %6934 = vst [vmem:[%s17336_s4 + $0x250] sm:$0xff] %v8499_v56  ;;  %10187 = vxpose.xlu0.b32.cont [5/16] %v10186_v42, 128  ;;  %v7471_v38 = vmul.f32 %v9346_v24, %v15228_v21  ;;  %v5024_v59 = vmul.f32 %v14275_v39, %v4766_v32  ;;  %v7217_v60 = vmax.f32 %v15600_v11, %v11886_v40  ;;  %v10916_v4 = vunpack.i.h.bf16 %v10912_v50  ;;  %v11888_v32 = vld [vmem:[#allocation4 + $0x6c0] sm:$0xff] }
 0x518   :  { %v8467_v52 = vpack.c.bf16 %v10015_v33, %v17520_v17  ;;  %v7472_v19 = vmul.f32 %v9347_v20, %v15228_v21  ;;  %v5025_v9 = vmul.f32 %v14275_v39, %v4767_v18  ;;  %v7218_v13 = vmax.f32 %v15600_v11, %v11887_v30  ;;  %v11889_v18 = vld [vmem:[#allocation4 + $0x6c8] sm:$0xff]  ;;  %v10917_v30 = vpop.trf.xlu1 }
 0x519   :  { %v9280_v31 = vround.rtne.f32 %v5024_v59  ;;  %v17521_v47 = vunpack.i.l.bf16 %v15333_v12  ;;  %v7281_v43 = vmin.f32 %v15591_v37, %v7217_v60  ;;  %v10913_v15 = vunpack.i.l.bf16 %v10912_v50 }
 0x51a   :  { %6902 = vst [vmem:[%s17336_s4 + $0x150] sm:$0xff] %v8467_v52  ;;  %v11196_v27 = vpack.i.bf16 %v7472_v19, %v7471_v38  ;;  %v9281_v0 = vround.rtne.f32 %v5025_v9  ;;  %v7282_v10 = vmin.f32 %v15591_v37, %v7218_v13  ;;  %v17522_v33 = vunpack.i.h.bf16 %v15361_v41  ;;  %v15927_v52 = vpop.trf.xlu0 }
 0x51b   :  { %v8435_v3 = vpack.c.bf16 %v10012_v51, %v17521_v47  ;;  %v5536_v56 = vmul.f32 %v9280_v31, %v13782_v28  ;;  %v7347_v62 = vmul.f32 %v15667_v8, %v7281_v43  ;;  %v4514_v20 = vmax.f32 %v13808_v34, %v11888_v32 }
 0x51c   :  { %v8533_v42 = vpack.c.bf16 %v10916_v4, %v17522_v33  ;;  %11197 = vxpose.xlu1.b32.cont [6/16] %v11196_v27, 128  ;;  %v5537_v12 = vmul.f32 %v9281_v0, %v13782_v28  ;;  %v7348_v24 = vmul.f32 %v15667_v8, %v7282_v10  ;;  %v4515_v17 = vmax.f32 %v13808_v34, %v11889_v18  ;;  %v11890_v27 = vld [vmem:[%s17334_s2 + $0xe0] sm:$0xff] }
 0x51d   :  { %6870 = vst [vmem:[%s17336_s4 + $0x50] sm:$0xff] %v8435_v3  ;;  %v9350_v38 = vround.rtne.f32 %v7347_v62  ;;  %v17523_v59 = vunpack.i.l.bf16 %v15361_v41  ;;  %v10020_v51 = vunpack.i.h.bf16 %v15829_v61  ;;  %v4770_v19 = vmin.f32 %v13789_v57, %v4514_v20 }
 0x51e   :  { %6968 = vst [vmem:[%s17336_s4 + $0x360] sm:$0xff] %v8533_v42  ;;  %v10188_v40 = vpack.i.bf16 %v5537_v12, %v5536_v56  ;;  %v9351_v60 = vround.rtne.f32 %v7348_v24  ;;  %v4771_v9 = vmin.f32 %v13789_v57, %v4515_v17  ;;  %v17524_v41 = vunpack.i.h.bf16 %v15355_v1  ;;  %v11891_v56 = vld [vmem:[%s17334_s2 + $0xe8] sm:$0xff]  ;;  %v15961_v32 = vpop.trf.xlu0 }
 0x51f   :  { %v8501_v50 = vpack.c.bf16 %v10913_v15, %v17523_v59  ;;  %v7475_v13 = vmul.f32 %v9350_v38, %v15228_v21  ;;  %v10017_v31 = vunpack.i.l.bf16 %v15829_v61  ;;  %v5028_v3 = vmul.f32 %v14275_v39, %v4770_v19 }
 0x520   :  { %v8469_v4 = vpack.c.bf16 %v10020_v51, %v17524_v41  ;;  %10189 = vxpose.xlu0.b32.cont [6/16] %v10188_v40, 128  ;;  %v7476_v47 = vmul.f32 %v9351_v60, %v15228_v21  ;;  %v5029_v43 = vmul.f32 %v14275_v39, %v4771_v9  ;;  %v7221_v0 = vmax.f32 %v15600_v11, %v11890_v27  ;;  %v11892_v51 = vld [vmem:[#allocation4 + $0x6e0] sm:$0xff] }
 0x521   :  { %6936 = vst [vmem:[%s17336_s4 + $0x260] sm:$0xff] %v8501_v50  ;;  %v17525_v10 = vunpack.i.l.bf16 %v15355_v1  ;;  %v7222_v62 = vmax.f32 %v15600_v11, %v11891_v56  ;;  %v10921_v15 = vunpack.i.h.bf16 %v10917_v30  ;;  %v9284_v42 = vround.rtne.f32 %v5028_v3  ;;  %v10922_v3 = vpop.trf.xlu1 }
 0x522   :  { %6904 = vst [vmem:[%s17336_s4 + $0x160] sm:$0xff] %v8469_v4  ;;  %v11198_v33 = vpack.i.bf16 %v7476_v47, %v7475_v13  ;;  %v9285_v12 = vround.rtne.f32 %v5029_v43  ;;  %v7285_v24 = vmin.f32 %v15591_v37, %v7221_v0  ;;  %v10918_v20 = vunpack.i.l.bf16 %v10917_v30  ;;  %v11893_v30 = vld [vmem:[#allocation4 + $0x6e8] sm:$0xff] }
 0x523   :  { %v8437_v61 = vpack.c.bf16 %v10017_v31, %v17525_v10  ;;  %v7286_v1 = vmin.f32 %v15591_v37, %v7222_v62  ;;  %v17526_v18 = vunpack.i.h.bf16 %v15384_v48  ;;  %v5540_v38 = vmul.f32 %v9284_v42, %v13782_v28  ;;  %v11894_v62 = vld [vmem:[%s17334_s2 + $0x100] sm:$0xff] }
 0x524   :  { %11199 = vxpose.xlu1.b32.cont [7/16] %v11198_v33, 128  ;;  %v5541_v59 = vmul.f32 %v9285_v12, %v13782_v28  ;;  %v7351_v50 = vmul.f32 %v15667_v8, %v7285_v24  ;;  %v4518_v40 = vmax.f32 %v13808_v34, %v11892_v51  ;;  %v17527_v19 = vunpack.i.l.bf16 %v15384_v48  ;;  %v15995_v33 = vpop.trf.xlu0 }
 0x525   :  { %6872 = vst [vmem:[%s17336_s4 + $0x60] sm:$0xff] %v8437_v61  ;;  %v8535_v17 = vpack.c.bf16 %v10921_v15, %v17526_v18  ;;  %v7352_v60 = vmul.f32 %v15667_v8, %v7286_v1  ;;  %v4519_v13 = vmax.f32 %v13808_v34, %v11893_v30  ;;  %v10025_v41 = vunpack.i.h.bf16 %v15866_v25 }
 0x526   :  { %v8503_v9 = vpack.c.bf16 %v10918_v20, %v17527_v19  ;;  %v10190_v4 = vpack.i.bf16 %v5541_v59, %v5540_v38  ;;  %v9354_v31 = vround.rtne.f32 %v7351_v50  ;;  %v4774_v47 = vmin.f32 %v13789_v57, %v4518_v40 }
 0x527   :  { %6970 = vst [vmem:[%s17336_s4 + $0x370] sm:$0xff] %v8535_v17  ;;  %v9355_v43 = vround.rtne.f32 %v7352_v60  ;;  %v4775_v48 = vmin.f32 %v13789_v57, %v4519_v13  ;;  %v17528_v27 = vunpack.i.h.bf16 %v15381_v58  ;;  %v10022_v56 = vunpack.i.l.bf16 %v15866_v25  ;;  %v11895_v25 = vld [vmem:[%s17334_s2 + $0x108] sm:$0xff] }
 0x528   :  { %6938 = vst [vmem:[%s17336_s4 + $0x270] sm:$0xff] %v8503_v9  ;;  %10191 = vxpose.xlu0.b32.cont [7/16] %v10190_v4, 128  ;;  %v7479_v10 = vmul.f32 %v9354_v31, %v15228_v21  ;;  %v5032_v61 = vmul.f32 %v14275_v39, %v4774_v47  ;;  %v7225_v15 = vmax.f32 %v15600_v11, %v11894_v62  ;;  %v10926_v1 = vunpack.i.h.bf16 %v10922_v3  ;;  %v11897_v31 = vld [vmem:[#allocation4 + $0x708] sm:$0xff] }
 0x529   :  { %v8471_v0 = vpack.c.bf16 %v10025_v41, %v17528_v27  ;;  %v7480_v42 = vmul.f32 %v9355_v43, %v15228_v21  ;;  %v5033_v12 = vmul.f32 %v14275_v39, %v4775_v48  ;;  %v7226_v24 = vmax.f32 %v15600_v11, %v11895_v25  ;;  %v11896_v41 = vld [vmem:[#allocation4 + $0x700] sm:$0xff] }
 0x52a   :  { %v9288_v20 = vround.rtne.f32 %v5032_v61  ;;  %v17529_v18 = vunpack.i.l.bf16 %v15381_v58  ;;  %v7289_v38 = vmin.f32 %v15591_v37, %v7225_v15  ;;  %v10923_v19 = vunpack.i.l.bf16 %v10922_v3  ;;  %v10927_v15 = vpop.trf.xlu1 }
 0x52b   :  { %6906 = vst [vmem:[%s17336_s4 + $0x170] sm:$0xff] %v8471_v0  ;;  %v11200_v59 = vpack.i.bf16 %v7480_v42, %v7479_v10  ;;  %v9289_v50 = vround.rtne.f32 %v5033_v12  ;;  %v7290_v51 = vmin.f32 %v15591_v37, %v7226_v24  ;;  %v17530_v9 = vunpack.i.h.bf16 %v15409_v35  ;;  %v16027_v0 = vpop.trf.xlu0 }
 0x52c   :  { %v8439_v17 = vpack.c.bf16 %v10022_v56, %v17529_v18  ;;  %v5544_v40 = vmul.f32 %v9288_v20, %v13782_v28  ;;  %v7355_v60 = vmul.f32 %v15667_v8, %v7289_v38  ;;  %v4522_v4 = vmax.f32 %v13808_v34, %v11896_v41  ;;  %v11898_v18 = vld [vmem:[%s17334_s2 + $0x120] sm:$0xff] }
 0x52d   :  { %v8537_v30 = vpack.c.bf16 %v10926_v1, %v17530_v9  ;;  %11201 = vxpose.xlu1.b32.cont [8/16] %v11200_v59, 128  ;;  %v5545_v58 = vmul.f32 %v9289_v50, %v13782_v28  ;;  %v7356_v13 = vmul.f32 %v15667_v8, %v7290_v51  ;;  %v4523_v47 = vmax.f32 %v13808_v34, %v11897_v31  ;;  %v11899_v59 = vld [vmem:[%s17334_s2 + $0x128] sm:$0xff] }
 0x52e   :  { %6874 = vst [vmem:[%s17336_s4 + $0x70] sm:$0xff] %v8439_v17  ;;  %v9358_v43 = vround.rtne.f32 %v7355_v60  ;;  %v17531_v48 = vunpack.i.l.bf16 %v15409_v35  ;;  %v10030_v3 = vunpack.i.h.bf16 %v15894_v49  ;;  %v4778_v56 = vmin.f32 %v13789_v57, %v4522_v4 }
 0x52f   :  { %6972 = vst [vmem:[%s17336_s4 + $0x380] sm:$0xff] %v8537_v30  ;;  %v10192_v10 = vpack.i.bf16 %v5545_v58, %v5544_v40  ;;  %v9359_v61 = vround.rtne.f32 %v7356_v13  ;;  %v4779_v62 = vmin.f32 %v13789_v57, %v4523_v47  ;;  %v17532_v35 = vunpack.i.h.bf16 %v15403_v46  ;;  %v16061_v41 = vpop.trf.xlu0 }
 0x530   :  { %v8505_v27 = vpack.c.bf16 %v10923_v19, %v17531_v48  ;;  %v7483_v42 = vmul.f32 %v9358_v43, %v15228_v21  ;;  %v10027_v25 = vunpack.i.l.bf16 %v15894_v49  ;;  %v5036_v1 = vmul.f32 %v14275_v39, %v4778_v56  ;;  %v11900_v43 = vld [vmem:[#allocation4 + $0x720] sm:$0xff] }
 0x531   :  { %v8473_v12 = vpack.c.bf16 %v10030_v3, %v17532_v35  ;;  %10193 = vxpose.xlu0.b32.cont [8/16] %v10192_v10, 128  ;;  %v7484_v24 = vmul.f32 %v9359_v61, %v15228_v21  ;;  %v5037_v20 = vmul.f32 %v14275_v39, %v4779_v62  ;;  %v7229_v17 = vmax.f32 %v15600_v11, %v11898_v18  ;;  %v11901_v61 = vld [vmem:[#allocation4 + $0x728] sm:$0xff] }
 0x532   :  { %6940 = vst [vmem:[%s17336_s4 + $0x280] sm:$0xff] %v8505_v27  ;;  %v17533_v38 = vunpack.i.l.bf16 %v15403_v46  ;;  %v7230_v50 = vmax.f32 %v15600_v11, %v11899_v59  ;;  %v10931_v51 = vunpack.i.h.bf16 %v10927_v15  ;;  %v9292_v60 = vround.rtne.f32 %v5036_v1 }
 0x533   :  { %6908 = vst [vmem:[%s17336_s4 + $0x180] sm:$0xff] %v8473_v12  ;;  %v11202_v40 = vpack.i.bf16 %v7484_v24, %v7483_v42  ;;  %v9293_v19 = vround.rtne.f32 %v5037_v20  ;;  %v7293_v9 = vmin.f32 %v15591_v37, %v7229_v17  ;;  %v10928_v46 = vunpack.i.l.bf16 %v10927_v15  ;;  %v10932_v12 = vpop.trf.xlu1 }
 0x534   :  { %v8441_v49 = vpack.c.bf16 %v10027_v25, %v17533_v38  ;;  %v7294_v30 = vmin.f32 %v15591_v37, %v7230_v50  ;;  %v17534_v58 = vunpack.i.h.bf16 %v15432_v26  ;;  %v5548_v4 = vmul.f32 %v9292_v60, %v13782_v28  ;;  %v11902_v38 = vld [vmem:[%s17334_s2 + $0x140] sm:$0xff]  ;;  %v16098_v60 = vpop.trf.xlu0 }
 0x535   :  { %11203 = vxpose.xlu1.b32.cont [9/16] %v11202_v40, 128  ;;  %v5549_v31 = vmul.f32 %v9293_v19, %v13782_v28  ;;  %v7359_v47 = vmul.f32 %v15667_v8, %v7293_v9  ;;  %v4526_v48 = vmax.f32 %v13808_v34, %v11900_v43  ;;  %v17535_v3 = vunpack.i.l.bf16 %v15432_v26 }
 0x536   :  { %6876 = vst [vmem:[%s17336_s4 + $0x80] sm:$0xff] %v8441_v49  ;;  %v8539_v13 = vpack.c.bf16 %v10931_v51, %v17534_v58  ;;  %v7360_v27 = vmul.f32 %v15667_v8, %v7294_v30  ;;  %v4527_v56 = vmax.f32 %v13808_v34, %v11901_v61  ;;  %v10035_v62 = vunpack.i.h.bf16 %v15927_v52  ;;  %v11903_v51 = vld [vmem:[%s17334_s2 + $0x148] sm:$0xff] }
 0x537   :  { %v8507_v10 = vpack.c.bf16 %v10928_v46, %v17535_v3  ;;  %v10194_v15 = vpack.i.bf16 %v5549_v31, %v5548_v4  ;;  %v9362_v42 = vround.rtne.f32 %v7359_v47  ;;  %v4782_v35 = vmin.f32 %v13789_v57, %v4526_v48 }
 0x538   :  { %6974 = vst [vmem:[%s17336_s4 + $0x390] sm:$0xff] %v8539_v13  ;;  %v9363_v25 = vround.rtne.f32 %v7360_v27  ;;  %v4783_v26 = vmin.f32 %v13789_v57, %v4527_v56  ;;  %v17536_v24 = vunpack.i.h.bf16 %v15429_v63  ;;  %v10032_v17 = vunpack.i.l.bf16 %v15927_v52  ;;  %v11905_v56 = vld [vmem:[#allocation4 + $0x748] sm:$0xff] }
 0x539   :  { %6942 = vst [vmem:[%s17336_s4 + $0x290] sm:$0xff] %v8507_v10  ;;  %10195 = vxpose.xlu0.b32.cont [9/16] %v10194_v15, 128  ;;  %v7487_v20 = vmul.f32 %v9362_v42, %v15228_v21  ;;  %v5040_v18 = vmul.f32 %v14275_v39, %v4782_v35  ;;  %v7233_v49 = vmax.f32 %v15600_v11, %v11902_v38  ;;  %v10936_v40 = vunpack.i.h.bf16 %v10932_v12  ;;  %v11904_v10 = vld [vmem:[#allocation4 + $0x740] sm:$0xff] }
 0x53a   :  { %v8475_v1 = vpack.c.bf16 %v10035_v62, %v17536_v24  ;;  %v7488_v59 = vmul.f32 %v9363_v25, %v15228_v21  ;;  %v5041_v50 = vmul.f32 %v14275_v39, %v4783_v26  ;;  %v7234_v52 = vmax.f32 %v15600_v11, %v11903_v51 }
 0x53b   :  { %v9296_v19 = vround.rtne.f32 %v5040_v18  ;;  %v17537_v9 = vunpack.i.l.bf16 %v15429_v63  ;;  %v7297_v46 = vmin.f32 %v15591_v37, %v7233_v49  ;;  %v10933_v43 = vunpack.i.l.bf16 %v10932_v12  ;;  %v16123_v18 = vpop.trf.xlu0 }
 0x53c   :  { %6910 = vst [vmem:[%s17336_s4 + $0x190] sm:$0xff] %v8475_v1  ;;  %v11204_v58 = vpack.i.bf16 %v7488_v59, %v7487_v20  ;;  %v9297_v13 = vround.rtne.f32 %v5041_v50  ;;  %v7298_v4 = vmin.f32 %v15591_v37, %v7234_v52  ;;  %v17538_v48 = vunpack.i.h.bf16 %v15457_v5  ;;  %v10937_v20 = vpop.trf.xlu1  ;;  %v11906_v52 = vld [vmem:[%s17334_s2 + $0x160] sm:$0xff] }
 0x53d   :  { %v8443_v30 = vpack.c.bf16 %v10032_v17, %v17537_v9  ;;  %v5552_v31 = vmul.f32 %v9296_v19, %v13782_v28  ;;  %v7363_v47 = vmul.f32 %v15667_v8, %v7297_v46  ;;  %v4530_v61 = vmax.f32 %v13808_v34, %v11904_v10  ;;  %v11907_v9 = vld [vmem:[%s17334_s2 + $0x168] sm:$0xff]  ;;  %v11908_v10 = vld [vmem:[#allocation4 + $0x760] sm:$0xff] }
 0x53e   :  { %v8541_v27 = vpack.c.bf16 %v10936_v40, %v17538_v48  ;;  %11205 = vxpose.xlu1.b32.cont [10/16] %v11204_v58, 128  ;;  %v5553_v63 = vmul.f32 %v9297_v13, %v13782_v28  ;;  %v7364_v3 = vmul.f32 %v15667_v8, %v7298_v4  ;;  %v4531_v62 = vmax.f32 %v13808_v34, %v11905_v56 }
 0x53f   :  { %6878 = vst [vmem:[%s17336_s4 + $0x90] sm:$0xff] %v8443_v30  ;;  %v9366_v15 = vround.rtne.f32 %v7363_v47  ;;  %v17539_v42 = vunpack.i.l.bf16 %v15457_v5  ;;  %v10040_v12 = vunpack.i.h.bf16 %v15961_v32  ;;  %v4786_v24 = vmin.f32 %v13789_v57, %v4530_v61  ;;  %v16159_v56 = vpop.trf.xlu0 }
 0x540   :  { %6976 = vst [vmem:[%s17336_s4 + $0x3a0] sm:$0xff] %v8541_v27  ;;  %v10196_v25 = vpack.i.bf16 %v5553_v63, %v5552_v31  ;;  %v9367_v26 = vround.rtne.f32 %v7364_v3  ;;  %v4787_v1 = vmin.f32 %v13789_v57, %v4531_v62  ;;  %v17540_v5 = vunpack.i.h.bf16 %v15451_v16 }
 0x541   :  { %v8509_v35 = vpack.c.bf16 %v10933_v43, %v17539_v42  ;;  %v7491_v17 = vmul.f32 %v9366_v15, %v15228_v21  ;;  %v10037_v49 = vunpack.i.l.bf16 %v15961_v32  ;;  %v5044_v50 = vmul.f32 %v14275_v39, %v4786_v24 }
 0x542   :  { %v8477_v38 = vpack.c.bf16 %v10040_v12, %v17540_v5  ;;  %10197 = vxpose.xlu0.b32.cont [10/16] %v10196_v25, 128  ;;  %v7492_v59 = vmul.f32 %v9367_v26, %v15228_v21  ;;  %v5045_v51 = vmul.f32 %v14275_v39, %v4787_v1  ;;  %v7237_v40 = vmax.f32 %v15600_v11, %v11906_v52 }
 0x543   :  { %6944 = vst [vmem:[%s17336_s4 + $0x2a0] sm:$0xff] %v8509_v35  ;;  %v17541_v19 = vunpack.i.l.bf16 %v15451_v16  ;;  %v7238_v30 = vmax.f32 %v15600_v11, %v11907_v9  ;;  %v10941_v46 = vunpack.i.h.bf16 %v10937_v20  ;;  %v9300_v13 = vround.rtne.f32 %v5044_v50  ;;  %v11909_v35 = vld [vmem:[#allocation4 + $0x768] sm:$0xff] }
 0x544   :  { %6912 = vst [vmem:[%s17336_s4 + $0x1a0] sm:$0xff] %v8477_v38  ;;  %v11206_v58 = vpack.i.bf16 %v7492_v59, %v7491_v17  ;;  %v9301_v4 = vround.rtne.f32 %v5045_v51  ;;  %v7301_v31 = vmin.f32 %v15591_v37, %v7237_v40  ;;  %v10938_v16 = vunpack.i.l.bf16 %v10937_v20  ;;  %v10942_v20 = vpop.trf.xlu1  ;;  %v11910_v51 = vld [vmem:[%s17334_s2 + $0x180] sm:$0xff] }
 0x545   :  { %v8445_v32 = vpack.c.bf16 %v10037_v49, %v17541_v19  ;;  %v7302_v47 = vmin.f32 %v15591_v37, %v7238_v30  ;;  %v17542_v43 = vunpack.i.h.bf16 %v15480_v54  ;;  %v5556_v27 = vmul.f32 %v9300_v13, %v13782_v28 }
 0x546   :  { %11207 = vxpose.xlu1.b32.cont [11/16] %v11206_v58, 128  ;;  %v5557_v63 = vmul.f32 %v9301_v4, %v13782_v28  ;;  %v7367_v3 = vmul.f32 %v15667_v8, %v7301_v31  ;;  %v4534_v61 = vmax.f32 %v13808_v34, %v11908_v10  ;;  %v17543_v15 = vunpack.i.l.bf16 %v15480_v54  ;;  %v16195_v4 = vpop.trf.xlu0 }
 0x547   :  { %6880 = vst [vmem:[%s17336_s4 + $0xa0] sm:$0xff] %v8445_v32  ;;  %v8543_v48 = vpack.c.bf16 %v10941_v46, %v17542_v43  ;;  %v7368_v62 = vmul.f32 %v15667_v8, %v7302_v47  ;;  %v4535_v12 = vmax.f32 %v13808_v34, %v11909_v35  ;;  %v10045_v25 = vunpack.i.h.bf16 %v15995_v33  ;;  %v11911_v32 = vld [vmem:[%s17334_s2 + $0x188] sm:$0xff] }
 0x548   :  { %v8511_v42 = vpack.c.bf16 %v10938_v16, %v17543_v15  ;;  %v10198_v26 = vpack.i.bf16 %v5557_v63, %v5556_v27  ;;  %v9370_v24 = vround.rtne.f32 %v7367_v3  ;;  %v4790_v1 = vmin.f32 %v13789_v57, %v4534_v61  ;;  %v11912_v61 = vld [vmem:[#allocation4 + $0x780] sm:$0xff]  ;;  %v11913_v15 = vld [vmem:[#allocation4 + $0x788] sm:$0xff] }
 0x549   :  { %6978 = vst [vmem:[%s17336_s4 + $0x3b0] sm:$0xff] %v8543_v48  ;;  %v9371_v17 = vround.rtne.f32 %v7368_v62  ;;  %v4791_v54 = vmin.f32 %v13789_v57, %v4535_v12  ;;  %v17544_v5 = vunpack.i.h.bf16 %v15477_v22  ;;  %v10042_v50 = vunpack.i.l.bf16 %v15995_v33 }
 0x54a   :  { %6946 = vst [vmem:[%s17336_s4 + $0x2b0] sm:$0xff] %v8511_v42  ;;  %10199 = vxpose.xlu0.b32.cont [11/16] %v10198_v26, 128  ;;  %v7495_v49 = vmul.f32 %v9370_v24, %v15228_v21  ;;  %v5048_v59 = vmul.f32 %v14275_v39, %v4790_v1  ;;  %v7241_v52 = vmax.f32 %v15600_v11, %v11910_v51  ;;  %v10946_v9 = vunpack.i.h.bf16 %v10942_v20 }
 0x54b   :  { %v8479_v38 = vpack.c.bf16 %v10045_v25, %v17544_v5  ;;  %v7496_v40 = vmul.f32 %v9371_v17, %v15228_v21  ;;  %v5049_v19 = vmul.f32 %v14275_v39, %v4791_v54  ;;  %v7242_v33 = vmax.f32 %v15600_v11, %v11911_v32  ;;  %v10947_v54 = vpop.trf.xlu1 }
 0x54c   :  { %v9304_v30 = vround.rtne.f32 %v5048_v59  ;;  %v17545_v46 = vunpack.i.l.bf16 %v15477_v22  ;;  %v7305_v13 = vmin.f32 %v15591_v37, %v7241_v52  ;;  %v10943_v27 = vunpack.i.l.bf16 %v10942_v20  ;;  %v16224_v59 = vpop.trf.xlu0 }
 0x54d   :  { %6914 = vst [vmem:[%s17336_s4 + $0x1b0] sm:$0xff] %v8479_v38  ;;  %v11208_v31 = vpack.i.bf16 %v7496_v40, %v7495_v49  ;;  %v9305_v47 = vround.rtne.f32 %v5049_v19  ;;  %v7306_v16 = vmin.f32 %v15591_v37, %v7242_v33  ;;  %v17546_v22 = vunpack.i.h.bf16 %v15505_v45  ;;  %v11914_v40 = vld [vmem:[%s17334_s2 + $0x1a0] sm:$0xff]  ;;  %v11915_v33 = vld [vmem:[%s17334_s2 + $0x1a8] sm:$0xff] }
 0x54e   :  { %v8447_v58 = vpack.c.bf16 %v10042_v50, %v17545_v46  ;;  %v5560_v43 = vmul.f32 %v9304_v30, %v13782_v28  ;;  %v7371_v48 = vmul.f32 %v15667_v8, %v7305_v13  ;;  %v4538_v62 = vmax.f32 %v13808_v34, %v11912_v61 }
 0x54f   :  { %v8545_v63 = vpack.c.bf16 %v10946_v9, %v17546_v22  ;;  %11209 = vxpose.xlu1.b32.cont [12/16] %v11208_v31, 128  ;;  %v5561_v3 = vmul.f32 %v9305_v47, %v13782_v28  ;;  %v7372_v10 = vmul.f32 %v15667_v8, %v7306_v16  ;;  %v4539_v42 = vmax.f32 %v13808_v34, %v11913_v15 }
 0x550   :  { %6882 = vst [vmem:[%s17336_s4 + $0xb0] sm:$0xff] %v8447_v58  ;;  %v9374_v35 = vround.rtne.f32 %v7371_v48  ;;  %v17547_v12 = vunpack.i.l.bf16 %v15505_v45  ;;  %v10050_v26 = vunpack.i.h.bf16 %v16027_v0  ;;  %v4794_v20 = vmin.f32 %v13789_v57, %v4538_v62 }
 0x551   :  { %6980 = vst [vmem:[%s17336_s4 + $0x3c0] sm:$0xff] %v8545_v63  ;;  %v10200_v24 = vpack.i.bf16 %v5561_v3, %v5560_v43  ;;  %v9375_v1 = vround.rtne.f32 %v7372_v10  ;;  %v4795_v17 = vmin.f32 %v13789_v57, %v4539_v42  ;;  %v17548_v45 = vunpack.i.h.bf16 %v15499_v36 }
 0x552   :  { %v8513_v25 = vpack.c.bf16 %v10943_v27, %v17547_v12  ;;  %v7499_v5 = vmul.f32 %v9374_v35, %v15228_v21  ;;  %v10047_v49 = vunpack.i.l.bf16 %v16027_v0  ;;  %v5052_v51 = vmul.f32 %v14275_v39, %v4794_v20  ;;  %v16267_v12 = vpop.trf.xlu0 }
 0x553   :  { %v8481_v38 = vpack.c.bf16 %v10050_v26, %v17548_v45  ;;  %10201 = vxpose.xlu0.b32.cont [12/16] %v10200_v24, 128  ;;  %v7500_v50 = vmul.f32 %v9375_v1, %v15228_v21  ;;  %v5053_v52 = vmul.f32 %v14275_v39, %v4795_v17  ;;  %v7245_v19 = vmax.f32 %v15600_v11, %v11914_v40  ;;  %v10952_v24 = vpop.trf.xlu1 }
 0x554   :  { %6948 = vst [vmem:[%s17336_s4 + $0x2c0] sm:$0xff] %v8513_v25  ;;  %v17549_v0 = vunpack.i.l.bf16 %v15499_v36  ;;  %v7246_v9 = vmax.f32 %v15600_v11, %v11915_v33  ;;  %v10951_v30 = vunpack.i.h.bf16 %v10947_v54  ;;  %v9308_v58 = vround.rtne.f32 %v5052_v51 }
 0x555   :  { %6916 = vst [vmem:[%s17336_s4 + $0x1c0] sm:$0xff] %v8481_v38  ;;  %v11210_v46 = vpack.i.bf16 %v7500_v50, %v7499_v5  ;;  %v9309_v13 = vround.rtne.f32 %v5053_v52  ;;  %v7309_v31 = vmin.f32 %v15591_v37, %v7245_v19  ;;  %v10948_v36 = vunpack.i.l.bf16 %v10947_v54 }
 0x556   :  { %v8449_v32 = vpack.c.bf16 %v10047_v49, %v17549_v0  ;;  %v7310_v47 = vmin.f32 %v15591_v37, %v7246_v9  ;;  %v17550_v16 = vunpack.i.h.bf16 %v15528_v44  ;;  %v5564_v48 = vmul.f32 %v9308_v58, %v13782_v28 }
 0x557   :  { %11211 = vxpose.xlu1.b32.cont [13/16] %v11210_v46, 128  ;;  %v5565_v27 = vmul.f32 %v9309_v13, %v13782_v28  ;;  %v7375_v22 = vmul.f32 %v15667_v8, %v7309_v31  ;;  %v17551_v63 = vmax.f32 %v13808_v34, %v13824_v53  ;;  %v17552_v61 = vunpack.i.l.bf16 %v15528_v44 }
 0x558   :  { %6884 = vst [vmem:[%s17336_s4 + $0xc0] sm:$0xff] %v8449_v32  ;;  %v8547_v43 = vpack.c.bf16 %v10951_v30, %v17550_v16  ;;  %v7376_v10 = vmul.f32 %v15667_v8, %v7310_v47  ;;  %v17553_v15 = vmax.f32 %v13808_v34, %v13828_v29  ;;  %v10055_v35 = vunpack.i.h.bf16 %v16061_v41  ;;  %v16296_v30 = vpop.trf.xlu0 }
 0x559   :  { %v4798_v3 = vmin.f32 %v13789_v57, %v17551_v63  ;;  %v8515_v62 = vpack.c.bf16 %v10948_v36, %v17552_v61  ;;  %v10202_v53 = vpack.i.bf16 %v5565_v27, %v5564_v48  ;;  %v9378_v25 = vround.rtne.f32 %v7375_v22  ;;  %v17562_v61 = vld [vmem:[#allocation10_spill] sm:$0xff] }
 0x55a   :  { %6982 = vst [vmem:[%s17336_s4 + $0x3d0] sm:$0xff] %v8547_v43  ;;  %v4799_v42 = vmin.f32 %v13789_v57, %v17553_v15  ;;  %v9379_v44 = vround.rtne.f32 %v7376_v10  ;;  %v17554_v29 = vunpack.i.h.bf16 %v15525_v7  ;;  %v10052_v5 = vunpack.i.l.bf16 %v16061_v41 }
 0x55b   :  { %v5056_v26 = vmul.f32 %v14275_v39, %v4798_v3  ;;  %6950 = vst [vmem:[%s17336_s4 + $0x2d0] sm:$0xff] %v8515_v62  ;;  %10203 = vxpose.xlu0.b32.cont [13/16] %v10202_v53, 128  ;;  %v7503_v17 = vmul.f32 %v9378_v25, %v15228_v21  ;;  %v17555_v45 = vmax.f32 %v15600_v11, %v15619_v14  ;;  %v10956_v40 = vunpack.i.h.bf16 %v10952_v24  ;;  %v10957_v3 = vpop.trf.xlu1 }
 0x55c   :  { %v5057_v1 = vmul.f32 %v14275_v39, %v4799_v42  ;;  %v8483_v20 = vpack.c.bf16 %v10055_v35, %v17554_v29  ;;  %v7504_v49 = vmul.f32 %v9379_v44, %v15228_v21  ;;  %v17556_v51 = vmax.f32 %v15600_v11, %v15626_v6  ;;  %v17564_v35 = vld [vmem:[#allocation13_spill] sm:$0xff] }
 0x55d   :  { %v9312_v54 = vround.rtne.f32 %v5056_v26  ;;  %v7313_v38 = vmin.f32 %v15591_v37, %v17555_v45  ;;  %v17557_v19 = vunpack.i.l.bf16 %v15525_v7  ;;  %v10953_v46 = vunpack.i.l.bf16 %v10952_v24  ;;  %v17566_v26 = vld [vmem:[#allocation14_spill] sm:$0xff] }
 0x55e   :  { %v9313_v50 = vround.rtne.f32 %v5057_v1  ;;  %6918 = vst [vmem:[%s17336_s4 + $0x1d0] sm:$0xff] %v8483_v20  ;;  %v7314_v52 = vmin.f32 %v15591_v37, %v17556_v51  ;;  %v11212_v32 = vpack.i.bf16 %v7504_v49, %v7503_v17  ;;  %v17558_v58 = vunpack.i.h.bf16 %v15553_v2  ;;  %v16338_v17 = vpop.trf.xlu0  ;;  %v17569_v51 = vld [vmem:[#allocation12_spill] sm:$0xff] }
 0x55f   :  { %v5568_v41 = vmul.f32 %v9312_v54, %v13782_v28  ;;  %v8451_v14 = vpack.c.bf16 %v10052_v5, %v17557_v19  ;;  %v7379_v0 = vmul.f32 %v15667_v8, %v7313_v38  ;;  %v17559_v7 = vmax.f32 %v13808_v34, %v13832_v23 }
 0x560   :  { %v5569_v33 = vmul.f32 %v9313_v50, %v13782_v28  ;;  %v7380_v9 = vmul.f32 %v15667_v8, %v7314_v52  ;;  %v8549_v13 = vpack.c.bf16 %v10956_v40, %v17558_v58  ;;  %11213 = vxpose.xlu1.b32.cont [14/16] %v11212_v32, 128  ;;  %v17560_v16 = vmax.f32 %v13808_v34, %v13836_v55  ;;  %v17572_v32 = vld [vmem:[#allocation9_spill] sm:$0xff] }
 0x561   :  { %6886 = vst [vmem:[%s17336_s4 + $0xd0] sm:$0xff] %v8451_v14  ;;  %v9382_v6 = vround.rtne.f32 %v7379_v0  ;;  %v4802_v31 = vmin.f32 %v13789_v57, %v17559_v7  ;;  %v10060_v48 = vunpack.i.h.bf16 %v16098_v60  ;;  %v17561_v22 = vunpack.i.l.bf16 %v15553_v2  ;;  %v17571_v14 = vld [vmem:[#allocation8_spill] sm:$0xff] }
 0x562   :  { %v10204_v47 = vpack.i.bf16 %v5569_v33, %v5568_v41  ;;  %v9383_v36 = vround.rtne.f32 %v7380_v9  ;;  %v4803_v43 = vmin.f32 %v13789_v57, %v17560_v16  ;;  %6984 = vst [vmem:[%s17336_s4 + $0x3e0] sm:$0xff] %v8549_v13  ;;  %v17563_v62 = vunpack.i.h.bf16 %v17562_v61 }
 0x563   :  { %v7507_v27 = vmul.f32 %v9382_v6, %v15228_v21  ;;  %v8517_v63 = vpack.c.bf16 %v10953_v46, %v17561_v22  ;;  %v5060_v23 = vmul.f32 %v14275_v39, %v4802_v31  ;;  %v10057_v42 = vunpack.i.l.bf16 %v16098_v60 }
 0x564   :  { %10205 = vxpose.xlu0.b32.cont [14/16] %v10204_v47, 128  ;;  %v7508_v10 = vmul.f32 %v9383_v36, %v15228_v21  ;;  %v5061_v55 = vmul.f32 %v14275_v39, %v4803_v43  ;;  %v8485_v15 = vpack.c.bf16 %v10060_v48, %v17563_v62  ;;  %v17565_v53 = vmax.f32 %v15600_v11, %v17564_v35  ;;  %v17574_v36 = vld [vmem:[#allocation11_spill] sm:$0xff]  ;;  %v16382_v35 = vld [vmem:[#allocation4 + $0x7b0] sm:$0xff] }
 0x565   :  { %6952 = vst [vmem:[%s17336_s4 + $0x2e0] sm:$0xff] %v8517_v63  ;;  %v9316_v2 = vround.rtne.f32 %v5060_v23  ;;  %v17567_v24 = vmax.f32 %v15600_v11, %v17566_v26  ;;  %v10961_v20 = vunpack.i.h.bf16 %v10957_v3  ;;  %v17568_v54 = vunpack.i.l.bf16 %v17562_v61  ;;  %v16370_v63 = vpop.trf.xlu0  ;;  %v11919_v26 = vld [vmem:[#allocation4 + $0x630] sm:$0xff] }
 0x566   :  { %v7317_v25 = vmin.f32 %v15591_v37, %v17565_v53  ;;  %v11214_v1 = vpack.i.bf16 %v7508_v10, %v7507_v27  ;;  %v9317_v29 = vround.rtne.f32 %v5061_v55  ;;  %6920 = vst [vmem:[%s17336_s4 + $0x1e0] sm:$0xff] %v8485_v15  ;;  %v10958_v50 = vunpack.i.l.bf16 %v10957_v3  ;;  %v11916_v27 = vld [vmem:[#allocation4 + $0x610] sm:$0xff]  ;;  %v11917_v55 = vld [vmem:[#allocation4 + $0x618] sm:$0xff] }
 0x567   :  { %v7318_v44 = vmin.f32 %v15591_v37, %v17567_v24  ;;  %v5572_v60 = vmul.f32 %v9316_v2, %v13782_v28  ;;  %v8453_v5 = vpack.c.bf16 %v10057_v42, %v17568_v54  ;;  %v17570_v52 = vunpack.i.h.bf16 %v17569_v51 }
 0x568   :  { %v7383_v45 = vmul.f32 %v15667_v8, %v7317_v25  ;;  %11215 = vxpose.xlu1.b32.cont [15/16] %v11214_v1, 128  ;;  %v5573_v49 = vmul.f32 %v9317_v29, %v13782_v28  ;;  %v5064_v0 = vmul.f32 %v14275_v39, %v17571_v14  ;;  %v5065_v33 = vmul.f32 %v14275_v39, %v17572_v32  ;;  %v16392_v29 = vld [vmem:[#allocation4 + $0x7b8] sm:$0xff] }
 0x569   :  { %v7384_v38 = vmul.f32 %v15667_v8, %v7318_v44  ;;  %v8551_v40 = vpack.c.bf16 %v10961_v20, %v17570_v52  ;;  %6888 = vst [vmem:[%s17336_s4 + $0xe0] sm:$0xff] %v8453_v5  ;;  %v17573_v6 = vunpack.i.l.bf16 %v17569_v51  ;;  %v10065_v58 = vunpack.i.h.bf16 %v16123_v18  ;;  %v11920_v44 = vld [vmem:[#allocation4 + $0x638] sm:$0xff]  ;;  %v16402_v51 = vpop.trf.xlu1  ;;  %v16404_v52 = vld [vmem:[#allocation4 + $0x7d0] sm:$0xff] }
 0x56a   :  { %v9386_v41 = vround.rtne.f32 %v7383_v45  ;;  %v10206_v9 = vpack.i.bf16 %v5573_v49, %v5572_v60  ;;  %v9320_v31 = vround.rtne.f32 %v5064_v0  ;;  %v9321_v47 = vround.rtne.f32 %v5065_v33 }
 0x56b   :  { %v9387_v19 = vround.rtne.f32 %v7384_v38  ;;  %v8519_v46 = vpack.c.bf16 %v10958_v50, %v17573_v6  ;;  %6986 = vst [vmem:[%s17336_s4 + $0x3f0] sm:$0xff] %v8551_v40  ;;  %v17575_v16 = vunpack.i.h.bf16 %v17574_v36  ;;  %v10062_v48 = vunpack.i.l.bf16 %v16123_v18  ;;  %v11922_v38 = vld [vmem:[#allocation4 + $0x650] sm:$0xff]  ;;  %v16400_v50 = vpop.trf.xlu0 }
 0x56c   :  { %v7511_v13 = vmul.f32 %v9386_v41, %v15228_v21  ;;  %10207 = vxpose.xlu0.b32.cont [15/16] %v10206_v9, 128  ;;  %v4492_v22 = vmax.f32 %v13808_v34, %v11916_v27  ;;  %v5576_v3 = vmul.f32 %v9320_v31, %v13782_v28  ;;  %v5577_v10 = vmul.f32 %v9321_v47, %v13782_v28  ;;  %v11925_v6 = vld [vmem:[#allocation4 + $0x7f0] sm:$0xff] }
 0x56d   :  { %v7512_v7 = vmul.f32 %v9387_v19, %v15228_v21  ;;  %6954 = vst [vmem:[%s17336_s4 + $0x2f0] sm:$0xff] %v8519_v46  ;;  %v8487_v43 = vpack.c.bf16 %v10065_v58, %v17575_v16  ;;  %v4493_v61 = vmax.f32 %v13808_v34, %v11917_v55  ;;  %v17576_v62 = vunpack.i.l.bf16 %v17574_v36  ;;  %v11924_v19 = vld [vmem:[#allocation4 + $0x658] sm:$0xff]  ;;  %v11926_v36 = vld [vmem:[#allocation4 + $0x670] sm:$0xff] }
 0x56e   :  { %v4748_v15 = vmin.f32 %v13789_v57, %v4492_v22  ;;  %v10208_v2 = vpack.i.bf16 %v5577_v10, %v5576_v3  ;;  %v4544_v53 = vmax.f32 %v13808_v34, %v16382_v35  ;;  %v4496_v24 = vmax.f32 %v13808_v34, %v11919_v26 }
 0x56f   :  { %v11216_v23 = vpack.i.bf16 %v7512_v7, %v7511_v13  ;;  %6922 = vst [vmem:[%s17336_s4 + $0x1f0] sm:$0xff] %v8487_v43  ;;  %v8455_v18 = vpack.c.bf16 %v10062_v48, %v17576_v62  ;;  %v4749_v42 = vmin.f32 %v13789_v57, %v4493_v61  ;;  %v4497_v1 = vmax.f32 %v13808_v34, %v11920_v44  ;;  %v11927_v43 = vld [vmem:[#allocation4 + $0x7f8] sm:$0xff] }
 0x570   :  { %v5006_v25 = vmul.f32 %v14275_v39, %v4748_v15  ;;  %v4545_v20 = vmax.f32 %v13808_v34, %v16392_v29  ;;  %10209 = vxpose.xlu0.b32.end [16/16] %v10208_v2, 128  ;;  %v4752_v5 = vmin.f32 %v13789_v57, %v4496_v24  ;;  %v4500_v49 = vmax.f32 %v13808_v34, %v11922_v38  ;;  %v16426_v15 = vpop.trf.xlu1  ;;  %v11931_v38 = vld [vmem:[#allocation4 + $0x698] sm:$0xff] }
 0x571   :  { %11217 = vxpose.xlu1.b32.end [16/16] %v11216_v23, 128  ;;  %6890 = vst [vmem:[%s17336_s4 + $0xf0] sm:$0xff] %v8455_v18  ;;  %v5007_v60 = vmul.f32 %v14275_v39, %v4749_v42  ;;  %v4753_v45 = vmin.f32 %v13789_v57, %v4497_v1  ;;  %v4548_v40 = vmax.f32 %v13808_v34, %v16404_v52  ;;  %v11928_v23 = vld [vmem:[#allocation4 + $0x678] sm:$0xff]  ;;  %v16424_v18 = vpop.trf.xlu0 }
 0x572   :  { %v9262_v54 = vround.rtne.f32 %v5006_v25  ;;  %v4501_v14 = vmax.f32 %v13808_v34, %v11924_v19  ;;  %v5010_v32 = vmul.f32 %v14275_v39, %v4752_v5  ;;  %v4756_v9 = vmin.f32 %v13789_v57, %v4500_v49  ;;  %v16429_v25 = vld [vmem:[#allocation4 + $0x7d8] sm:$0xff]  ;;  %v11930_v5 = vld [vmem:[#allocation4 + $0x690] sm:$0xff] }
 0x573   :  { %v9263_v41 = vround.rtne.f32 %v5007_v60  ;;  %v5011_v33 = vmul.f32 %v14275_v39, %v4753_v45  ;;  %v4552_v46 = vmax.f32 %v13808_v34, %v11925_v6  ;;  %v4504_v16 = vmax.f32 %v13808_v34, %v11926_v36 }
 0x574   :  { %v5518_v0 = vmul.f32 %v9262_v54, %v13782_v28  ;;  %v4757_v13 = vmin.f32 %v13789_v57, %v4501_v14  ;;  %v9266_v7 = vround.rtne.f32 %v5010_v32  ;;  %v5014_v47 = vmul.f32 %v14275_v39, %v4756_v9  ;;  %v16450_v9 = vld [vmem:[%s17334_s2 + $0x1d0] sm:$0xff]  ;;  %v16458_v36 = vpop.trf.xlu1 }
 0x575   :  { %v5519_v58 = vmul.f32 %v9263_v41, %v13782_v28  ;;  %v9267_v31 = vround.rtne.f32 %v5011_v33  ;;  %v4553_v48 = vmax.f32 %v13808_v34, %v11927_v43  ;;  %v4505_v3 = vmax.f32 %v13808_v34, %v11928_v23 }
 0x576   :  { %v5015_v22 = vmul.f32 %v14275_v39, %v4757_v13  ;;  %v5522_v10 = vmul.f32 %v9266_v7, %v13782_v28  ;;  %v9270_v61 = vround.rtne.f32 %v5014_v47  ;;  %v4760_v62 = vmin.f32 %v13789_v57, %v4504_v16  ;;  %v11934_v7 = vld [vmem:[#allocation4 + $0x6b8] sm:$0xff]  ;;  %v16456_v47 = vpop.trf.xlu0 }
 0x577   :  { %v11074_v27 = vpack.i.bf16 %v5519_v58, %v5518_v0  ;;  %v5523_v55 = vmul.f32 %v9267_v31, %v13782_v28  ;;  %v4761_v42 = vmin.f32 %v13789_v57, %v4505_v3  ;;  %v4508_v45 = vmax.f32 %v13808_v34, %v11930_v5  ;;  %v11933_v58 = vld [vmem:[#allocation4 + $0x6b0] sm:$0xff]  ;;  %v16469_v3 = vld [vmem:[%s17334_s2 + $0x1d8] sm:$0xff] }
 0x578   :  { %v9271_v2 = vround.rtne.f32 %v5015_v22  ;;  %v5526_v44 = vmul.f32 %v9270_v61, %v13782_v28  ;;  %v5018_v1 = vmul.f32 %v14275_v39, %v4760_v62  ;;  %v4509_v49 = vmax.f32 %v13808_v34, %v11931_v38  ;;  %v16484_v5 = vpop.trf.xlu1 }
 0x579   :  { %11075 = vxpose.xlu0.b32.start [1/16] %v11074_v27, 128  ;;  %v11076_v24 = vpack.i.bf16 %v5523_v55, %v5522_v10  ;;  %v5019_v54 = vmul.f32 %v14275_v39, %v4761_v42  ;;  %v16440_v41 = vmin.f32 %v13789_v57, %v4552_v46  ;;  %v16443_v14 = vmin.f32 %v13789_v57, %v4553_v48  ;;  %v16476_v55 = vld [vmem:[%s17334_s2 + $0x1f0] sm:$0xff] }
 0x57a   :  { %v5527_v60 = vmul.f32 %v9271_v2, %v13782_v28  ;;  %v9274_v19 = vround.rtne.f32 %v5018_v1  ;;  %v4764_v32 = vmin.f32 %v13789_v57, %v4508_v45  ;;  %v4765_v33 = vmin.f32 %v13789_v57, %v4509_v49 }
 0x57b   :  { %v9275_v0 = vround.rtne.f32 %v5019_v54  ;;  %v4512_v13 = vmax.f32 %v13808_v34, %v11933_v58  ;;  %v4513_v31 = vmax.f32 %v13808_v34, %v11934_v7  ;;  %v16495_v58 = vld [vmem:[%s17334_s2 + $0x1f8] sm:$0xff] }
 0x57c   :  { %v11078_v46 = vpack.i.bf16 %v5527_v60, %v5526_v44  ;;  %v5530_v16 = vmul.f32 %v9274_v19, %v13782_v28  ;;  %v5022_v48 = vmul.f32 %v14275_v39, %v4764_v32  ;;  %v5023_v27 = vmul.f32 %v14275_v39, %v4765_v33  ;;  %v11937_v44 = vld [vmem:[#allocation4 + $0x6d0] sm:$0xff]  ;;  %v11938_v60 = vld [vmem:[#allocation4 + $0x6d8] sm:$0xff] }
 0x57d   :  { %11077 = vxpose.xlu0.b32.cont [2/16] %v11076_v24, 128  ;;  %v5531_v43 = vmul.f32 %v9275_v0, %v13782_v28  ;;  %v4768_v22 = vmin.f32 %v13789_v57, %v4512_v13  ;;  %v4769_v23 = vmin.f32 %v13789_v57, %v4513_v31  ;;  %v4516_v1 = vmax.f32 %v13808_v34, %v11937_v44  ;;  %v11940_v31 = vld [vmem:[#allocation4 + $0x6f0] sm:$0xff] }
 0x57e   :  { %v9278_v62 = vround.rtne.f32 %v5022_v48  ;;  %v9279_v2 = vround.rtne.f32 %v5023_v27  ;;  %v4517_v54 = vmax.f32 %v13808_v34, %v11938_v60 }
 0x57f   :  { %v5026_v42 = vmul.f32 %v14275_v39, %v4768_v22  ;;  %v5027_v24 = vmul.f32 %v14275_v39, %v4769_v23  ;;  %v11080_v45 = vpack.i.bf16 %v5531_v43, %v5530_v16  ;;  %v4772_v32 = vmin.f32 %v13789_v57, %v4516_v1  ;;  %v16505_v23 = vpop.trf.xlu1 }
 0x580   :  { %v5534_v38 = vmul.f32 %v9278_v62, %v13782_v28  ;;  %v5535_v49 = vmul.f32 %v9279_v2, %v13782_v28  ;;  %v4773_v33 = vmin.f32 %v13789_v57, %v4517_v54  ;;  %v4520_v16 = vmax.f32 %v13808_v34, %v11940_v31  ;;  %v11941_v2 = vld [vmem:[#allocation4 + $0x6f8] sm:$0xff] }
 0x581   :  { %11079 = vxpose.xlu0.b32.cont [3/16] %v11078_v46, 128  ;;  %v9282_v19 = vround.rtne.f32 %v5026_v42  ;;  %v9283_v0 = vround.rtne.f32 %v5027_v24  ;;  %v16490_v46 = vpop.trf.xlu0  ;;  %v5030_v27 = vmul.f32 %v14275_v39, %v4772_v32  ;;  %v4521_v42 = vmax.f32 %v13808_v34, %v11941_v2  ;;  %v11943_v31 = vld [vmem:[#allocation4 + $0x718] sm:$0xff] }
 0x582   :  { %v5031_v22 = vmul.f32 %v14275_v39, %v4773_v33  ;;  %v11082_v62 = vpack.i.bf16 %v5535_v49, %v5534_v38  ;;  %v4776_v24 = vmin.f32 %v13789_v57, %v4520_v16  ;;  %v4525_v16 = vmax.f32 %v13808_v34, %v11943_v31  ;;  %v11944_v31 = vld [vmem:[#allocation4 + $0x730] sm:$0xff] }
 0x583   :  { %v5538_v43 = vmul.f32 %v9282_v19, %v13782_v28  ;;  %v5539_v48 = vmul.f32 %v9283_v0, %v13782_v28  ;;  %v9286_v1 = vround.rtne.f32 %v5030_v27  ;;  %v11942_v0 = vld [vmem:[#allocation4 + $0x710] sm:$0xff]  ;;  %v4528_v13 = vmax.f32 %v13808_v34, %v11944_v31 }
 0x584   :  { %v9287_v60 = vround.rtne.f32 %v5031_v22  ;;  %v5034_v19 = vmul.f32 %v14275_v39, %v4776_v24  ;;  %v4524_v32 = vmax.f32 %v13808_v34, %v11942_v0  ;;  %v16519_v22 = vpop.trf.xlu1 }
 0x585   :  { %11081 = vxpose.xlu0.b32.cont [4/16] %v11080_v45, 128  ;;  %v4777_v45 = vmin.f32 %v13789_v57, %v4521_v42  ;;  %v11084_v38 = vpack.i.bf16 %v5539_v48, %v5538_v43  ;;  %v5542_v49 = vmul.f32 %v9286_v1, %v13782_v28  ;;  %v16517_v27 = vpop.trf.xlu0  ;;  %v4781_v48 = vmin.f32 %v13789_v57, %v4525_v16  ;;  %v11946_v43 = vld [vmem:[#allocation4 + $0x750] sm:$0xff] }
 0x586   :  { %v5543_v33 = vmul.f32 %v9287_v60, %v13782_v28  ;;  %v9290_v2 = vround.rtne.f32 %v5034_v19  ;;  %v4780_v42 = vmin.f32 %v13789_v57, %v4524_v32  ;;  %v11945_v19 = vld [vmem:[#allocation4 + $0x738] sm:$0xff] }
 0x587   :  { %v4529_v32 = vmax.f32 %v13808_v34, %v11945_v19 }
 0x588   :  { %v5546_v60 = vmul.f32 %v9290_v2, %v13782_v28  ;;  %v5038_v0 = vmul.f32 %v14275_v39, %v4780_v42  ;;  %v11086_v61 = vpack.i.bf16 %v5543_v33, %v5542_v49  ;;  %v16531_v10 = vpop.trf.xlu1  ;;  %v4532_v49 = vmax.f32 %v13808_v34, %v11946_v43 }
 0x589   :  { %11083 = vxpose.xlu0.b32.cont [5/16] %v11082_v62, 128  ;;  %v5035_v62 = vmul.f32 %v14275_v39, %v4777_v45  ;;  %v5039_v45 = vmul.f32 %v14275_v39, %v4781_v48  ;;  %v4785_v42 = vmin.f32 %v13789_v57, %v4529_v32  ;;  %v16538_v33 = vpop.trf.xlu0 }
 0x58a   :  { %v9294_v16 = vround.rtne.f32 %v5038_v0 }
 0x58b   :  { %v9291_v1 = vround.rtne.f32 %v5035_v62  ;;  %v9295_v2 = vround.rtne.f32 %v5039_v45  ;;  %v5043_v32 = vmul.f32 %v14275_v39, %v4785_v42  ;;  %v4788_v62 = vmin.f32 %v13789_v57, %v4532_v49  ;;  %v11948_v42 = vld [vmem:[#allocation4 + $0x770] sm:$0xff] }
 0x58c   :  { %v16547_v43 = vpop.trf.xlu1  ;;  %v4536_v49 = vmax.f32 %v13808_v34, %v11948_v42 }
 0x58d   :  { %11085 = vxpose.xlu0.b32.cont [6/16] %v11084_v38, 128  ;;  %v5547_v6 = vmul.f32 %v9291_v1, %v13782_v28  ;;  %v4784_v38 = vmin.f32 %v13789_v57, %v4528_v13  ;;  %v11947_v1 = vld [vmem:[#allocation4 + $0x758] sm:$0xff]  ;;  %v5550_v13 = vmul.f32 %v9294_v16, %v13782_v28  ;;  %v5551_v45 = vmul.f32 %v9295_v2, %v13782_v28  ;;  %v16558_v7 = vpop.trf.xlu0 }
 0x58e   :  { %v4533_v0 = vmax.f32 %v13808_v34, %v11947_v1  ;;  %v11949_v1 = vld [vmem:[#allocation4 + $0x778] sm:$0xff] }
 0x58f   :  { %v11088_v31 = vpack.i.bf16 %v5547_v6, %v5546_v60  ;;  %v5042_v19 = vmul.f32 %v14275_v39, %v4784_v38  ;;  %v9299_v60 = vround.rtne.f32 %v5043_v32  ;;  %v5046_v38 = vmul.f32 %v14275_v39, %v4788_v62 }
 0x590   :  { %v4789_v48 = vmin.f32 %v13789_v57, %v4533_v0  ;;  %v11090_v24 = vpack.i.bf16 %v5551_v45, %v5550_v13  ;;  %v16560_v32 = vpop.trf.xlu1 }
 0x591   :  { %11087 = vxpose.xlu0.b32.cont [7/16] %v11086_v61, 128  ;;  %v9298_v54 = vround.rtne.f32 %v5042_v19  ;;  %v4537_v19 = vmax.f32 %v13808_v34, %v11949_v1  ;;  %v5555_v0 = vmul.f32 %v9299_v60, %v13782_v28  ;;  %v9302_v6 = vround.rtne.f32 %v5046_v38  ;;  %v11950_v1 = vld [vmem:[#allocation4 + $0x790] sm:$0xff] }
 0x592   :  { %v5047_v2 = vmul.f32 %v14275_v39, %v4789_v48  ;;  %v4540_v13 = vmax.f32 %v13808_v34, %v11950_v1 }
 0x593   :  { %v5554_v16 = vmul.f32 %v9298_v54, %v13782_v28  ;;  %v4793_v54 = vmin.f32 %v13789_v57, %v4537_v19  ;;  %v5558_v19 = vmul.f32 %v9302_v6, %v13782_v28  ;;  %v4801_v6 = vmin.f32 %v13789_v57, %v4545_v20 }
 0x594   :  { %v9303_v62 = vround.rtne.f32 %v5047_v2  ;;  %v11951_v2 = vld [vmem:[#allocation4 + $0x798] sm:$0xff]  ;;  %v4796_v48 = vmin.f32 %v13789_v57, %v4540_v13  ;;  %v16573_v44 = vpop.trf.xlu1 }
 0x595   :  { %11089 = vxpose.xlu0.b32.cont [8/16] %v11088_v31, 128  ;;  %v4792_v31 = vmin.f32 %v13789_v57, %v4536_v49  ;;  %v11092_v45 = vpack.i.bf16 %v5555_v0, %v5554_v16  ;;  %v5051_v38 = vmul.f32 %v14275_v39, %v4793_v54  ;;  %v4541_v49 = vmax.f32 %v13808_v34, %v11951_v2  ;;  %v16587_v54 = vpop.trf.xlu0 }
 0x596   :  { %v5559_v42 = vmul.f32 %v9303_v62, %v13782_v28  ;;  %v5054_v0 = vmul.f32 %v14275_v39, %v4796_v48 }
 0x597   :  { %v5050_v60 = vmul.f32 %v14275_v39, %v4792_v31  ;;  %v9307_v26 = vround.rtne.f32 %v5051_v38  ;;  %v4800_v31 = vmin.f32 %v13789_v57, %v4544_v53  ;;  %v5059_v53 = vmul.f32 %v14275_v39, %v4801_v6 }
 0x598   :  { %v16595_v38 = vpop.trf.xlu1  ;;  %v11094_v20 = vpack.i.bf16 %v5559_v42, %v5558_v19 }
 0x599   :  { %11091 = vxpose.xlu0.b32.cont [9/16] %v11090_v24, 128  ;;  %v9306_v61 = vround.rtne.f32 %v5050_v60  ;;  %v4797_v24 = vmin.f32 %v13789_v57, %v4541_v49  ;;  %v5563_v13 = vmul.f32 %v9307_v26, %v13782_v28  ;;  %v9310_v60 = vround.rtne.f32 %v5054_v0 }
 0x59a   :  { %v5058_v35 = vmul.f32 %v14275_v39, %v4800_v31  ;;  %v9315_v16 = vround.rtne.f32 %v5059_v53  ;;  %v4804_v26 = vmin.f32 %v13789_v57, %v4548_v40  ;;  %v17577_v0 = vmax.f32 %v13808_v34, %v16429_v25 }
 0x59b   :  { %v5562_v1 = vmul.f32 %v9306_v61, %v13782_v28  ;;  %v5055_v48 = vmul.f32 %v14275_v39, %v4797_v24  ;;  %v5566_v42 = vmul.f32 %v9310_v60, %v13782_v28  ;;  %v5066_v34 = vmul.f32 %v14275_v39, %v16440_v41  ;;  %v11952_v41 = vld [vmem:[%s17334_s2 + $0x10] sm:$0xff] }
 0x59c   :  { %v4805_v31 = vmin.f32 %v13789_v57, %v17577_v0  ;;  %v5062_v6 = vmul.f32 %v14275_v39, %v4804_v26  ;;  %v16613_v52 = vpop.trf.xlu1  ;;  %v7195_v26 = vmax.f32 %v15600_v11, %v11952_v41 }
 0x59d   :  { %11093 = vxpose.xlu0.b32.cont [10/16] %v11092_v45, 128  ;;  %v9311_v2 = vround.rtne.f32 %v5055_v48  ;;  %v9314_v45 = vround.rtne.f32 %v5058_v35  ;;  %v11096_v24 = vpack.i.bf16 %v5563_v13, %v5562_v1  ;;  %v16611_v48 = vpop.trf.xlu0  ;;  %v5571_v35 = vmul.f32 %v9315_v16, %v13782_v28 }
 0x59e   :  { %v5063_v1 = vmul.f32 %v14275_v39, %v4805_v31  ;;  %v9318_v60 = vround.rtne.f32 %v5062_v6  ;;  %v9322_v6 = vround.rtne.f32 %v5066_v34  ;;  %v11956_v34 = vld [vmem:[%s17334_s2 + $0x50] sm:$0xff] }
 0x59f   :  { %v5567_v19 = vmul.f32 %v9311_v2, %v13782_v28  ;;  %v5570_v40 = vmul.f32 %v9314_v45, %v13782_v28  ;;  %v7203_v41 = vmax.f32 %v15600_v11, %v11956_v34 }
 0x5a0   :  { %v9319_v45 = vround.rtne.f32 %v5063_v1  ;;  %v16631_v0 = vpop.trf.xlu1  ;;  %v7259_v1 = vmin.f32 %v15591_v37, %v7195_v26  ;;  %v11957_v26 = vld [vmem:[%s17334_s2 + $0x58] sm:$0xff] }
 0x5a1   :  { %11095 = vxpose.xlu0.b32.cont [11/16] %v11094_v20, 128  ;;  %v5067_v20 = vmul.f32 %v14275_v39, %v16443_v14  ;;  %v11098_v2 = vpack.i.bf16 %v5567_v19, %v5566_v42  ;;  %v11100_v31 = vpack.i.bf16 %v5571_v35, %v5570_v40  ;;  %v11954_v14 = vld [vmem:[%s17334_s2 + $0x30] sm:$0xff]  ;;  %v5574_v19 = vmul.f32 %v9318_v60, %v13782_v28  ;;  %v11955_v40 = vld [vmem:[%s17334_s2 + $0x38] sm:$0xff] }
 0x5a2   :  { %v7199_v42 = vmax.f32 %v15600_v11, %v11954_v14  ;;  %v7200_v35 = vmax.f32 %v15600_v11, %v11955_v40  ;;  %v7204_v53 = vmax.f32 %v15600_v11, %v11957_v26  ;;  %v5575_v40 = vmul.f32 %v9319_v45, %v13782_v28  ;;  %v11958_v26 = vld [vmem:[%s17334_s2 + $0x70] sm:$0xff] }
 0x5a3   :  { %v7325_v16 = vmul.f32 %v15667_v8, %v7259_v1  ;;  %v7267_v34 = vmin.f32 %v15591_v37, %v7203_v41  ;;  %v7207_v45 = vmax.f32 %v15600_v11, %v11958_v26  ;;  %v11959_v41 = vld [vmem:[%s17334_s2 + $0x78] sm:$0xff] }
 0x5a4   :  { %v7263_v60 = vmin.f32 %v15591_v37, %v7199_v42  ;;  %v7264_v25 = vmin.f32 %v15591_v37, %v7200_v35  ;;  %v7268_v42 = vmin.f32 %v15591_v37, %v7204_v53  ;;  %v11102_v26 = vpack.i.bf16 %v5575_v40, %v5574_v19 }
 0x5a5   :  { %11097 = vxpose.xlu0.b32.cont [12/16] %v11096_v24, 128  ;;  %v11953_v24 = vld [vmem:[%s17334_s2 + $0x18] sm:$0xff]  ;;  %v9328_v13 = vround.rtne.f32 %v7325_v16  ;;  %v7333_v35 = vmul.f32 %v15667_v8, %v7267_v34  ;;  %v7271_v57 = vmin.f32 %v15591_v37, %v7207_v45 }
 0x5a6   :  { %v7196_v39 = vmax.f32 %v15600_v11, %v11953_v24  ;;  %v9323_v24 = vround.rtne.f32 %v5067_v20  ;;  %v7330_v1 = vmul.f32 %v15667_v8, %v7264_v25  ;;  %v7334_v61 = vmul.f32 %v15667_v8, %v7268_v42  ;;  %v11960_v42 = vld [vmem:[%s17334_s2 + $0x90] sm:$0xff] }
 0x5a7   :  { %v5578_v25 = vmul.f32 %v9322_v6, %v13782_v28  ;;  %v7453_v29 = vmul.f32 %v9328_v13, %v15228_v21  ;;  %v7211_v19 = vmax.f32 %v15600_v11, %v11960_v42  ;;  %v7337_v6 = vmul.f32 %v15667_v8, %v7271_v57  ;;  %v11964_v13 = vld [vmem:[%s17334_s2 + $0xd0] sm:$0xff] }
 0x5a8   :  { %v7260_v14 = vmin.f32 %v15591_v37, %v7196_v39  ;;  %v7329_v39 = vmul.f32 %v15667_v8, %v7263_v60  ;;  %v5579_v34 = vmul.f32 %v9323_v24, %v13782_v28  ;;  %v9333_v62 = vround.rtne.f32 %v7330_v1  ;;  %v11961_v24 = vld [vmem:[%s17334_s2 + $0x98] sm:$0xff] }
 0x5a9   :  { %11099 = vxpose.xlu0.b32.cont [13/16] %v11098_v2, 128  ;;  %v16661_v2 = vpop.trf.xlu1  ;;  %v9337_v60 = vround.rtne.f32 %v7334_v61  ;;  %v7212_v61 = vmax.f32 %v15600_v11, %v11961_v24  ;;  %v7275_v1 = vmin.f32 %v15591_v37, %v7211_v19 }
 0x5aa   :  { %v7326_v20 = vmul.f32 %v15667_v8, %v7260_v14  ;;  %v7208_v14 = vmax.f32 %v15600_v11, %v11959_v41  ;;  %v9332_v49 = vround.rtne.f32 %v7329_v39  ;;  %v11104_v45 = vpack.i.bf16 %v5579_v34, %v5578_v25  ;;  %v11963_v34 = vld [vmem:[%s17334_s2 + $0xb8] sm:$0xff] }
 0x5ab   :  { %v7458_v57 = vmul.f32 %v9333_v62, %v15228_v21  ;;  %v7276_v42 = vmin.f32 %v15591_v37, %v7212_v61  ;;  %v16712_v25 = vmul.f32 %v9337_v60, %v15228_v21  ;;  %v7216_v19 = vmax.f32 %v15600_v11, %v11963_v34 }
 0x5ac   :  { %v9329_v53 = vround.rtne.f32 %v7326_v20  ;;  %v7272_v41 = vmin.f32 %v15591_v37, %v7208_v14  ;;  %v9336_v20 = vround.rtne.f32 %v7333_v35  ;;  %v11962_v35 = vld [vmem:[%s17334_s2 + $0xb0] sm:$0xff]  ;;  %v9340_v62 = vround.rtne.f32 %v7337_v6  ;;  %v11965_v6 = vld [vmem:[%s17334_s2 + $0xd8] sm:$0xff] }
 0x5ad   :  { %11101 = vxpose.xlu0.b32.cont [14/16] %v11100_v31, 128  ;;  %v16689_v40 = vpop.trf.xlu1  ;;  %v7215_v14 = vmax.f32 %v15600_v11, %v11962_v35  ;;  %v7342_v61 = vmul.f32 %v15667_v8, %v7276_v42  ;;  %v17580_v34 = vunpack.i.h.bf16 %v16159_v56 }
 0x5ae   :  { %v7454_v31 = vmul.f32 %v9329_v53, %v15228_v21  ;;  %v7457_v53 = vmul.f32 %v9332_v49, %v15228_v21  ;;  %v16709_v39 = vmul.f32 %v9336_v20, %v15228_v21 }
 0x5af   :  { %v9345_v16 = vround.rtne.f32 %v7342_v61  ;;  %v17581_v61 = vunpack.i.l.bf16 %v16195_v4 }
 0x5b0   :  { %v11298_v24 = vpack.i.bf16 %v7454_v31, %v7453_v29  ;;  %v7279_v29 = vmin.f32 %v15591_v37, %v7215_v14  ;;  %v11300_v60 = vpack.i.bf16 %v7458_v57, %v7457_v53  ;;  %v17579_v14 = vunpack.i.l.bf16 %v16159_v56 }
 0x5b1   :  { %11103 = vxpose.xlu0.b32.cont [15/16] %v11102_v26, 128  ;;  %v7338_v26 = vmul.f32 %v15667_v8, %v7272_v41  ;;  %v7341_v41 = vmul.f32 %v15667_v8, %v7275_v1  ;;  %v16721_v35 = vpop.trf.xlu1  ;;  %v7220_v1 = vmax.f32 %v15600_v11, %v11965_v6  ;;  %v11302_v53 = vpack.i.bf16 %v16712_v25, %v16709_v39  ;;  %v11966_v6 = vld [vmem:[%s17334_s2 + $0xf0] sm:$0xff] }
 0x5b2   :  { %17578 = vst [vmem:[#allocation10_spill] sm:$0xff] %v16721_v35  ;;  %v7280_v57 = vmin.f32 %v15591_v37, %v7216_v19  ;;  %v7345_v35 = vmul.f32 %v15667_v8, %v7279_v29 }
 0x5b3   :  { %v9341_v28 = vround.rtne.f32 %v7338_v26 }
 0x5b4   :  { %v10210_v49 = vpop.trf.xlu0 }
 0x5b5   :  { %11105 = vxpose.xlu0.b32.end [16/16] %v11104_v45, 128  ;;  %v10214_v31 = vunpack.i.h.bf16 %v10210_v49  ;;  %v10211_v20 = vunpack.i.l.bf16 %v10210_v49  ;;  %v7219_v45 = vmax.f32 %v15600_v11, %v11964_v13  ;;  %v9344_v13 = vround.rtne.f32 %v7341_v41 }
 0x5b6   :  { %v7466_v25 = vmul.f32 %v9341_v28, %v15228_v21  ;;  %v7284_v41 = vmin.f32 %v15591_v37, %v7220_v1  ;;  %v7470_v1 = vmul.f32 %v9345_v16, %v15228_v21  ;;  %v11968_v16 = vld [vmem:[%s17334_s2 + $0x110] sm:$0xff] }
 0x5b7   :  { %v8426_v42 = vpack.c.bf16 %v10211_v20, %v17579_v14  ;;  %v8458_v49 = vpack.c.bf16 %v10214_v31, %v17580_v34  ;;  %v7223_v20 = vmax.f32 %v15600_v11, %v11966_v6  ;;  %v7283_v19 = vmin.f32 %v15591_v37, %v7219_v45  ;;  %v11967_v34 = vld [vmem:[%s17334_s2 + $0xf8] sm:$0xff] }
 0x5b8   :  { %v10215_v26 = vpop.trf.xlu0  ;;  %v17582_v31 = vunpack.i.h.bf16 %v16195_v4  ;;  %v7469_v45 = vmul.f32 %v9344_v13, %v15228_v21 }
 0x5b9   :  { %11299 = vxpose.xlu0.b32.start [1/16] %v11298_v24, 128  ;;  %6861 = vst [vmem:[%s17336_s4 + $0x8] sm:$0xff] %v8426_v42  ;;  %6893 = vst [vmem:[%s17336_s4 + $0x108] sm:$0xff] %v8458_v49  ;;  %v10219_v56 = vunpack.i.h.bf16 %v10215_v26  ;;  %v10216_v39 = vunpack.i.l.bf16 %v10215_v26  ;;  %v7465_v24 = vmul.f32 %v9340_v62, %v15228_v21  ;;  %v7346_v42 = vmul.f32 %v15667_v8, %v7280_v57  ;;  %v16762_v49 = vpop.trf.xlu1 }
 0x5ba   :  { %v7224_v62 = vmax.f32 %v15600_v11, %v11967_v34  ;;  %v9348_v26 = vround.rtne.f32 %v7345_v35  ;;  %v7287_v4 = vmin.f32 %v15591_v37, %v7223_v20  ;;  %v7227_v35 = vmax.f32 %v15600_v11, %v11968_v16 }
 0x5bb   :  { %v8428_v29 = vpack.c.bf16 %v10216_v39, %v17581_v61  ;;  %v8460_v14 = vpack.c.bf16 %v10219_v56, %v17582_v31  ;;  %v7350_v56 = vmul.f32 %v15667_v8, %v7284_v41  ;;  %v17583_v20 = vunpack.i.l.bf16 %v16224_v59 }
 0x5bc   :  { %v10220_v28 = vpop.trf.xlu0  ;;  %v7288_v13 = vmin.f32 %v15591_v37, %v7224_v62  ;;  %v17584_v61 = vunpack.i.h.bf16 %v16224_v59  ;;  %v7353_v31 = vmul.f32 %v15667_v8, %v7287_v4  ;;  %v11306_v62 = vpack.i.bf16 %v7470_v1, %v7469_v45 }
 0x5bd   :  { %11301 = vxpose.xlu0.b32.cont [2/16] %v11300_v60, 128  ;;  %6863 = vst [vmem:[%s17336_s4 + $0x18] sm:$0xff] %v8428_v29  ;;  %6895 = vst [vmem:[%s17336_s4 + $0x118] sm:$0xff] %v8460_v14  ;;  %v10224_v57 = vunpack.i.h.bf16 %v10220_v28  ;;  %v10221_v6 = vunpack.i.l.bf16 %v10220_v28  ;;  %v7349_v60 = vmul.f32 %v15667_v8, %v7283_v19  ;;  %v11969_v19 = vld [vmem:[%s17334_s2 + $0x118] sm:$0xff]  ;;  %v11304_v14 = vpack.i.bf16 %v7466_v25, %v7465_v24 }
 0x5be   :  { %v7228_v41 = vmax.f32 %v15600_v11, %v11969_v19  ;;  %v9349_v28 = vround.rtne.f32 %v7346_v42  ;;  %v7354_v16 = vmul.f32 %v15667_v8, %v7288_v13  ;;  %v7291_v24 = vmin.f32 %v15591_v37, %v7227_v35  ;;  %v11971_v35 = vld [vmem:[%s17334_s2 + $0x138] sm:$0xff] }
 0x5bf   :  { %v8430_v39 = vpack.c.bf16 %v10221_v6, %v17583_v20  ;;  %v8462_v29 = vpack.c.bf16 %v10224_v57, %v17584_v61  ;;  %v16796_v57 = vpop.trf.xlu1  ;;  %v9352_v6 = vround.rtne.f32 %v7349_v60  ;;  %v17585_v42 = vunpack.i.l.bf16 %v16267_v12  ;;  %v11970_v60 = vld [vmem:[%s17334_s2 + $0x130] sm:$0xff] }
 0x5c0   :  { %v10225_v34 = vpop.trf.xlu0  ;;  %v7292_v25 = vmin.f32 %v15591_v37, %v7228_v41  ;;  %v17586_v1 = vunpack.i.h.bf16 %v16267_v12  ;;  %v7473_v20 = vmul.f32 %v9348_v26, %v15228_v21  ;;  %v9357_v19 = vround.rtne.f32 %v7354_v16 }
 0x5c1   :  { %11303 = vxpose.xlu0.b32.cont [3/16] %v11302_v53, 128  ;;  %6865 = vst [vmem:[%s17336_s4 + $0x28] sm:$0xff] %v8430_v39  ;;  %6897 = vst [vmem:[%s17336_s4 + $0x128] sm:$0xff] %v8462_v29  ;;  %v10229_v59 = vunpack.i.h.bf16 %v10225_v34  ;;  %v10226_v4 = vunpack.i.l.bf16 %v10225_v34  ;;  %v9353_v53 = vround.rtne.f32 %v7350_v56  ;;  %v9356_v39 = vround.rtne.f32 %v7353_v31 }
 0x5c2   :  { %v7474_v29 = vmul.f32 %v9349_v28, %v15228_v21  ;;  %v7231_v56 = vmax.f32 %v15600_v11, %v11970_v60  ;;  %v7232_v12 = vmax.f32 %v15600_v11, %v11971_v35  ;;  %v7477_v41 = vmul.f32 %v9352_v6, %v15228_v21 }
 0x5c3   :  { %v8432_v45 = vpack.c.bf16 %v10226_v4, %v17585_v42  ;;  %v8464_v13 = vpack.c.bf16 %v10229_v59, %v17586_v1  ;;  %v7357_v34 = vmul.f32 %v15667_v8, %v7291_v24  ;;  %v7358_v28 = vmul.f32 %v15667_v8, %v7292_v25  ;;  %v11972_v1 = vld [vmem:[%s17334_s2 + $0x150] sm:$0xff] }
 0x5c4   :  { %v10230_v61 = vpop.trf.xlu0  ;;  %v17587_v16 = vunpack.i.l.bf16 %v16296_v30  ;;  %v17588_v4 = vunpack.i.h.bf16 %v16296_v30  ;;  %v7235_v6 = vmax.f32 %v15600_v11, %v11972_v1  ;;  %v7482_v25 = vmul.f32 %v9357_v19, %v15228_v21 }
 0x5c5   :  { %11305 = vxpose.xlu0.b32.cont [4/16] %v11304_v14, 128  ;;  %6867 = vst [vmem:[%s17336_s4 + $0x38] sm:$0xff] %v8432_v45  ;;  %6899 = vst [vmem:[%s17336_s4 + $0x138] sm:$0xff] %v8464_v13  ;;  %v10234_v26 = vunpack.i.h.bf16 %v10230_v61  ;;  %v10231_v31 = vunpack.i.l.bf16 %v10230_v61  ;;  %v7478_v14 = vmul.f32 %v9353_v53, %v15228_v21  ;;  %v16829_v45 = vmul.f32 %v9356_v39, %v15228_v21  ;;  %v16835_v53 = vpop.trf.xlu1  ;;  %v11973_v39 = vld [vmem:[%s17334_s2 + $0x158] sm:$0xff] }
 0x5c6   :  { %v7295_v13 = vmin.f32 %v15591_v37, %v7231_v56  ;;  %v7296_v30 = vmin.f32 %v15591_v37, %v7232_v12  ;;  %v7236_v61 = vmax.f32 %v15600_v11, %v11973_v39  ;;  %v11308_v60 = vpack.i.bf16 %v7474_v29, %v7473_v20  ;;  %v11974_v29 = vld [vmem:[%s17334_s2 + $0x170] sm:$0xff] }
 0x5c7   :  { %v8434_v59 = vpack.c.bf16 %v10231_v31, %v17587_v16  ;;  %v8466_v42 = vpack.c.bf16 %v10234_v26, %v17588_v4  ;;  %v9360_v56 = vround.rtne.f32 %v7357_v34  ;;  %v9361_v35 = vround.rtne.f32 %v7358_v28 }
 0x5c8   :  { %v10235_v24 = vpop.trf.xlu0  ;;  %v7299_v12 = vmin.f32 %v15591_v37, %v7235_v6  ;;  %v17589_v26 = vunpack.i.l.bf16 %v16338_v17  ;;  %v17590_v16 = vunpack.i.h.bf16 %v16338_v17  ;;  %v11310_v1 = vpack.i.bf16 %v7478_v14, %v7477_v41 }
 0x5c9   :  { %11307 = vxpose.xlu0.b32.cont [5/16] %v11306_v62, 128  ;;  %6869 = vst [vmem:[%s17336_s4 + $0x48] sm:$0xff] %v8434_v59  ;;  %6901 = vst [vmem:[%s17336_s4 + $0x148] sm:$0xff] %v8466_v42  ;;  %v10239_v62 = vunpack.i.h.bf16 %v10235_v24  ;;  %v10236_v19 = vunpack.i.l.bf16 %v10235_v24  ;;  %v7300_v59 = vmin.f32 %v15591_v37, %v7236_v61  ;;  %v11312_v42 = vpack.i.bf16 %v7482_v25, %v16829_v45  ;;  %v16869_v14 = vpop.trf.xlu1  ;;  %v11975_v25 = vld [vmem:[%s17334_s2 + $0x178] sm:$0xff] }
 0x5ca   :  { %v7361_v24 = vmul.f32 %v15667_v8, %v7295_v13  ;;  %v7362_v20 = vmul.f32 %v15667_v8, %v7296_v30  ;;  %v7239_v34 = vmax.f32 %v15600_v11, %v11974_v29  ;;  %v7485_v28 = vmul.f32 %v9360_v56, %v15228_v21  ;;  %v11976_v56 = vld [vmem:[%s17334_s2 + $0x190] sm:$0xff] }
 0x5cb   :  { %v8436_v31 = vpack.c.bf16 %v10236_v19, %v17589_v26  ;;  %v8468_v4 = vpack.c.bf16 %v10239_v62, %v17590_v16  ;;  %v7486_v45 = vmul.f32 %v9361_v35, %v15228_v21  ;;  %v7365_v6 = vmul.f32 %v15667_v8, %v7299_v12 }
 0x5cc   :  { %v10240_v39 = vpop.trf.xlu0  ;;  %v7240_v13 = vmax.f32 %v15600_v11, %v11975_v25  ;;  %v17591_v30 = vunpack.i.l.bf16 %v16370_v63  ;;  %v17592_v62 = vunpack.i.h.bf16 %v16370_v63  ;;  %v7243_v35 = vmax.f32 %v15600_v11, %v11976_v56 }
 0x5cd   :  { %11309 = vxpose.xlu0.b32.cont [6/16] %v11308_v60, 128  ;;  %6871 = vst [vmem:[%s17336_s4 + $0x58] sm:$0xff] %v8436_v31  ;;  %6903 = vst [vmem:[%s17336_s4 + $0x158] sm:$0xff] %v8468_v4  ;;  %v10244_v17 = vunpack.i.h.bf16 %v10240_v39  ;;  %v10241_v41 = vunpack.i.l.bf16 %v10240_v39  ;;  %v7366_v60 = vmul.f32 %v15667_v8, %v7300_v59  ;;  %v9364_v26 = vround.rtne.f32 %v7361_v24  ;;  %v11977_v4 = vld [vmem:[%s17334_s2 + $0x198] sm:$0xff] }
 0x5ce   :  { %v9365_v31 = vround.rtne.f32 %v7362_v20  ;;  %v7303_v16 = vmin.f32 %v15591_v37, %v7239_v34  ;;  %v7244_v63 = vmax.f32 %v15600_v11, %v11977_v4  ;;  %v11314_v39 = vpack.i.bf16 %v7486_v45, %v7485_v28 }
 0x5cf   :  { %v8438_v61 = vpack.c.bf16 %v10241_v41, %v17591_v30  ;;  %v8470_v19 = vpack.c.bf16 %v10244_v17, %v17592_v62  ;;  %v9368_v24 = vround.rtne.f32 %v7365_v6  ;;  %v7304_v20 = vmin.f32 %v15591_v37, %v7240_v13  ;;  %v16905_v62 = vpop.trf.xlu1  ;;  %v11978_v13 = vld [vmem:[%s17334_s2 + $0x1b0] sm:$0xff] }
 0x5d0   :  { %v10245_v12 = vpop.trf.xlu0  ;;  %v7307_v29 = vmin.f32 %v15591_v37, %v7243_v35  ;;  %v17593_v34 = vunpack.i.l.bf16 %v16400_v50  ;;  %v17594_v41 = vunpack.i.h.bf16 %v16400_v50  ;;  %v9369_v30 = vround.rtne.f32 %v7366_v60 }
 0x5d1   :  { %11311 = vxpose.xlu0.b32.cont [7/16] %v11310_v1, 128  ;;  %6873 = vst [vmem:[%s17336_s4 + $0x68] sm:$0xff] %v8438_v61  ;;  %6905 = vst [vmem:[%s17336_s4 + $0x168] sm:$0xff] %v8470_v19  ;;  %v10249_v1 = vunpack.i.h.bf16 %v10245_v12  ;;  %v10246_v59 = vunpack.i.l.bf16 %v10245_v12  ;;  %v7308_v61 = vmin.f32 %v15591_v37, %v7244_v63  ;;  %v7489_v28 = vmul.f32 %v9364_v26, %v15228_v21  ;;  %v11979_v26 = vld [vmem:[%s17334_s2 + $0x1b8] sm:$0xff] }
 0x5d2   :  { %v7490_v45 = vmul.f32 %v9365_v31, %v15228_v21  ;;  %v7369_v6 = vmul.f32 %v15667_v8, %v7303_v16  ;;  %v7247_v50 = vmax.f32 %v15600_v11, %v11978_v13  ;;  %v7370_v56 = vmul.f32 %v15667_v8, %v7304_v20 }
 0x5d3   :  { %v8440_v17 = vpack.c.bf16 %v10246_v59, %v17593_v34  ;;  %v8472_v25 = vpack.c.bf16 %v10249_v1, %v17594_v41  ;;  %v7373_v35 = vmul.f32 %v15667_v8, %v7307_v29  ;;  %v7374_v12 = vmul.f32 %v15667_v8, %v7308_v61 }
 0x5d4   :  { %v10250_v19 = vpop.trf.xlu0  ;;  %v7248_v31 = vmax.f32 %v15600_v11, %v11979_v26  ;;  %v17595_v16 = vunpack.i.l.bf16 %v16424_v18  ;;  %v17596_v63 = vunpack.i.h.bf16 %v16424_v18  ;;  %v7493_v59 = vmul.f32 %v9368_v24, %v15228_v21 }
 0x5d5   :  { %11313 = vxpose.xlu0.b32.cont [8/16] %v11312_v42, 128  ;;  %6875 = vst [vmem:[%s17336_s4 + $0x78] sm:$0xff] %v8440_v17  ;;  %6907 = vst [vmem:[%s17336_s4 + $0x178] sm:$0xff] %v8472_v25  ;;  %v10254_v42 = vunpack.i.h.bf16 %v10250_v19  ;;  %v10251_v60 = vunpack.i.l.bf16 %v10250_v19  ;;  %v7494_v20 = vmul.f32 %v9369_v30, %v15228_v21  ;;  %v10164_v29 = vunpack.i.l.bf16 %v16558_v7  ;;  %v16942_v30 = vpop.trf.xlu1 }
 0x5d6   :  { %v11316_v34 = vpack.i.bf16 %v7490_v45, %v7489_v28  ;;  %v7311_v41 = vmin.f32 %v15591_v37, %v7247_v50  ;;  %v7312_v25 = vmin.f32 %v15591_v37, %v7248_v31  ;;  %v9372_v61 = vround.rtne.f32 %v7369_v6 }
 0x5d7   :  { %v8442_v4 = vpack.c.bf16 %v10251_v60, %v17595_v16  ;;  %v8474_v1 = vpack.c.bf16 %v10254_v42, %v17596_v63  ;;  %v9376_v19 = vround.rtne.f32 %v7373_v35  ;;  %v9377_v28 = vround.rtne.f32 %v7374_v12 }
 0x5d8   :  { %v10255_v17 = vpop.trf.xlu0  ;;  %v10172_v45 = vunpack.i.h.bf16 %v16587_v54  ;;  %v17597_v13 = vunpack.i.l.bf16 %v16456_v47  ;;  %v17598_v42 = vunpack.i.h.bf16 %v16456_v47  ;;  %v11318_v26 = vpack.i.bf16 %v7494_v20, %v7493_v59 }
 0x5d9   :  { %11315 = vxpose.xlu0.b32.cont [9/16] %v11314_v39, 128  ;;  %6877 = vst [vmem:[%s17336_s4 + $0x88] sm:$0xff] %v8442_v4  ;;  %6909 = vst [vmem:[%s17336_s4 + $0x188] sm:$0xff] %v8474_v1  ;;  %v10259_v18 = vunpack.i.h.bf16 %v10255_v17  ;;  %v10256_v24 = vunpack.i.l.bf16 %v10255_v17  ;;  %v9373_v39 = vround.rtne.f32 %v7370_v56  ;;  %v7377_v16 = vmul.f32 %v15667_v8, %v7311_v41 }
 0x5da   :  { %v7378_v4 = vmul.f32 %v15667_v8, %v7312_v25  ;;  %v17599_v6 = vmax.f32 %v15600_v11, %v16450_v9  ;;  %v17600_v35 = vmax.f32 %v15600_v11, %v16469_v3  ;;  %v7497_v1 = vmul.f32 %v9372_v61, %v15228_v21  ;;  %v16973_v25 = vpop.trf.xlu1 }
 0x5db   :  { %v8444_v50 = vpack.c.bf16 %v10256_v24, %v17597_v13  ;;  %v8476_v60 = vpack.c.bf16 %v10259_v18, %v17598_v42  ;;  %v7498_v9 = vmul.f32 %v9373_v39, %v15228_v21  ;;  %v7501_v59 = vmul.f32 %v9376_v19, %v15228_v21 }
 0x5dc   :  { %v10260_v31 = vpop.trf.xlu0  ;;  %v7315_v56 = vmin.f32 %v15591_v37, %v17599_v6  ;;  %v7316_v12 = vmin.f32 %v15591_v37, %v17600_v35  ;;  %v7502_v3 = vmul.f32 %v9377_v28, %v15228_v21  ;;  %v17601_v20 = vunpack.i.l.bf16 %v16490_v46 }
 0x5dd   :  { %11317 = vxpose.xlu0.b32.cont [10/16] %v11316_v34, 128  ;;  %6879 = vst [vmem:[%s17336_s4 + $0x98] sm:$0xff] %v8444_v50  ;;  %6911 = vst [vmem:[%s17336_s4 + $0x198] sm:$0xff] %v8476_v60  ;;  %v10264_v47 = vunpack.i.h.bf16 %v10260_v31  ;;  %v10261_v63 = vunpack.i.l.bf16 %v10260_v31  ;;  %v17602_v17 = vunpack.i.h.bf16 %v16490_v46  ;;  %v9380_v24 = vround.rtne.f32 %v7377_v16 }
 0x5de   :  { %v9381_v13 = vround.rtne.f32 %v7378_v4  ;;  %v7381_v61 = vmul.f32 %v15667_v8, %v7315_v56  ;;  %v7382_v39 = vmul.f32 %v15667_v8, %v7316_v12  ;;  %v11320_v28 = vpack.i.bf16 %v7498_v9, %v7497_v1 }
 0x5df   :  { %v8446_v34 = vpack.c.bf16 %v10261_v63, %v17601_v20  ;;  %v8478_v41 = vpack.c.bf16 %v10264_v47, %v17602_v17  ;;  %v11322_v50 = vpack.i.bf16 %v7502_v3, %v7501_v59  ;;  %v17603_v42 = vmax.f32 %v15600_v11, %v16476_v55 }
 0x5e0   :  { %v10265_v18 = vpop.trf.xlu0  ;;  %v17605_v16 = vunpack.i.l.bf16 %v16517_v27  ;;  %v17606_v6 = vunpack.i.h.bf16 %v16517_v27  ;;  %v7505_v12 = vmul.f32 %v9380_v24, %v15228_v21  ;;  %v7506_v47 = vmul.f32 %v9381_v13, %v15228_v21 }
 0x5e1   :  { %11319 = vxpose.xlu0.b32.cont [11/16] %v11318_v26, 128  ;;  %6881 = vst [vmem:[%s17336_s4 + $0xa8] sm:$0xff] %v8446_v34  ;;  %6913 = vst [vmem:[%s17336_s4 + $0x1a8] sm:$0xff] %v8478_v41  ;;  %v10269_v46 = vunpack.i.h.bf16 %v10265_v18  ;;  %v10266_v19 = vunpack.i.l.bf16 %v10265_v18  ;;  %v7319_v60 = vmin.f32 %v15591_v37, %v17603_v42  ;;  %v17604_v26 = vmax.f32 %v15600_v11, %v16495_v58  ;;  %v17003_v58 = vpop.trf.xlu1 }
 0x5e2   :  { %v9384_v55 = vround.rtne.f32 %v7381_v61  ;;  %v9385_v63 = vround.rtne.f32 %v7382_v39  ;;  %v10169_v9 = vunpack.i.l.bf16 %v16587_v54  ;;  %v10177_v59 = vunpack.i.h.bf16 %v16611_v48 }
 0x5e3   :  { %v7320_v31 = vmin.f32 %v15591_v37, %v17604_v26  ;;  %v8448_v4 = vpack.c.bf16 %v10266_v19, %v17605_v16  ;;  %v8480_v56 = vpack.c.bf16 %v10269_v46, %v17606_v6  ;;  %v7385_v27 = vmul.f32 %v15667_v8, %v7319_v60 }
 0x5e4   :  { %v10270_v35 = vpop.trf.xlu0  ;;  %v17607_v3 = vunpack.i.l.bf16 %v16538_v33  ;;  %v17608_v34 = vunpack.i.h.bf16 %v16538_v33  ;;  %v7509_v18 = vmul.f32 %v9384_v55, %v15228_v21  ;;  %v7510_v24 = vmul.f32 %v9385_v63, %v15228_v21 }
 0x5e5   :  { %11321 = vxpose.xlu0.b32.cont [12/16] %v11320_v28, 128  ;;  %6883 = vst [vmem:[%s17336_s4 + $0xb8] sm:$0xff] %v8448_v4  ;;  %6915 = vst [vmem:[%s17336_s4 + $0x1b8] sm:$0xff] %v8480_v56  ;;  %v10274_v37 = vunpack.i.h.bf16 %v10270_v35  ;;  %v10271_v11 = vunpack.i.l.bf16 %v10270_v35  ;;  %v7386_v1 = vmul.f32 %v15667_v8, %v7320_v31  ;;  %v11324_v61 = vpack.i.bf16 %v7506_v47, %v7505_v12  ;;  %v17026_v42 = vpop.trf.xlu1 }
 0x5e6   :  { %v9388_v39 = vround.rtne.f32 %v7385_v27  ;;  %v10174_v46 = vunpack.i.l.bf16 %v16611_v48  ;;  %v17609_v28 = vunpack.i.h.bf16 %v16558_v7  ;;  %v11326_v60 = vpack.i.bf16 %v7510_v24, %v7509_v18 }
 0x5e7   :  { %v8450_v20 = vpack.c.bf16 %v10271_v11, %v17607_v3  ;;  %v8482_v17 = vpack.c.bf16 %v10274_v37, %v17608_v34  ;;  %v9389_v33 = vround.rtne.f32 %v7386_v1  ;;  %v10998_v31 = vunpack.i.h.bf16 %v16402_v51 }
 0x5e8   :  { %v10275_v41 = vpop.trf.xlu0  ;;  %v7513_v7 = vmul.f32 %v9388_v39, %v15228_v21  ;;  %v10995_v56 = vunpack.i.l.bf16 %v16402_v51  ;;  %v11003_v12 = vunpack.i.h.bf16 %v16426_v15  ;;  %v11000_v47 = vunpack.i.l.bf16 %v16426_v15 }
 0x5e9   :  { %11323 = vxpose.xlu0.b32.cont [13/16] %v11322_v50, 128  ;;  %6885 = vst [vmem:[%s17336_s4 + $0xc8] sm:$0xff] %v8450_v20  ;;  %6917 = vst [vmem:[%s17336_s4 + $0x1c8] sm:$0xff] %v8482_v17  ;;  %v10279_v8 = vunpack.i.h.bf16 %v10275_v41  ;;  %v10276_v13 = vunpack.i.l.bf16 %v10275_v41  ;;  %v7514_v16 = vmul.f32 %v9389_v33, %v15228_v21  ;;  %v17048_v54 = vpop.trf.xlu1  ;;  %v11008_v51 = vunpack.i.h.bf16 %v16458_v36 }
 0x5ea   :  { %v11005_v11 = vunpack.i.l.bf16 %v16458_v36  ;;  %v11013_v15 = vunpack.i.h.bf16 %v16484_v5  ;;  %v11010_v27 = vunpack.i.l.bf16 %v16484_v5  ;;  %v11018_v1 = vunpack.i.h.bf16 %v16505_v23 }
 0x5eb   :  { %v8452_v19 = vpack.c.bf16 %v10276_v13, %v10164_v29  ;;  %v8484_v50 = vpack.c.bf16 %v10279_v8, %v17609_v28  ;;  %v11020_v36 = vunpack.i.l.bf16 %v16519_v22  ;;  %v11028_v3 = vunpack.i.h.bf16 %v16531_v10 }
 0x5ec   :  { %v10280_v26 = vpop.trf.xlu0  ;;  %v11025_v20 = vunpack.i.l.bf16 %v16531_v10  ;;  %v11033_v41 = vunpack.i.h.bf16 %v16547_v43  ;;  %v11030_v18 = vunpack.i.l.bf16 %v16547_v43  ;;  %v11038_v13 = vunpack.i.h.bf16 %v16560_v32 }
 0x5ed   :  { %11325 = vxpose.xlu0.b32.cont [14/16] %v11324_v61, 128  ;;  %6887 = vst [vmem:[%s17336_s4 + $0xd8] sm:$0xff] %v8452_v19  ;;  %6919 = vst [vmem:[%s17336_s4 + $0x1d8] sm:$0xff] %v8484_v50  ;;  %v10284_v48 = vunpack.i.h.bf16 %v10280_v26  ;;  %v10281_v29 = vunpack.i.l.bf16 %v10280_v26  ;;  %v17066_v34 = vpop.trf.xlu1  ;;  %v11035_v61 = vunpack.i.l.bf16 %v16560_v32  ;;  %v11219_v28 = vunpack.i.l.bf16 %v16762_v49 }
 0x5ee   :  { %v11227_v50 = vunpack.i.h.bf16 %v16796_v57  ;;  %v11048_v32 = vunpack.i.h.bf16 %v16595_v38 }
 0x5ef   :  { %v8454_v4 = vpack.c.bf16 %v10281_v29, %v10169_v9  ;;  %v8486_v6 = vpack.c.bf16 %v10284_v48, %v10172_v45  ;;  %v11328_v45 = vpack.i.bf16 %v7514_v16, %v7513_v7  ;;  %v11015_v9 = vunpack.i.l.bf16 %v16505_v23 }
 0x5f0   :  { %v10285_v35 = vpop.trf.xlu0  ;;  %v11232_v7 = vunpack.i.h.bf16 %v16835_v53 }
 0x5f1   :  { %11327 = vxpose.xlu0.b32.cont [15/16] %v11326_v60, 128  ;;  %6889 = vst [vmem:[%s17336_s4 + $0xe8] sm:$0xff] %v8454_v4  ;;  %6921 = vst [vmem:[%s17336_s4 + $0x1e8] sm:$0xff] %v8486_v6  ;;  %v10289_v21 = vunpack.i.h.bf16 %v10285_v35  ;;  %v10286_v55 = vunpack.i.l.bf16 %v10285_v35  ;;  %v17081_v48 = vpop.trf.xlu1  ;;  %v11237_v35 = vunpack.i.h.bf16 %v16869_v14 }
 0x5f3   :  { %v8456_v63 = vpack.c.bf16 %v10286_v55, %v10174_v46  ;;  %v8488_v37 = vpack.c.bf16 %v10289_v21, %v10177_v59  ;;  %v11023_v59 = vunpack.i.h.bf16 %v16519_v22  ;;  %v11222_v46 = vunpack.i.h.bf16 %v16762_v49 }
 0x5f4   :  { %v8665_v21 = vpack.c.bf16 %v11237_v35, %v11232_v7 }
 0x5f5   :  { %11329 = vxpose.xlu0.b32.end [16/16] %v11328_v45, 128  ;;  %6891 = vst [vmem:[%s17336_s4 + $0xf8] sm:$0xff] %v8456_v63  ;;  %6923 = vst [vmem:[%s17336_s4 + $0x1f8] sm:$0xff] %v8488_v37  ;;  %v8660_v29 = vpack.c.bf16 %v11227_v50, %v11222_v46  ;;  %v17101_v63 = vpop.trf.xlu1  ;;  %v11249_v50 = vunpack.i.l.bf16 %v16973_v25 }
 0x5f6   :  { %8785 = vst [vmem:[%s17337_s5 + $0x48] sm:$0xff] %v8665_v21  }
 0x5f7   :  { %8784 = vst [vmem:[%s17337_s5 + $0x40] sm:$0xff] %v8660_v29  }
 0x5f9   :  { %v11106_v17 = vpop.trf.xlu0 }
 0x5fa   :  { %v11110_v24 = vunpack.i.h.bf16 %v11106_v17  ;;  %v11107_v8 = vunpack.i.l.bf16 %v11106_v17 }
 0x5fc   :  { %v8522_v39 = vpack.c.bf16 %v11110_v24, %v10998_v31  ;;  %v8490_v33 = vpack.c.bf16 %v11107_v8, %v10995_v56  ;;  %v11224_v31 = vunpack.i.l.bf16 %v16796_v57  ;;  %v11229_v56 = vunpack.i.l.bf16 %v16835_v53 }
 0x5fd   :  { %v11111_v19 = vpop.trf.xlu0  ;;  %v11242_v53 = vunpack.i.h.bf16 %v16905_v62  ;;  %v11239_v24 = vunpack.i.l.bf16 %v16905_v62  ;;  %v11247_v8 = vunpack.i.h.bf16 %v16942_v30  ;;  %v11252_v62 = vunpack.i.h.bf16 %v16973_v25 }
 0x5fe   :  { %6957 = vst [vmem:[%s17336_s4 + $0x308] sm:$0xff] %v8522_v39  ;;  %6925 = vst [vmem:[%s17336_s4 + $0x208] sm:$0xff] %v8490_v33  ;;  %v11115_v60 = vunpack.i.h.bf16 %v11111_v19  ;;  %v11112_v26 = vunpack.i.l.bf16 %v11111_v19  ;;  %v8620_v6 = vpack.c.bf16 %v11224_v31, %v11219_v28 }
 0x5ff   :  { %v8670_v39 = vpack.c.bf16 %v11247_v8, %v11242_v53 }
 0x600   :  { %v8524_v49 = vpack.c.bf16 %v11115_v60, %v11003_v12  ;;  %v8492_v16 = vpack.c.bf16 %v11112_v26, %v11000_v47  ;;  %8621 = vst [vmem:[%s17337_s5] sm:$0xff] %v8620_v6   ;;  %v11234_v47 = vunpack.i.l.bf16 %v16869_v14  ;;  %v11257_v60 = vunpack.i.h.bf16 %v17003_v58 }
 0x601   :  { %v11116_v4 = vpop.trf.xlu0  ;;  %8786 = vst [vmem:[%s17337_s5 + $0x50] sm:$0xff] %v8670_v39   ;;  %v11262_v26 = vunpack.i.h.bf16 %v17026_v42 }
 0x602   :  { %6959 = vst [vmem:[%s17336_s4 + $0x318] sm:$0xff] %v8524_v49  ;;  %6927 = vst [vmem:[%s17336_s4 + $0x218] sm:$0xff] %v8492_v16  ;;  %v11120_v57 = vunpack.i.h.bf16 %v11116_v4  ;;  %v11117_v12 = vunpack.i.l.bf16 %v11116_v4  ;;  %v8625_v17 = vpack.c.bf16 %v11234_v47, %v11229_v56  ;;  %v8675_v25 = vpack.c.bf16 %v11257_v60, %v11252_v62 }
 0x603   :  { %v11259_v16 = vunpack.i.l.bf16 %v17026_v42  ;;  %v11267_v4 = vunpack.i.h.bf16 %v17048_v54  ;;  %v11272_v42 = vunpack.i.h.bf16 %v17066_v34  ;;  %v11269_v47 = vunpack.i.l.bf16 %v17066_v34 }
 0x604   :  { %v8526_v55 = vpack.c.bf16 %v11120_v57, %v11008_v51  ;;  %v8494_v45 = vpack.c.bf16 %v11117_v12, %v11005_v11  ;;  %8777 = vst [vmem:[%s17337_s5 + $0x8] sm:$0xff] %v8625_v17   ;;  %v11244_v11 = vunpack.i.l.bf16 %v16942_v30  ;;  %8787 = vst [vmem:[%s17337_s5 + $0x58] sm:$0xff] %v8675_v25   ;;  %v11282_v34 = vunpack.i.h.bf16 %v17101_v63 }
 0x605   :  { %v11121_v37 = vpop.trf.xlu0  ;;  %v11279_v17 = vunpack.i.l.bf16 %v17101_v63 }
 0x606   :  { %6961 = vst [vmem:[%s17336_s4 + $0x328] sm:$0xff] %v8526_v55  ;;  %6929 = vst [vmem:[%s17336_s4 + $0x228] sm:$0xff] %v8494_v45  ;;  %v11125_v14 = vunpack.i.h.bf16 %v11121_v37  ;;  %v11122_v51 = vunpack.i.l.bf16 %v11121_v37  ;;  %v8630_v28 = vpack.c.bf16 %v11244_v11, %v11239_v24 }
 0x608   :  { %v8528_v33 = vpack.c.bf16 %v11125_v14, %v11013_v15  ;;  %v8496_v46 = vpack.c.bf16 %v11122_v51, %v11010_v27  ;;  %v11283_v15 = vpop.trf.xlu1  ;;  %8778 = vst [vmem:[%s17337_s5 + $0x10] sm:$0xff] %v8630_v28   ;;  %v11254_v27 = vunpack.i.l.bf16 %v17003_v58  ;;  %v11040_v28 = vunpack.i.l.bf16 %v16573_v44 }
 0x609   :  { %v11126_v19 = vpop.trf.xlu0  ;;  %v11287_v24 = vunpack.i.h.bf16 %v11283_v15 }
 0x60a   :  { %6963 = vst [vmem:[%s17336_s4 + $0x338] sm:$0xff] %v8528_v33  ;;  %6931 = vst [vmem:[%s17336_s4 + $0x238] sm:$0xff] %v8496_v46  ;;  %v11130_v5 = vunpack.i.h.bf16 %v11126_v19  ;;  %v11127_v30 = vunpack.i.l.bf16 %v11126_v19  ;;  %v8635_v49 = vpack.c.bf16 %v11254_v27, %v11249_v50  ;;  %v11043_v19 = vunpack.i.h.bf16 %v16573_v44 }
 0x60b   :  { %v8690_v8 = vpack.c.bf16 %v11287_v24, %v11282_v34 }
 0x60c   :  { %v8530_v31 = vpack.c.bf16 %v11130_v5, %v11018_v1  ;;  %v8498_v29 = vpack.c.bf16 %v11127_v30, %v11015_v9  ;;  %8779 = vst [vmem:[%s17337_s5 + $0x18] sm:$0xff] %v8635_v49   ;;  %v11264_v1 = vunpack.i.l.bf16 %v17048_v54  ;;  %v8680_v9 = vpack.c.bf16 %v11267_v4, %v11262_v26  ;;  %v11288_v35 = vpop.trf.xlu1 }
 0x60d   :  { %v11131_v7 = vpop.trf.xlu0  ;;  %v11277_v54 = vunpack.i.h.bf16 %v17081_v48  ;;  %v11292_v14 = vunpack.i.h.bf16 %v11288_v35  ;;  %8790 = vst [vmem:[%s17337_s5 + $0x70] sm:$0xff] %v8690_v8   ;;  %v11289_v62 = vunpack.i.l.bf16 %v11288_v35  ;;  %v11063_v35 = vunpack.i.h.bf16 %v16661_v2 }
 0x60e   :  { %6965 = vst [vmem:[%s17336_s4 + $0x348] sm:$0xff] %v8530_v31  ;;  %6933 = vst [vmem:[%s17336_s4 + $0x248] sm:$0xff] %v8498_v29  ;;  %v11135_v23 = vunpack.i.h.bf16 %v11131_v7  ;;  %v11132_v58 = vunpack.i.l.bf16 %v11131_v7  ;;  %v8640_v12 = vpack.c.bf16 %v11264_v1, %v11259_v16  ;;  %v11053_v29 = vunpack.i.h.bf16 %v16613_v52 }
 0x60f   :  { %8788 = vst [vmem:[%s17337_s5 + $0x60] sm:$0xff] %v8680_v9   ;;  %v8685_v21 = vpack.c.bf16 %v11277_v54, %v11272_v42  ;;  %v11050_v7 = vunpack.i.l.bf16 %v16613_v52  ;;  %v11055_v1 = vunpack.i.l.bf16 %v16631_v0 }
 0x610   :  { %v8532_v6 = vpack.c.bf16 %v11135_v23, %v11023_v59  ;;  %v8500_v56 = vpack.c.bf16 %v11132_v58, %v11020_v36  ;;  %8780 = vst [vmem:[%s17337_s5 + $0x20] sm:$0xff] %v8640_v12   ;;  %v11274_v36 = vunpack.i.l.bf16 %v17081_v48  ;;  %v11284_v48 = vunpack.i.l.bf16 %v11283_v15 }
 0x611   :  { %v11136_v57 = vpop.trf.xlu0  ;;  %8789 = vst [vmem:[%s17337_s5 + $0x68] sm:$0xff] %v8685_v21   ;;  %v11058_v58 = vunpack.i.h.bf16 %v16631_v0 }
 0x612   :  { %6967 = vst [vmem:[%s17336_s4 + $0x358] sm:$0xff] %v8532_v6  ;;  %6935 = vst [vmem:[%s17336_s4 + $0x258] sm:$0xff] %v8500_v56  ;;  %v11140_v22 = vunpack.i.h.bf16 %v11136_v57  ;;  %v11137_v59 = vunpack.i.l.bf16 %v11136_v57  ;;  %v8645_v37 = vpack.c.bf16 %v11274_v36, %v11269_v47  ;;  %v8650_v39 = vpack.c.bf16 %v11284_v48, %v11279_v17 }
 0x613   :  { %v11060_v57 = vunpack.i.l.bf16 %v16661_v2  ;;  %v11065_v36 = vunpack.i.l.bf16 %v16689_v40 }
 0x614   :  { %v8534_v53 = vpack.c.bf16 %v11140_v22, %v11028_v3  ;;  %v8502_v55 = vpack.c.bf16 %v11137_v59, %v11025_v20  ;;  %v11293_v20 = vpop.trf.xlu1  ;;  %8781 = vst [vmem:[%s17337_s5 + $0x28] sm:$0xff] %v8645_v37   ;;  %8782 = vst [vmem:[%s17337_s5 + $0x30] sm:$0xff] %v8650_v39   ;;  %v11068_v59 = vunpack.i.h.bf16 %v16689_v40 }
 0x615   :  { %v11141_v45 = vpop.trf.xlu0  ;;  %v11297_v33 = vunpack.i.h.bf16 %v11293_v20  ;;  %v11294_v43 = vunpack.i.l.bf16 %v11293_v20 }
 0x616   :  { %6969 = vst [vmem:[%s17336_s4 + $0x368] sm:$0xff] %v8534_v53  ;;  %6937 = vst [vmem:[%s17336_s4 + $0x268] sm:$0xff] %v8502_v55  ;;  %v11145_v3 = vunpack.i.h.bf16 %v11141_v45  ;;  %v11142_v10 = vunpack.i.l.bf16 %v11141_v45  ;;  %v17610_v45 = vld [vmem:[#allocation10_spill] sm:$0xff] }
 0x617   :  { %v8655_v30 = vpack.c.bf16 %v11294_v43, %v11289_v62  ;;  %v11073_v37 = vunpack.i.h.bf16 %v17610_v45  ;;  %v11070_v17 = vunpack.i.l.bf16 %v17610_v45 }
 0x618   :  { %v8536_v63 = vpack.c.bf16 %v11145_v3, %v11033_v41  ;;  %v8504_v51 = vpack.c.bf16 %v11142_v10, %v11030_v18  ;;  %v8695_v18 = vpack.c.bf16 %v11297_v33, %v11292_v14 }
 0x619   :  { %v11146_v11 = vpop.trf.xlu0  ;;  %8783 = vst [vmem:[%s17337_s5 + $0x38] sm:$0xff] %v8655_v30  }
 0x61a   :  { %6971 = vst [vmem:[%s17336_s4 + $0x378] sm:$0xff] %v8536_v63  ;;  %6939 = vst [vmem:[%s17336_s4 + $0x278] sm:$0xff] %v8504_v51  ;;  %v11150_v41 = vunpack.i.h.bf16 %v11146_v11  ;;  %v11147_v46 = vunpack.i.l.bf16 %v11146_v11 }
 0x61b   :  { %8791 = vst [vmem:[%s17337_s5 + $0x78] sm:$0xff] %v8695_v18  }
 0x61c   :  { %v8538_v50 = vpack.c.bf16 %v11150_v41, %v11038_v13  ;;  %v8506_v60 = vpack.c.bf16 %v11147_v46, %v11035_v61  ;;  %v11045_v13 = vunpack.i.l.bf16 %v16595_v38 }
 0x61d   :  { %v11151_v5 = vpop.trf.xlu0 }
 0x61e   :  { %6973 = vst [vmem:[%s17336_s4 + $0x388] sm:$0xff] %v8538_v50  ;;  %6941 = vst [vmem:[%s17336_s4 + $0x288] sm:$0xff] %v8506_v60  ;;  %v11155_v44 = vunpack.i.h.bf16 %v11151_v5  ;;  %v11152_v15 = vunpack.i.l.bf16 %v11151_v5 }
 0x620   :  { %v8540_v61 = vpack.c.bf16 %v11155_v44, %v11043_v19  ;;  %v8508_v27 = vpack.c.bf16 %v11152_v15, %v11040_v28 }
 0x621   :  { %v11156_v25 = vpop.trf.xlu0 }
 0x622   :  { %6975 = vst [vmem:[%s17336_s4 + $0x398] sm:$0xff] %v8540_v61  ;;  %6943 = vst [vmem:[%s17336_s4 + $0x298] sm:$0xff] %v8508_v27  ;;  %v11160_v26 = vunpack.i.h.bf16 %v11156_v25  ;;  %v11157_v31 = vunpack.i.l.bf16 %v11156_v25 }
 0x624   :  { %v8542_v49 = vpack.c.bf16 %v11160_v26, %v11048_v32  ;;  %v8510_v16 = vpack.c.bf16 %v11157_v31, %v11045_v13 }
 0x625   :  { %v11161_v38 = vpop.trf.xlu0 }
 0x626   :  { %6977 = vst [vmem:[%s17336_s4 + $0x3a8] sm:$0xff] %v8542_v49  ;;  %6945 = vst [vmem:[%s17336_s4 + $0x2a8] sm:$0xff] %v8510_v16  ;;  %v11165_v4 = vunpack.i.h.bf16 %v11161_v38  ;;  %v11162_v23 = vunpack.i.l.bf16 %v11161_v38 }
 0x628   :  { %v8544_v9 = vpack.c.bf16 %v11165_v4, %v11053_v29  ;;  %v8512_v42 = vpack.c.bf16 %v11162_v23, %v11050_v7 }
 0x629   :  { %v11166_v52 = vpop.trf.xlu0 }
 0x62a   :  { %6979 = vst [vmem:[%s17336_s4 + $0x3b8] sm:$0xff] %v8544_v9  ;;  %6947 = vst [vmem:[%s17336_s4 + $0x2b8] sm:$0xff] %v8512_v42  ;;  %v11170_v6 = vunpack.i.h.bf16 %v11166_v52  ;;  %v11167_v56 = vunpack.i.l.bf16 %v11166_v52 }
 0x62c   :  { %v8546_v12 = vpack.c.bf16 %v11170_v6, %v11058_v58  ;;  %v8514_v47 = vpack.c.bf16 %v11167_v56, %v11055_v1 }
 0x62d   :  { %v11171_v0 = vpop.trf.xlu0 }
 0x62e   :  { %6981 = vst [vmem:[%s17336_s4 + $0x3c8] sm:$0xff] %v8546_v12  ;;  %6949 = vst [vmem:[%s17336_s4 + $0x2c8] sm:$0xff] %v8514_v47  ;;  %v11175_v54 = vunpack.i.h.bf16 %v11171_v0  ;;  %v11172_v22 = vunpack.i.l.bf16 %v11171_v0 }
 0x630   :  { %v8548_v21 = vpack.c.bf16 %v11175_v54, %v11063_v35  ;;  %v8516_v34 = vpack.c.bf16 %v11172_v22, %v11060_v57 }
 0x631   :  { %v11176_v2 = vpop.trf.xlu0 }
 0x632   :  { %6983 = vst [vmem:[%s17336_s4 + $0x3d8] sm:$0xff] %v8548_v21  ;;  %6951 = vst [vmem:[%s17336_s4 + $0x2d8] sm:$0xff] %v8516_v34  ;;  %v11180_v53 = vunpack.i.h.bf16 %v11176_v2  ;;  %v11177_v55 = vunpack.i.l.bf16 %v11176_v2 }
 0x634   :  { %v8550_v24 = vpack.c.bf16 %v11180_v53, %v11068_v59  ;;  %v8518_v3 = vpack.c.bf16 %v11177_v55, %v11065_v36 }
 0x635   :  { %v11181_v40 = vpop.trf.xlu0 }
 0x636   :  { %6985 = vst [vmem:[%s17336_s4 + $0x3e8] sm:$0xff] %v8550_v24  ;;  %6953 = vst [vmem:[%s17336_s4 + $0x2e8] sm:$0xff] %v8518_v3  ;;  %v11185_v10 = vunpack.i.h.bf16 %v11181_v40  ;;  %v11182_v20 = vunpack.i.l.bf16 %v11181_v40 }
 0x638   :  { %v8552_v48 = vpack.c.bf16 %v11185_v10, %v11073_v37  ;;  %v8520_v8 = vpack.c.bf16 %v11182_v20, %v11070_v17 }
 0x639   :  { %v11330_v14 = vpop.trf.xlu0 }
 0x63a   :  { %6987 = vst [vmem:[%s17336_s4 + $0x3f8] sm:$0xff] %v8552_v48  ;;  %6955 = vst [vmem:[%s17336_s4 + $0x2f8] sm:$0xff] %v8520_v8  ;;  %v11334_v63 = vunpack.i.h.bf16 %v11330_v14  ;;  %v11331_v51 = vunpack.i.l.bf16 %v11330_v14 }
 0x63d   :  { %v11335_v11 = vpop.trf.xlu0 }
 0x63e   :  { %v11339_v39 = vunpack.i.h.bf16 %v11335_v11  ;;  %v11336_v62 = vunpack.i.l.bf16 %v11335_v11 }
 0x640   :  { %v8700_v33 = vpack.c.bf16 %v11336_v62, %v11331_v51  ;;  %v8740_v41 = vpack.c.bf16 %v11339_v39, %v11334_v63 }
 0x641   :  { %v11340_v46 = vpop.trf.xlu0 }
 0x642   :  { %8792 = vst [vmem:[%s17337_s5 + $0x80] sm:$0xff] %v8700_v33   ;;  %8800 = vst [vmem:[%s17337_s5 + $0xc0] sm:$0xff] %v8740_v41   ;;  %v11344_v43 = vunpack.i.h.bf16 %v11340_v46  ;;  %v11341_v18 = vunpack.i.l.bf16 %v11340_v46 }
 0x645   :  { %v11345_v19 = vpop.trf.xlu0 }
 0x646   :  { %v11349_v28 = vunpack.i.h.bf16 %v11345_v19  ;;  %v11346_v50 = vunpack.i.l.bf16 %v11345_v19 }
 0x648   :  { %v8705_v60 = vpack.c.bf16 %v11346_v50, %v11341_v18  ;;  %v8745_v5 = vpack.c.bf16 %v11349_v28, %v11344_v43 }
 0x649   :  { %v11350_v30 = vpop.trf.xlu0 }
 0x64a   :  { %8793 = vst [vmem:[%s17337_s5 + $0x88] sm:$0xff] %v8705_v60   ;;  %8801 = vst [vmem:[%s17337_s5 + $0xc8] sm:$0xff] %v8745_v5   ;;  %v11354_v44 = vunpack.i.h.bf16 %v11350_v30  ;;  %v11351_v15 = vunpack.i.l.bf16 %v11350_v30 }
 0x64d   :  { %v11355_v32 = vpop.trf.xlu0 }
 0x64e   :  { %v11359_v13 = vunpack.i.h.bf16 %v11355_v32  ;;  %v11356_v61 = vunpack.i.l.bf16 %v11355_v32 }
 0x650   :  { %v8710_v27 = vpack.c.bf16 %v11356_v61, %v11351_v15  ;;  %v8750_v25 = vpack.c.bf16 %v11359_v13, %v11354_v44 }
 0x651   :  { %v11360_v26 = vpop.trf.xlu0 }
 0x652   :  { %8794 = vst [vmem:[%s17337_s5 + $0x90] sm:$0xff] %v8710_v27   ;;  %8802 = vst [vmem:[%s17337_s5 + $0xd0] sm:$0xff] %v8750_v25   ;;  %v11364_v31 = vunpack.i.h.bf16 %v11360_v26  ;;  %v11361_v29 = vunpack.i.l.bf16 %v11360_v26 }
 0x655   :  { %v11365_v7 = vpop.trf.xlu0 }
 0x656   :  { %v11369_v49 = vunpack.i.h.bf16 %v11365_v7  ;;  %v11366_v16 = vunpack.i.l.bf16 %v11365_v7 }
 0x658   :  { %v8715_v38 = vpack.c.bf16 %v11366_v16, %v11361_v29  ;;  %v8755_v4 = vpack.c.bf16 %v11369_v49, %v11364_v31 }
 0x659   :  { %v11370_v23 = vpop.trf.xlu0 }
 0x65a   :  { %8795 = vst [vmem:[%s17337_s5 + $0x98] sm:$0xff] %v8715_v38   ;;  %8803 = vst [vmem:[%s17337_s5 + $0xd8] sm:$0xff] %v8755_v4   ;;  %v11374_v58 = vunpack.i.h.bf16 %v11370_v23  ;;  %v11371_v1 = vunpack.i.l.bf16 %v11370_v23 }
 0x65d   :  { %v11375_v9 = vpop.trf.xlu0 }
 0x65e   :  { %v11379_v42 = vunpack.i.h.bf16 %v11375_v9  ;;  %v11376_v52 = vunpack.i.l.bf16 %v11375_v9 }
 0x660   :  { %v8720_v6 = vpack.c.bf16 %v11376_v52, %v11371_v1  ;;  %v8760_v56 = vpack.c.bf16 %v11379_v42, %v11374_v58 }
 0x661   :  { %v11380_v35 = vpop.trf.xlu0 }
 0x662   :  { %8796 = vst [vmem:[%s17337_s5 + $0xa0] sm:$0xff] %v8720_v6   ;;  %8804 = vst [vmem:[%s17337_s5 + $0xe0] sm:$0xff] %v8760_v56   ;;  %v11384_v57 = vunpack.i.h.bf16 %v11380_v35  ;;  %v11381_v12 = vunpack.i.l.bf16 %v11380_v35 }
 0x665   :  { %v11385_v47 = vpop.trf.xlu0 }
 0x666   :  { %v11389_v0 = vunpack.i.h.bf16 %v11385_v47  ;;  %v11386_v54 = vunpack.i.l.bf16 %v11385_v47 }
 0x668   :  { %v8725_v22 = vpack.c.bf16 %v11386_v54, %v11381_v12  ;;  %v8765_v59 = vpack.c.bf16 %v11389_v0, %v11384_v57 }
 0x669   :  { %v11390_v36 = vpop.trf.xlu0 }
 0x66a   :  { %8797 = vst [vmem:[%s17337_s5 + $0xa8] sm:$0xff] %v8725_v22   ;;  %8805 = vst [vmem:[%s17337_s5 + $0xe8] sm:$0xff] %v8765_v59   ;;  %v11394_v21 = vunpack.i.h.bf16 %v11390_v36  ;;  %v11391_v34 = vunpack.i.l.bf16 %v11390_v36 }
 0x66d   :  { %v11395_v2 = vpop.trf.xlu0 }
 0x66e   :  { %v11399_v53 = vunpack.i.h.bf16 %v11395_v2  ;;  %v11396_v55 = vunpack.i.l.bf16 %v11395_v2 }
 0x670   :  { %v8730_v45 = vpack.c.bf16 %v11396_v55, %v11391_v34  ;;  %v8770_v37 = vpack.c.bf16 %v11399_v53, %v11394_v21 }
 0x671   :  { %v11400_v17 = vpop.trf.xlu0 }
 0x672   :  { %8798 = vst [vmem:[%s17337_s5 + $0xb0] sm:$0xff] %v8730_v45   ;;  %8806 = vst [vmem:[%s17337_s5 + $0xf0] sm:$0xff] %v8770_v37   ;;  %v11404_v24 = vunpack.i.h.bf16 %v11400_v17  ;;  %v11401_v3 = vunpack.i.l.bf16 %v11400_v17 }
 0x675   :  { %v11405_v40 = vpop.trf.xlu0 }
 0x676   :  { %v11409_v10 = vunpack.i.h.bf16 %v11405_v40  ;;  %v11406_v20 = vunpack.i.l.bf16 %v11405_v40 }
 0x678   :  { %v8735_v48 = vpack.c.bf16 %v11406_v20, %v11401_v3  ;;  %v8775_v8 = vpack.c.bf16 %v11409_v10, %v11404_v24 }
 0x67a   :  { %8799 = vst [vmem:[%s17337_s5 + $0xb8] sm:$0xff] %v8735_v48   ;;  %8807 = vst [vmem:[%s17337_s5 + $0xf8] sm:$0xff] %v8775_v8  }
 0x67b   :  { %7975 = vsyncpa [#allocation3], 1 }
 0x67c   :  { %7976 = vsyncpa [#allocation5], 1 }

</bundles_post_ra>
